<compile_context>
chip_gen: v7x
topology: tpu7x:2x2x1
jax: 0.10.0
libtpu: 0.0.40
codegen_flags: <defaults>
</compile_context>

<pallas_src>
import math

import jax
import jax.numpy as jnp
from jax.experimental import pallas as pl
from jax.experimental.pallas import tpu as pltpu

# ---------------- model hyper-parameters (small, consistent with the module) ----------
DIM = 32                      # model width
HEADS = 4                     # attention heads
KEY_SIZE = 8                  # per-head key size
HK = HEADS * KEY_SIZE         # 32
QKV = 3 * HK                  # 96
HIDDEN = 4 * DIM              # FFN widening
LAYERS = 2                    # number of axial layers (must be even)
LN_EPS = 1e-5
ATTN_SCALE = 1.0 / math.sqrt(KEY_SIZE)

assert LAYERS % 2 == 0, "axial layers must come in (over-d, over-N) pairs"

# ---------------- packed "vector bank" row layout --------------------------------------
VEC_LANES = 128
R_IN_W0, R_IN_W1, R_IN_B = 0, 1, 2
R_FLN_G, R_FLN_B = 3, 4
R_U_B, R_V_B = 5, 6
R_SCAL = 7                    # lanes [0]=exp(temp), [1]=bias
VEC_GLOBAL_ROWS = 8
VEC_ROWS_PER_LAYER = 8        # ln1_g, ln1_b, bqkv, bo, ln2_g, ln2_b, b1, b2
VEC_ROWS = VEC_GLOBAL_ROWS + VEC_ROWS_PER_LAYER * LAYERS


# =========================== in-kernel helpers =========================================

def _vrow(vec_ref, r, width=DIM):
    """One packed parameter row as a [1, width] f32 value (row r is its own tile)."""
    return vec_ref[r][:, :width]


def _ln(x, g, b):
    """LayerNorm over the last dim. x: [M, DIM] f32; g/b: [1, DIM] f32."""
    mean = jnp.mean(x, axis=-1, keepdims=True)
    xc = x - mean
    var = jnp.mean(xc * xc, axis=-1, keepdims=True)
    return xc * jax.lax.rsqrt(var + LN_EPS) * g + b


def _axial_permute(z, a, s):
    """Reorder rows of z [a*s, DIM] from (i*s + j) to (j*a + i) ordering.

    Done as an exact f32 permutation matmul on the VMEM-resident activation; the
    permutation matrix is built from in-kernel iotas (no div/mod, no constants).
    """
    m = a * s
    jj = jax.lax.broadcasted_iota(jnp.int32, (s, a, m), 0)
    ii = jax.lax.broadcasted_iota(jnp.int32, (s, a, m), 1)
    cc = jax.lax.broadcasted_iota(jnp.int32, (s, a, m), 2)
    perm = (cc == ii * s + jj).astype(z.dtype).reshape(m, m)
    return jnp.dot(perm, z, preferred_element_type=jnp.float32)


def _layer_body(z, a, s, l, vec_ref, wcat_ref, w2_ref):
    """One pre-LN axial transformer layer.  z: [a*s, DIM] f32; attention over s."""
    m = a * s
    base = VEC_GLOBAL_ROWS + l * VEC_ROWS_PER_LAYER
    ln1_g, ln1_b = _vrow(vec_ref, base + 0), _vrow(vec_ref, base + 1)
    bqkv = _vrow(vec_ref, base + 2, QKV)
    bo = _vrow(vec_ref, base + 3)
    ln2_g, ln2_b = _vrow(vec_ref, base + 4), _vrow(vec_ref, base + 5)
    b1 = _vrow(vec_ref, base + 6, HIDDEN)
    b2 = _vrow(vec_ref, base + 7)
    wc = wcat_ref[l]                                        # [DIM, QKV+DIM+HIDDEN] bf16
    wqkv, wo, w1 = wc[:, :QKV], wc[:, QKV:QKV + DIM], wc[:, QKV + DIM:]
    w2 = w2_ref[l]                                          # [HIDDEN, DIM] bf16

    # ---- fused LN -> single QKV matmul -> batched multi-head attention -> out-proj ----
    zn = _ln(z, ln1_g, ln1_b)
    qkv = jnp.dot(zn.astype(jnp.bfloat16), wqkv,
                  preferred_element_type=jnp.float32) + bqkv            # [m, 96] f32
    qkv = qkv.reshape(a, s, QKV).astype(jnp.bfloat16)
    # fold heads into the leading batch axis (lane slices + major-dim concat only)
    q = jnp.concatenate([qkv[:, :, h * KEY_SIZE:(h + 1) * KEY_SIZE]
                         for h in range(HEADS)], axis=0)                # [H*a, s, K]
    k = jnp.concatenate([qkv[:, :, HK + h * KEY_SIZE:HK + (h + 1) * KEY_SIZE]
                         for h in range(HEADS)], axis=0)
    v = jnp.concatenate([qkv[:, :, 2 * HK + h * KEY_SIZE:2 * HK + (h + 1) * KEY_SIZE]
                         for h in range(HEADS)], axis=0)
    sc = jnp.einsum('bqc,bkc->bqk', q, k,
                    preferred_element_type=jnp.float32) * ATTN_SCALE    # [H*a, s, s]
    sc = sc - jnp.max(sc, axis=-1, keepdims=True)
    p = jnp.exp(sc)
    p = p * pl.reciprocal(jnp.sum(p, axis=-1, keepdims=True), approx=True)
    o = jnp.einsum('bqk,bkc->bqc', p.astype(jnp.bfloat16), v,
                   preferred_element_type=jnp.float32)                  # [H*a, s, K]
    # un-fold heads back onto lanes and do ONE K=32 output projection
    o = jnp.concatenate([o[h * a:(h + 1) * a] for h in range(HEADS)], axis=-1)
    attn = jnp.dot(o.reshape(m, HK).astype(jnp.bfloat16), wo,
                   preferred_element_type=jnp.float32)
    z = z + attn + bo

    # ---- fused LN -> position-wise FFN (residual) ----
    zn2 = _ln(z, ln2_g, ln2_b)
    hid = jnp.dot(zn2.astype(jnp.bfloat16), w1,
                  preferred_element_type=jnp.float32) + b1
    hid = jnp.maximum(hid, 0.0)
    z = z + jnp.dot(hid.astype(jnp.bfloat16), w2,
                    preferred_element_type=jnp.float32) + b2
    return z


# =========================== fused forward kernel ======================================

def _fwd_kernel(x_ref, vec_ref, wcat_ref, w2_ref, uv_ref, o_ref):
    """Per batch element: input proj + all axial layers + LN + max-pool + edge logits."""
    n, d = x_ref.shape[1], x_ref.shape[2]
    x = x_ref[0].astype(jnp.float32)                                    # [n, d, 2]

    # input projection with K=2: VPU broadcast-FMA instead of an MXU matmul
    z = (x[:, :, 0:1] * _vrow(vec_ref, R_IN_W0)
         + x[:, :, 1:2] * _vrow(vec_ref, R_IN_W1)
         + _vrow(vec_ref, R_IN_B))                                      # [n, d, DIM]
    z = z.reshape(n * d, DIM)

    # alternating axial layers; the activation never leaves VMEM
    a, s = n, d
    for l in range(LAYERS):
        if l > 0:
            z = _axial_permute(z, a, s)       # in-VMEM axial N<->d swap (no HBM trip)
            a, s = s, a
        z = _layer_body(z, a, s, l, vec_ref, wcat_ref, w2_ref)

    # final LayerNorm + max over the observation axis (still VMEM-resident)
    z = _ln(z, _vrow(vec_ref, R_FLN_G), _vrow(vec_ref, R_FLN_B))
    zp = jnp.max(z.reshape(a, s, DIM), axis=1)                          # [d, DIM]

    # edge logits: cosine-similarity head  (u v^T) * exp(temp) + bias
    u = jnp.dot(zp, uv_ref[0], preferred_element_type=jnp.float32) + _vrow(vec_ref, R_U_B)
    v = jnp.dot(zp, uv_ref[1], preferred_element_type=jnp.float32) + _vrow(vec_ref, R_V_B)
    u = u * jax.lax.rsqrt(jnp.sum(u * u, axis=-1, keepdims=True) + 1e-8)
    v = v * jax.lax.rsqrt(jnp.sum(v * v, axis=-1, keepdims=True) + 1e-8)
    logits = jnp.einsum('ie,je->ij', u, v, preferred_element_type=jnp.float32)
    scal = _vrow(vec_ref, R_SCAL, 2)                                    # [1, 2]
    o_ref[0] = (logits * scal[:, 0:1] + scal[:, 1:2]).astype(o_ref.dtype)


# =========================== pallas_call wrapper =======================================

def base_model_forward(packed, x, is_training=False):
    """x: [B, N, d, 2] -> edge logits [B, d, d]. (dropout is a no-op at inference)"""
    del is_training
    b, n, d, c = x.shape
    assert c == 2
    vec, wcat, w2, uv = packed["vec"], packed["wcat"], packed["w2"], packed["uv"]
    return pl.pallas_call(
        _fwd_kernel,
        out_shape=jax.ShapeDtypeStruct((b, d, d), jnp.float32),
        grid=(b,),
        in_specs=[
            pl.BlockSpec((1, n, d, 2), lambda i: (i, 0, 0, 0)),
            pl.BlockSpec(vec.shape, lambda i: (0, 0, 0)),
            pl.BlockSpec(wcat.shape, lambda i: (0, 0, 0)),
            pl.BlockSpec(w2.shape, lambda i: (0, 0, 0)),
            pl.BlockSpec(uv.shape, lambda i: (0, 0, 0)),
        ],
        out_specs=pl.BlockSpec((1, d, d), lambda i: (i, 0, 0)),
        compiler_params=pltpu.CompilerParams(
            dimension_semantics=("parallel",)),
    )(x, vec, wcat, w2, uv)


# =========================== parameter init & packing ==================================

def init_params(key):
    keys = iter(jax.random.split(key, 32))

    def w(fan_in, fan_out):
        m = jax.random.normal(next(keys), (fan_in, fan_out), jnp.float32)
        return m / jnp.sqrt(jnp.float32(fan_in))

    def zeros(*shape):
        return jnp.zeros(shape, jnp.float32)

    def ones(*shape):
        return jnp.ones(shape, jnp.float32)

    params = {
        "in_w": w(2, DIM), "in_b": zeros(DIM),
        "layers": [],
        "final_ln_g": ones(DIM), "final_ln_b": zeros(DIM),
        "u_w": w(DIM, DIM), "u_b": zeros(DIM),
        "v_w": w(DIM, DIM), "v_b": zeros(DIM),
        "temp": jnp.float32(0.0),      # learned cosine temperature (init 0)
        "bias": jnp.float32(-3.0),     # edge-logit bias init
    }
    for _ in range(LAYERS):
        params["layers"].append({
            "ln1_g": ones(DIM), "ln1_b": zeros(DIM),
            "ln2_g": ones(DIM), "ln2_b": zeros(DIM),
            "wqkv": w(DIM, QKV), "bqkv": zeros(QKV),     # wq|wk|wv -> one QKV matmul
            "wo": w(HK, DIM), "bo": zeros(DIM),
            "w1": w(DIM, HIDDEN), "b1": zeros(HIDDEN),
            "w2": w(HIDDEN, DIM), "b2": zeros(DIM),
        })
    return params


def pack_params(params):
    """Consolidate ~30 tiny parameter arrays into 4 kernel inputs."""
    def row(v):
        v = jnp.asarray(v, jnp.float32).reshape(-1)
        return jnp.zeros((VEC_LANES,), jnp.float32).at[: v.shape[0]].set(v)

    rows = [
        row(params["in_w"][0]), row(params["in_w"][1]), row(params["in_b"]),
        row(params["final_ln_g"]), row(params["final_ln_b"]),
        row(params["u_b"]), row(params["v_b"]),
        row(jnp.stack([jnp.exp(params["temp"]), params["bias"]])),
    ]
    for lp in params["layers"]:
        rows += [row(lp["ln1_g"]), row(lp["ln1_b"]), row(lp["bqkv"]), row(lp["bo"]),
                 row(lp["ln2_g"]), row(lp["ln2_b"]), row(lp["b1"]), row(lp["b2"])]
    assert len(rows) == VEC_ROWS
    vec = jnp.stack(rows).reshape(VEC_ROWS, 1, VEC_LANES)               # f32 vector bank

    wcat = jnp.stack([jnp.concatenate([lp["wqkv"], lp["wo"], lp["w1"]], axis=1)
                      for lp in params["layers"]]).astype(jnp.bfloat16)  # [L, DIM, 256]
    w2 = jnp.stack([lp["w2"] for lp in params["layers"]]).astype(jnp.bfloat16)
    uv = jnp.stack([params["u_w"], params["v_w"]]).astype(jnp.float32)   # [2, DIM, DIM]
    return {"vec": vec, "wcat": wcat, "w2": w2, "uv": uv}


# =========================== model ====================================================

class InferenceModel:
    """JAX/Pallas counterpart of avici InferenceModel (forward + inference helpers)."""

    def __init__(self, params, mask_diag=True):
        self.mask_diag = mask_diag
        self.packed = pack_params(params)
        self._forward = jax.jit(base_model_forward)

    def forward(self, x, is_training=False):
        del is_training
        return self._forward(self.packed, x)

    def infer_edge_logprobs(self, x, is_training=False):
        logits = self.forward(x, is_training)
        logp = jax.nn.log_sigmoid(logits)
        if self.mask_diag:
            eye = jnp.eye(logits.shape[-1], dtype=bool)
            logp = jnp.where(eye, -jnp.inf, logp)
        return logp

    def infer_edge_probs(self, x):
        return jnp.exp(self.infer_edge_logprobs(x, is_training=False))


# =========================== main ======================================================

if __name__ == "__main__":
    key = jax.random.PRNGKey(0)
    pkey, xkey = jax.random.split(key)

    params = init_params(pkey)
    B, N, D_VARS = 2, 8, 8
    x = jax.random.normal(xkey, (B, N, D_VARS, 2), jnp.float32)

    model = InferenceModel(params, mask_diag=True)

    logits = jax.block_until_ready(model.forward(x, is_training=False))
    assert logits.shape == (B, D_VARS, D_VARS), logits.shape
    assert bool(jnp.all(jnp.isfinite(logits)))

    probs = jax.block_until_ready(model.infer_edge_probs(x))
    assert probs.shape == (B, D_VARS, D_VARS)
    assert bool(jnp.all(jnp.diagonal(probs, axis1=-2, axis2=-1) == 0.0))
    assert bool(jnp.all((probs >= 0.0) & (probs <= 1.0)))

    print("KERNEL_OK")
</pallas_src>

<mosaic_0001>
module attributes {stable_mosaic.version = 11 : i64} {
  func.func @_fwd_kernel(%arg0: i32, %arg1: memref<1x8x8x2xf32, #tpu.memory_space<vmem>>, %arg2: memref<24x1x128xf32, #tpu.memory_space<vmem>>, %arg3: memref<2x32x256xbf16, #tpu.memory_space<vmem>>, %arg4: memref<2x128x32xbf16, #tpu.memory_space<vmem>>, %arg5: memref<2x32x32xf32, #tpu.memory_space<vmem>>, %arg6: memref<1x8x8xf32, #tpu.memory_space<vmem>>) attributes {dimension_semantics = [#tpu.dimension_semantics<parallel>], iteration_bounds = array<i64: 2>, scalar_prefetch = 0 : i64, scratch_operands = 0 : i64, tpu.core_type = #tpu.core_type<tc>, window_params = [{transform_indices = @transform_0, window_bounds = array<i64: 1, 8, 8, 2>}, {pipeline_mode = #tpu.pipeline_mode<synchronous>, transform_indices = @transform_1, window_bounds = array<i64: 24, 1, 128>}, {pipeline_mode = #tpu.pipeline_mode<synchronous>, transform_indices = @transform_2, window_bounds = array<i64: 2, 32, 256>}, {pipeline_mode = #tpu.pipeline_mode<synchronous>, transform_indices = @transform_3, window_bounds = array<i64: 2, 128, 32>}, {pipeline_mode = #tpu.pipeline_mode<synchronous>, transform_indices = @transform_4, window_bounds = array<i64: 2, 32, 32>}, {transform_indices = @transform_5, window_bounds = array<i64: 1, 8, 8>}]} {
    %c0 = arith.constant 0 : index
    %c0_0 = arith.constant 0 : index
    %c0_1 = arith.constant 0 : index
    %c0_2 = arith.constant 0 : index
    %0 = vector.load %arg1[%c0, %c0_0, %c0_1, %c0_2] : memref<1x8x8x2xf32, #tpu.memory_space<vmem>>, vector<1x8x8x2xf32>
    %1 = vector.shape_cast %0 : vector<1x8x8x2xf32> to vector<8x8x2xf32>
    %2 = vector.extract_strided_slice %1 {offsets = [0, 0, 0], sizes = [8, 8, 1], strides = [1, 1, 1]} : vector<8x8x2xf32> to vector<8x8x1xf32>
    %c0_3 = arith.constant 0 : index
    %c0_4 = arith.constant 0 : index
    %c0_5 = arith.constant 0 : index
    %3 = vector.load %arg2[%c0_3, %c0_4, %c0_5] : memref<24x1x128xf32, #tpu.memory_space<vmem>>, vector<1x1x128xf32>
    %4 = vector.shape_cast %3 : vector<1x1x128xf32> to vector<1x128xf32>
    %5 = vector.extract_strided_slice %4 {offsets = [0, 0], sizes = [1, 32], strides = [1, 1]} : vector<1x128xf32> to vector<1x32xf32>
    %6 = vector.shape_cast %5 : vector<1x32xf32> to vector<1x1x32xf32>
    %7 = vector.broadcast %2 : vector<8x8x1xf32> to vector<8x8x32xf32>
    %8 = vector.broadcast %6 : vector<1x1x32xf32> to vector<8x8x32xf32>
    %9 = arith.mulf %7, %8 : vector<8x8x32xf32>
    %10 = vector.extract_strided_slice %1 {offsets = [0, 0, 1], sizes = [8, 8, 1], strides = [1, 1, 1]} : vector<8x8x2xf32> to vector<8x8x1xf32>
    %c1 = arith.constant 1 : index
    %c0_6 = arith.constant 0 : index
    %c0_7 = arith.constant 0 : index
    %11 = vector.load %arg2[%c1, %c0_6, %c0_7] : memref<24x1x128xf32, #tpu.memory_space<vmem>>, vector<1x1x128xf32>
    %12 = vector.shape_cast %11 : vector<1x1x128xf32> to vector<1x128xf32>
    %13 = vector.extract_strided_slice %12 {offsets = [0, 0], sizes = [1, 32], strides = [1, 1]} : vector<1x128xf32> to vector<1x32xf32>
    %14 = vector.shape_cast %13 : vector<1x32xf32> to vector<1x1x32xf32>
    %15 = vector.broadcast %10 : vector<8x8x1xf32> to vector<8x8x32xf32>
    %16 = vector.broadcast %14 : vector<1x1x32xf32> to vector<8x8x32xf32>
    %17 = arith.mulf %15, %16 : vector<8x8x32xf32>
    %18 = arith.addf %9, %17 : vector<8x8x32xf32>
    %c2 = arith.constant 2 : index
    %c0_8 = arith.constant 0 : index
    %c0_9 = arith.constant 0 : index
    %19 = vector.load %arg2[%c2, %c0_8, %c0_9] : memref<24x1x128xf32, #tpu.memory_space<vmem>>, vector<1x1x128xf32>
    %20 = vector.shape_cast %19 : vector<1x1x128xf32> to vector<1x128xf32>
    %21 = vector.extract_strided_slice %20 {offsets = [0, 0], sizes = [1, 32], strides = [1, 1]} : vector<1x128xf32> to vector<1x32xf32>
    %22 = vector.shape_cast %21 : vector<1x32xf32> to vector<1x1x32xf32>
    %23 = vector.broadcast %22 : vector<1x1x32xf32> to vector<8x8x32xf32>
    %24 = arith.addf %18, %23 : vector<8x8x32xf32>
    %25 = vector.shape_cast %24 : vector<8x8x32xf32> to vector<64x32xf32>
    %c8 = arith.constant 8 : index
    %c0_10 = arith.constant 0 : index
    %c0_11 = arith.constant 0 : index
    %26 = vector.load %arg2[%c8, %c0_10, %c0_11] : memref<24x1x128xf32, #tpu.memory_space<vmem>>, vector<1x1x128xf32>
    %27 = vector.shape_cast %26 : vector<1x1x128xf32> to vector<1x128xf32>
    %28 = vector.extract_strided_slice %27 {offsets = [0, 0], sizes = [1, 32], strides = [1, 1]} : vector<1x128xf32> to vector<1x32xf32>
    %c9 = arith.constant 9 : index
    %c0_12 = arith.constant 0 : index
    %c0_13 = arith.constant 0 : index
    %29 = vector.load %arg2[%c9, %c0_12, %c0_13] : memref<24x1x128xf32, #tpu.memory_space<vmem>>, vector<1x1x128xf32>
    %30 = vector.shape_cast %29 : vector<1x1x128xf32> to vector<1x128xf32>
    %31 = vector.extract_strided_slice %30 {offsets = [0, 0], sizes = [1, 32], strides = [1, 1]} : vector<1x128xf32> to vector<1x32xf32>
    %c10 = arith.constant 10 : index
    %c0_14 = arith.constant 0 : index
    %c0_15 = arith.constant 0 : index
    %32 = vector.load %arg2[%c10, %c0_14, %c0_15] : memref<24x1x128xf32, #tpu.memory_space<vmem>>, vector<1x1x128xf32>
    %33 = vector.shape_cast %32 : vector<1x1x128xf32> to vector<1x128xf32>
    %34 = vector.extract_strided_slice %33 {offsets = [0, 0], sizes = [1, 96], strides = [1, 1]} : vector<1x128xf32> to vector<1x96xf32>
    %c11 = arith.constant 11 : index
    %c0_16 = arith.constant 0 : index
    %c0_17 = arith.constant 0 : index
    %35 = vector.load %arg2[%c11, %c0_16, %c0_17] : memref<24x1x128xf32, #tpu.memory_space<vmem>>, vector<1x1x128xf32>
    %36 = vector.shape_cast %35 : vector<1x1x128xf32> to vector<1x128xf32>
    %37 = vector.extract_strided_slice %36 {offsets = [0, 0], sizes = [1, 32], strides = [1, 1]} : vector<1x128xf32> to vector<1x32xf32>
    %c12 = arith.constant 12 : index
    %c0_18 = arith.constant 0 : index
    %c0_19 = arith.constant 0 : index
    %38 = vector.load %arg2[%c12, %c0_18, %c0_19] : memref<24x1x128xf32, #tpu.memory_space<vmem>>, vector<1x1x128xf32>
    %39 = vector.shape_cast %38 : vector<1x1x128xf32> to vector<1x128xf32>
    %40 = vector.extract_strided_slice %39 {offsets = [0, 0], sizes = [1, 32], strides = [1, 1]} : vector<1x128xf32> to vector<1x32xf32>
    %c13 = arith.constant 13 : index
    %c0_20 = arith.constant 0 : index
    %c0_21 = arith.constant 0 : index
    %41 = vector.load %arg2[%c13, %c0_20, %c0_21] : memref<24x1x128xf32, #tpu.memory_space<vmem>>, vector<1x1x128xf32>
    %42 = vector.shape_cast %41 : vector<1x1x128xf32> to vector<1x128xf32>
    %43 = vector.extract_strided_slice %42 {offsets = [0, 0], sizes = [1, 32], strides = [1, 1]} : vector<1x128xf32> to vector<1x32xf32>
    %c14 = arith.constant 14 : index
    %c0_22 = arith.constant 0 : index
    %c0_23 = arith.constant 0 : index
    %44 = vector.load %arg2[%c14, %c0_22, %c0_23] : memref<24x1x128xf32, #tpu.memory_space<vmem>>, vector<1x1x128xf32>
    %45 = vector.shape_cast %44 : vector<1x1x128xf32> to vector<1x128xf32>
    %c15 = arith.constant 15 : index
    %c0_24 = arith.constant 0 : index
    %c0_25 = arith.constant 0 : index
    %46 = vector.load %arg2[%c15, %c0_24, %c0_25] : memref<24x1x128xf32, #tpu.memory_space<vmem>>, vector<1x1x128xf32>
    %47 = vector.shape_cast %46 : vector<1x1x128xf32> to vector<1x128xf32>
    %48 = vector.extract_strided_slice %47 {offsets = [0, 0], sizes = [1, 32], strides = [1, 1]} : vector<1x128xf32> to vector<1x32xf32>
    %c0_26 = arith.constant 0 : index
    %c0_27 = arith.constant 0 : index
    %c0_28 = arith.constant 0 : index
    %49 = vector.load %arg3[%c0_26, %c0_27, %c0_28] : memref<2x32x256xbf16, #tpu.memory_space<vmem>>, vector<1x32x256xbf16>
    %50 = vector.shape_cast %49 : vector<1x32x256xbf16> to vector<32x256xbf16>
    %51 = vector.extract_strided_slice %50 {offsets = [0, 0], sizes = [32, 96], strides = [1, 1]} : vector<32x256xbf16> to vector<32x96xbf16>
    %52 = vector.extract_strided_slice %50 {offsets = [0, 96], sizes = [32, 32], strides = [1, 1]} : vector<32x256xbf16> to vector<32x32xbf16>
    %53 = vector.extract_strided_slice %50 {offsets = [0, 128], sizes = [32, 128], strides = [1, 1]} : vector<32x256xbf16> to vector<32x128xbf16>
    %c0_29 = arith.constant 0 : index
    %c0_30 = arith.constant 0 : index
    %c0_31 = arith.constant 0 : index
    %54 = vector.load %arg4[%c0_29, %c0_30, %c0_31] : memref<2x128x32xbf16, #tpu.memory_space<vmem>>, vector<1x128x32xbf16>
    %55 = vector.shape_cast %54 : vector<1x128x32xbf16> to vector<128x32xbf16>
    %cst = arith.constant dense<0.000000e+00> : vector<64xf32>
    %56 = vector.multi_reduction <add>, %25, %cst [1] : vector<64x32xf32> to vector<64xf32>
    %57 = vector.shape_cast %56 : vector<64xf32> to vector<64x1xf32>
    %cst_32 = arith.constant 3.200000e+01 : f32
    %58 = vector.broadcast %cst_32 : f32 to vector<64x1xf32>
    %59 = arith.divf %57, %58 : vector<64x1xf32>
    %60 = vector.broadcast %59 : vector<64x1xf32> to vector<64x32xf32>
    %61 = arith.subf %25, %60 : vector<64x32xf32>
    %62 = arith.mulf %61, %61 : vector<64x32xf32>
    %cst_33 = arith.constant dense<0.000000e+00> : vector<64xf32>
    %63 = vector.multi_reduction <add>, %62, %cst_33 [1] : vector<64x32xf32> to vector<64xf32>
    %64 = vector.shape_cast %63 : vector<64xf32> to vector<64x1xf32>
    %cst_34 = arith.constant 3.200000e+01 : f32
    %65 = vector.broadcast %cst_34 : f32 to vector<64x1xf32>
    %66 = arith.divf %64, %65 : vector<64x1xf32>
    %cst_35 = arith.constant 9.99999974E-6 : f32
    %67 = vector.broadcast %cst_35 : f32 to vector<64x1xf32>
    %68 = arith.addf %66, %67 : vector<64x1xf32>
    %69 = math.rsqrt %68 : vector<64x1xf32>
    %70 = vector.broadcast %69 : vector<64x1xf32> to vector<64x32xf32>
    %71 = arith.mulf %61, %70 : vector<64x32xf32>
    %72 = vector.broadcast %28 : vector<1x32xf32> to vector<64x32xf32>
    %73 = arith.mulf %71, %72 : vector<64x32xf32>
    %74 = vector.broadcast %31 : vector<1x32xf32> to vector<64x32xf32>
    %75 = arith.addf %73, %74 : vector<64x32xf32>
    %76 = arith.truncf %75 : vector<64x32xf32> to vector<64x32xbf16>
    %cst_36 = arith.constant dense<0.000000e+00> : vector<64x96xf32>
    %77 = tpu.matmul %76, %51, %cst_36 {dimension_numbers = #tpu.dot_dimension_numbers<[1], [0], [0], [1], [0, 0, 1, 1], [], []>} : vector<64x32xbf16>, vector<32x96xbf16>, vector<64x96xf32> -> vector<64x96xf32>
    %78 = vector.broadcast %34 : vector<1x96xf32> to vector<64x96xf32>
    %79 = arith.addf %77, %78 : vector<64x96xf32>
    %80 = vector.shape_cast %79 : vector<64x96xf32> to vector<8x8x96xf32>
    %81 = arith.truncf %80 : vector<8x8x96xf32> to vector<8x8x96xbf16>
    %82 = vector.extract_strided_slice %81 {offsets = [0, 0, 0], sizes = [8, 8, 8], strides = [1, 1, 1]} : vector<8x8x96xbf16> to vector<8x8x8xbf16>
    %83 = vector.extract_strided_slice %81 {offsets = [0, 0, 8], sizes = [8, 8, 8], strides = [1, 1, 1]} : vector<8x8x96xbf16> to vector<8x8x8xbf16>
    %84 = vector.extract_strided_slice %81 {offsets = [0, 0, 16], sizes = [8, 8, 8], strides = [1, 1, 1]} : vector<8x8x96xbf16> to vector<8x8x8xbf16>
    %85 = vector.extract_strided_slice %81 {offsets = [0, 0, 24], sizes = [8, 8, 8], strides = [1, 1, 1]} : vector<8x8x96xbf16> to vector<8x8x8xbf16>
    %86 = tpu.concatenate %82, %83, %84, %85 in 0 : vector<8x8x8xbf16>, vector<8x8x8xbf16>, vector<8x8x8xbf16>, vector<8x8x8xbf16> -> vector<32x8x8xbf16>
    %87 = vector.extract_strided_slice %81 {offsets = [0, 0, 32], sizes = [8, 8, 8], strides = [1, 1, 1]} : vector<8x8x96xbf16> to vector<8x8x8xbf16>
    %88 = vector.extract_strided_slice %81 {offsets = [0, 0, 40], sizes = [8, 8, 8], strides = [1, 1, 1]} : vector<8x8x96xbf16> to vector<8x8x8xbf16>
    %89 = vector.extract_strided_slice %81 {offsets = [0, 0, 48], sizes = [8, 8, 8], strides = [1, 1, 1]} : vector<8x8x96xbf16> to vector<8x8x8xbf16>
    %90 = vector.extract_strided_slice %81 {offsets = [0, 0, 56], sizes = [8, 8, 8], strides = [1, 1, 1]} : vector<8x8x96xbf16> to vector<8x8x8xbf16>
    %91 = tpu.concatenate %87, %88, %89, %90 in 0 : vector<8x8x8xbf16>, vector<8x8x8xbf16>, vector<8x8x8xbf16>, vector<8x8x8xbf16> -> vector<32x8x8xbf16>
    %92 = vector.extract_strided_slice %81 {offsets = [0, 0, 64], sizes = [8, 8, 8], strides = [1, 1, 1]} : vector<8x8x96xbf16> to vector<8x8x8xbf16>
    %93 = vector.extract_strided_slice %81 {offsets = [0, 0, 72], sizes = [8, 8, 8], strides = [1, 1, 1]} : vector<8x8x96xbf16> to vector<8x8x8xbf16>
    %94 = vector.extract_strided_slice %81 {offsets = [0, 0, 80], sizes = [8, 8, 8], strides = [1, 1, 1]} : vector<8x8x96xbf16> to vector<8x8x8xbf16>
    %95 = vector.extract_strided_slice %81 {offsets = [0, 0, 88], sizes = [8, 8, 8], strides = [1, 1, 1]} : vector<8x8x96xbf16> to vector<8x8x8xbf16>
    %96 = tpu.concatenate %92, %93, %94, %95 in 0 : vector<8x8x8xbf16>, vector<8x8x8xbf16>, vector<8x8x8xbf16>, vector<8x8x8xbf16> -> vector<32x8x8xbf16>
    "tpu.trace_start"() <{level = 10 : i32, message = "bqc,bkc->bqk"}> : () -> ()
    %cst_37 = arith.constant dense<0.000000e+00> : vector<32x8x8xf32>
    %97 = tpu.matmul %86, %91, %cst_37 {dimension_numbers = #tpu.dot_dimension_numbers<[2], [2], [1], [1], [0, 0, 0, 1, 1, 1], [0], [0]>} : vector<32x8x8xbf16>, vector<32x8x8xbf16>, vector<32x8x8xf32> -> vector<32x8x8xf32>
    "tpu.trace_stop"() : () -> ()
    %cst_38 = arith.constant 0.353553385 : f32
    %98 = vector.broadcast %cst_38 : f32 to vector<32x8x8xf32>
    %99 = arith.mulf %97, %98 : vector<32x8x8xf32>
    %cst_39 = arith.constant dense<0xFF800000> : vector<32x8xf32>
    %100 = vector.multi_reduction <maximumf>, %99, %cst_39 [2] : vector<32x8x8xf32> to vector<32x8xf32>
    %101 = vector.shape_cast %100 : vector<32x8xf32> to vector<32x8x1xf32>
    %102 = vector.broadcast %101 : vector<32x8x1xf32> to vector<32x8x8xf32>
    %103 = arith.subf %99, %102 : vector<32x8x8xf32>
    %104 = math.exp %103 : vector<32x8x8xf32>
    %cst_40 = arith.constant dense<0.000000e+00> : vector<32x8xf32>
    %105 = vector.multi_reduction <add>, %104, %cst_40 [2] : vector<32x8x8xf32> to vector<32x8xf32>
    %106 = vector.shape_cast %105 : vector<32x8xf32> to vector<32x8x1xf32>
    %107 = tpu.reciprocal %106 {approx = true} : vector<32x8x1xf32> -> vector<32x8x1xf32>
    %108 = vector.broadcast %107 : vector<32x8x1xf32> to vector<32x8x8xf32>
    %109 = arith.mulf %104, %108 : vector<32x8x8xf32>
    %110 = arith.truncf %109 : vector<32x8x8xf32> to vector<32x8x8xbf16>
    "tpu.trace_start"() <{level = 10 : i32, message = "bqk,bkc->bqc"}> : () -> ()
    %cst_41 = arith.constant dense<0.000000e+00> : vector<32x8x8xf32>
    %111 = tpu.matmul %110, %96, %cst_41 {dimension_numbers = #tpu.dot_dimension_numbers<[2], [1], [1], [2], [0, 0, 0, 1, 1, 2], [0], [0]>} : vector<32x8x8xbf16>, vector<32x8x8xbf16>, vector<32x8x8xf32> -> vector<32x8x8xf32>
    "tpu.trace_stop"() : () -> ()
    %112 = vector.extract_strided_slice %111 {offsets = [0, 0, 0], sizes = [8, 8, 8], strides = [1, 1, 1]} : vector<32x8x8xf32> to vector<8x8x8xf32>
    %113 = vector.extract_strided_slice %111 {offsets = [8, 0, 0], sizes = [8, 8, 8], strides = [1, 1, 1]} : vector<32x8x8xf32> to vector<8x8x8xf32>
    %114 = vector.extract_strided_slice %111 {offsets = [16, 0, 0], sizes = [8, 8, 8], strides = [1, 1, 1]} : vector<32x8x8xf32> to vector<8x8x8xf32>
    %115 = vector.extract_strided_slice %111 {offsets = [24, 0, 0], sizes = [8, 8, 8], strides = [1, 1, 1]} : vector<32x8x8xf32> to vector<8x8x8xf32>
    %116 = tpu.concatenate %112, %113, %114, %115 in 2 : vector<8x8x8xf32>, vector<8x8x8xf32>, vector<8x8x8xf32>, vector<8x8x8xf32> -> vector<8x8x32xf32>
    %117 = vector.shape_cast %116 : vector<8x8x32xf32> to vector<64x32xf32>
    %118 = arith.truncf %117 : vector<64x32xf32> to vector<64x32xbf16>
    %cst_42 = arith.constant dense<0.000000e+00> : vector<64x32xf32>
    %119 = tpu.matmul %118, %52, %cst_42 {dimension_numbers = #tpu.dot_dimension_numbers<[1], [0], [0], [1], [0, 0, 1, 1], [], []>} : vector<64x32xbf16>, vector<32x32xbf16>, vector<64x32xf32> -> vector<64x32xf32>
    %120 = arith.addf %25, %119 : vector<64x32xf32>
    %121 = vector.broadcast %37 : vector<1x32xf32> to vector<64x32xf32>
    %122 = arith.addf %120, %121 : vector<64x32xf32>
    %cst_43 = arith.constant dense<0.000000e+00> : vector<64xf32>
    %123 = vector.multi_reduction <add>, %122, %cst_43 [1] : vector<64x32xf32> to vector<64xf32>
    %124 = vector.shape_cast %123 : vector<64xf32> to vector<64x1xf32>
    %cst_44 = arith.constant 3.200000e+01 : f32
    %125 = vector.broadcast %cst_44 : f32 to vector<64x1xf32>
    %126 = arith.divf %124, %125 : vector<64x1xf32>
    %127 = vector.broadcast %126 : vector<64x1xf32> to vector<64x32xf32>
    %128 = arith.subf %122, %127 : vector<64x32xf32>
    %129 = arith.mulf %128, %128 : vector<64x32xf32>
    %cst_45 = arith.constant dense<0.000000e+00> : vector<64xf32>
    %130 = vector.multi_reduction <add>, %129, %cst_45 [1] : vector<64x32xf32> to vector<64xf32>
    %131 = vector.shape_cast %130 : vector<64xf32> to vector<64x1xf32>
    %cst_46 = arith.constant 3.200000e+01 : f32
    %132 = vector.broadcast %cst_46 : f32 to vector<64x1xf32>
    %133 = arith.divf %131, %132 : vector<64x1xf32>
    %cst_47 = arith.constant 9.99999974E-6 : f32
    %134 = vector.broadcast %cst_47 : f32 to vector<64x1xf32>
    %135 = arith.addf %133, %134 : vector<64x1xf32>
    %136 = math.rsqrt %135 : vector<64x1xf32>
    %137 = vector.broadcast %136 : vector<64x1xf32> to vector<64x32xf32>
    %138 = arith.mulf %128, %137 : vector<64x32xf32>
    %139 = vector.broadcast %40 : vector<1x32xf32> to vector<64x32xf32>
    %140 = arith.mulf %138, %139 : vector<64x32xf32>
    %141 = vector.broadcast %43 : vector<1x32xf32> to vector<64x32xf32>
    %142 = arith.addf %140, %141 : vector<64x32xf32>
    %143 = arith.truncf %142 : vector<64x32xf32> to vector<64x32xbf16>
    %cst_48 = arith.constant dense<0.000000e+00> : vector<64x128xf32>
    %144 = tpu.matmul %143, %53, %cst_48 {dimension_numbers = #tpu.dot_dimension_numbers<[1], [0], [0], [1], [0, 0, 1, 1], [], []>} : vector<64x32xbf16>, vector<32x128xbf16>, vector<64x128xf32> -> vector<64x128xf32>
    %145 = vector.broadcast %45 : vector<1x128xf32> to vector<64x128xf32>
    %146 = arith.addf %144, %145 : vector<64x128xf32>
    %cst_49 = arith.constant 0.000000e+00 : f32
    %147 = vector.broadcast %cst_49 : f32 to vector<64x128xf32>
    %148 = arith.maximumf %146, %147 : vector<64x128xf32>
    %149 = arith.truncf %148 : vector<64x128xf32> to vector<64x128xbf16>
    %cst_50 = arith.constant dense<0.000000e+00> : vector<64x32xf32>
    %150 = tpu.matmul %149, %55, %cst_50 {dimension_numbers = #tpu.dot_dimension_numbers<[1], [0], [0], [1], [0, 0, 1, 1], [], []>} : vector<64x128xbf16>, vector<128x32xbf16>, vector<64x32xf32> -> vector<64x32xf32>
    %151 = arith.addf %122, %150 : vector<64x32xf32>
    %152 = vector.broadcast %48 : vector<1x32xf32> to vector<64x32xf32>
    %153 = arith.addf %151, %152 : vector<64x32xf32>
    %154 = tpu.iota {dimensions = array<i32: 0>} : vector<8x8x64xi32>
    %155 = tpu.iota {dimensions = array<i32: 1>} : vector<8x8x64xi32>
    %156 = tpu.iota {dimensions = array<i32: 2>} : vector<8x8x64xi32>
    %c8_i32 = arith.constant 8 : i32
    %157 = vector.broadcast %c8_i32 : i32 to vector<8x8x64xi32>
    %158 = arith.muli %155, %157 : vector<8x8x64xi32>
    %159 = arith.addi %158, %154 : vector<8x8x64xi32>
    %160 = arith.cmpi eq, %156, %159 : vector<8x8x64xi32>
    %161 = arith.extui %160 : vector<8x8x64xi1> to vector<8x8x64xi32>
    %162 = arith.sitofp %161 : vector<8x8x64xi32> to vector<8x8x64xf32>
    %163 = vector.shape_cast %162 : vector<8x8x64xf32> to vector<64x64xf32>
    %cst_51 = arith.constant dense<0.000000e+00> : vector<64x32xf32>
    %164 = tpu.matmul %163, %153, %cst_51 {dimension_numbers = #tpu.dot_dimension_numbers<[1], [0], [0], [1], [0, 0, 1, 1], [], []>} : vector<64x64xf32>, vector<64x32xf32>, vector<64x32xf32> -> vector<64x32xf32>
    %c16 = arith.constant 16 : index
    %c0_52 = arith.constant 0 : index
    %c0_53 = arith.constant 0 : index
    %165 = vector.load %arg2[%c16, %c0_52, %c0_53] : memref<24x1x128xf32, #tpu.memory_space<vmem>>, vector<1x1x128xf32>
    %166 = vector.shape_cast %165 : vector<1x1x128xf32> to vector<1x128xf32>
    %167 = vector.extract_strided_slice %166 {offsets = [0, 0], sizes = [1, 32], strides = [1, 1]} : vector<1x128xf32> to vector<1x32xf32>
    %c17 = arith.constant 17 : index
    %c0_54 = arith.constant 0 : index
    %c0_55 = arith.constant 0 : index
    %168 = vector.load %arg2[%c17, %c0_54, %c0_55] : memref<24x1x128xf32, #tpu.memory_space<vmem>>, vector<1x1x128xf32>
    %169 = vector.shape_cast %168 : vector<1x1x128xf32> to vector<1x128xf32>
    %170 = vector.extract_strided_slice %169 {offsets = [0, 0], sizes = [1, 32], strides = [1, 1]} : vector<1x128xf32> to vector<1x32xf32>
    %c18 = arith.constant 18 : index
    %c0_56 = arith.constant 0 : index
    %c0_57 = arith.constant 0 : index
    %171 = vector.load %arg2[%c18, %c0_56, %c0_57] : memref<24x1x128xf32, #tpu.memory_space<vmem>>, vector<1x1x128xf32>
    %172 = vector.shape_cast %171 : vector<1x1x128xf32> to vector<1x128xf32>
    %173 = vector.extract_strided_slice %172 {offsets = [0, 0], sizes = [1, 96], strides = [1, 1]} : vector<1x128xf32> to vector<1x96xf32>
    %c19 = arith.constant 19 : index
    %c0_58 = arith.constant 0 : index
    %c0_59 = arith.constant 0 : index
    %174 = vector.load %arg2[%c19, %c0_58, %c0_59] : memref<24x1x128xf32, #tpu.memory_space<vmem>>, vector<1x1x128xf32>
    %175 = vector.shape_cast %174 : vector<1x1x128xf32> to vector<1x128xf32>
    %176 = vector.extract_strided_slice %175 {offsets = [0, 0], sizes = [1, 32], strides = [1, 1]} : vector<1x128xf32> to vector<1x32xf32>
    %c20 = arith.constant 20 : index
    %c0_60 = arith.constant 0 : index
    %c0_61 = arith.constant 0 : index
    %177 = vector.load %arg2[%c20, %c0_60, %c0_61] : memref<24x1x128xf32, #tpu.memory_space<vmem>>, vector<1x1x128xf32>
    %178 = vector.shape_cast %177 : vector<1x1x128xf32> to vector<1x128xf32>
    %179 = vector.extract_strided_slice %178 {offsets = [0, 0], sizes = [1, 32], strides = [1, 1]} : vector<1x128xf32> to vector<1x32xf32>
    %c21 = arith.constant 21 : index
    %c0_62 = arith.constant 0 : index
    %c0_63 = arith.constant 0 : index
    %180 = vector.load %arg2[%c21, %c0_62, %c0_63] : memref<24x1x128xf32, #tpu.memory_space<vmem>>, vector<1x1x128xf32>
    %181 = vector.shape_cast %180 : vector<1x1x128xf32> to vector<1x128xf32>
    %182 = vector.extract_strided_slice %181 {offsets = [0, 0], sizes = [1, 32], strides = [1, 1]} : vector<1x128xf32> to vector<1x32xf32>
    %c22 = arith.constant 22 : index
    %c0_64 = arith.constant 0 : index
    %c0_65 = arith.constant 0 : index
    %183 = vector.load %arg2[%c22, %c0_64, %c0_65] : memref<24x1x128xf32, #tpu.memory_space<vmem>>, vector<1x1x128xf32>
    %184 = vector.shape_cast %183 : vector<1x1x128xf32> to vector<1x128xf32>
    %c23 = arith.constant 23 : index
    %c0_66 = arith.constant 0 : index
    %c0_67 = arith.constant 0 : index
    %185 = vector.load %arg2[%c23, %c0_66, %c0_67] : memref<24x1x128xf32, #tpu.memory_space<vmem>>, vector<1x1x128xf32>
    %186 = vector.shape_cast %185 : vector<1x1x128xf32> to vector<1x128xf32>
    %187 = vector.extract_strided_slice %186 {offsets = [0, 0], sizes = [1, 32], strides = [1, 1]} : vector<1x128xf32> to vector<1x32xf32>
    %c1_68 = arith.constant 1 : index
    %c0_69 = arith.constant 0 : index
    %c0_70 = arith.constant 0 : index
    %188 = vector.load %arg3[%c1_68, %c0_69, %c0_70] : memref<2x32x256xbf16, #tpu.memory_space<vmem>>, vector<1x32x256xbf16>
    %189 = vector.shape_cast %188 : vector<1x32x256xbf16> to vector<32x256xbf16>
    %190 = vector.extract_strided_slice %189 {offsets = [0, 0], sizes = [32, 96], strides = [1, 1]} : vector<32x256xbf16> to vector<32x96xbf16>
    %191 = vector.extract_strided_slice %189 {offsets = [0, 96], sizes = [32, 32], strides = [1, 1]} : vector<32x256xbf16> to vector<32x32xbf16>
    %192 = vector.extract_strided_slice %189 {offsets = [0, 128], sizes = [32, 128], strides = [1, 1]} : vector<32x256xbf16> to vector<32x128xbf16>
    %c1_71 = arith.constant 1 : index
    %c0_72 = arith.constant 0 : index
    %c0_73 = arith.constant 0 : index
    %193 = vector.load %arg4[%c1_71, %c0_72, %c0_73] : memref<2x128x32xbf16, #tpu.memory_space<vmem>>, vector<1x128x32xbf16>
    %194 = vector.shape_cast %193 : vector<1x128x32xbf16> to vector<128x32xbf16>
    %cst_74 = arith.constant dense<0.000000e+00> : vector<64xf32>
    %195 = vector.multi_reduction <add>, %164, %cst_74 [1] : vector<64x32xf32> to vector<64xf32>
    %196 = vector.shape_cast %195 : vector<64xf32> to vector<64x1xf32>
    %cst_75 = arith.constant 3.200000e+01 : f32
    %197 = vector.broadcast %cst_75 : f32 to vector<64x1xf32>
    %198 = arith.divf %196, %197 : vector<64x1xf32>
    %199 = vector.broadcast %198 : vector<64x1xf32> to vector<64x32xf32>
    %200 = arith.subf %164, %199 : vector<64x32xf32>
    %201 = arith.mulf %200, %200 : vector<64x32xf32>
    %cst_76 = arith.constant dense<0.000000e+00> : vector<64xf32>
    %202 = vector.multi_reduction <add>, %201, %cst_76 [1] : vector<64x32xf32> to vector<64xf32>
    %203 = vector.shape_cast %202 : vector<64xf32> to vector<64x1xf32>
    %cst_77 = arith.constant 3.200000e+01 : f32
    %204 = vector.broadcast %cst_77 : f32 to vector<64x1xf32>
    %205 = arith.divf %203, %204 : vector<64x1xf32>
    %cst_78 = arith.constant 9.99999974E-6 : f32
    %206 = vector.broadcast %cst_78 : f32 to vector<64x1xf32>
    %207 = arith.addf %205, %206 : vector<64x1xf32>
    %208 = math.rsqrt %207 : vector<64x1xf32>
    %209 = vector.broadcast %208 : vector<64x1xf32> to vector<64x32xf32>
    %210 = arith.mulf %200, %209 : vector<64x32xf32>
    %211 = vector.broadcast %167 : vector<1x32xf32> to vector<64x32xf32>
    %212 = arith.mulf %210, %211 : vector<64x32xf32>
    %213 = vector.broadcast %170 : vector<1x32xf32> to vector<64x32xf32>
    %214 = arith.addf %212, %213 : vector<64x32xf32>
    %215 = arith.truncf %214 : vector<64x32xf32> to vector<64x32xbf16>
    %cst_79 = arith.constant dense<0.000000e+00> : vector<64x96xf32>
    %216 = tpu.matmul %215, %190, %cst_79 {dimension_numbers = #tpu.dot_dimension_numbers<[1], [0], [0], [1], [0, 0, 1, 1], [], []>} : vector<64x32xbf16>, vector<32x96xbf16>, vector<64x96xf32> -> vector<64x96xf32>
    %217 = vector.broadcast %173 : vector<1x96xf32> to vector<64x96xf32>
    %218 = arith.addf %216, %217 : vector<64x96xf32>
    %219 = vector.shape_cast %218 : vector<64x96xf32> to vector<8x8x96xf32>
    %220 = arith.truncf %219 : vector<8x8x96xf32> to vector<8x8x96xbf16>
    %221 = vector.extract_strided_slice %220 {offsets = [0, 0, 0], sizes = [8, 8, 8], strides = [1, 1, 1]} : vector<8x8x96xbf16> to vector<8x8x8xbf16>
    %222 = vector.extract_strided_slice %220 {offsets = [0, 0, 8], sizes = [8, 8, 8], strides = [1, 1, 1]} : vector<8x8x96xbf16> to vector<8x8x8xbf16>
    %223 = vector.extract_strided_slice %220 {offsets = [0, 0, 16], sizes = [8, 8, 8], strides = [1, 1, 1]} : vector<8x8x96xbf16> to vector<8x8x8xbf16>
    %224 = vector.extract_strided_slice %220 {offsets = [0, 0, 24], sizes = [8, 8, 8], strides = [1, 1, 1]} : vector<8x8x96xbf16> to vector<8x8x8xbf16>
    %225 = tpu.concatenate %221, %222, %223, %224 in 0 : vector<8x8x8xbf16>, vector<8x8x8xbf16>, vector<8x8x8xbf16>, vector<8x8x8xbf16> -> vector<32x8x8xbf16>
    %226 = vector.extract_strided_slice %220 {offsets = [0, 0, 32], sizes = [8, 8, 8], strides = [1, 1, 1]} : vector<8x8x96xbf16> to vector<8x8x8xbf16>
    %227 = vector.extract_strided_slice %220 {offsets = [0, 0, 40], sizes = [8, 8, 8], strides = [1, 1, 1]} : vector<8x8x96xbf16> to vector<8x8x8xbf16>
    %228 = vector.extract_strided_slice %220 {offsets = [0, 0, 48], sizes = [8, 8, 8], strides = [1, 1, 1]} : vector<8x8x96xbf16> to vector<8x8x8xbf16>
    %229 = vector.extract_strided_slice %220 {offsets = [0, 0, 56], sizes = [8, 8, 8], strides = [1, 1, 1]} : vector<8x8x96xbf16> to vector<8x8x8xbf16>
    %230 = tpu.concatenate %226, %227, %228, %229 in 0 : vector<8x8x8xbf16>, vector<8x8x8xbf16>, vector<8x8x8xbf16>, vector<8x8x8xbf16> -> vector<32x8x8xbf16>
    %231 = vector.extract_strided_slice %220 {offsets = [0, 0, 64], sizes = [8, 8, 8], strides = [1, 1, 1]} : vector<8x8x96xbf16> to vector<8x8x8xbf16>
    %232 = vector.extract_strided_slice %220 {offsets = [0, 0, 72], sizes = [8, 8, 8], strides = [1, 1, 1]} : vector<8x8x96xbf16> to vector<8x8x8xbf16>
    %233 = vector.extract_strided_slice %220 {offsets = [0, 0, 80], sizes = [8, 8, 8], strides = [1, 1, 1]} : vector<8x8x96xbf16> to vector<8x8x8xbf16>
    %234 = vector.extract_strided_slice %220 {offsets = [0, 0, 88], sizes = [8, 8, 8], strides = [1, 1, 1]} : vector<8x8x96xbf16> to vector<8x8x8xbf16>
    %235 = tpu.concatenate %231, %232, %233, %234 in 0 : vector<8x8x8xbf16>, vector<8x8x8xbf16>, vector<8x8x8xbf16>, vector<8x8x8xbf16> -> vector<32x8x8xbf16>
    "tpu.trace_start"() <{level = 10 : i32, message = "bqc,bkc->bqk"}> : () -> ()
    %cst_80 = arith.constant dense<0.000000e+00> : vector<32x8x8xf32>
    %236 = tpu.matmul %225, %230, %cst_80 {dimension_numbers = #tpu.dot_dimension_numbers<[2], [2], [1], [1], [0, 0, 0, 1, 1, 1], [0], [0]>} : vector<32x8x8xbf16>, vector<32x8x8xbf16>, vector<32x8x8xf32> -> vector<32x8x8xf32>
    "tpu.trace_stop"() : () -> ()
    %cst_81 = arith.constant 0.353553385 : f32
    %237 = vector.broadcast %cst_81 : f32 to vector<32x8x8xf32>
    %238 = arith.mulf %236, %237 : vector<32x8x8xf32>
    %cst_82 = arith.constant dense<0xFF800000> : vector<32x8xf32>
    %239 = vector.multi_reduction <maximumf>, %238, %cst_82 [2] : vector<32x8x8xf32> to vector<32x8xf32>
    %240 = vector.shape_cast %239 : vector<32x8xf32> to vector<32x8x1xf32>
    %241 = vector.broadcast %240 : vector<32x8x1xf32> to vector<32x8x8xf32>
    %242 = arith.subf %238, %241 : vector<32x8x8xf32>
    %243 = math.exp %242 : vector<32x8x8xf32>
    %cst_83 = arith.constant dense<0.000000e+00> : vector<32x8xf32>
    %244 = vector.multi_reduction <add>, %243, %cst_83 [2] : vector<32x8x8xf32> to vector<32x8xf32>
    %245 = vector.shape_cast %244 : vector<32x8xf32> to vector<32x8x1xf32>
    %246 = tpu.reciprocal %245 {approx = true} : vector<32x8x1xf32> -> vector<32x8x1xf32>
    %247 = vector.broadcast %246 : vector<32x8x1xf32> to vector<32x8x8xf32>
    %248 = arith.mulf %243, %247 : vector<32x8x8xf32>
    %249 = arith.truncf %248 : vector<32x8x8xf32> to vector<32x8x8xbf16>
    "tpu.trace_start"() <{level = 10 : i32, message = "bqk,bkc->bqc"}> : () -> ()
    %cst_84 = arith.constant dense<0.000000e+00> : vector<32x8x8xf32>
    %250 = tpu.matmul %249, %235, %cst_84 {dimension_numbers = #tpu.dot_dimension_numbers<[2], [1], [1], [2], [0, 0, 0, 1, 1, 2], [0], [0]>} : vector<32x8x8xbf16>, vector<32x8x8xbf16>, vector<32x8x8xf32> -> vector<32x8x8xf32>
    "tpu.trace_stop"() : () -> ()
    %251 = vector.extract_strided_slice %250 {offsets = [0, 0, 0], sizes = [8, 8, 8], strides = [1, 1, 1]} : vector<32x8x8xf32> to vector<8x8x8xf32>
    %252 = vector.extract_strided_slice %250 {offsets = [8, 0, 0], sizes = [8, 8, 8], strides = [1, 1, 1]} : vector<32x8x8xf32> to vector<8x8x8xf32>
    %253 = vector.extract_strided_slice %250 {offsets = [16, 0, 0], sizes = [8, 8, 8], strides = [1, 1, 1]} : vector<32x8x8xf32> to vector<8x8x8xf32>
    %254 = vector.extract_strided_slice %250 {offsets = [24, 0, 0], sizes = [8, 8, 8], strides = [1, 1, 1]} : vector<32x8x8xf32> to vector<8x8x8xf32>
    %255 = tpu.concatenate %251, %252, %253, %254 in 2 : vector<8x8x8xf32>, vector<8x8x8xf32>, vector<8x8x8xf32>, vector<8x8x8xf32> -> vector<8x8x32xf32>
    %256 = vector.shape_cast %255 : vector<8x8x32xf32> to vector<64x32xf32>
    %257 = arith.truncf %256 : vector<64x32xf32> to vector<64x32xbf16>
    %cst_85 = arith.constant dense<0.000000e+00> : vector<64x32xf32>
    %258 = tpu.matmul %257, %191, %cst_85 {dimension_numbers = #tpu.dot_dimension_numbers<[1], [0], [0], [1], [0, 0, 1, 1], [], []>} : vector<64x32xbf16>, vector<32x32xbf16>, vector<64x32xf32> -> vector<64x32xf32>
    %259 = arith.addf %164, %258 : vector<64x32xf32>
    %260 = vector.broadcast %176 : vector<1x32xf32> to vector<64x32xf32>
    %261 = arith.addf %259, %260 : vector<64x32xf32>
    %cst_86 = arith.constant dense<0.000000e+00> : vector<64xf32>
    %262 = vector.multi_reduction <add>, %261, %cst_86 [1] : vector<64x32xf32> to vector<64xf32>
    %263 = vector.shape_cast %262 : vector<64xf32> to vector<64x1xf32>
    %cst_87 = arith.constant 3.200000e+01 : f32
    %264 = vector.broadcast %cst_87 : f32 to vector<64x1xf32>
    %265 = arith.divf %263, %264 : vector<64x1xf32>
    %266 = vector.broadcast %265 : vector<64x1xf32> to vector<64x32xf32>
    %267 = arith.subf %261, %266 : vector<64x32xf32>
    %268 = arith.mulf %267, %267 : vector<64x32xf32>
    %cst_88 = arith.constant dense<0.000000e+00> : vector<64xf32>
    %269 = vector.multi_reduction <add>, %268, %cst_88 [1] : vector<64x32xf32> to vector<64xf32>
    %270 = vector.shape_cast %269 : vector<64xf32> to vector<64x1xf32>
    %cst_89 = arith.constant 3.200000e+01 : f32
    %271 = vector.broadcast %cst_89 : f32 to vector<64x1xf32>
    %272 = arith.divf %270, %271 : vector<64x1xf32>
    %cst_90 = arith.constant 9.99999974E-6 : f32
    %273 = vector.broadcast %cst_90 : f32 to vector<64x1xf32>
    %274 = arith.addf %272, %273 : vector<64x1xf32>
    %275 = math.rsqrt %274 : vector<64x1xf32>
    %276 = vector.broadcast %275 : vector<64x1xf32> to vector<64x32xf32>
    %277 = arith.mulf %267, %276 : vector<64x32xf32>
    %278 = vector.broadcast %179 : vector<1x32xf32> to vector<64x32xf32>
    %279 = arith.mulf %277, %278 : vector<64x32xf32>
    %280 = vector.broadcast %182 : vector<1x32xf32> to vector<64x32xf32>
    %281 = arith.addf %279, %280 : vector<64x32xf32>
    %282 = arith.truncf %281 : vector<64x32xf32> to vector<64x32xbf16>
    %cst_91 = arith.constant dense<0.000000e+00> : vector<64x128xf32>
    %283 = tpu.matmul %282, %192, %cst_91 {dimension_numbers = #tpu.dot_dimension_numbers<[1], [0], [0], [1], [0, 0, 1, 1], [], []>} : vector<64x32xbf16>, vector<32x128xbf16>, vector<64x128xf32> -> vector<64x128xf32>
    %284 = vector.broadcast %184 : vector<1x128xf32> to vector<64x128xf32>
    %285 = arith.addf %283, %284 : vector<64x128xf32>
    %cst_92 = arith.constant 0.000000e+00 : f32
    %286 = vector.broadcast %cst_92 : f32 to vector<64x128xf32>
    %287 = arith.maximumf %285, %286 : vector<64x128xf32>
    %288 = arith.truncf %287 : vector<64x128xf32> to vector<64x128xbf16>
    %cst_93 = arith.constant dense<0.000000e+00> : vector<64x32xf32>
    %289 = tpu.matmul %288, %194, %cst_93 {dimension_numbers = #tpu.dot_dimension_numbers<[1], [0], [0], [1], [0, 0, 1, 1], [], []>} : vector<64x128xbf16>, vector<128x32xbf16>, vector<64x32xf32> -> vector<64x32xf32>
    %290 = arith.addf %261, %289 : vector<64x32xf32>
    %291 = vector.broadcast %187 : vector<1x32xf32> to vector<64x32xf32>
    %292 = arith.addf %290, %291 : vector<64x32xf32>
    %c3 = arith.constant 3 : index
    %c0_94 = arith.constant 0 : index
    %c0_95 = arith.constant 0 : index
    %293 = vector.load %arg2[%c3, %c0_94, %c0_95] : memref<24x1x128xf32, #tpu.memory_space<vmem>>, vector<1x1x128xf32>
    %294 = vector.shape_cast %293 : vector<1x1x128xf32> to vector<1x128xf32>
    %295 = vector.extract_strided_slice %294 {offsets = [0, 0], sizes = [1, 32], strides = [1, 1]} : vector<1x128xf32> to vector<1x32xf32>
    %c4 = arith.constant 4 : index
    %c0_96 = arith.constant 0 : index
    %c0_97 = arith.constant 0 : index
    %296 = vector.load %arg2[%c4, %c0_96, %c0_97] : memref<24x1x128xf32, #tpu.memory_space<vmem>>, vector<1x1x128xf32>
    %297 = vector.shape_cast %296 : vector<1x1x128xf32> to vector<1x128xf32>
    %298 = vector.extract_strided_slice %297 {offsets = [0, 0], sizes = [1, 32], strides = [1, 1]} : vector<1x128xf32> to vector<1x32xf32>
    %cst_98 = arith.constant dense<0.000000e+00> : vector<64xf32>
    %299 = vector.multi_reduction <add>, %292, %cst_98 [1] : vector<64x32xf32> to vector<64xf32>
    %300 = vector.shape_cast %299 : vector<64xf32> to vector<64x1xf32>
    %cst_99 = arith.constant 3.200000e+01 : f32
    %301 = vector.broadcast %cst_99 : f32 to vector<64x1xf32>
    %302 = arith.divf %300, %301 : vector<64x1xf32>
    %303 = vector.broadcast %302 : vector<64x1xf32> to vector<64x32xf32>
    %304 = arith.subf %292, %303 : vector<64x32xf32>
    %305 = arith.mulf %304, %304 : vector<64x32xf32>
    %cst_100 = arith.constant dense<0.000000e+00> : vector<64xf32>
    %306 = vector.multi_reduction <add>, %305, %cst_100 [1] : vector<64x32xf32> to vector<64xf32>
    %307 = vector.shape_cast %306 : vector<64xf32> to vector<64x1xf32>
    %cst_101 = arith.constant 3.200000e+01 : f32
    %308 = vector.broadcast %cst_101 : f32 to vector<64x1xf32>
    %309 = arith.divf %307, %308 : vector<64x1xf32>
    %cst_102 = arith.constant 9.99999974E-6 : f32
    %310 = vector.broadcast %cst_102 : f32 to vector<64x1xf32>
    %311 = arith.addf %309, %310 : vector<64x1xf32>
    %312 = math.rsqrt %311 : vector<64x1xf32>
    %313 = vector.broadcast %312 : vector<64x1xf32> to vector<64x32xf32>
    %314 = arith.mulf %304, %313 : vector<64x32xf32>
    %315 = vector.broadcast %295 : vector<1x32xf32> to vector<64x32xf32>
    %316 = arith.mulf %314, %315 : vector<64x32xf32>
    %317 = vector.broadcast %298 : vector<1x32xf32> to vector<64x32xf32>
    %318 = arith.addf %316, %317 : vector<64x32xf32>
    %319 = vector.shape_cast %318 : vector<64x32xf32> to vector<8x8x32xf32>
    %cst_103 = arith.constant dense<0xFF800000> : vector<8x32xf32>
    %320 = vector.multi_reduction <maximumf>, %319, %cst_103 [1] : vector<8x8x32xf32> to vector<8x32xf32>
    %c0_104 = arith.constant 0 : index
    %c0_105 = arith.constant 0 : index
    %c0_106 = arith.constant 0 : index
    %321 = vector.load %arg5[%c0_104, %c0_105, %c0_106] : memref<2x32x32xf32, #tpu.memory_space<vmem>>, vector<1x32x32xf32>
    %322 = vector.shape_cast %321 : vector<1x32x32xf32> to vector<32x32xf32>
    %cst_107 = arith.constant dense<0.000000e+00> : vector<8x32xf32>
    %323 = tpu.matmul %320, %322, %cst_107 {dimension_numbers = #tpu.dot_dimension_numbers<[1], [0], [0], [1], [0, 0, 1, 1], [], []>} : vector<8x32xf32>, vector<32x32xf32>, vector<8x32xf32> -> vector<8x32xf32>
    %c5 = arith.constant 5 : index
    %c0_108 = arith.constant 0 : index
    %c0_109 = arith.constant 0 : index
    %324 = vector.load %arg2[%c5, %c0_108, %c0_109] : memref<24x1x128xf32, #tpu.memory_space<vmem>>, vector<1x1x128xf32>
    %325 = vector.shape_cast %324 : vector<1x1x128xf32> to vector<1x128xf32>
    %326 = vector.extract_strided_slice %325 {offsets = [0, 0], sizes = [1, 32], strides = [1, 1]} : vector<1x128xf32> to vector<1x32xf32>
    %327 = vector.broadcast %326 : vector<1x32xf32> to vector<8x32xf32>
    %328 = arith.addf %323, %327 : vector<8x32xf32>
    %c1_110 = arith.constant 1 : index
    %c0_111 = arith.constant 0 : index
    %c0_112 = arith.constant 0 : index
    %329 = vector.load %arg5[%c1_110, %c0_111, %c0_112] : memref<2x32x32xf32, #tpu.memory_space<vmem>>, vector<1x32x32xf32>
    %330 = vector.shape_cast %329 : vector<1x32x32xf32> to vector<32x32xf32>
    %cst_113 = arith.constant dense<0.000000e+00> : vector<8x32xf32>
    %331 = tpu.matmul %320, %330, %cst_113 {dimension_numbers = #tpu.dot_dimension_numbers<[1], [0], [0], [1], [0, 0, 1, 1], [], []>} : vector<8x32xf32>, vector<32x32xf32>, vector<8x32xf32> -> vector<8x32xf32>
    %c6 = arith.constant 6 : index
    %c0_114 = arith.constant 0 : index
    %c0_115 = arith.constant 0 : index
    %332 = vector.load %arg2[%c6, %c0_114, %c0_115] : memref<24x1x128xf32, #tpu.memory_space<vmem>>, vector<1x1x128xf32>
    %333 = vector.shape_cast %332 : vector<1x1x128xf32> to vector<1x128xf32>
    %334 = vector.extract_strided_slice %333 {offsets = [0, 0], sizes = [1, 32], strides = [1, 1]} : vector<1x128xf32> to vector<1x32xf32>
    %335 = vector.broadcast %334 : vector<1x32xf32> to vector<8x32xf32>
    %336 = arith.addf %331, %335 : vector<8x32xf32>
    %337 = arith.mulf %328, %328 : vector<8x32xf32>
    %cst_116 = arith.constant dense<0.000000e+00> : vector<8xf32>
    %338 = vector.multi_reduction <add>, %337, %cst_116 [1] : vector<8x32xf32> to vector<8xf32>
    %339 = vector.shape_cast %338 : vector<8xf32> to vector<8x1xf32>
    %cst_117 = arith.constant 9.99999993E-9 : f32
    %340 = vector.broadcast %cst_117 : f32 to vector<8x1xf32>
    %341 = arith.addf %339, %340 : vector<8x1xf32>
    %342 = math.rsqrt %341 : vector<8x1xf32>
    %343 = vector.broadcast %342 : vector<8x1xf32> to vector<8x32xf32>
    %344 = arith.mulf %328, %343 : vector<8x32xf32>
    %345 = arith.mulf %336, %336 : vector<8x32xf32>
    %cst_118 = arith.constant dense<0.000000e+00> : vector<8xf32>
    %346 = vector.multi_reduction <add>, %345, %cst_118 [1] : vector<8x32xf32> to vector<8xf32>
    %347 = vector.shape_cast %346 : vector<8xf32> to vector<8x1xf32>
    %cst_119 = arith.constant 9.99999993E-9 : f32
    %348 = vector.broadcast %cst_119 : f32 to vector<8x1xf32>
    %349 = arith.addf %347, %348 : vector<8x1xf32>
    %350 = math.rsqrt %349 : vector<8x1xf32>
    %351 = vector.broadcast %350 : vector<8x1xf32> to vector<8x32xf32>
    %352 = arith.mulf %336, %351 : vector<8x32xf32>
    "tpu.trace_start"() <{level = 10 : i32, message = "ie,je->ij"}> : () -> ()
    %cst_120 = arith.constant dense<0.000000e+00> : vector<8x8xf32>
    %353 = tpu.matmul %344, %352, %cst_120 {dimension_numbers = #tpu.dot_dimension_numbers<[1], [1], [0], [0], [0, 0, 1, 0], [], []>} : vector<8x32xf32>, vector<8x32xf32>, vector<8x8xf32> -> vector<8x8xf32>
    "tpu.trace_stop"() : () -> ()
    %c7 = arith.constant 7 : index
    %c0_121 = arith.constant 0 : index
    %c0_122 = arith.constant 0 : index
    %354 = vector.load %arg2[%c7, %c0_121, %c0_122] : memref<24x1x128xf32, #tpu.memory_space<vmem>>, vector<1x1x128xf32>
    %355 = vector.shape_cast %354 : vector<1x1x128xf32> to vector<1x128xf32>
    %356 = vector.extract_strided_slice %355 {offsets = [0, 0], sizes = [1, 2], strides = [1, 1]} : vector<1x128xf32> to vector<1x2xf32>
    %357 = vector.extract_strided_slice %356 {offsets = [0, 0], sizes = [1, 1], strides = [1, 1]} : vector<1x2xf32> to vector<1x1xf32>
    %358 = vector.broadcast %357 : vector<1x1xf32> to vector<8x8xf32>
    %359 = arith.mulf %353, %358 : vector<8x8xf32>
    %360 = vector.extract_strided_slice %356 {offsets = [0, 1], sizes = [1, 1], strides = [1, 1]} : vector<1x2xf32> to vector<1x1xf32>
    %361 = vector.broadcast %360 : vector<1x1xf32> to vector<8x8xf32>
    %362 = arith.addf %359, %361 : vector<8x8xf32>
    %c0_123 = arith.constant 0 : index
    %c0_124 = arith.constant 0 : index
    %c0_125 = arith.constant 0 : index
    %363 = vector.load %arg6[%c0_123, %c0_124, %c0_125] : memref<1x8x8xf32, #tpu.memory_space<vmem>>, vector<1x8x8xf32>
    %364 = vector.shape_cast %363 : vector<1x8x8xf32> to vector<8x8xf32>
    %365 = vector.shape_cast %362 : vector<8x8xf32> to vector<1x8x8xf32>
    tpu.vector_store %arg6[%c0_123, %c0_124, %c0_125], %365 {strides = array<i32>} : memref<1x8x8xf32, #tpu.memory_space<vmem>>, vector<1x8x8xf32>,
    return
  }
  func.func @transform_0(%arg0: i32) -> (i32, i32, i32, i32) {
    %c0_i32 = arith.constant 0 : i32
    %c0_i32_0 = arith.constant 0 : i32
    %c0_i32_1 = arith.constant 0 : i32
    %c0_i32_2 = arith.constant 0 : i32
    return %arg0, %c0_i32, %c0_i32_0, %c0_i32_1 : i32, i32, i32, i32
  }
  func.func @transform_1(%arg0: i32) -> (i32, i32, i32) {
    %c0_i32 = arith.constant 0 : i32
    %c0_i32_0 = arith.constant 0 : i32
    %c0_i32_1 = arith.constant 0 : i32
    %c0_i32_2 = arith.constant 0 : i32
    return %c0_i32, %c0_i32_0, %c0_i32_1 : i32, i32, i32
  }
  func.func @transform_2(%arg0: i32) -> (i32, i32, i32) {
    %c0_i32 = arith.constant 0 : i32
    %c0_i32_0 = arith.constant 0 : i32
    %c0_i32_1 = arith.constant 0 : i32
    %c0_i32_2 = arith.constant 0 : i32
    return %c0_i32, %c0_i32_0, %c0_i32_1 : i32, i32, i32
  }
  func.func @transform_3(%arg0: i32) -> (i32, i32, i32) {
    %c0_i32 = arith.constant 0 : i32
    %c0_i32_0 = arith.constant 0 : i32
    %c0_i32_1 = arith.constant 0 : i32
    %c0_i32_2 = arith.constant 0 : i32
    return %c0_i32, %c0_i32_0, %c0_i32_1 : i32, i32, i32
  }
  func.func @transform_4(%arg0: i32) -> (i32, i32, i32) {
    %c0_i32 = arith.constant 0 : i32
    %c0_i32_0 = arith.constant 0 : i32
    %c0_i32_1 = arith.constant 0 : i32
    %c0_i32_2 = arith.constant 0 : i32
    return %c0_i32, %c0_i32_0, %c0_i32_1 : i32, i32, i32
  }
  func.func @transform_5(%arg0: i32) -> (i32, i32, i32) {
    %c0_i32 = arith.constant 0 : i32
    %c0_i32_0 = arith.constant 0 : i32
    %c0_i32_1 = arith.constant 0 : i32
    return %arg0, %c0_i32, %c0_i32_0 : i32, i32, i32
  }
}

</mosaic_0001>

<bundles_post_ra>
// kernel: base_model_forward.1
= control target key start
LH: loop header
LB: loop body
LE: loop exit
PB: predicated region body
PF: predicated region fallthrough
CT: control target
= control target key end

     0   :  { %10 = vsyncpa [#allocation3], 0  ;;  %s15174_s0 = inlined_call_operand.vmem [shape: f32[2,8,8,2], index: 0, kind: input, shape index: {}]   ;;  %s15175_s1 = inlined_call_operand.vmem [shape: f32[24,1,128], index: 1, kind: input, shape index: {}]   ;;  %s15176_s2 = inlined_call_operand.vmem [shape: bf16[2,32,256], index: 2, kind: input, shape index: {}]   ;;  %s15177_s3 = inlined_call_operand.vmem [shape: bf16[2,128,32], index: 3, kind: input, shape index: {}]   ;;  %s15178_s4 = inlined_call_operand.vmem [shape: f32[2,32,32], index: 4, kind: input, shape index: {}]   ;;  %s15179_s5 = inlined_call_operand.hbm [shape: f32[2,8,8], index: 5, kind: output, shape index: {}]  }
   0x1   :  { %12 = vsyncpa [#allocation3 + $0x1], 0  ;;  %s12203_s18 = smov 0   ;;  %s12205_s19 = smov 0  }
   0x2   :  { %s12207_s20 = smov 0   ;;  %s12209_s21 = smov 0  }
   0x3 LB: > { %s12224_s22 = sadd.s32 4294967295, %s12156_s21   ;;  %s9939_s23 = sadd.s32 4294967294, %s12156_s21   ;;  %s12156_s21 = sphi %s12209_s21, %s15288_s21   ;;  %s12152_s20 = sphi %s12207_s20, %s15287_s20   ;;  %s12148_s19 = sphi %s12205_s19, %s15286_s19   ;;  %s12144_s18 = sphi %s12203_s18, %s15285_s18  }
   0x4   : > { %s12228_s24 = sadd.s32 1, %s12156_s21   ;;  %s135_s25 = sadd.s32 1, %s12152_s20 }
   0x5   : > { %s132_s26 = ssub.s32 %s12156_s21, %s12228_s24  ;;  %p145_p0 = scmp.ne.s32.totalorder %s12152_s20, %s12148_s19 }
   0x6   : > { %p133_p1 = scmp.eq.s32.totalorder %s132_s26, 0  ;;  %p146_p2 = scmp.eq.s32.totalorder %s12224_s22, 1 }
   0x7   : > { %p151_p3 = scmp.ne.s32.totalorder %s12148_s19, %s12144_s18  ;;  %p152_p4 = scmp.eq.s32.totalorder %s9939_s23, 1 }
   0x8   : > { %s12239_s27 = scalar_select %p133_p1, %s12152_s20, %s135_s25  }
   0x9   : > { %p12241_p5 = por %p146_p2, %p145_p0  ;;  %p12245_p6 = por %p152_p4, %p151_p3 }
   0xa   : > { %p9942_p7 = scmp.ge.s32.totalorder %s12156_s21, 1  ;;  %p190_p8 = scmp.lt.s32.totalorder %s12156_s21, 3 }
   0xc   : > { %p191_p9 = pnand %p9942_p7, %p190_p8 }
   0xe   : > { %194 = sbr.rel (%p191_p9) target bundleno = 6955 (0x1b2b), region = 40 }
  0x15   : > { %p218_p10 = scmp.lt.s32.totalorder %s12224_s22, 1  ;;  %v15180_v0 = vmov 1   ;;  %v12159_v4 = vmov 0   ;;  %v9948_v12 = vld [vmem:[%s15175_s1 + $0x1] ss:$0 sm:$0xff]  ;;  %vm395_vm0 = vcmask 261120  }
  0x16   : > { %11592 = vset.pattern.permute.xlu0 %v15180_v0  ;;  %11590 = vset.pattern.permute.xlu1 %v15180_v0  ;;  %v9946_v13 = vld [vmem:[%s15175_s1] ss:$0 sm:$0xff]  ;;  %v9950_v18 = vld [vmem:[%s15175_s1 + $0x2] ss:$0 sm:$0xff]  ;;  %s12160_s10 = smov 120   ;;  %vm12162_vm1 = vmmov 0  }
  0x17   : > { %s219_s30 = scalar_select %p218_p10, %s12224_s22, 1  ;;  %vm694_vm2 = vcmask 64512   ;;  %vm2650_vm3 = vcmask 1043456   ;;  %vm4286_vm4 = vcmask 130048   ;;  %vm4295_vm5 = vcmask 195584  }
  0x18   : > { %s12163_s11 = smov 96   ;;  %s12164_s12 = smov 112   ;;  %vm4823_vm6 = vcmask 523264   ;;  %vm9589_vm15 = vcmask 1041409  }
  0x19   : > { %s10217_s6 = sshll.u32 %s219_s30, 6  ;;  %s12165_s13 = smov 104  }
  0x1a   : > { %s222_s9 = scalar_lea.vmem %s15174_s0, %s10217_s6  ;;  %s12166_s14 = smov 64  }
  0x1b   : > { %v226_v1 = vld [vmem:[%s222_s9 + $0x10] sm:$0xff]  ;;  %v224_v2 = vld [vmem:[%s222_s9] sm:$0xff]  ;;  %v225_v3 = vld [vmem:[%s222_s9 + $0x8] sm:$0xff]  ;;  %s12167_s17 = smov 32   ;;  %s12168_s26 = smov 8  }
  0x1c   : > { %298 = vperm.xlu0 %11592, %v226_v1   ;;  %290 = vperm.xlu1 %11590, %v224_v2   ;;  %v227_v5 = vld [vmem:[%s222_s9 + $0x18] sm:$0xff]  ;;  %v229_v6 = vld [vmem:[%s222_s9 + $0x28] sm:$0xff]  ;;  %v228_v7 = vld [vmem:[%s222_s9 + $0x20] sm:$0xff]  ;;  %s12169_s30 = smov 16   ;;  %s15191_s6 = smov 24  }
  0x1d   : > { %v230_v8 = vld [vmem:[%s222_s9 + $0x30] sm:$0xff]  ;;  %v231_v9 = vld [vmem:[%s222_s9 + $0x38] sm:$0xff]  ;;  %s215_s23 = sand.u32 1, %s12148_s19   ;;  %s10214_s7 = sshll.u32 %s12224_s22, 7 }
  0x1e   : > { %s9943_s25 = sshll.u32 %s215_s23, 3 }
  0x20   : > { %11593 = vset.pattern.permute.xlu0 %v12159_v4  ;;  %294 = vperm.xlu1 %11590, %v225_v3  }
  0x21   : > { %235 = vperm.xlu0 %11593, %v224_v2  }
  0x24   : > { %11591 = vset.pattern.permute.xlu1 %v12159_v4 }
  0x25   : > { %240 = vperm.xlu0 %11593, %v225_v3   ;;  %250 = vperm.xlu1 %11591, %v227_v5  }
  0x29   : > { %245 = vperm.xlu0 %11593, %v226_v1   ;;  %11594 = vset.pattern.permute.xlu1 %v15180_v0 }
  0x2a   : > { %302 = vperm.xlu1 %11594, %v227_v5  }
  0x2d   : > { %260 = vperm.xlu0 %11593, %v229_v6  }
  0x2e   : > { %11595 = vset.pattern.permute.xlu1 %v12159_v4 }
  0x2f   : > { %255 = vperm.xlu1 %11595, %v228_v7  }
  0x31   : > { %265 = vperm.xlu0 %11593, %v230_v8  }
  0x33   : > { %11596 = vset.pattern.permute.xlu1 %v15180_v0 }
  0x34   : > { %306 = vperm.xlu1 %11596, %v228_v7  }
  0x35   : > { %11598 = vset.pattern.permute.xlu0 %v15180_v0 }
  0x36   : > { %314 = vperm.xlu0 %11598, %v230_v8  }
  0x38   : > { %310 = vperm.xlu1 %11596, %v229_v6  }
  0x3a   : > { %11720 = vset.pattern.permute.xlu0 %v12159_v4 }
  0x3c   : > { %11597 = vset.pattern.permute.xlu1 %v12159_v4 }
  0x3d   : > { %270 = vperm.xlu1 %11597, %v231_v9  }
  0x41   : > { %11599 = vset.pattern.permute.xlu1 %v15180_v0 }
  0x42   : > { %318 = vperm.xlu1 %11599, %v231_v9  }
  0x9b   : > { %v291_v10 = vpop.permute.xlu1 %290  ;;  %v299_v11 = vpop.permute.xlu0 %298 }
  0x9c   : > { %v327_v16 = vmul.f32 %v9948_v12, %v291_v10  ;;  %v329_v28 = vmul.f32 %v9948_v12, %v299_v11 }
  0x9f   : > { %v295_v14 = vpop.permute.xlu1 %294 }
  0xa0   : > { %v236_v15 = vpop.permute.xlu0 %235  ;;  %v328_v22 = vmul.f32 %v9948_v12, %v295_v14 }
  0xa1   : > { %v279_v17 = vmul.f32 %v9946_v13, %v236_v15 }
  0xa3   : > { %v335_v19 = vadd.f32 %v327_v16, %v279_v17 }
  0xa4   : > { %v241_v20 = vpop.permute.xlu0 %240  ;;  %v251_v21 = vpop.permute.xlu1 %250 }
  0xa5   : > { %v280_v23 = vmul.f32 %v9946_v13, %v241_v20  ;;  %v12271_v24 = vadd.f32 %v9950_v18, %v335_v19  ;;  %v282_v32 = vmul.f32 %v9946_v13, %v251_v21 }
  0xa7   : > { %15204 = vst [vmem:[#allocation5_spill] sm:$0xff] %v12271_v24  ;;  %v336_v25 = vadd.f32 %v328_v22, %v280_v23  ;;  %v396_v26 = vsel %vm395_vm0, %v12271_v24, 0.0 }
  0xa8   : > { %v246_v27 = vpop.permute.xlu0 %245  ;;  %397 = vadd.xlane.f32.xlu1 %v396_v26 }
  0xa9   : > { %v281_v29 = vmul.f32 %v9946_v13, %v246_v27  ;;  %v303_v30 = vpop.permute.xlu1 %302  ;;  %v12275_v31 = vadd.f32 %v9950_v18, %v336_v25 }
  0xaa   : > { %v330_v33 = vmul.f32 %v9948_v12, %v303_v30 }
  0xab   : > { %15205 = vst [vmem:[#allocation6_spill] sm:$0xff] %v12275_v31  ;;  %v337_v34 = vadd.f32 %v329_v28, %v281_v29  ;;  %v399_v35 = vsel %vm395_vm0, %v12275_v31, 0.0 }
  0xac   : > { %v338_v36 = vadd.f32 %v330_v33, %v282_v32  ;;  %v261_v37 = vpop.permute.xlu0 %260  ;;  %400 = vadd.xlane.f32.xlu0 %v399_v35 }
  0xad   : > { %v12279_v38 = vadd.f32 %v9950_v18, %v337_v34  ;;  %v284_v52 = vmul.f32 %v9946_v13, %v261_v37 }
  0xae   : > { %v256_v39 = vpop.permute.xlu1 %255  ;;  %v12281_v40 = vadd.f32 %v9950_v18, %v338_v36 }
  0xaf   : > { %15206 = vst [vmem:[#allocation7_spill] sm:$0xff] %v12279_v38  ;;  %v402_v41 = vsel %vm395_vm0, %v12279_v38, 0.0  ;;  %v283_v44 = vmul.f32 %v9946_v13, %v256_v39 }
  0xb0   : > { %15207 = vst [vmem:[#allocation8_spill] sm:$0xff] %v12281_v40  ;;  %v266_v42 = vpop.permute.xlu0 %265  ;;  %403 = vadd.xlane.f32.xlu0 %v402_v41  ;;  %v405_v43 = vsel %vm395_vm0, %v12281_v40, 0.0 }
  0xb1   : > { %406 = vadd.xlane.f32.xlu1 %v405_v43  ;;  %v285_v48 = vmul.f32 %v9946_v13, %v266_v42 }
  0xb3   : > { %v307_v45 = vpop.permute.xlu1 %306 }
  0xb4   : > { %v331_v46 = vmul.f32 %v9948_v12, %v307_v45 }
  0xb5   : > { %v315_v47 = vpop.permute.xlu0 %314 }
  0xb6   : > { %v339_v49 = vadd.f32 %v331_v46, %v283_v44  ;;  %v333_v50 = vmul.f32 %v9948_v12, %v315_v47 }
  0xb7   : > { %v311_v51 = vpop.permute.xlu1 %310 }
  0xb8   : > { %v341_v53 = vadd.f32 %v333_v50, %v285_v48  ;;  %v332_v54 = vmul.f32 %v9948_v12, %v311_v51  ;;  %v12287_v55 = vadd.f32 %v9950_v18, %v339_v49  ;;  %v11722_v50 = vld [vmem:[%s15176_s2] ss:$8 sps:$4 sm:$0xff]   ;;  %v11724_v51 = vld [vmem:[%s15176_s2 + $0x10] ss:$8 sps:$4 sm:$0xff]  }
  0xb9   : > { %10562 = vmatprep.subr.bf16.mxu0 %v11722_v50  ;;  %11533 = vmatprep.subr.bf16.mxu1 %v11722_v50 }
  0xba   : > { %15208 = vst [vmem:[#allocation9_spill] sm:$0xff] %v12287_v55  ;;  %v340_v56 = vadd.f32 %v332_v54, %v284_v52  ;;  %v408_v57 = vsel %vm395_vm0, %v12287_v55, 0.0  ;;  %v12291_v58 = vadd.f32 %v9950_v18, %v341_v53  ;;  %10563 = vmatpush3.bf16.msra.mxu0 %v11722_v50  ;;  %11535 = vmatpush3.bf16.msra.mxu1 %v11722_v50 }
  0xbb   : > { %409 = vadd.xlane.f32.xlu0 %v408_v57  ;;  %10564 = vmatprep.subr.bf16.mxu0 %v11724_v51 }
  0xbc   : > { %15209 = vst [vmem:[#allocation10_spill] sm:$0xff] %v12291_v58  ;;  %v271_v59 = vpop.permute.xlu1 %270  ;;  %v12293_v60 = vadd.f32 %v9950_v18, %v340_v56  ;;  %v414_v61 = vsel %vm395_vm0, %v12291_v58, 0.0  ;;  %11534 = vmatprep.subr.bf16.mxu1 %v11724_v51 }
  0xbd   : > { %v286_v63 = vmul.f32 %v9946_v13, %v271_v59 }
  0xbe   : > { %15210 = vst [vmem:[#allocation11_spill] sm:$0xff] %v12293_v60  ;;  %v411_v62 = vsel %vm395_vm0, %v12293_v60, 0.0  ;;  %10565 = vmatpush3.bf16.msra.mxu0 %v11724_v51  ;;  %11536 = vmatpush3.bf16.msra.mxu1 %v11724_v51 }
  0xbf   : > { %415 = vadd.xlane.f32.xlu0 %v414_v61  ;;  %412 = vadd.xlane.f32.xlu1 %v411_v62 }
  0xc1   : > { %v319_v1 = vpop.permute.xlu1 %318 }
  0xc2   : > { %v334_v2 = vmul.f32 %v9948_v12, %v319_v1 }
  0xc4   : > { %v342_v3 = vadd.f32 %v334_v2, %v286_v63 }
  0xc6   : > { %v12299_v4 = vadd.f32 %v9950_v18, %v342_v3 }
  0xc8   : > { %15211 = vst [vmem:[#allocation12_spill] sm:$0xff] %v12299_v4  ;;  %v417_v5 = vsel %vm395_vm0, %v12299_v4, 0.0 }
  0xc9   : > { %418 = vadd.xlane.f32.xlu1 %v417_v5 }
 0x135   : > { %v398_v6 = vpop.xlane.xlu1 %397 }
 0x136   : > { %v421_v7 = vmul.f32 0.03125, %v398_v6  ;;  %v9959_v6 = vld [vmem:[%s15175_s1 + $0x8] ss:$0 sm:$0xff] }
 0x138   : > { %v12304_v8 = vsub.f32 %v12271_v24, %v421_v7 }
 0x139   : > { %v401_v9 = vpop.xlane.xlu0 %400 }
 0x13a   : > { %v422_v10 = vmul.f32 0.03125, %v401_v9  ;;  %v437_v11 = vmul.f32 %v12304_v8, %v12304_v8 }
 0x13c   : > { %v12309_v13 = vsub.f32 %v12275_v31, %v422_v10  ;;  %v445_v12 = vsel %vm395_vm0, %v437_v11, 0.0 }
 0x13d   : > { %v404_v14 = vpop.xlane.xlu0 %403  ;;  %446 = vadd.xlane.f32.xlu0 %v445_v12 }
 0x13e   : > { %v423_v15 = vmul.f32 0.03125, %v404_v14  ;;  %v407_v16 = vpop.xlane.xlu1 %406  ;;  %v438_v17 = vmul.f32 %v12309_v13, %v12309_v13  ;;  %v9960_v14 = vld [vmem:[%s15175_s1 + $0x9] ss:$0 sm:$0xff] }
 0x13f   : > { %v424_v18 = vmul.f32 0.03125, %v407_v16 }
 0x140   : > { %v12315_v19 = vsub.f32 %v12279_v38, %v423_v15  ;;  %v448_v20 = vsel %vm395_vm0, %v438_v17, 0.0 }
 0x141   : > { %v12319_v21 = vsub.f32 %v12281_v40, %v424_v18  ;;  %449 = vadd.xlane.f32.xlu1 %v448_v20 }
 0x142   : > { %v439_v22 = vmul.f32 %v12315_v19, %v12315_v19 }
 0x143   : > { %v440_v23 = vmul.f32 %v12319_v21, %v12319_v21 }
 0x144   : > { %v451_v25 = vsel %vm395_vm0, %v439_v22, 0.0 }
 0x145   : > { %452 = vadd.xlane.f32.xlu0 %v451_v25  ;;  %v454_v26 = vsel %vm395_vm0, %v440_v23, 0.0 }
 0x146   : > { %455 = vadd.xlane.f32.xlu1 %v454_v26 }
 0x148   : > { %v410_v27 = vpop.xlane.xlu0 %409 }
 0x149   : > { %v425_v28 = vmul.f32 0.03125, %v410_v27 }
 0x14b   : > { %v12328_v29 = vsub.f32 %v12287_v55, %v425_v28 }
 0x14c   : > { %v416_v30 = vpop.xlane.xlu0 %415  ;;  %v413_v32 = vpop.xlane.xlu1 %412 }
 0x14d   : > { %v427_v33 = vmul.f32 0.03125, %v416_v30  ;;  %v426_v34 = vmul.f32 0.03125, %v413_v32  ;;  %v441_v35 = vmul.f32 %v12328_v29, %v12328_v29 }
 0x14f   : > { %v12333_v36 = vsub.f32 %v12291_v58, %v427_v33  ;;  %v12336_v37 = vsub.f32 %v12293_v60, %v426_v34  ;;  %v457_v39 = vsel %vm395_vm0, %v441_v35, 0.0 }
 0x150   : > { %458 = vadd.xlane.f32.xlu0 %v457_v39 }
 0x151   : > { %v443_v41 = vmul.f32 %v12333_v36, %v12333_v36  ;;  %v442_v42 = vmul.f32 %v12336_v37, %v12336_v37 }
 0x153   : > { %v463_v43 = vsel %vm395_vm0, %v443_v41, 0.0  ;;  %v460_v44 = vsel %vm395_vm0, %v442_v42, 0.0 }
 0x154   : > { %464 = vadd.xlane.f32.xlu0 %v463_v43  ;;  %461 = vadd.xlane.f32.xlu1 %v460_v44 }
 0x156   : > { %v419_v45 = vpop.xlane.xlu1 %418 }
 0x157   : > { %v428_v46 = vmul.f32 0.03125, %v419_v45 }
 0x159   : > { %v12346_v47 = vsub.f32 %v12299_v4, %v428_v46 }
 0x15b   : > { %v444_v48 = vmul.f32 %v12346_v47, %v12346_v47 }
 0x15d   : > { %v466_v49 = vsel %vm395_vm0, %v444_v48, 0.0 }
 0x15e   : > { %467 = vadd.xlane.f32.xlu1 %v466_v49 }
 0x1ca   : > { %v447_v52 = vpop.xlane.xlu0 %446 }
 0x1cb   : > { %v469_v53 = vmul.f32 0.03125, %v447_v52 }
 0x1cd   : > { %v477_v54 = vadd.f32 1e-05, %v469_v53 }
 0x1ce   : > { %v450_v56 = vpop.xlane.xlu1 %449 }
 0x1cf   : > { %11750 = vrsqrt.f32 %v477_v54  ;;  %v470_v57 = vmul.f32 0.03125, %v450_v56 }
 0x1d1   : > { %v478_v59 = vadd.f32 1e-05, %v470_v57 }
 0x1d2   : > { %v453_v61 = vpop.xlane.xlu0 %452 }
 0x1d3   : > { %11752 = vrsqrt.f32 %v478_v59  ;;  %v471_v62 = vmul.f32 0.03125, %v453_v61  ;;  %v456_v63 = vpop.xlane.xlu1 %455 }
 0x1d4   : > { %v472_v1 = vmul.f32 0.03125, %v456_v63 }
 0x1d5   : > { %v479_v2 = vadd.f32 1e-05, %v471_v62 }
 0x1d6   : > { %v480_v3 = vadd.f32 1e-05, %v472_v1 }
 0x1d7   : > { %11754 = vrsqrt.f32 %v479_v2 }
 0x1d8   : > { %11756 = vrsqrt.f32 %v480_v3 }
 0x1d9   : > { %v11751_v5 = vpop.eup %11750 }
 0x1da   : > { %v493_v7 = vmul.f32 %v11751_v5, %v12304_v8 }
 0x1dc   : > { %v507_v11 = vmul.f32 %v9959_v6, %v493_v7 }
 0x1dd   : > { %v11753_v9 = vpop.eup %11752  ;;  %v459_v10 = vpop.xlane.xlu0 %458 }
 0x1de   : > { %v473_v12 = vmul.f32 0.03125, %v459_v10  ;;  %v494_v15 = vmul.f32 %v11753_v9, %v12309_v13  ;;  %v521_v23 = vadd.f32 %v9960_v14, %v507_v11 }
 0x1e0   : > { %v481_v16 = vadd.f32 1e-05, %v473_v12  ;;  %v508_v17 = vmul.f32 %v9959_v6, %v494_v15  ;;  %v15181_v15 = vmov 0.0  }
 0x1e1   : > { %v11755_v18 = vpop.eup %11754  ;;  %v465_v20 = vpop.xlane.xlu0 %464  ;;  %10574 = vmatprep.subr.bf16.mxu1 %v15181_v15  ;;  %10586 = vmatprep.subr.bf16.mxu0 %v15181_v15 }
 0x1e2   : > { %v462_v22 = vpop.xlane.xlu1 %461  ;;  %v11757_v25 = vpop.eup %11756  ;;  %11758 = vrsqrt.f32 %v481_v16  ;;  %v475_v26 = vmul.f32 0.03125, %v465_v20  ;;  %v522_v27 = vadd.f32 %v9960_v14, %v508_v17  ;;  %v495_v28 = vmul.f32 %v11755_v18, %v12315_v19 }
 0x1e3   : > { %v474_v8 = vmul.f32 0.03125, %v462_v22  ;;  %v496_v30 = vmul.f32 %v11757_v25, %v12319_v21 }
 0x1e4   : > { %v529_v33 = vpack.c.bf16 %v522_v27, %v521_v23  ;;  %v509_v34 = vmul.f32 %v9959_v6, %v495_v28  ;;  %v483_v13 = vadd.f32 1e-05, %v475_v26 }
 0x1e5   : > { %v482_v32 = vadd.f32 1e-05, %v474_v8  ;;  %v510_v35 = vmul.f32 %v9959_v6, %v496_v30 }
 0x1e6   : > { %10566 = vmatprep.mubr.msk.bf16.mxu0 %vm395_vm0, %v529_v33  ;;  %v523_v39 = vadd.f32 %v9960_v14, %v509_v34 }
 0x1e7   : > { %11760 = vrsqrt.f32 %v482_v32  ;;  %v524_v41 = vadd.f32 %v9960_v14, %v510_v35 }
 0x1e8   : > { %11762 = vrsqrt.f32 %v483_v13 }
 0x1e9   : > { %v530_v42 = vpack.c.bf16 %v524_v41, %v523_v39 }
 0x1eb   : > { %10567 = vmatmul.mubr.msk.bf16.vlgmr.msra.gmra.mrb[0].mxu0 %vm395_vm0, %v530_v42  ;;  %v468_v43 = vpop.xlane.xlu1 %467 }
 0x1ec   : > { %v11759_v44 = vpop.eup %11758  ;;  %v476_v45 = vmul.f32 0.03125, %v468_v43  ;;  %10588 = vmatprep.mubr.msk.bf16.mxu0 %vm12162_vm1, %v15181_v15 }
 0x1ed   : > { %v497_v21 = vmul.f32 %v11759_v44, %v12328_v29 }
 0x1ee   : > { %v484_v19 = vadd.f32 1e-05, %v476_v45 }
 0x1ef   : > { %v511_v49 = vmul.f32 %v9959_v6, %v497_v21 }
 0x1f0   : > { %11764 = vrsqrt.f32 %v484_v19 }
 0x1f1   : > { %v11761_v46 = vpop.eup %11760  ;;  %v525_v52 = vadd.f32 %v9960_v14, %v511_v49 }
 0x1f2   : > { %v498_v48 = vmul.f32 %v11761_v46, %v12336_v37  ;;  %v11763_v50 = vpop.eup %11762  ;;  %v9961_v37 = vld [vmem:[%s15175_s1 + $0xa] ss:$0 sm:$0xff] }
 0x1f3   : > { %v499_v54 = vmul.f32 %v11763_v50, %v12333_v36 }
 0x1f4   : > { %v512_v51 = vmul.f32 %v9959_v6, %v498_v48 }
 0x1f5   : > { %v513_v61 = vmul.f32 %v9959_v6, %v499_v54 }
 0x1f6   : > { %v526_v53 = vadd.f32 %v9960_v14, %v512_v51 }
 0x1f7   : > { %v527_v29 = vadd.f32 %v9960_v14, %v513_v61 }
 0x1f8   : > { %v531_v56 = vpack.c.bf16 %v526_v53, %v525_v52 }
 0x1fa   : > { %v11765_v57 = vpop.eup %11764  ;;  %10570 = vmatprep.mubr.msk.bf16.mxu1 %vm395_vm0, %v531_v56 }
 0x1fb   : > { %v500_v59 = vmul.f32 %v11765_v57, %v12346_v47 }
 0x1fd   : > { %v514_v62 = vmul.f32 %v9959_v6, %v500_v59 }
 0x1ff   : > { %v528_v63 = vadd.f32 %v9960_v14, %v514_v62 }
 0x201   : > { %v532_v1 = vpack.c.bf16 %v528_v63, %v527_v29 }
 0x203   : > { %10571 = vmatmul.mubr.msk.bf16.vlgmr.msra.gmra.mrb[0].mxu1 %vm395_vm0, %v532_v1 }
 0x204   : > { %10576 = vmatprep.mubr.msk.bf16.mxu1 %vm12162_vm1, %v15181_v15 }
 0x2be   : > { %v10568_v2 = vpop.f32.mrb[0].mxu0 }
 0x2bf   : > { %v597_v3 = vpop.f32.mrb[1].mxu0  ;;  %v606_v11 = vadd.f32 %v10568_v2, %v9961_v37 }
 0x2c0   : > { %v598_v36 = vadd.f32 %v9961_v37, %v597_v3  ;;  %v10569_v5 = vpop.f32.mrb[2].mxu0 }
 0x2c1   : > { %v600_v7 = vpop.f32.mrb[3].mxu0  ;;  %v609_v10 = vadd.f32 %v10569_v5, %v9961_v37  ;;  %v12388_v14 = vpack.c.bf16 %v606_v11, %v606_v11 }
 0x2c2   : > { %v12378_v9 = vpack.c.bf16 %v598_v36, %v598_v36  ;;  %v601_v47 = vadd.f32 %v9961_v37, %v600_v7 }
 0x2c3   : > { %v12384_v12 = vpack.c.bf16 %v609_v10, %v609_v10 }
 0x2c4   : > { %v12380_v6 = vpack.c.bf16 %v601_v47, %v601_v47  ;;  %644 = vrot.lane.b32.xlu0 %v12378_v9, %s12160_s10 }
 0x2c6   : > { %646 = vrot.lane.b32.xlu1 %v12380_v6, %s12160_s10 }
 0x2c8   : > { %650 = vrot.lane.b32.xlu0 %v12384_v12, %s12160_s10 }
 0x2ca   : > { %648 = vrot.lane.b32.xlu1 %v12388_v14, %s12160_s10 }
 0x2d6   : > { %v10572_v16 = vpop.f32.mrb[0].mxu1 }
 0x2d7   : > { %v613_v17 = vpop.f32.mrb[1].mxu1  ;;  %v622_v26 = vadd.f32 %v10572_v16, %v9961_v37 }
 0x2d8   : > { %v614_v18 = vadd.f32 %v9961_v37, %v613_v17  ;;  %v10573_v20 = vpop.f32.mrb[2].mxu1 }
 0x2d9   : > { %v616_v22 = vpop.f32.mrb[3].mxu1  ;;  %v625_v27 = vadd.f32 %v10573_v20, %v9961_v37  ;;  %v12408_v28 = vpack.c.bf16 %v622_v26, %v622_v26 }
 0x2da   : > { %v12396_v23 = vpack.c.bf16 %v614_v18, %v614_v18  ;;  %v617_v25 = vadd.f32 %v9961_v37, %v616_v22 }
 0x2db   : > { %v12412_v30 = vpack.c.bf16 %v625_v27, %v625_v27 }
 0x2dc   : > { %v12402_v8 = vpack.c.bf16 %v617_v25, %v617_v25  ;;  %652 = vrot.lane.b32.xlu1 %v12396_v23, %s12160_s10 }
 0x2de   : > { %654 = vrot.lane.b32.xlu0 %v12402_v8, %s12160_s10 }
 0x2e0   : > { %692 = vrot.lane.b32.xlu1 %v12378_v9, %s12163_s11 }
 0x2e2   : > { %656 = vrot.lane.b32.xlu0 %v12408_v28, %s12160_s10 }
 0x2e4   : > { %658 = vrot.lane.b32.xlu1 %v12412_v30, %s12160_s10 }
 0x2e6   : > { %741 = vrot.lane.b32.xlu0 %v12380_v6, %s12163_s11 }
 0x2e8   : > { %660 = vrot.lane.b32.xlu1 %v12378_v9, %s12164_s12 }
 0x2ea   : > { %662 = vrot.lane.b32.xlu0 %v12380_v6, %s12164_s12 }
 0x2ec   : > { %789 = vrot.lane.b32.xlu1 %v12388_v14, %s12163_s11 }
 0x2ee   : > { %837 = vrot.lane.b32.xlu0 %v12384_v12, %s12163_s11 }
 0x2f0   : > { %664 = vrot.lane.b32.xlu1 %v12388_v14, %s12164_s12 }
 0x2f2   : > { %666 = vrot.lane.b32.xlu0 %v12384_v12, %s12164_s12 }
 0x2f4   : > { %885 = vrot.lane.b32.xlu1 %v12396_v23, %s12163_s11 }
 0x2f6   : > { %933 = vrot.lane.b32.xlu0 %v12402_v8, %s12163_s11 }
 0x2f8   : > { %668 = vrot.lane.b32.xlu1 %v12396_v23, %s12164_s12 }
 0x2fa   : > { %670 = vrot.lane.b32.xlu0 %v12402_v8, %s12164_s12 }
 0x2fc   : > { %981 = vrot.lane.b32.xlu1 %v12408_v28, %s12163_s11 }
 0x2fe   : > { %1029 = vrot.lane.b32.xlu0 %v12412_v30, %s12163_s11 }
 0x300   : > { %672 = vrot.lane.b32.xlu1 %v12408_v28, %s12164_s12 }
 0x302   : > { %674 = vrot.lane.b32.xlu0 %v12412_v30, %s12164_s12 }
 0x336   : > { %v12448_v32 = vpop.permute.xlu0 %644 }
 0x337   : > { %1077 = vrot.lane.b32.xlu1 %v12448_v32, %s12163_s11 }
 0x338   : > { %v12452_v33 = vpop.permute.xlu1 %646 }
 0x339   : > { %1125 = vrot.lane.b32.xlu0 %v12452_v33, %s12163_s11 }
 0x33a   : > { %v12464_v35 = vpop.permute.xlu0 %650 }
 0x33b   : > { %676 = vrot.lane.b32.xlu1 %v12378_v9, %s12165_s13 }
 0x33c   : > { %v12460_v34 = vpop.permute.xlu1 %648 }
 0x33d   : > { %678 = vrot.lane.b32.xlu0 %v12380_v6, %s12165_s13 }
 0x33f   : > { %1173 = vrot.lane.b32.xlu1 %v12460_v34, %s12163_s11 }
 0x341   : > { %1221 = vrot.lane.b32.xlu0 %v12464_v35, %s12163_s11 }
 0x343   : > { %680 = vrot.lane.b32.xlu1 %v12388_v14, %s12165_s13 }
 0x345   : > { %682 = vrot.lane.b32.xlu0 %v12384_v12, %s12165_s13 }
 0x34e   : > { %v12472_v13 = vpop.permute.xlu1 %652 }
 0x34f   : > { %1269 = vrot.lane.b32.xlu1 %v12472_v13, %s12163_s11 }
 0x350   : > { %v12476_v39 = vpop.permute.xlu0 %654 }
 0x351   : > { %1317 = vrot.lane.b32.xlu0 %v12476_v39, %s12163_s11 }
 0x352   : > { %v693_v41 = vpop.permute.xlu1 %692 }
 0x353   : > { %v699_v42 = vsel %vm694_vm2, %v693_v41, 0  ;;  %684 = vrot.lane.b32.xlu1 %v12396_v23, %s12165_s13 }
 0x354   : > { %v12483_v43 = vpop.permute.xlu0 %656  ;;  %10575 = vmatpush3.bf16.xpose.msra.mxu1 %v699_v42 }
 0x355   : > { %686 = vrot.lane.b32.xlu0 %v12402_v8, %s12165_s13  ;;  %10580 = vmatprep.subr.bf16.mxu1 %v15181_v15 }
 0x356   : > { %v12488_v44 = vpop.permute.xlu1 %658 }
 0x357   : > { %1365 = vrot.lane.b32.xlu1 %v12483_v43, %s12163_s11 }
 0x358   : > { %v742_v45 = vpop.permute.xlu0 %741 }
 0x359   : > { %1413 = vrot.lane.b32.xlu0 %v12488_v44, %s12163_s11  ;;  %v747_v21 = vsel %vm694_vm2, %v742_v45, 0 }
 0x35a   : > { %v12494_v19 = vpop.permute.xlu1 %660 }
 0x35b   : > { %688 = vrot.lane.b32.xlu1 %v12408_v28, %s12165_s13  ;;  %10577 = vmatmul.mubr.msk.bf16.vlgmr.msra.gmra.mrb[4].mxu1 %vm694_vm2, %v12378_v9 }
 0x35c   : > { %v12501_v46 = vpop.permute.xlu0 %662  ;;  %10581 = vmatpush3.bf16.xpose.msra.mxu1 %v747_v21  ;;  %10582 = vmatprep.mubr.msk.bf16.mxu1 %vm12162_vm1, %v15181_v15 }
 0x35d   : > { %690 = vrot.lane.b32.xlu0 %v12412_v30, %s12165_s13  ;;  %10592 = vmatprep.subr.bf16.mxu1 %v15181_v15 }
 0x35e   : > { %v790_v48 = vpop.permute.xlu1 %789 }
 0x35f   : > { %v795_v49 = vsel %vm694_vm2, %v790_v48, 0  ;;  %1461 = vrot.lane.b32.xlu1 %v12494_v19, %s12163_s11 }
 0x360   : > { %v838_v50 = vpop.permute.xlu0 %837  ;;  %10587 = vmatpush3.bf16.xpose.msra.mxu0 %v795_v49 }
 0x361   : > { %1509 = vrot.lane.b32.xlu0 %v12501_v46, %s12163_s11  ;;  %10598 = vmatprep.subr.bf16.mxu0 %v15181_v15  ;;  %v843_v52 = vsel %vm694_vm2, %v838_v50, 0 }
 0x362   : > { %v12514_v51 = vpop.permute.xlu1 %664 }
 0x363   : > { %10583 = vmatmul.mubr.msk.bf16.vlgmr.msra.gmra.mrb[8].mxu1 %vm694_vm2, %v12380_v6  ;;  %1557 = vrot.lane.b32.xlu1 %v12514_v51, %s12163_s11 }
 0x364   : > { %v12521_v53 = vpop.permute.xlu0 %666  ;;  %10593 = vmatpush3.bf16.xpose.msra.mxu1 %v843_v52  ;;  %10594 = vmatprep.mubr.msk.bf16.mxu1 %vm12162_vm1, %v15181_v15 }
 0x365   : > { %1605 = vrot.lane.b32.xlu0 %v12521_v53, %s12163_s11  ;;  %10604 = vmatprep.subr.bf16.mxu1 %v15181_v15 }
 0x366   : > { %v886_v54 = vpop.permute.xlu1 %885 }
 0x367   : > { %v891_v56 = vsel %vm694_vm2, %v886_v54, 0  ;;  %10589 = vmatmul.mubr.msk.bf16.vlgmr.msra.gmra.mrb[4].mxu0 %vm694_vm2, %v12388_v14 }
 0x368   : > { %v934_v57 = vpop.permute.xlu0 %933  ;;  %10599 = vmatpush3.bf16.xpose.msra.mxu0 %v891_v56  ;;  %10600 = vmatprep.mubr.msk.bf16.mxu0 %vm12162_vm1, %v15181_v15 }
 0x369   : > { %10610 = vmatprep.subr.bf16.mxu0 %v15181_v15  ;;  %v939_v61 = vsel %vm694_vm2, %v934_v57, 0 }
 0x36a   : > { %v12534_v59 = vpop.permute.xlu1 %668 }
 0x36b   : > { %10595 = vmatmul.mubr.msk.bf16.vlgmr.msra.gmra.mrb[12].mxu1 %vm694_vm2, %v12384_v12  ;;  %1653 = vrot.lane.b32.xlu1 %v12534_v59, %s12163_s11 }
 0x36c   : > { %v12541_v62 = vpop.permute.xlu0 %670  ;;  %10605 = vmatpush3.bf16.xpose.msra.mxu1 %v939_v61  ;;  %10606 = vmatprep.mubr.msk.bf16.mxu1 %vm12162_vm1, %v15181_v15 }
 0x36d   : > { %1701 = vrot.lane.b32.xlu0 %v12541_v62, %s12163_s11  ;;  %10616 = vmatprep.subr.bf16.mxu1 %v15181_v15 }
 0x36e   : > { %v982_v29 = vpop.permute.xlu1 %981 }
 0x36f   : > { %v987_v63 = vsel %vm694_vm2, %v982_v29, 0  ;;  %10601 = vmatmul.mubr.msk.bf16.vlgmr.msra.gmra.mrb[8].mxu0 %vm694_vm2, %v12396_v23 }
 0x370   : > { %v1030_v1 = vpop.permute.xlu0 %1029  ;;  %10611 = vmatpush3.bf16.xpose.msra.mxu0 %v987_v63  ;;  %10612 = vmatprep.mubr.msk.bf16.mxu0 %vm12162_vm1, %v15181_v15 }
 0x371   : > { %10622 = vmatprep.subr.bf16.mxu0 %v15181_v15  ;;  %v1035_v2 = vsel %vm694_vm2, %v1030_v1, 0 }
 0x372   : > { %v12554_v37 = vpop.permute.xlu1 %672 }
 0x373   : > { %10607 = vmatmul.mubr.msk.bf16.vlgmr.msra.gmra.mrb[16].mxu1 %vm694_vm2, %v12402_v8  ;;  %1749 = vrot.lane.b32.xlu1 %v12554_v37, %s12163_s11 }
 0x374   : > { %v12561_v3 = vpop.permute.xlu0 %674  ;;  %10617 = vmatpush3.bf16.xpose.msra.mxu1 %v1035_v2  ;;  %10618 = vmatprep.mubr.msk.bf16.mxu1 %vm12162_vm1, %v15181_v15 }
 0x375   : > { %1797 = vrot.lane.b32.xlu0 %v12561_v3, %s12163_s11  ;;  %10628 = vmatprep.subr.bf16.mxu1 %v15181_v15 }
 0x377   : > { %10613 = vmatmul.mubr.msk.bf16.vlgmr.msra.gmra.mrb[12].mxu0 %vm694_vm2, %v12408_v28 }
 0x378   : > { %10624 = vmatprep.mubr.msk.bf16.mxu0 %vm12162_vm1, %v15181_v15 }
 0x37b   : > { %10619 = vmatmul.mubr.msk.bf16.vlgmr.msra.gmra.mrb[20].mxu1 %vm694_vm2, %v12412_v30 }
 0x37c   : > { %10630 = vmatprep.mubr.msk.bf16.mxu1 %vm12162_vm1, %v15181_v15 }
 0x3a9   : > { %v1078_v36 = vpop.permute.xlu1 %1077 }
 0x3aa   : > { %v1083_v5 = vsel %vm694_vm2, %v1078_v36, 0 }
 0x3ab   : > { %v1126_v7 = vpop.permute.xlu0 %1125  ;;  %10623 = vmatpush3.bf16.xpose.msra.mxu0 %v1083_v5 }
 0x3ac   : > { %v1131_v10 = vsel %vm694_vm2, %v1126_v7, 0  ;;  %10634 = vmatprep.subr.bf16.mxu0 %v15181_v15 }
 0x3ad   : > { %10629 = vmatpush3.bf16.xpose.msra.mxu1 %v1131_v10  ;;  %v12579_v47 = vpop.permute.xlu1 %676 }
 0x3ae   : > { %1845 = vrot.lane.b32.xlu1 %v12579_v47, %s12163_s11  ;;  %10640 = vmatprep.subr.bf16.mxu1 %v15181_v15 }
 0x3af   : > { %v12584_v11 = vpop.permute.xlu0 %678 }
 0x3b0   : > { %1893 = vrot.lane.b32.xlu0 %v12584_v11, %s12163_s11 }
 0x3b1   : > { %v1174_v16 = vpop.permute.xlu1 %1173 }
 0x3b2   : > { %v1179_v17 = vsel %vm694_vm2, %v1174_v16, 0  ;;  %10625 = vmatmul.mubr.msk.bf16.vlgmr.msra.gmra.mrb[16].mxu0 %vm694_vm2, %v12448_v32 }
 0x3b3   : > { %v1222_v18 = vpop.permute.xlu0 %1221  ;;  %10635 = vmatpush3.bf16.xpose.msra.mxu0 %v1179_v17  ;;  %10636 = vmatprep.mubr.msk.bf16.mxu0 %vm12162_vm1, %v15181_v15 }
 0x3b4   : > { %v1227_v20 = vsel %vm694_vm2, %v1222_v18, 0  ;;  %10631 = vmatmul.mubr.msk.bf16.vlgmr.msra.gmra.mrb[24].mxu1 %vm694_vm2, %v12452_v33  ;;  %10646 = vmatprep.subr.bf16.mxu0 %v15181_v15 }
 0x3b5   : > { %10641 = vmatpush3.bf16.xpose.msra.mxu1 %v1227_v20  ;;  %v12597_v22 = vpop.permute.xlu1 %680  ;;  %10642 = vmatprep.mubr.msk.bf16.mxu1 %vm12162_vm1, %v15181_v15 }
 0x3b6   : > { %1941 = vrot.lane.b32.xlu1 %v12597_v22, %s12163_s11  ;;  %10652 = vmatprep.subr.bf16.mxu1 %v15181_v15 }
 0x3b7   : > { %v12604_v25 = vpop.permute.xlu0 %682 }
 0x3b8   : > { %1989 = vrot.lane.b32.xlu0 %v12604_v25, %s12163_s11 }
 0x3ba   : > { %10637 = vmatmul.mubr.msk.bf16.vlgmr.msra.gmra.mrb[20].mxu0 %vm694_vm2, %v12460_v34 }
 0x3bb   : > { %10648 = vmatprep.mubr.msk.bf16.mxu0 %vm12162_vm1, %v15181_v15 }
 0x3bc   : > { %10643 = vmatmul.mubr.msk.bf16.vlgmr.msra.gmra.mrb[28].mxu1 %vm694_vm2, %v12464_v35 }
 0x3bd   : > { %10654 = vmatprep.mubr.msk.bf16.mxu1 %vm12162_vm1, %v15181_v15 }
 0x3c1   : > { %v1270_v26 = vpop.permute.xlu1 %1269 }
 0x3c2   : > { %v1275_v27 = vsel %vm694_vm2, %v1270_v26, 0 }
 0x3c3   : > { %v1318_v41 = vpop.permute.xlu0 %1317  ;;  %10647 = vmatpush3.bf16.xpose.msra.mxu0 %v1275_v27 }
 0x3c4   : > { %v1323_v42 = vsel %vm694_vm2, %v1318_v41, 0  ;;  %10658 = vmatprep.subr.bf16.mxu0 %v15181_v15 }
 0x3c5   : > { %10653 = vmatpush3.bf16.xpose.msra.mxu1 %v1323_v42  ;;  %v12619_v45 = vpop.permute.xlu1 %684 }
 0x3c6   : > { %2037 = vrot.lane.b32.xlu1 %v12619_v45, %s12163_s11  ;;  %10664 = vmatprep.subr.bf16.mxu1 %v15181_v15 }
 0x3c7   : > { %v12624_v21 = vpop.permute.xlu0 %686 }
 0x3c8   : > { %2085 = vrot.lane.b32.xlu0 %v12624_v21, %s12163_s11 }
 0x3c9   : > { %v1366_v48 = vpop.permute.xlu1 %1365 }
 0x3ca   : > { %v1371_v49 = vsel %vm694_vm2, %v1366_v48, 0  ;;  %10649 = vmatmul.mubr.msk.bf16.vlgmr.msra.gmra.mrb[24].mxu0 %vm694_vm2, %v12472_v13 }
 0x3cb   : > { %v1414_v50 = vpop.permute.xlu0 %1413  ;;  %10659 = vmatpush3.bf16.xpose.msra.mxu0 %v1371_v49  ;;  %10660 = vmatprep.mubr.msk.bf16.mxu0 %vm12162_vm1, %v15181_v15 }
 0x3cc   : > { %v1419_v52 = vsel %vm694_vm2, %v1414_v50, 0  ;;  %10655 = vmatmul.mubr.msk.bf16.vlgmr.msra.gmra.mrb[32].mxu1 %vm694_vm2, %v12476_v39  ;;  %10670 = vmatprep.subr.bf16.mxu0 %v15181_v15 }
 0x3cd   : > { %10665 = vmatpush3.bf16.xpose.msra.mxu1 %v1419_v52  ;;  %v12637_v54 = vpop.permute.xlu1 %688  ;;  %10666 = vmatprep.mubr.msk.bf16.mxu1 %vm12162_vm1, %v15181_v15 }
 0x3ce   : > { %2133 = vrot.lane.b32.xlu1 %v12637_v54, %s12163_s11  ;;  %10676 = vmatprep.subr.bf16.mxu1 %v15181_v15 }
 0x3cf   : > { %v12644_v56 = vpop.permute.xlu0 %690 }
 0x3d0   : > { %2181 = vrot.lane.b32.xlu0 %v12644_v56, %s12163_s11 }
 0x3d1   : > { %v1462_v57 = vpop.permute.xlu1 %1461 }
 0x3d2   : > { %v1467_v61 = vsel %vm694_vm2, %v1462_v57, 0  ;;  %10661 = vmatmul.mubr.msk.bf16.vlgmr.msra.gmra.mrb[28].mxu0 %vm694_vm2, %v12483_v43  ;;  %2694 = vrot.lane.b32.xlu1 %v12380_v6, %s12166_s14 }
 0x3d3   : > { %v1510_v29 = vpop.permute.xlu0 %1509  ;;  %10671 = vmatpush3.bf16.xpose.msra.mxu0 %v1467_v61  ;;  %10672 = vmatprep.mubr.msk.bf16.mxu0 %vm12162_vm1, %v15181_v15 }
 0x3d4   : > { %v1515_v63 = vsel %vm694_vm2, %v1510_v29, 0  ;;  %10667 = vmatmul.mubr.msk.bf16.vlgmr.msra.gmra.mrb[36].mxu1 %vm694_vm2, %v12488_v44  ;;  %2645 = vrot.lane.b32.xlu0 %v12378_v9, %s12166_s14 }
 0x3d5   : > { %10677 = vmatpush3.bf16.xpose.msra.mxu1 %v1515_v63  ;;  %10682 = vmatprep.subr.bf16.mxu0 %v15181_v15  ;;  %v1558_v6 = vpop.permute.xlu1 %1557 }
 0x3d6   : > { %2790 = vrot.lane.b32.xlu1 %v12384_v12, %s12166_s14  ;;  %10678 = vmatprep.mubr.msk.bf16.mxu1 %vm12162_vm1, %v15181_v15  ;;  %v1563_v2 = vsel %vm694_vm2, %v1558_v6, 0 }
 0x3d7   : > { %10688 = vmatprep.subr.bf16.mxu1 %v15181_v15  ;;  %v1606_v1 = vpop.permute.xlu0 %1605 }
 0x3d8   : > { %2742 = vrot.lane.b32.xlu0 %v12388_v14, %s12166_s14  ;;  %v1611_v9 = vsel %vm694_vm2, %v1606_v1, 0 }
 0x3da   : > { %2886 = vrot.lane.b32.xlu1 %v12402_v8, %s12166_s14  ;;  %10673 = vmatmul.mubr.msk.bf16.vlgmr.msra.gmra.mrb[32].mxu0 %vm694_vm2, %v12494_v19 }
 0x3db   : > { %10683 = vmatpush3.bf16.xpose.msra.mxu0 %v1563_v2  ;;  %10684 = vmatprep.mubr.msk.bf16.mxu0 %vm12162_vm1, %v15181_v15 }
 0x3dc   : > { %2838 = vrot.lane.b32.xlu0 %v12396_v23, %s12166_s14  ;;  %10679 = vmatmul.mubr.msk.bf16.vlgmr.msra.gmra.mrb[40].mxu1 %vm694_vm2, %v12501_v46 }
 0x3dd   : > { %10689 = vmatpush3.bf16.xpose.msra.mxu1 %v1611_v9  ;;  %10694 = vmatprep.subr.bf16.mxu0 %v15181_v15  ;;  %v1654_v12 = vpop.permute.xlu1 %1653 }
 0x3de   : > { %2982 = vrot.lane.b32.xlu1 %v12412_v30, %s12166_s14  ;;  %10690 = vmatprep.mubr.msk.bf16.mxu1 %vm12162_vm1, %v15181_v15  ;;  %v1659_v23 = vsel %vm694_vm2, %v1654_v12, 0 }
 0x3df   : > { %10700 = vmatprep.subr.bf16.mxu1 %v15181_v15  ;;  %v1702_v14 = vpop.permute.xlu0 %1701 }
 0x3e0   : > { %2934 = vrot.lane.b32.xlu0 %v12408_v28, %s12166_s14  ;;  %v1707_v8 = vsel %vm694_vm2, %v1702_v14, 0 }
 0x3e2   : > { %3174 = vrot.lane.b32.xlu1 %v12464_v35, %s12166_s14  ;;  %10685 = vmatmul.mubr.msk.bf16.vlgmr.msra.gmra.mrb[36].mxu0 %vm694_vm2, %v12514_v51 }
 0x3e3   : > { %10695 = vmatpush3.bf16.xpose.msra.mxu0 %v1659_v23  ;;  %10696 = vmatprep.mubr.msk.bf16.mxu0 %vm12162_vm1, %v15181_v15 }
 0x3e4   : > { %3030 = vrot.lane.b32.xlu0 %v12448_v32, %s12166_s14  ;;  %10691 = vmatmul.mubr.msk.bf16.vlgmr.msra.gmra.mrb[44].mxu1 %vm694_vm2, %v12521_v53 }
 0x3e5   : > { %10701 = vmatpush3.bf16.xpose.msra.mxu1 %v1707_v8  ;;  %10706 = vmatprep.subr.bf16.mxu0 %v15181_v15  ;;  %v1750_v28 = vpop.permute.xlu1 %1749 }
 0x3e6   : > { %3366 = vrot.lane.b32.xlu1 %v12488_v44, %s12166_s14  ;;  %10702 = vmatprep.mubr.msk.bf16.mxu1 %vm12162_vm1, %v15181_v15  ;;  %v1755_v32 = vsel %vm694_vm2, %v1750_v28, 0 }
 0x3e7   : > { %10712 = vmatprep.subr.bf16.mxu1 %v15181_v15  ;;  %v1798_v30 = vpop.permute.xlu0 %1797 }
 0x3e8   : > { %3126 = vrot.lane.b32.xlu0 %v12460_v34, %s12166_s14  ;;  %v1803_v35 = vsel %vm694_vm2, %v1798_v30, 0 }
 0x3ea   : > { %3558 = vrot.lane.b32.xlu1 %v12521_v53, %s12166_s14  ;;  %10697 = vmatmul.mubr.msk.bf16.vlgmr.msra.gmra.mrb[40].mxu0 %vm694_vm2, %v12534_v59 }
 0x3eb   : > { %10707 = vmatpush3.bf16.xpose.msra.mxu0 %v1755_v32  ;;  %10708 = vmatprep.mubr.msk.bf16.mxu0 %vm12162_vm1, %v15181_v15 }
 0x3ec   : > { %3222 = vrot.lane.b32.xlu0 %v12472_v13, %s12166_s14  ;;  %10703 = vmatmul.mubr.msk.bf16.vlgmr.msra.gmra.mrb[48].mxu1 %vm694_vm2, %v12541_v62 }
 0x3ed   : > { %10713 = vmatpush3.bf16.xpose.msra.mxu1 %v1803_v35  ;;  %10714 = vmatprep.mubr.msk.bf16.mxu1 %vm12162_vm1, %v15181_v15 }
 0x3ee   : > { %3750 = vrot.lane.b32.xlu1 %v12561_v3, %s12166_s14  ;;  %10718 = vmatprep.subr.bf16.mxu0 %v15181_v15 }
 0x3ef   : > { %10724 = vmatprep.subr.bf16.mxu1 %v15181_v15 }
 0x3f0   : > { %3318 = vrot.lane.b32.xlu0 %v12483_v43, %s12166_s14 }
 0x3f2   : > { %3078 = vrot.lane.b32.xlu1 %v12452_v33, %s12166_s14  ;;  %10709 = vmatmul.mubr.msk.bf16.vlgmr.msra.gmra.mrb[44].mxu0 %vm694_vm2, %v12554_v37 }
 0x3f3   : > { %10720 = vmatprep.mubr.msk.bf16.mxu0 %vm12162_vm1, %v15181_v15 }
 0x3f4   : > { %10715 = vmatmul.mubr.msk.bf16.vlgmr.msra.gmra.mrb[52].mxu1 %vm694_vm2, %v12561_v3  ;;  %3414 = vrot.lane.b32.xlu0 %v12494_v19, %s12166_s14 }
 0x3f5   : > { %10726 = vmatprep.mubr.msk.bf16.mxu1 %vm12162_vm1, %v15181_v15 }
 0x3f6   : > { %3270 = vrot.lane.b32.xlu1 %v12476_v39, %s12166_s14 }
 0x3f8   : > { %3510 = vrot.lane.b32.xlu0 %v12514_v51, %s12166_s14 }
 0x3fa   : > { %3462 = vrot.lane.b32.xlu1 %v12501_v46, %s12166_s14 }
 0x3fc   : > { %3606 = vrot.lane.b32.xlu0 %v12534_v59, %s12166_s14 }
 0x3fe   : > { %3654 = vrot.lane.b32.xlu1 %v12541_v62, %s12166_s14 }
 0x400   : > { %3702 = vrot.lane.b32.xlu0 %v12554_v37, %s12166_s14 }
 0x402   : > { %3846 = vrot.lane.b32.xlu1 %v12584_v11, %s12166_s14 }
 0x404   : > { %3798 = vrot.lane.b32.xlu0 %v12579_v47, %s12166_s14 }
 0x420   : > { %v1846_v33 = vpop.permute.xlu1 %1845 }
 0x421   : > { %v1851_v34 = vsel %vm694_vm2, %v1846_v33, 0 }
 0x422   : > { %v1894_v13 = vpop.permute.xlu0 %1893  ;;  %10719 = vmatpush3.bf16.xpose.msra.mxu0 %v1851_v34 }
 0x423   : > { %v1899_v39 = vsel %vm694_vm2, %v1894_v13, 0  ;;  %10730 = vmatprep.subr.bf16.mxu0 %v15181_v15 }
 0x424   : > { %10725 = vmatpush3.bf16.xpose.msra.mxu1 %v1899_v39 }
 0x425   : > { %10736 = vmatprep.subr.bf16.mxu1 %v15181_v15 }
 0x428   : > { %v1942_v43 = vpop.permute.xlu1 %1941 }
 0x429   : > { %v1947_v44 = vsel %vm694_vm2, %v1942_v43, 0  ;;  %10721 = vmatmul.mubr.msk.bf16.vlgmr.msra.gmra.mrb[48].mxu0 %vm694_vm2, %v12579_v47 }
 0x42a   : > { %v1990_v19 = vpop.permute.xlu0 %1989  ;;  %10731 = vmatpush3.bf16.xpose.msra.mxu0 %v1947_v44  ;;  %10732 = vmatprep.mubr.msk.bf16.mxu0 %vm12162_vm1, %v15181_v15 }
 0x42b   : > { %v1995_v46 = vsel %vm694_vm2, %v1990_v19, 0  ;;  %10727 = vmatmul.mubr.msk.bf16.vlgmr.msra.gmra.mrb[56].mxu1 %vm694_vm2, %v12584_v11  ;;  %10742 = vmatprep.subr.bf16.mxu0 %v15181_v15 }
 0x42c   : > { %10737 = vmatpush3.bf16.xpose.msra.mxu1 %v1995_v46  ;;  %10738 = vmatprep.mubr.msk.bf16.mxu1 %vm12162_vm1, %v15181_v15 }
 0x42d   : > { %10748 = vmatprep.subr.bf16.mxu1 %v15181_v15 }
 0x42e   : > { %v735_v51 = vpop.f32.mrb[4].mxu1 }
 0x42f   : > { %v12772_v53 = vmul.f32 0.35355338, %v735_v51  ;;  %v10578_v59 = vpop.f32.mrb[5].mxu1 }
 0x430   : > { %v738_v62 = vpop.f32.mrb[6].mxu1 }
 0x431   : > { %v10579_v37 = vpop.f32.mrb[7].mxu1  ;;  %10733 = vmatmul.mubr.msk.bf16.vlgmr.msra.gmra.mrb[52].mxu0 %vm694_vm2, %v12597_v22  ;;  %v2261_v3 = vsel %vm694_vm2, %v12772_v53, -inf }
 0x432   : > { %2262 = vmax.xlane.f32.xlu1 %v2261_v3  ;;  %10744 = vmatprep.mubr.msk.bf16.mxu0 %vm12162_vm1, %v15181_v15 }
 0x433   : > { %10739 = vmatmul.mubr.msk.bf16.vlgmr.msra.gmra.mrb[60].mxu1 %vm694_vm2, %v12604_v25 }
 0x434   : > { %10750 = vmatprep.mubr.msk.bf16.mxu1 %vm12162_vm1, %v15181_v15 }
 0x436   : > { %v783_v36 = vpop.f32.mrb[8].mxu1 }
 0x437   : > { %v10584_v5 = vpop.f32.mrb[9].mxu1  ;;  %v12807_v23 = vmul.f32 0.35355338, %v783_v36 }
 0x438   : > { %v786_v7 = vpop.f32.mrb[10].mxu1  ;;  %v2038_v10 = vpop.permute.xlu1 %2037 }
 0x439   : > { %v2043_v47 = vsel %vm694_vm2, %v2038_v10, 0  ;;  %v10585_v11 = vpop.f32.mrb[11].mxu1  ;;  %v2264_v43 = vsel %vm694_vm2, %v12807_v23, -inf }
 0x43a   : > { %v2086_v16 = vpop.permute.xlu0 %2085  ;;  %v831_v17 = vpop.f32.mrb[4].mxu0  ;;  %10743 = vmatpush3.bf16.xpose.msra.mxu0 %v2043_v47 }
 0x43b   : > { %v2091_v18 = vsel %vm694_vm2, %v2086_v16, 0  ;;  %v12786_v20 = vmul.f32 0.35355338, %v831_v17  ;;  %v10590_v26 = vpop.f32.mrb[5].mxu0  ;;  %10754 = vmatprep.subr.bf16.mxu0 %v15181_v15 }
 0x43c   : > { %v834_v27 = vpop.f32.mrb[6].mxu0  ;;  %10749 = vmatpush3.bf16.xpose.msra.mxu1 %v2091_v18 }
 0x43d   : > { %v10591_v41 = vpop.f32.mrb[7].mxu0  ;;  %v2267_v42 = vsel %vm694_vm2, %v12786_v20, -inf  ;;  %10760 = vmatprep.subr.bf16.mxu1 %v15181_v15 }
 0x43e   : > { %v879_v48 = vpop.f32.mrb[12].mxu1  ;;  %2268 = vmax.xlane.f32.xlu0 %v2267_v42 }
 0x43f   : > { %v12792_v49 = vmul.f32 0.35355338, %v879_v48  ;;  %v10596_v50 = vpop.f32.mrb[13].mxu1 }
 0x440   : > { %v882_v52 = vpop.f32.mrb[14].mxu1  ;;  %v2134_v57 = vpop.permute.xlu1 %2133 }
 0x441   : > { %v2139_v61 = vsel %vm694_vm2, %v2134_v57, 0  ;;  %v10597_v29 = vpop.f32.mrb[15].mxu1  ;;  %10745 = vmatmul.mubr.msk.bf16.vlgmr.msra.gmra.mrb[56].mxu0 %vm694_vm2, %v12619_v45  ;;  %v2270_v63 = vsel %vm694_vm2, %v12792_v49, -inf }
 0x442   : > { %v2182_v6 = vpop.permute.xlu0 %2181  ;;  %v927_v1 = vpop.f32.mrb[8].mxu0  ;;  %2271 = vmax.xlane.f32.xlu1 %v2270_v63  ;;  %10755 = vmatpush3.bf16.xpose.msra.mxu0 %v2139_v61 }
 0x443   : > { %v2187_v2 = vsel %vm694_vm2, %v2182_v6, 0  ;;  %v12800_v9 = vmul.f32 0.35355338, %v927_v1  ;;  %v10602_v12 = vpop.f32.mrb[9].mxu0  ;;  %10751 = vmatmul.mubr.msk.bf16.vlgmr.msra.gmra.mrb[64].mxu1 %vm694_vm2, %v12624_v21  ;;  %10756 = vmatprep.mubr.msk.bf16.mxu0 %vm12162_vm1, %v15181_v15 }
 0x444   : > { %v930_v14 = vpop.f32.mrb[10].mxu0  ;;  %10761 = vmatpush3.bf16.xpose.msra.mxu1 %v2187_v2  ;;  %10766 = vmatprep.subr.bf16.mxu0 %v15181_v15  ;;  %v2695_v34 = vpop.permute.xlu1 %2694 }
 0x445   : > { %v10603_v8 = vpop.f32.mrb[11].mxu0  ;;  %v2273_v28 = vsel %vm694_vm2, %v12800_v9, -inf  ;;  %10762 = vmatprep.mubr.msk.bf16.mxu1 %vm12162_vm1, %v15181_v15  ;;  %10772 = vmatprep.subr.bf16.mxu1 %v15181_v15  ;;  %v2700_v51 = vsel %vm2650_vm3, %v2695_v34, 0 }
 0x446   : > { %v975_v30 = vpop.f32.mrb[16].mxu1  ;;  %2274 = vmax.xlane.f32.xlu0 %v2273_v28  ;;  %v2646_v35 = vpop.permute.xlu0 %2645 }
 0x447   : > { %v12814_v32 = vmul.f32 0.35355338, %v975_v30  ;;  %v10608_v33 = vpop.f32.mrb[17].mxu1  ;;  %v2652_v19 = vsel %vm2650_vm3, %v2646_v35, 0 }
 0x448   : > { %v978_v13 = vpop.f32.mrb[18].mxu1  ;;  %v12842_v18 = vpop.permute.xlu1 %2790 }
 0x449   : > { %v10609_v39 = vpop.f32.mrb[19].mxu1  ;;  %10757 = vmatmul.mubr.msk.bf16.vlgmr.msra.gmra.mrb[60].mxu0 %vm694_vm2, %v12637_v54  ;;  %v2276_v44 = vsel %vm694_vm2, %v12814_v32, -inf }
 0x44a   : > { %v1023_v46 = vpop.f32.mrb[12].mxu0  ;;  %2265 = vmax.xlane.f32.xlu0 %v2264_v43  ;;  %2277 = vmax.xlane.f32.xlu1 %v2276_v44  ;;  %v12840_v17 = vpop.permute.xlu0 %2742 }
 0x44b   : > { %v12824_v59 = vmul.f32 0.35355338, %v1023_v46  ;;  %10767 = vmatpush3.bf16.msra.mxu0 %v2652_v19  ;;  %v10614_v62 = vpop.f32.mrb[13].mxu0  ;;  %10763 = vmatmul.mubr.msk.bf16.vlgmr.msra.gmra.mrb[68].mxu1 %vm694_vm2, %v12644_v56 }
 0x44c   : > { %v1026_v37 = vpop.f32.mrb[14].mxu0  ;;  %10773 = vmatpush3.bf16.msra.mxu1 %v2700_v51  ;;  %10774 = vmatprep.mubr.msk.bf16.mxu1 %vm12162_vm1, %v15181_v15  ;;  %v12854_v2 = vpop.permute.xlu1 %2886 }
 0x44d   : > { %v10615_v3 = vpop.f32.mrb[15].mxu0  ;;  %v2279_v36 = vsel %vm694_vm2, %v12824_v59, -inf  ;;  %10784 = vmatprep.subr.bf16.mxu1 %v15181_v15  ;;  %10768 = vmatprep.mubr.msk.bf16.mxu0 %vm12162_vm1, %v15181_v15 }
 0x44e   : > { %v1071_v5 = vpop.f32.mrb[20].mxu1  ;;  %2280 = vmax.xlane.f32.xlu0 %v2279_v36  ;;  %10778 = vmatprep.subr.bf16.mxu0 %v15181_v15  ;;  %v12844_v27 = vpop.permute.xlu0 %2838 }
 0x44f   : > { %v12836_v7 = vmul.f32 0.35355338, %v1071_v5  ;;  %v10620_v10 = vpop.f32.mrb[21].mxu1 }
 0x450   : > { %v1074_v47 = vpop.f32.mrb[22].mxu1  ;;  %v12864_v43 = vpop.permute.xlu1 %2982 }
 0x451   : > { %v10621_v11 = vpop.f32.mrb[23].mxu1  ;;  %v2282_v16 = vsel %vm694_vm2, %v12836_v7, -inf }
 0x452   : > { %2283 = vmax.xlane.f32.xlu1 %v2282_v16  ;;  %v12856_v12 = vpop.permute.xlu0 %2934 }
 0x454   : > { %v12870_v62 = vpop.permute.xlu1 %3174 }
 0x456   : > { %v12866_v19 = vpop.permute.xlu0 %3030 }
 0x458   : > { %v12874_v3 = vpop.permute.xlu1 %3366 }
 0x459   : > { %15212 = vst [vmem:[#allocation13_spill] sm:$0xff] %v12874_v3 }
 0x45a   : > { %v12872_v37 = vpop.permute.xlu0 %3126 }
 0x45e   : > { %v12876_v5 = vpop.permute.xlu0 %3222 }
 0x485   : > { %v1119_v26 = vpop.f32.mrb[16].mxu0 }
 0x486   : > { %v12846_v41 = vmul.f32 0.35355338, %v1119_v26  ;;  %v10626_v42 = vpop.f32.mrb[17].mxu0 }
 0x487   : > { %v1122_v48 = vpop.f32.mrb[18].mxu0  ;;  %v1167_v50 = vpop.f32.mrb[24].mxu1 }
 0x488   : > { %v12848_v52 = vmul.f32 0.35355338, %v1167_v50  ;;  %v10627_v57 = vpop.f32.mrb[19].mxu0  ;;  %v10632_v61 = vpop.f32.mrb[25].mxu1  ;;  %v2285_v29 = vsel %vm694_vm2, %v12846_v41, -inf }
 0x489   : > { %v1170_v63 = vpop.f32.mrb[26].mxu1  ;;  %2286 = vmax.xlane.f32.xlu0 %v2285_v29  ;;  %v12884_v61 = vpop.permute.xlu1 %3558 }
 0x48a   : > { %v10633_v6 = vpop.f32.mrb[27].mxu1  ;;  %v2288_v1 = vsel %vm694_vm2, %v12848_v52, -inf  ;;  %15213 = vst [vmem:[#allocation14_spill] sm:$0xff] %v12884_v61  ;;  %v12886_v63 = vpop.permute.xlu0 %3318 }
 0x48b   : > { %2289 = vmax.xlane.f32.xlu1 %v2288_v1 }
 0x48d   : > { %v1215_v14 = vpop.f32.mrb[20].mxu0 }
 0x48e   : > { %v12858_v8 = vmul.f32 0.35355338, %v1215_v14  ;;  %v10638_v28 = vpop.f32.mrb[21].mxu0 }
 0x48f   : > { %v1218_v30 = vpop.f32.mrb[22].mxu0  ;;  %v1263_v35 = vpop.f32.mrb[28].mxu1 }
 0x490   : > { %v12860_v33 = vmul.f32 0.35355338, %v1263_v35  ;;  %v10639_v34 = vpop.f32.mrb[23].mxu0  ;;  %v10644_v13 = vpop.f32.mrb[29].mxu1  ;;  %v2291_v39 = vsel %vm694_vm2, %v12858_v8, -inf }
 0x491   : > { %v1266_v44 = vpop.f32.mrb[30].mxu1  ;;  %2292 = vmax.xlane.f32.xlu0 %v2291_v39 }
 0x492   : > { %v10645_v46 = vpop.f32.mrb[31].mxu1  ;;  %v2294_v51 = vsel %vm694_vm2, %v12860_v33, -inf  ;;  %v12892_v44 = vpop.permute.xlu1 %3750 }
 0x493   : > { %2295 = vmax.xlane.f32.xlu1 %v2294_v51  ;;  %15214 = vst [vmem:[#allocation15_spill] sm:$0xff] %v12892_v44  ;;  %v12896_v46 = vpop.permute.xlu0 %3414 }
 0x49d   : > { %v1311_v36 = vpop.f32.mrb[24].mxu0 }
 0x49e   : > { %v12878_v10 = vmul.f32 0.35355338, %v1311_v36  ;;  %v10650_v47 = vpop.f32.mrb[25].mxu0 }
 0x49f   : > { %v1314_v11 = vpop.f32.mrb[26].mxu0  ;;  %v1359_v16 = vpop.f32.mrb[32].mxu1 }
 0x4a0   : > { %v10651_v26 = vpop.f32.mrb[27].mxu0  ;;  %v10656_v42 = vpop.f32.mrb[33].mxu1  ;;  %v2297_v48 = vsel %vm694_vm2, %v12878_v10, -inf }
 0x4a1   : > { %v1362_v50 = vpop.f32.mrb[34].mxu1  ;;  %2298 = vmax.xlane.f32.xlu0 %v2297_v48 }
 0x4a2   : > { %v10657_v57 = vpop.f32.mrb[35].mxu1  ;;  %v12898_v50 = vpop.permute.xlu1 %3078 }
 0x4a4   : > { %3894 = vrot.lane.b32.xlu1 %v12597_v22, %s12166_s14 }
 0x4a5   : > { %v1407_v29 = vpop.f32.mrb[28].mxu0 }
 0x4a6   : > { %v12888_v6 = vmul.f32 0.35355338, %v1407_v29  ;;  %v10662_v1 = vpop.f32.mrb[29].mxu0  ;;  %v12902_v29 = vpop.permute.xlu0 %3510 }
 0x4a7   : > { %v1410_v14 = vpop.f32.mrb[30].mxu0  ;;  %v1455_v28 = vpop.f32.mrb[36].mxu1  ;;  %15215 = vst [vmem:[#allocation16_spill] sm:$0xff] %v12902_v29 }
 0x4a8   : > { %v10663_v30 = vpop.f32.mrb[31].mxu0  ;;  %v10668_v35 = vpop.f32.mrb[37].mxu1  ;;  %v2303_v34 = vsel %vm694_vm2, %v12888_v6, -inf  ;;  %v12922_v4 = vmul.f32 0.35355338, %v1455_v28 }
 0x4a9   : > { %v1458_v13 = vpop.f32.mrb[38].mxu1  ;;  %2304 = vmax.xlane.f32.xlu0 %v2303_v34 }
 0x4aa   : > { %v10669_v39 = vpop.f32.mrb[39].mxu1  ;;  %v2306_v31 = vsel %vm694_vm2, %v12922_v4, -inf }
 0x4ab   : > { %v12904_v39 = vpop.permute.xlu1 %3270 }
 0x4ad   : > { %v12894_v22 = vpop.f32.mrb[32].mxu0 }
 0x4ae   : > { %v10674_v51 = vpop.f32.mrb[33].mxu0 }
 0x4af   : > { %v1506_v36 = vpop.f32.mrb[34].mxu0  ;;  %v1551_v47 = vpop.f32.mrb[40].mxu1 }
 0x4b0   : > { %v10675_v11 = vpop.f32.mrb[35].mxu0  ;;  %v10680_v26 = vpop.f32.mrb[41].mxu1 }
 0x4b1   : > { %v1554_v42 = vpop.f32.mrb[42].mxu1  ;;  %v12906_v36 = vpop.permute.xlu0 %3606 }
 0x4b2   : > { %v10681_v48 = vpop.f32.mrb[43].mxu1  ;;  %15216 = vst [vmem:[#allocation17_spill] sm:$0xff] %v12906_v36  ;;  %v12912_v0 = vpop.permute.xlu1 %3462 }
 0x4b3   : > { %15217 = vst [vmem:[#allocation18_spill] sm:$0xff] %v12912_v0 }
 0x4b5   : > { %v12900_v57 = vpop.f32.mrb[36].mxu0 }
 0x4b6   : > { %v10686_v1 = vpop.f32.mrb[37].mxu0  ;;  %v12920_v60 = vpop.permute.xlu1 %3654 }
 0x4b7   : > { %v1602_v14 = vpop.f32.mrb[38].mxu0  ;;  %v1647_v30 = vpop.f32.mrb[44].mxu1  ;;  %15219 = vst [vmem:[#allocation20_spill] sm:$0xff] %v12920_v60 }
 0x4b8   : > { %v10687_v35 = vpop.f32.mrb[39].mxu0  ;;  %v10692_v34 = vpop.f32.mrb[45].mxu1  ;;  %v12934_v28 = vmul.f32 0.35355338, %v1647_v30 }
 0x4b9   : > { %v1650_v13 = vpop.f32.mrb[46].mxu1  ;;  %v12914_v34 = vpop.permute.xlu0 %3702 }
 0x4ba   : > { %v10693_v51 = vpop.f32.mrb[47].mxu1  ;;  %15218 = vst [vmem:[#allocation19_spill] sm:$0xff] %v12914_v34  ;;  %v12916_v13 = vmul.f32 0.35355338, %v1359_v16  ;;  %v2318_v38 = vsel %vm694_vm2, %v12934_v28, -inf }
 0x4bd   : > { %v12908_v11 = vpop.f32.mrb[40].mxu0 }
 0x4be   : > { %v10698_v26 = vpop.f32.mrb[41].mxu0 }
 0x4bf   : > { %v1743_v42 = vpop.f32.mrb[48].mxu1  ;;  %3942 = vrot.lane.b32.xlu0 %v12604_v25, %s12166_s14  ;;  %v1698_v48 = vpop.f32.mrb[42].mxu0 }
 0x4c0   : > { %v10699_v1 = vpop.f32.mrb[43].mxu0  ;;  %v10704_v14 = vpop.f32.mrb[49].mxu1  ;;  %v2300_v48 = vsel %vm694_vm2, %v12916_v13, -inf }
 0x4c1   : > { %v1746_v35 = vpop.f32.mrb[50].mxu1 }
 0x4c2   : > { %v10705_v51 = vpop.f32.mrb[51].mxu1  ;;  %v12926_v35 = vpop.permute.xlu0 %3798 }
 0x4c3   : > { %15220 = vst [vmem:[#allocation21_spill] sm:$0xff] %v12926_v35  ;;  %v12928_v51 = vmul.f32 0.35355338, %v1551_v47 }
 0x4c5   : > { %v12918_v15 = vpop.f32.mrb[44].mxu0 }
 0x4c6   : > { %v10710_v26 = vpop.f32.mrb[45].mxu0 }
 0x4c7   : > { %v1794_v55 = vpop.f32.mrb[46].mxu0  ;;  %v1839_v25 = vpop.f32.mrb[52].mxu1 }
 0x4c8   : > { %v10716_v1 = vpop.f32.mrb[53].mxu1  ;;  %2301 = vmax.xlane.f32.xlu1 %v2300_v48  ;;  %v10711_v14 = vpop.f32.mrb[47].mxu0 }
 0x4c9   : > { %v1842_v16 = vpop.f32.mrb[54].mxu1  ;;  %v12932_v26 = vpop.permute.xlu1 %3846  ;;  %v2312_v1 = vsel %vm694_vm2, %v12928_v51, -inf }
 0x4ca   : > { %v10717_v58 = vpop.f32.mrb[55].mxu1  ;;  %15221 = vst [vmem:[#allocation22_spill] sm:$0xff] %v12932_v26  ;;  %v12939_v16 = vmul.f32 0.35355338, %v1743_v42  ;;  %v12948_v42 = vmul.f32 0.35355338, %v12894_v22 }
 0x4cb   : > { %v2269_v55 = vpop.xlane.xlu0 %2268 }
 0x4cc   : > { %2307 = vmax.xlane.f32.xlu1 %v2306_v31  ;;  %v2359_v14 = vsub.f32 %v12786_v20, %v2269_v55  ;;  %v2324_v35 = vsel %vm694_vm2, %v12939_v16, -inf }
 0x4cd   : > { %v2263_v48 = vpop.xlane.xlu1 %2262 }
 0x4ce   : > { %v2357_v58 = vsub.f32 %v12772_v53, %v2263_v48  ;;  %v2393_v40 = vmul.f32 1.442695, %v2359_v14  ;;  %v2309_v48 = vsel %vm694_vm2, %v12948_v42, -inf }
 0x4d0   : > { %2313 = vmax.xlane.f32.xlu1 %v2312_v1  ;;  %v2389_v31 = vmul.f32 1.442695, %v2357_v58  ;;  %11766 = vpow2.f32 %v2393_v40  ;;  %v12968_v58 = vmul.f32 0.35355338, %v1839_v25 }
 0x4d1   : > { %v2272_v30 = vpop.xlane.xlu1 %2271 }
 0x4d2   : > { %v2360_v53 = vsub.f32 %v12792_v49, %v2272_v30  ;;  %11768 = vpow2.f32 %v2389_v31  ;;  %v12973_v30 = vmul.f32 0.35355338, %v12908_v11 }
 0x4d3   : > { %v2275_v47 = vpop.xlane.xlu0 %2274 }
 0x4d4   : > { %2319 = vmax.xlane.f32.xlu1 %v2318_v38  ;;  %v2361_v1 = vsub.f32 %v12800_v9, %v2275_v47  ;;  %v12953_v38 = vmul.f32 0.35355338, %v12900_v57  ;;  %v2395_v40 = vmul.f32 1.442695, %v2360_v53 }
 0x4d6   : > { %v2315_v22 = vsel %vm694_vm2, %v12953_v38, -inf }
 0x4d7   : > { %v2266_v24 = vpop.xlane.xlu0 %2265  ;;  %v2278_v25 = vpop.xlane.xlu1 %2277 }
 0x4d8   : > { %v2358_v20 = vsub.f32 %v12807_v23, %v2266_v24  ;;  %2325 = vmax.xlane.f32.xlu1 %v2324_v35  ;;  %v2397_v24 = vmul.f32 1.442695, %v2361_v1 }
 0x4da   : > { %v2391_v55 = vmul.f32 1.442695, %v2358_v20  ;;  %v12959_v35 = vpop.eup %11766  ;;  %v2330_v20 = vsel %vm694_vm2, %v12968_v58, -inf }
 0x4db   : > { %v2281_v23 = vpop.xlane.xlu0 %2280  ;;  %v2459_v57 = vsel %vm694_vm2, %v12959_v35, 0.0 }
 0x4dc   : > { %11770 = vpow2.f32 %v2391_v55  ;;  %v2363_v49 = vsub.f32 %v12824_v59, %v2281_v23  ;;  %v12962_v9 = vpop.eup %11768  ;;  %v2321_v55 = vsel %vm694_vm2, %v12973_v30, -inf }
 0x4dd   : > { %11772 = vpow2.f32 %v2395_v40  ;;  %v2453_v59 = vsel %vm694_vm2, %v12962_v9, 0.0  ;;  %v12989_v40 = vmul.f32 0.35355338, %v12918_v15 }
 0x4de   : > { %2310 = vmax.xlane.f32.xlu0 %v2309_v48  ;;  %11774 = vpow2.f32 %v2397_v24  ;;  %v2401_v31 = vmul.f32 1.442695, %v2363_v49  ;;  %v2362_v48 = vsub.f32 %v12814_v32, %v2278_v25 }
 0x4df   : > { %v2327_v49 = vsel %vm694_vm2, %v12989_v40, -inf }
 0x4e0   : > { %11776 = vpow2.f32 %v2401_v31  ;;  %v2399_v23 = vmul.f32 1.442695, %v2362_v48 }
 0x4e2   : > { %2316 = vmax.xlane.f32.xlu0 %v2315_v22  ;;  %v2284_v22 = vpop.xlane.xlu1 %2283  ;;  %11778 = vpow2.f32 %v2399_v23 }
 0x4e6   : > { %v12966_v14 = vpop.eup %11770  ;;  %2460 = vadd.xlane.f32.xlu0 %v2459_v57 }
 0x4e7   : > { %v2456_v47 = vsel %vm694_vm2, %v12966_v14, 0.0  ;;  %v12979_v53 = vpop.eup %11772 }
 0x4e8   : > { %2457 = vadd.xlane.f32.xlu1 %v2456_v47  ;;  %v12983_v1 = vpop.eup %11774  ;;  %v2462_v11 = vsel %vm694_vm2, %v12979_v53, 0.0  ;;  %v2364_v47 = vsub.f32 %v12836_v7, %v2284_v22 }
 0x4e9   : > { %v2465_v24 = vsel %vm694_vm2, %v12983_v1, 0.0 }
 0x4ea   : > { %2454 = vadd.xlane.f32.xlu0 %v2453_v59  ;;  %v12995_v57 = vpop.eup %11776  ;;  %v2403_v15 = vmul.f32 1.442695, %v2364_v47 }
 0x4eb   : > { %v2471_v32 = vsel %vm694_vm2, %v12995_v57, 0.0 }
 0x4ec   : > { %2331 = vmax.xlane.f32.xlu1 %v2330_v20  ;;  %11780 = vpow2.f32 %v2403_v15  ;;  %v13008_v47 = vpop.eup %11778 }
 0x4ee   : > { %2322 = vmax.xlane.f32.xlu0 %v2321_v55 }
 0x4f0   : > { %2463 = vadd.xlane.f32.xlu1 %v2462_v11 }
 0x4f2   : > { %2466 = vadd.xlane.f32.xlu0 %v2465_v24 }
 0x4f6   : > { %2328 = vmax.xlane.f32.xlu0 %v2327_v49 }
 0x4fa   : > { %2472 = vadd.xlane.f32.xlu0 %v2471_v32 }
 0x4fc   : > { %v1887_v31 = vpop.f32.mrb[48].mxu0 }
 0x4fd   : > { %v13000_v59 = vmul.f32 0.35355338, %v1887_v31  ;;  %v10722_v20 = vpop.f32.mrb[49].mxu0 }
 0x4fe   : > { %v1890_v25 = vpop.f32.mrb[50].mxu0  ;;  %v1935_v55 = vpop.f32.mrb[56].mxu1 }
 0x4ff   : > { %v13002_v11 = vmul.f32 0.35355338, %v1935_v55  ;;  %v10723_v48 = vpop.f32.mrb[51].mxu0  ;;  %v10728_v24 = vpop.f32.mrb[57].mxu1  ;;  %v2333_v23 = vsel %vm694_vm2, %v13000_v59, -inf  ;;  %v2468_v25 = vsel %vm694_vm2, %v13008_v47, 0.0 }
 0x500   : > { %v1938_v7 = vpop.f32.mrb[58].mxu1  ;;  %2334 = vmax.xlane.f32.xlu0 %v2333_v23 }
 0x501   : > { %v10729_v22 = vpop.f32.mrb[59].mxu1  ;;  %v2336_v49 = vsel %vm694_vm2, %v13002_v11, -inf }
 0x502   : > { %2337 = vmax.xlane.f32.xlu1 %v2336_v49 }
 0x504   : > { %v1983_v32 = vpop.f32.mrb[52].mxu0 }
 0x505   : > { %v13010_v31 = vmul.f32 0.35355338, %v1983_v32  ;;  %v10734_v20 = vpop.f32.mrb[53].mxu0 }
 0x506   : > { %v1986_v55 = vpop.f32.mrb[54].mxu0  ;;  %v2031_v48 = vpop.f32.mrb[60].mxu1  ;;  %2469 = vadd.xlane.f32.xlu1 %v2468_v25 }
 0x507   : > { %v13014_v15 = vmul.f32 0.35355338, %v2031_v48  ;;  %v10735_v24 = vpop.f32.mrb[55].mxu0  ;;  %v10740_v23 = vpop.f32.mrb[61].mxu1  ;;  %v2339_v7 = vsel %vm694_vm2, %v13010_v31, -inf }
 0x508   : > { %v2034_v22 = vpop.f32.mrb[62].mxu1  ;;  %2340 = vmax.xlane.f32.xlu0 %v2339_v7  ;;  %v13020_v20 = vpop.eup %11780 }
 0x509   : > { %v10741_v49 = vpop.f32.mrb[63].mxu1  ;;  %v2342_v32 = vsel %vm694_vm2, %v13014_v15, -inf  ;;  %v2474_v55 = vsel %vm694_vm2, %v13020_v20, 0.0 }
 0x50a   : > { %2343 = vmax.xlane.f32.xlu1 %v2342_v32 }
 0x50e   : > { %2475 = vadd.xlane.f32.xlu1 %v2474_v55 }
 0x514   : > { %v2079_v25 = vpop.f32.mrb[56].mxu0 }
 0x515   : > { %v13024_v48 = vmul.f32 0.35355338, %v2079_v25  ;;  %v10746_v24 = vpop.f32.mrb[57].mxu0 }
 0x516   : > { %v2127_v23 = vpop.f32.mrb[64].mxu1  ;;  %v2287_v26 = vpop.xlane.xlu0 %2286 }
 0x517   : > { %v13026_v34 = vmul.f32 0.35355338, %v2127_v23  ;;  %v2365_v7 = vsub.f32 %v12846_v41, %v2287_v26  ;;  %v2082_v22 = vpop.f32.mrb[58].mxu0  ;;  %v10752_v49 = vpop.f32.mrb[65].mxu1  ;;  %v2345_v44 = vsel %vm694_vm2, %v13024_v48, -inf }
 0x518   : > { %v10747_v32 = vpop.f32.mrb[59].mxu0  ;;  %v2130_v36 = vpop.f32.mrb[66].mxu1  ;;  %2346 = vmax.xlane.f32.xlu0 %v2345_v44 }
 0x519   : > { %v2405_v60 = vmul.f32 1.442695, %v2365_v7  ;;  %v2290_v55 = vpop.xlane.xlu1 %2289  ;;  %v10753_v29 = vpop.f32.mrb[67].mxu1  ;;  %v2348_v25 = vsel %vm694_vm2, %v13026_v34, -inf }
 0x51a   : > { %v2366_v24 = vsub.f32 %v12848_v52, %v2290_v55  ;;  %2349 = vmax.xlane.f32.xlu1 %v2348_v25 }
 0x51b   : > { %11782 = vpow2.f32 %v2405_v60 }
 0x51c   : > { %v2407_v23 = vmul.f32 1.442695, %v2366_v24  ;;  %v2175_v41 = vpop.f32.mrb[60].mxu0 }
 0x51d   : > { %v13034_v26 = vmul.f32 0.35355338, %v2175_v41  ;;  %v10758_v22 = vpop.f32.mrb[61].mxu0 }
 0x51e   : > { %11784 = vpow2.f32 %v2407_v23  ;;  %v2223_v49 = vpop.f32.mrb[68].mxu1  ;;  %v2293_v32 = vpop.xlane.xlu0 %2292 }
 0x51f   : > { %v13036_v36 = vmul.f32 0.35355338, %v2223_v49  ;;  %v2367_v44 = vsub.f32 %v12858_v8, %v2293_v32  ;;  %v2178_v29 = vpop.f32.mrb[62].mxu0  ;;  %v10764_v7 = vpop.f32.mrb[69].mxu1  ;;  %v2351_v61 = vsel %vm694_vm2, %v13034_v26, -inf }
 0x520   : > { %v10759_v52 = vpop.f32.mrb[63].mxu0  ;;  %v2226_v55 = vpop.f32.mrb[70].mxu1  ;;  %2352 = vmax.xlane.f32.xlu1 %v2351_v61 }
 0x521   : > { %v2409_v60 = vmul.f32 1.442695, %v2367_v44  ;;  %v2296_v25 = vpop.xlane.xlu1 %2295  ;;  %v10765_v24 = vpop.f32.mrb[71].mxu1  ;;  %v2354_v23 = vsel %vm694_vm2, %v13036_v36, -inf }
 0x522   : > { %v2368_v41 = vsub.f32 %v12860_v33, %v2296_v25  ;;  %2355 = vmax.xlane.f32.xlu0 %v2354_v23 }
 0x523   : > { %11786 = vpow2.f32 %v2409_v60 }
 0x524   : > { %v2411_v22 = vmul.f32 1.442695, %v2368_v41 }
 0x525   : > { %v13044_v8 = vpop.eup %11782 }
 0x526   : > { %11788 = vpow2.f32 %v2411_v22  ;;  %v2477_v49 = vsel %vm694_vm2, %v13044_v8, 0.0 }
 0x527   : > { %2478 = vadd.xlane.f32.xlu0 %v2477_v49 }
 0x528   : > { %v13048_v32 = vpop.eup %11784 }
 0x529   : > { %v2480_v61 = vsel %vm694_vm2, %v13048_v32, 0.0 }
 0x52a   : > { %2481 = vadd.xlane.f32.xlu1 %v2480_v61  ;;  %v13070_v61 = vpop.permute.xlu1 %3894 }
 0x52b   : > { %15222 = vst [vmem:[#allocation23_spill] sm:$0xff] %v13070_v61 }
 0x52d   : > { %v13052_v44 = vpop.eup %11786 }
 0x52e   : > { %v2299_v29 = vpop.xlane.xlu0 %2298  ;;  %v2483_v33 = vsel %vm694_vm2, %v13052_v44, 0.0 }
 0x52f   : > { %v2369_v7 = vsub.f32 %v12878_v10, %v2299_v29  ;;  %2484 = vadd.xlane.f32.xlu1 %v2483_v33 }
 0x530   : > { %v13057_v52 = vpop.eup %11788 }
 0x531   : > { %v2413_v55 = vmul.f32 1.442695, %v2369_v7  ;;  %v2486_v60 = vsel %vm694_vm2, %v13057_v52, 0.0 }
 0x532   : > { %2487 = vadd.xlane.f32.xlu0 %v2486_v60 }
 0x533   : > { %11790 = vpow2.f32 %v2413_v55 }
 0x536   : > { %v2305_v25 = vpop.xlane.xlu0 %2304 }
 0x537   : > { %v2371_v24 = vsub.f32 %v12888_v6, %v2305_v25 }
 0x539   : > { %v2417_v23 = vmul.f32 1.442695, %v2371_v24 }
 0x53b   : > { %11792 = vpow2.f32 %v2417_v23 }
 0x53d   : > { %v13062_v41 = vpop.eup %11790 }
 0x53e   : > { %v2489_v22 = vsel %vm694_vm2, %v13062_v41, 0.0 }
 0x53f   : > { %2490 = vadd.xlane.f32.xlu1 %v2489_v22 }
 0x545   : > { %v13066_v10 = vpop.eup %11792 }
 0x546   : > { %v2495_v49 = vsel %vm694_vm2, %v13066_v10, 0.0 }
 0x547   : > { %2496 = vadd.xlane.f32.xlu1 %v2495_v49 }
 0x555   : > { %v2302_v29 = vpop.xlane.xlu1 %2301 }
 0x556   : > { %v2370_v33 = vsub.f32 %v12916_v13, %v2302_v29  ;;  %v13081_v29 = vpop.permute.xlu0 %3942 }
 0x558   : > { %v2415_v6 = vmul.f32 1.442695, %v2370_v33 }
 0x559   : > { %v2308_v7 = vpop.xlane.xlu1 %2307 }
 0x55a   : > { %11794 = vpow2.f32 %v2415_v6  ;;  %v2372_v55 = vsub.f32 %v12922_v4, %v2308_v7 }
 0x55c   : > { %v2419_v60 = vmul.f32 1.442695, %v2372_v55 }
 0x55d   : > { %v2314_v25 = vpop.xlane.xlu1 %2313 }
 0x55e   : > { %11796 = vpow2.f32 %v2419_v60  ;;  %v2374_v24 = vsub.f32 %v12928_v51, %v2314_v25 }
 0x560   : > { %v2423_v23 = vmul.f32 1.442695, %v2374_v24 }
 0x561   : > { %v2320_v22 = vpop.xlane.xlu1 %2319 }
 0x562   : > { %11798 = vpow2.f32 %v2423_v23  ;;  %v2376_v49 = vsub.f32 %v12934_v28, %v2320_v22 }
 0x564   : > { %v13076_v0 = vpop.eup %11794  ;;  %v2427_v61 = vmul.f32 1.442695, %v2376_v49 }
 0x565   : > { %v2326_v3 = vpop.xlane.xlu1 %2325  ;;  %v2492_v13 = vsel %vm694_vm2, %v13076_v0, 0.0 }
 0x566   : > { %11800 = vpow2.f32 %v2427_v61  ;;  %v2378_v4 = vsub.f32 %v12939_v16, %v2326_v3  ;;  %2493 = vadd.xlane.f32.xlu0 %v2492_v13 }
 0x568   : > { %v13083_v33 = vpop.eup %11796  ;;  %v2431_v51 = vmul.f32 1.442695, %v2378_v4 }
 0x569   : > { %v2498_v6 = vsel %vm694_vm2, %v13083_v33, 0.0 }
 0x56a   : > { %11802 = vpow2.f32 %v2431_v51  ;;  %2499 = vadd.xlane.f32.xlu0 %v2498_v6 }
 0x56b   : > { %v2311_v28 = vpop.xlane.xlu0 %2310 }
 0x56c   : > { %v13087_v7 = vpop.eup %11798  ;;  %v2373_v55 = vsub.f32 %v12948_v42, %v2311_v28 }
 0x56d   : > { %v2504_v61 = vsel %vm694_vm2, %v13087_v7, 0.0 }
 0x56e   : > { %v2421_v3 = vmul.f32 1.442695, %v2373_v55  ;;  %2505 = vadd.xlane.f32.xlu0 %v2504_v61 }
 0x56f   : > { %v2317_v16 = vpop.xlane.xlu0 %2316 }
 0x570   : > { %v13092_v60 = vpop.eup %11800  ;;  %11804 = vpow2.f32 %v2421_v3  ;;  %v2375_v25 = vsub.f32 %v12953_v38, %v2317_v16 }
 0x571   : > { %v2510_v24 = vsel %vm694_vm2, %v13092_v60, 0.0 }
 0x572   : > { %v2425_v23 = vmul.f32 1.442695, %v2375_v25  ;;  %2511 = vadd.xlane.f32.xlu0 %v2510_v24 }
 0x573   : > { %v2461_v22 = vpop.xlane.xlu0 %2460 }
 0x574   : > { %v13097_v49 = vpop.eup %11802  ;;  %11806 = vpow2.f32 %v2425_v23 }
 0x575   : > { %v2458_v42 = vpop.xlane.xlu1 %2457  ;;  %v2516_v13 = vsel %vm694_vm2, %v13097_v49, 0.0 }
 0x576   : > { %11808 = vrcp.f32 %v2458_v42  ;;  %2517 = vadd.xlane.f32.xlu0 %v2516_v13 }
 0x577   : > { %v2455_v4 = vpop.xlane.xlu0 %2454 }
 0x578   : > { %11810 = vrcp.f32 %v2455_v4 }
 0x579   : > { %v2332_v51 = vpop.xlane.xlu1 %2331  ;;  %11812 = vrcp.f32 %v2461_v22 }
 0x57a   : > { %v13101_v6 = vpop.eup %11804  ;;  %v2380_v38 = vsub.f32 %v12968_v58, %v2332_v51 }
 0x57b   : > { %v2323_v28 = vpop.xlane.xlu0 %2322  ;;  %v2501_v55 = vsel %vm694_vm2, %v13101_v6, 0.0 }
 0x57c   : > { %v2435_v61 = vmul.f32 1.442695, %v2380_v38  ;;  %v2377_v3 = vsub.f32 %v12973_v30, %v2323_v28  ;;  %2502 = vadd.xlane.f32.xlu1 %v2501_v55  ;;  %v2796_v28 = vsel %vm2650_vm3, %v12842_v18, 0 }
 0x57d   : > { %v2464_v16 = vpop.xlane.xlu1 %2463 }
 0x57e   : > { %v13107_v25 = vpop.eup %11806  ;;  %11814 = vpow2.f32 %v2435_v61  ;;  %v2429_v24 = vmul.f32 1.442695, %v2377_v3 }
 0x57f   : > { %11816 = vrcp.f32 %v2464_v16  ;;  %v2467_v23 = vpop.xlane.xlu0 %2466  ;;  %v2507_v42 = vsel %vm694_vm2, %v13107_v25, 0.0  ;;  %v15223_v16 = vmov 0.0  }
 0x580   : > { %v11809_v58 = vpop.eup %11808  ;;  %11818 = vpow2.f32 %v2429_v24  ;;  %2508 = vadd.xlane.f32.xlu1 %v2507_v42 }
 0x581   : > { %v2582_v13 = vmul.f32 %v11809_v58, %v12966_v14  ;;  %11820 = vrcp.f32 %v2467_v23  ;;  %v2748_v14 = vsel %vm2650_vm3, %v12840_v17, 0 }
 0x582   : > { %v11811_v22 = vpop.eup %11810 }
 0x583   : > { %v2329_v4 = vpop.xlane.xlu0 %2328  ;;  %v2614_v51 = vpack.c.bf16 %v2582_v13, %v2582_v13  ;;  %v2581_v30 = vmul.f32 %v11811_v22, %v12962_v9  ;;  %v11813_v61 = vpop.eup %11812 }
 0x584   : > { %v2379_v38 = vsub.f32 %v12989_v40, %v2329_v4  ;;  %v2583_v17 = vmul.f32 %v11813_v61, %v12959_v35  ;;  %v2844_v35 = vsel %vm2650_vm3, %v12844_v27, 0 }
 0x585   : > { %10775 = vmatmul.mubr.msk.bf16.vlgmr.msra.gmra.mrb[72].mxu1 %vm694_vm2, %v2614_v51  ;;  %v2613_v55 = vpack.c.bf16 %v2581_v30, %v2581_v30  ;;  %v2892_v30 = vsel %vm2650_vm3, %v12854_v2, 0 }
 0x586   : > { %v2433_v3 = vmul.f32 1.442695, %v2379_v38  ;;  %10785 = vmatpush3.bf16.msra.mxu1 %v2796_v28  ;;  %10786 = vmatprep.mubr.msk.bf16.mxu1 %vm12162_vm1, %v15223_v16  ;;  %v2615_v4 = vpack.c.bf16 %v2583_v17, %v2583_v17 }
 0x587   : > { %10769 = vmatmul.mubr.msk.bf16.vlgmr.msra.gmra.mrb[64].mxu0 %vm694_vm2, %v2613_v55  ;;  %10796 = vmatprep.subr.bf16.mxu1 %v15223_v16  ;;  %v2473_v40 = vpop.xlane.xlu0 %2472 }
 0x588   : > { %v13123_v9 = vpop.eup %11814  ;;  %11822 = vpow2.f32 %v2433_v3  ;;  %10779 = vmatpush3.bf16.msra.mxu0 %v2748_v14  ;;  %10780 = vmatprep.mubr.msk.bf16.mxu0 %vm12162_vm1, %v15223_v16 }
 0x589   : > { %v11817_v18 = vpop.eup %11816  ;;  %v2522_v24 = vsel %vm694_vm2, %v13123_v9, 0.0  ;;  %10790 = vmatprep.subr.bf16.mxu0 %v15223_v16  ;;  %11824 = vrcp.f32 %v2473_v40 }
 0x58a   : > { %v13131_v23 = vpop.eup %11818  ;;  %2523 = vadd.xlane.f32.xlu0 %v2522_v24  ;;  %v2584_v42 = vmul.f32 %v11817_v18, %v12979_v53 }
 0x58b   : > { %v2513_v58 = vsel %vm694_vm2, %v13131_v23, 0.0  ;;  %v11821_v51 = vpop.eup %11820 }
 0x58c   : > { %2514 = vadd.xlane.f32.xlu1 %v2513_v58  ;;  %v2616_v13 = vpack.c.bf16 %v2584_v42, %v2584_v42  ;;  %v2585_v2 = vmul.f32 %v11821_v51, %v12983_v1  ;;  %v2940_v1 = vsel %vm2650_vm3, %v12856_v12, 0 }
 0x58d   : > { %v2335_v22 = vpop.xlane.xlu0 %2334 }
 0x58e   : > { %v2381_v38 = vsub.f32 %v13000_v59, %v2335_v22  ;;  %10787 = vmatmul.mubr.msk.bf16.vlgmr.msra.gmra.mrb[76].mxu1 %vm694_vm2, %v2616_v13  ;;  %v2617_v3 = vpack.c.bf16 %v2585_v2, %v2585_v2  ;;  %v3084_v2 = vsel %vm2650_vm3, %v12898_v50, 0 }
 0x58f   : > { %10797 = vmatpush3.bf16.msra.mxu1 %v2892_v30  ;;  %10781 = vmatmul.mubr.msk.bf16.vlgmr.msra.gmra.mrb[68].mxu0 %vm694_vm2, %v2615_v4  ;;  %v2338_v53 = vpop.xlane.xlu1 %2337  ;;  %v3036_v4 = vsel %vm2650_vm3, %v12866_v19, 0 }
 0x590   : > { %v2437_v28 = vmul.f32 1.442695, %v2381_v38  ;;  %10791 = vmatpush3.bf16.msra.mxu0 %v2844_v35  ;;  %v2382_v55 = vsub.f32 %v13002_v11, %v2338_v53  ;;  %10792 = vmatprep.mubr.msk.bf16.mxu0 %vm12162_vm1, %v15223_v16  ;;  %v2988_v38 = vsel %vm2650_vm3, %v12864_v43, 0 }
 0x591   : > { %10802 = vmatprep.subr.bf16.mxu0 %v15223_v16  ;;  %10798 = vmatprep.mubr.msk.bf16.mxu1 %vm12162_vm1, %v15223_v16 }
 0x592   : > { %v13150_v59 = vpop.eup %11822  ;;  %11826 = vpow2.f32 %v2437_v28  ;;  %v2439_v27 = vmul.f32 1.442695, %v2382_v55  ;;  %10808 = vmatprep.subr.bf16.mxu1 %v15223_v16 }
 0x593   : > { %v2470_v61 = vpop.xlane.xlu1 %2469  ;;  %v2519_v11 = vsel %vm694_vm2, %v13150_v59, 0.0  ;;  %v11825_v14 = vpop.eup %11824 }
 0x594   : > { %11828 = vpow2.f32 %v2439_v27  ;;  %2520 = vadd.xlane.f32.xlu1 %v2519_v11  ;;  %v2587_v24 = vmul.f32 %v11825_v14, %v12995_v57 }
 0x595   : > { %11830 = vrcp.f32 %v2470_v61  ;;  %v2341_v35 = vpop.xlane.xlu0 %2340 }
 0x596   : > { %v2619_v13 = vpack.c.bf16 %v2587_v24, %v2587_v24  ;;  %v2383_v50 = vsub.f32 %v13010_v31, %v2341_v35 }
 0x597   : > { %10793 = vmatmul.mubr.msk.bf16.vlgmr.msra.gmra.mrb[72].mxu0 %vm694_vm2, %v2617_v3  ;;  %v2344_v18 = vpop.xlane.xlu1 %2343 }
 0x598   : > { %10803 = vmatpush3.bf16.msra.mxu0 %v2940_v1  ;;  %v2384_v40 = vsub.f32 %v13014_v15, %v2344_v18  ;;  %10804 = vmatprep.mubr.msk.bf16.mxu0 %vm12162_vm1, %v15223_v16  ;;  %v2441_v24 = vmul.f32 1.442695, %v2383_v50 }
 0x599   : > { %10814 = vmatprep.subr.bf16.mxu0 %v15223_v16 }
 0x59a   : > { %v2443_v17 = vmul.f32 1.442695, %v2384_v40 }
 0x59b   : > { %v2476_v42 = vpop.xlane.xlu1 %2475 }
 0x59c   : > { %v13163_v58 = vpop.eup %11826  ;;  %11832 = vpow2.f32 %v2443_v17 }
 0x59d   : > { %11834 = vrcp.f32 %v2476_v42  ;;  %v2525_v12 = vsel %vm694_vm2, %v13163_v58, 0.0 }
 0x59e   : > { %v13167_v22 = vpop.eup %11828  ;;  %2526 = vadd.xlane.f32.xlu1 %v2525_v12 }
 0x59f   : > { %v11831_v15 = vpop.eup %11830  ;;  %10805 = vmatmul.mubr.msk.bf16.vlgmr.msra.gmra.mrb[76].mxu0 %vm694_vm2, %v2619_v13  ;;  %v2528_v57 = vsel %vm694_vm2, %v13167_v22, 0.0  ;;  %v3132_v13 = vsel %vm2650_vm3, %v12872_v37, 0 }
 0x5a0   : > { %10815 = vmatpush3.bf16.msra.mxu0 %v3036_v4  ;;  %2529 = vadd.xlane.f32.xlu0 %v2528_v57  ;;  %v2586_v51 = vmul.f32 %v11831_v15, %v13008_v47 }
 0x5a1   : > { %10816 = vmatprep.mubr.msk.bf16.mxu0 %vm12162_vm1, %v15223_v16  ;;  %10826 = vmatprep.subr.bf16.mxu0 %v15223_v16 }
 0x5a2   : > { %v2618_v30 = vpack.c.bf16 %v2586_v51, %v2586_v51 }
 0x5a4   : > { %10799 = vmatmul.mubr.msk.bf16.vlgmr.msra.gmra.mrb[80].mxu1 %vm694_vm2, %v2618_v30 }
 0x5a5   : > { %10809 = vmatpush3.bf16.msra.mxu1 %v2988_v38  ;;  %10810 = vmatprep.mubr.msk.bf16.mxu1 %vm12162_vm1, %v15223_v16  ;;  %v2347_v43 = vpop.xlane.xlu0 %2346 }
 0x5a6   : > { %v13183_v19 = vpop.eup %11832  ;;  %10820 = vmatprep.subr.bf16.mxu1 %v15223_v16 }
 0x5a7   : > { %v11835_v47 = vpop.eup %11834  ;;  %v2534_v53 = vsel %vm694_vm2, %v13183_v19, 0.0  ;;  %v2350_v27 = vpop.xlane.xlu1 %2349 }
 0x5a8   : > { %2535 = vadd.xlane.f32.xlu0 %v2534_v53  ;;  %v2588_v28 = vmul.f32 %v11835_v47, %v13020_v20 }
 0x5aa   : > { %v2620_v55 = vpack.c.bf16 %v2588_v28, %v2588_v28 }
 0x5ac   : > { %10811 = vmatmul.mubr.msk.bf16.vlgmr.msra.gmra.mrb[84].mxu1 %vm694_vm2, %v2620_v55 }
 0x5ad   : > { %10821 = vmatpush3.bf16.msra.mxu1 %v3084_v2  ;;  %10822 = vmatprep.mubr.msk.bf16.mxu1 %vm12162_vm1, %v15223_v16  ;;  %v2353_v11 = vpop.xlane.xlu1 %2352 }
 0x5ae   : > { %10832 = vmatprep.subr.bf16.mxu1 %v15223_v16  ;;  %v2387_v31 = vsub.f32 %v13034_v26, %v2353_v11  ;;  %v3324_v11 = vsel %vm2650_vm3, %v12886_v63, 0 }
 0x5af   : > { %v2356_v61 = vpop.xlane.xlu0 %2355  ;;  %3990 = vrot.lane.b32.xlu1 %v12619_v45, %s12166_s14  ;;  %v2385_v45 = vsub.f32 %v13024_v48, %v2347_v43 }
 0x5b0   : > { %v2449_v37 = vmul.f32 1.442695, %v2387_v31  ;;  %v2388_v30 = vsub.f32 %v13036_v36, %v2356_v61  ;;  %v3276_v36 = vsel %vm2650_vm3, %v12904_v39, 0 }
 0x5b4   : > { %v2479_v20 = vpop.xlane.xlu0 %2478 }
 0x5b5   : > { %11836 = vrcp.f32 %v2479_v20 }
 0x5b7   : > { %v2482_v3 = vpop.xlane.xlu1 %2481 }
 0x5b8   : > { %11838 = vrcp.f32 %v2482_v3 }
 0x5bc   : > { %v2485_v14 = vpop.xlane.xlu1 %2484 }
 0x5bd   : > { %11840 = vrcp.f32 %v2485_v14 }
 0x5be   : > { %4038 = vrot.lane.b32.xlu0 %v12624_v21, %s12166_s14  ;;  %v2445_v21 = vmul.f32 1.442695, %v2385_v45 }
 0x5bf   : > { %v11837_v1 = vpop.eup %11836  ;;  %v2488_v18 = vpop.xlane.xlu0 %2487 }
 0x5c0   : > { %11842 = vrcp.f32 %v2488_v18  ;;  %v2589_v40 = vmul.f32 %v11837_v1, %v13044_v8  ;;  %v3180_v8 = vsel %vm2650_vm3, %v12870_v62, 0  ;;  %v3420_v1 = vsel %vm2650_vm3, %v12896_v46, 0 }
 0x5c1   : > { %11844 = vpow2.f32 %v2441_v24 }
 0x5c2   : > { %v11839_v17 = vpop.eup %11838  ;;  %v2621_v42 = vpack.c.bf16 %v2589_v40, %v2589_v40  ;;  %11846 = vpow2.f32 %v2445_v21  ;;  %v15225_v21 = vld [vmem:[#allocation18_spill] sm:$0xff] }
 0x5c3   : > { %v2590_v12 = vmul.f32 %v11839_v17, %v13048_v32  ;;  %v2386_v32 = vsub.f32 %v13026_v34, %v2350_v27  ;;  %v3228_v34 = vsel %vm2650_vm3, %v12876_v5, 0  ;;  %11848 = vpow2.f32 %v2449_v37 }
 0x5c4   : > { %10817 = vmatmul.mubr.msk.bf16.vlgmr.msra.gmra.mrb[80].mxu0 %vm694_vm2, %v2621_v42  ;;  %v15224_v42 = vld [vmem:[#allocation13_spill] sm:$0xff] }
 0x5c5   : > { %10827 = vmatpush3.bf16.msra.mxu0 %v3132_v13  ;;  %v2622_v15 = vpack.c.bf16 %v2590_v12, %v2590_v12  ;;  %10828 = vmatprep.mubr.msk.bf16.mxu0 %vm12162_vm1, %v15223_v16  ;;  %v2447_v51 = vmul.f32 1.442695, %v2386_v32  ;;  %v3372_v12 = vsel %vm2650_vm3, %v15224_v42, 0 }
 0x5c6   : > { %10838 = vmatprep.subr.bf16.mxu0 %v15223_v16 }
 0x5c7   : > { %v11841_v48 = vpop.eup %11840  ;;  %10823 = vmatmul.mubr.msk.bf16.vlgmr.msra.gmra.mrb[88].mxu1 %vm694_vm2, %v2622_v15  ;;  %v3468_v15 = vsel %vm2650_vm3, %v15225_v21, 0 }
 0x5c8   : > { %10833 = vmatpush3.bf16.msra.mxu1 %v3180_v8  ;;  %v2591_v26 = vmul.f32 %v11841_v48, %v13052_v44  ;;  %10834 = vmatprep.mubr.msk.bf16.mxu1 %vm12162_vm1, %v15223_v16 }
 0x5c9   : > { %10844 = vmatprep.subr.bf16.mxu1 %v15223_v16 }
 0x5ca   : > { %v11843_v4 = vpop.eup %11842  ;;  %v2623_v57 = vpack.c.bf16 %v2591_v26, %v2591_v26  ;;  %v15226_v26 = vld [vmem:[#allocation14_spill] sm:$0xff] }
 0x5cb   : > { %v2592_v62 = vmul.f32 %v11843_v4, %v13057_v52  ;;  %v13226_v47 = vpop.eup %11844  ;;  %v2451_v52 = vmul.f32 1.442695, %v2388_v30  ;;  %v3564_v4 = vsel %vm2650_vm3, %v15226_v26, 0 }
 0x5cc   : > { %10829 = vmatmul.mubr.msk.bf16.vlgmr.msra.gmra.mrb[84].mxu0 %vm694_vm2, %v2623_v57  ;;  %v2491_v44 = vpop.xlane.xlu1 %2490  ;;  %v2531_v5 = vsel %vm694_vm2, %v13226_v47, 0.0  ;;  %v13236_v35 = vpop.eup %11846 }
 0x5cd   : > { %10839 = vmatpush3.bf16.msra.mxu0 %v3228_v34  ;;  %11850 = vrcp.f32 %v2491_v44  ;;  %v2624_v38 = vpack.c.bf16 %v2592_v62, %v2592_v62  ;;  %10840 = vmatprep.mubr.msk.bf16.mxu0 %vm12162_vm1, %v15223_v16  ;;  %v13238_v39 = vpop.eup %11848  ;;  %v2537_v28 = vsel %vm694_vm2, %v13236_v35, 0.0  ;;  %v15227_v44 = vld [vmem:[#allocation16_spill] sm:$0xff] }
 0x5ce   : > { %10850 = vmatprep.subr.bf16.mxu0 %v15223_v16  ;;  %11852 = vpow2.f32 %v2447_v51  ;;  %v2543_v27 = vsel %vm694_vm2, %v13238_v39, 0.0 }
 0x5cf   : > { %10835 = vmatmul.mubr.msk.bf16.vlgmr.msra.gmra.mrb[92].mxu1 %vm694_vm2, %v2624_v38  ;;  %11854 = vpow2.f32 %v2451_v52  ;;  %v3516_v38 = vsel %vm2650_vm3, %v15227_v44, 0 }
 0x5d0   : > { %10845 = vmatpush3.bf16.msra.mxu1 %v3276_v36  ;;  %10846 = vmatprep.mubr.msk.bf16.mxu1 %vm12162_vm1, %v15223_v16 }
 0x5d1   : > { %10856 = vmatprep.subr.bf16.mxu1 %v15223_v16 }
 0x5d3   : > { %2532 = vadd.xlane.f32.xlu1 %v2531_v5 }
 0x5d4   : > { %v2497_v53 = vpop.xlane.xlu1 %2496 }
 0x5d5   : > { %11856 = vrcp.f32 %v2497_v53 }
 0x5d7   : > { %v11851_v55 = vpop.eup %11850  ;;  %2538 = vadd.xlane.f32.xlu1 %v2537_v28 }
 0x5d8   : > { %v2593_v43 = vmul.f32 %v11851_v55, %v13062_v41  ;;  %v13243_v2 = vpop.eup %11852  ;;  %v12090_v55 = vld [vmem:[%s15176_s2] ss:$8 sps:$4 sm:$0xff]  }
 0x5d9   : > { %v2540_v20 = vsel %vm694_vm2, %v13243_v2, 0.0  ;;  %v13252_v3 = vpop.eup %11854 }
 0x5da   : > { %v2625_v61 = vpack.c.bf16 %v2593_v43, %v2593_v43  ;;  %v2546_v14 = vsel %vm694_vm2, %v13252_v3, 0.0 }
 0x5db   : > { %2544 = vadd.xlane.f32.xlu1 %v2543_v27  ;;  %v15229_v27 = vld [vmem:[#allocation17_spill] sm:$0xff] }
 0x5dc   : > { %10841 = vmatmul.mubr.msk.bf16.vlgmr.msra.gmra.mrb[88].mxu0 %vm694_vm2, %v2625_v61  ;;  %v3612_v61 = vsel %vm2650_vm3, %v15229_v27, 0 }
 0x5dd   : > { %10851 = vmatpush3.bf16.msra.mxu0 %v3324_v11  ;;  %2541 = vadd.xlane.f32.xlu0 %v2540_v20  ;;  %v12091_v20 = vld [vmem:[%s15176_s2 + $0x10] ss:$8 sps:$4 sm:$0xff]  }
 0x5de   : > { %10852 = vmatprep.mubr.msk.bf16.mxu0 %vm12162_vm1, %v15223_v16  ;;  %10862 = vmatprep.subr.bf16.mxu0 %v15223_v16 }
 0x5df   : > { %v11857_v41 = vpop.eup %11856 }
 0x5e0   : > { %v2595_v63 = vmul.f32 %v11857_v41, %v13066_v10  ;;  %v15230_v41 = vld [vmem:[#allocation15_spill] sm:$0xff] }
 0x5e1   : > { %2547 = vadd.xlane.f32.xlu0 %v2546_v14  ;;  %v3756_v14 = vsel %vm2650_vm3, %v15230_v41, 0 }
 0x5e2   : > { %v2627_v50 = vpack.c.bf16 %v2595_v63, %v2595_v63 }
 0x5e4   : > { %10853 = vmatmul.mubr.msk.bf16.vlgmr.msra.gmra.mrb[92].mxu0 %vm694_vm2, %v2627_v50 }
 0x5e5   : > { %10863 = vmatpush3.bf16.msra.mxu0 %v3420_v1  ;;  %10864 = vmatprep.mubr.msk.bf16.mxu0 %vm12162_vm1, %v15223_v16 }
 0x5e6   : > { %10874 = vmatprep.subr.bf16.mxu0 %v15223_v16 }
 0x5ec   : > { %4086 = vrot.lane.b32.xlu1 %v12637_v54, %s12166_s14 }
 0x5f0   : > { %4308 = vrot.lane.b32.xlu1 %v12090_v55, %s12167_s17 }
 0x5f3   : > { %v2494_v18 = vpop.xlane.xlu0 %2493 }
 0x5f4   : > { %11858 = vrcp.f32 %v2494_v18  ;;  %4310 = vrot.lane.b32.xlu1 %v12091_v20, %s12167_s17 }
 0x5f7   : > { %v2500_v40 = vpop.xlane.xlu0 %2499  ;;  %4134 = vrot.lane.b32.xlu0 %v12644_v56, %s12166_s14 }
 0x5f8   : > { %11860 = vrcp.f32 %v2500_v40  ;;  %v15231_v40 = vld [vmem:[#allocation19_spill] sm:$0xff] }
 0x5fb   : > { %v2506_v10 = vpop.xlane.xlu0 %2505 }
 0x5fc   : > { %11862 = vrcp.f32 %v2506_v10  ;;  %v3708_v10 = vsel %vm2650_vm3, %v15231_v40, 0 }
 0x5fe   : > { %v11859_v46 = vpop.eup %11858 }
 0x5ff   : > { %v2594_v24 = vmul.f32 %v11859_v46, %v13076_v0  ;;  %v2512_v54 = vpop.xlane.xlu0 %2511 }
 0x600   : > { %11864 = vrcp.f32 %v2512_v54  ;;  %v15233_v54 = vld [vmem:[#allocation21_spill] sm:$0xff] }
 0x601   : > { %v2626_v45 = vpack.c.bf16 %v2594_v24, %v2594_v24  ;;  %v15232_v24 = vld [vmem:[#allocation22_spill] sm:$0xff] }
 0x602   : > { %v11861_v17 = vpop.eup %11860 }
 0x603   : > { %10847 = vmatmul.mubr.msk.bf16.vlgmr.msra.gmra.mrb[96].mxu1 %vm694_vm2, %v2626_v45  ;;  %v2596_v56 = vmul.f32 %v11861_v17, %v13083_v33  ;;  %v2518_v48 = vpop.xlane.xlu0 %2517  ;;  %v3852_v45 = vsel %vm2650_vm3, %v15232_v24, 0 }
 0x604   : > { %10857 = vmatpush3.bf16.msra.mxu1 %v3372_v12  ;;  %10858 = vmatprep.mubr.msk.bf16.mxu1 %vm12162_vm1, %v15223_v16 }
 0x605   : > { %10868 = vmatprep.subr.bf16.mxu1 %v15223_v16  ;;  %v2628_v0 = vpack.c.bf16 %v2596_v56, %v2596_v56  ;;  %v3804_v56 = vsel %vm2650_vm3, %v15233_v54, 0 }
 0x606   : > { %v11863_v31 = vpop.eup %11862 }
 0x607   : > { %v2598_v33 = vmul.f32 %v11863_v31, %v13087_v7 }
 0x609   : > { %v2503_v13 = vpop.xlane.xlu1 %2502  ;;  %v2630_v32 = vpack.c.bf16 %v2598_v33, %v2598_v33 }
 0x60a   : > { %11866 = vrcp.f32 %v2503_v13  ;;  %v11865_v37 = vpop.eup %11864 }
 0x60b   : > { %10859 = vmatmul.mubr.msk.bf16.vlgmr.msra.gmra.mrb[100].mxu1 %vm694_vm2, %v2628_v0  ;;  %v2600_v7 = vmul.f32 %v11865_v37, %v13092_v60 }
 0x60c   : > { %10869 = vmatpush3.bf16.msra.mxu1 %v3468_v15  ;;  %10870 = vmatprep.mubr.msk.bf16.mxu1 %vm12162_vm1, %v15223_v16 }
 0x60d   : > { %v2509_v8 = vpop.xlane.xlu1 %2508  ;;  %10880 = vmatprep.subr.bf16.mxu1 %v15223_v16  ;;  %v2632_v52 = vpack.c.bf16 %v2600_v7, %v2600_v7 }
 0x60e   : > { %11868 = vrcp.f32 %v2509_v8 }
 0x60f   : > { %11870 = vrcp.f32 %v2518_v48  ;;  %v15234_v48 = vld [vmem:[#allocation23_spill] sm:$0xff] }
 0x610   : > { %v3900_v8 = vsel %vm2650_vm3, %v15234_v48, 0 }
 0x613   : > { %10871 = vmatmul.mubr.msk.bf16.vlgmr.msra.gmra.mrb[104].mxu1 %vm694_vm2, %v2630_v32  ;;  %v3948_v32 = vsel %vm2650_vm3, %v13081_v29, 0 }
 0x614   : > { %v11867_v57 = vpop.eup %11866  ;;  %10881 = vmatpush3.bf16.msra.mxu1 %v3564_v4  ;;  %10882 = vmatprep.mubr.msk.bf16.mxu1 %vm12162_vm1, %v15223_v16 }
 0x615   : > { %v2597_v51 = vmul.f32 %v11867_v57, %v13101_v6  ;;  %10892 = vmatprep.subr.bf16.mxu1 %v15223_v16  ;;  %v15228_v6 = vld [vmem:[#allocation20_spill] sm:$0xff] }
 0x616   : > { %v3660_v60 = vsel %vm2650_vm3, %v15228_v6, 0 }
 0x617   : > { %v2524_v30 = vpop.xlane.xlu0 %2523  ;;  %v2629_v62 = vpack.c.bf16 %v2597_v51, %v2597_v51 }
 0x618   : > { %v11869_v34 = vpop.eup %11868  ;;  %11872 = vrcp.f32 %v2524_v30 }
 0x619   : > { %10865 = vmatmul.mubr.msk.bf16.vlgmr.msra.gmra.mrb[96].mxu0 %vm694_vm2, %v2629_v62  ;;  %v2515_v36 = vpop.xlane.xlu1 %2514  ;;  %v11871_v5 = vpop.eup %11870  ;;  %v2599_v53 = vmul.f32 %v11869_v34, %v13107_v25 }
 0x61a   : > { %10875 = vmatpush3.bf16.msra.mxu0 %v3516_v38  ;;  %11874 = vrcp.f32 %v2515_v36  ;;  %10876 = vmatprep.mubr.msk.bf16.mxu0 %vm12162_vm1, %v15223_v16  ;;  %v2602_v28 = vmul.f32 %v11871_v5, %v13097_v49 }
 0x61b   : > { %10883 = vmatmul.mubr.msk.bf16.vlgmr.msra.gmra.mrb[108].mxu1 %vm694_vm2, %v2632_v52  ;;  %10886 = vmatprep.subr.bf16.mxu0 %v15223_v16  ;;  %v2631_v43 = vpack.c.bf16 %v2599_v53, %v2599_v53 }
 0x61c   : > { %10893 = vmatpush3.bf16.msra.mxu1 %v3660_v60  ;;  %10894 = vmatprep.mubr.msk.bf16.mxu1 %vm12162_vm1, %v15223_v16  ;;  %v2634_v11 = vpack.c.bf16 %v2602_v28, %v2602_v28 }
 0x61d   : > { %10904 = vmatprep.subr.bf16.mxu1 %v15223_v16 }
 0x621   : > { %10877 = vmatmul.mubr.msk.bf16.vlgmr.msra.gmra.mrb[100].mxu0 %vm694_vm2, %v2631_v43  ;;  %v2521_v25 = vpop.xlane.xlu1 %2520 }
 0x622   : > { %v11873_v49 = vpop.eup %11872  ;;  %10887 = vmatpush3.bf16.msra.mxu0 %v3612_v61  ;;  %11876 = vrcp.f32 %v2521_v25  ;;  %10888 = vmatprep.mubr.msk.bf16.mxu0 %vm12162_vm1, %v15223_v16 }
 0x623   : > { %10895 = vmatmul.mubr.msk.bf16.vlgmr.msra.gmra.mrb[112].mxu1 %vm694_vm2, %v2634_v11  ;;  %10898 = vmatprep.subr.bf16.mxu0 %v15223_v16  ;;  %v2604_v1 = vmul.f32 %v11873_v49, %v13123_v9 }
 0x624   : > { %v11875_v63 = vpop.eup %11874  ;;  %10905 = vmatpush3.bf16.msra.mxu1 %v3756_v14  ;;  %10906 = vmatprep.mubr.msk.bf16.mxu1 %vm12162_vm1, %v15223_v16 }
 0x625   : > { %v2601_v50 = vmul.f32 %v11875_v63, %v13131_v23  ;;  %10916 = vmatprep.subr.bf16.mxu1 %v15223_v16  ;;  %v2636_v46 = vpack.c.bf16 %v2604_v1, %v2604_v1 }
 0x627   : > { %v2633_v18 = vpack.c.bf16 %v2601_v50, %v2601_v50 }
 0x629   : > { %10889 = vmatmul.mubr.msk.bf16.vlgmr.msra.gmra.mrb[104].mxu0 %vm694_vm2, %v2633_v18 }
 0x62a   : > { %10899 = vmatpush3.bf16.msra.mxu0 %v3708_v10  ;;  %10900 = vmatprep.mubr.msk.bf16.mxu0 %vm12162_vm1, %v15223_v16 }
 0x62b   : > { %10907 = vmatmul.mubr.msk.bf16.vlgmr.msra.gmra.mrb[116].mxu1 %vm694_vm2, %v2636_v46  ;;  %v2527_v23 = vpop.xlane.xlu1 %2526  ;;  %10910 = vmatprep.subr.bf16.mxu0 %v15223_v16 }
 0x62c   : > { %v11877_v9 = vpop.eup %11876  ;;  %10917 = vmatpush3.bf16.msra.mxu1 %v3852_v45  ;;  %11878 = vrcp.f32 %v2527_v23  ;;  %10918 = vmatprep.mubr.msk.bf16.mxu1 %vm12162_vm1, %v15223_v16 }
 0x62d   : > { %v2530_v17 = vpop.xlane.xlu0 %2529  ;;  %v2603_v42 = vmul.f32 %v11877_v9, %v13150_v59  ;;  %10928 = vmatprep.subr.bf16.mxu1 %v15223_v16 }
 0x62e   : > { %11880 = vrcp.f32 %v2530_v17 }
 0x62f   : > { %v2635_v12 = vpack.c.bf16 %v2603_v42, %v2603_v42  ;;  %v3991_v62 = vpop.permute.xlu1 %3990 }
 0x630   : > { %v3996_v18 = vsel %vm2650_vm3, %v3991_v62, 0 }
 0x631   : > { %10901 = vmatmul.mubr.msk.bf16.vlgmr.msra.gmra.mrb[108].mxu0 %vm694_vm2, %v2635_v12 }
 0x632   : > { %10911 = vmatpush3.bf16.msra.mxu0 %v3804_v56  ;;  %10912 = vmatprep.mubr.msk.bf16.mxu0 %vm12162_vm1, %v15223_v16 }
 0x633   : > { %10922 = vmatprep.subr.bf16.mxu0 %v15223_v16 }
 0x635   : > { %v2536_v13 = vpop.xlane.xlu0 %2535 }
 0x636   : > { %v11879_v0 = vpop.eup %11878  ;;  %11882 = vrcp.f32 %v2536_v13 }
 0x637   : > { %v2605_v59 = vmul.f32 %v11879_v0, %v13163_v58 }
 0x638   : > { %v11881_v31 = vpop.eup %11880 }
 0x639   : > { %v2637_v21 = vpack.c.bf16 %v2605_v59, %v2605_v59  ;;  %v2606_v15 = vmul.f32 %v11881_v31, %v13167_v22  ;;  %v4039_v37 = vpop.permute.xlu0 %4038 }
 0x63a   : > { %v4044_v4 = vsel %vm2650_vm3, %v4039_v37, 0 }
 0x63b   : > { %10913 = vmatmul.mubr.msk.bf16.vlgmr.msra.gmra.mrb[112].mxu0 %vm694_vm2, %v2637_v21  ;;  %v2638_v33 = vpack.c.bf16 %v2606_v15, %v2606_v15 }
 0x63c   : > { %10923 = vmatpush3.bf16.msra.mxu0 %v3900_v8  ;;  %10924 = vmatprep.mubr.msk.bf16.mxu0 %vm12162_vm1, %v15223_v16 }
 0x63d   : > { %10919 = vmatmul.mubr.msk.bf16.vlgmr.msra.gmra.mrb[120].mxu1 %vm694_vm2, %v2638_v33  ;;  %10934 = vmatprep.subr.bf16.mxu0 %v15223_v16 }
 0x63e   : > { %10929 = vmatpush3.bf16.msra.mxu1 %v3948_v32  ;;  %10930 = vmatprep.mubr.msk.bf16.mxu1 %vm12162_vm1, %v15223_v16 }
 0x63f   : > { %10940 = vmatprep.subr.bf16.mxu1 %v15223_v16 }
 0x640   : > { %v11883_v58 = vpop.eup %11882 }
 0x641   : > { %v2608_v22 = vmul.f32 %v11883_v58, %v13183_v19 }
 0x643   : > { %v2640_v26 = vpack.c.bf16 %v2608_v22, %v2608_v22 }
 0x645   : > { %10931 = vmatmul.mubr.msk.bf16.vlgmr.msra.gmra.mrb[124].mxu1 %vm694_vm2, %v2640_v26 }
 0x646   : > { %10941 = vmatpush3.bf16.msra.mxu1 %v4044_v4  ;;  %10942 = vmatprep.mubr.msk.bf16.mxu1 %vm12162_vm1, %v15223_v16 }
 0x647   : > { %10952 = vmatprep.subr.bf16.mxu1 %v15223_v16 }
 0x658   : > { %v13368_v29 = vpop.f32.mrb[72].mxu1 }
 0x659   : > { %v10776_v57 = vpop.f32.mrb[73].mxu1 }
 0x65a   : > { %v13370_v51 = vpop.f32.mrb[64].mxu0  ;;  %v2739_v7 = vpop.f32.mrb[74].mxu1 }
 0x65b   : > { %v10770_v30 = vpop.f32.mrb[65].mxu0  ;;  %v10777_v19 = vpop.f32.mrb[75].mxu1 }
 0x65c   : > { %v2691_v34 = vpop.f32.mrb[66].mxu0 }
 0x65d   : > { %v10771_v44 = vpop.f32.mrb[67].mxu0 }
 0x660   : > { %v2533_v38 = vpop.xlane.xlu1 %2532 }
 0x661   : > { %v13372_v36 = vpop.f32.mrb[76].mxu1  ;;  %11884 = vrcp.f32 %v2533_v38 }
 0x662   : > { %v10788_v52 = vpop.f32.mrb[77].mxu1  ;;  %v13374_v5 = vpop.f32.mrb[68].mxu0 }
 0x663   : > { %v2835_v6 = vpop.f32.mrb[78].mxu1  ;;  %v10782_v60 = vpop.f32.mrb[69].mxu0 }
 0x664   : > { %v10789_v53 = vpop.f32.mrb[79].mxu1  ;;  %v2787_v28 = vpop.f32.mrb[70].mxu0 }
 0x665   : > { %v2539_v55 = vpop.xlane.xlu1 %2538  ;;  %v10783_v43 = vpop.f32.mrb[71].mxu0 }
 0x666   : > { %11886 = vrcp.f32 %v2539_v55 }
 0x669   : > { %v2545_v27 = vpop.xlane.xlu1 %2544 }
 0x66a   : > { %v13376_v61 = vpop.f32.mrb[72].mxu0  ;;  %v2542_v25 = vpop.xlane.xlu0 %2541 }
 0x66b   : > { %v11885_v11 = vpop.eup %11884  ;;  %11888 = vrcp.f32 %v2542_v25  ;;  %v10794_v20 = vpop.f32.mrb[73].mxu0 }
 0x66c   : > { %v2883_v49 = vpop.f32.mrb[74].mxu0  ;;  %v2607_v41 = vmul.f32 %v11885_v11, %v13226_v47  ;;  %11890 = vrcp.f32 %v2545_v27 }
 0x66d   : > { %v10795_v14 = vpop.f32.mrb[75].mxu0  ;;  %v4087_v45 = vpop.permute.xlu1 %4086 }
 0x66e   : > { %v2548_v63 = vpop.xlane.xlu0 %2547  ;;  %v2639_v50 = vpack.c.bf16 %v2607_v41, %v2607_v41  ;;  %v4092_v56 = vsel %vm2650_vm3, %v4087_v45, 0 }
 0x66f   : > { %11892 = vrcp.f32 %v2548_v63 }
 0x670   : > { %v11887_v1 = vpop.eup %11886  ;;  %10925 = vmatmul.mubr.msk.bf16.vlgmr.msra.gmra.mrb[116].mxu0 %vm694_vm2, %v2639_v50 }
 0x671   : > { %10935 = vmatpush3.bf16.msra.mxu0 %v3996_v18  ;;  %10936 = vmatprep.mubr.msk.bf16.mxu0 %vm12162_vm1, %v15223_v16  ;;  %v2609_v47 = vmul.f32 %v11887_v1, %v13236_v35  ;;  %v4309_v37 = vpop.permute.xlu1 %4308 }
 0x672   : > { %v13383_v40 = vpop.f32.mrb[76].mxu0  ;;  %10946 = vmatprep.subr.bf16.mxu0 %v15223_v16  ;;  %v4135_v12 = vpop.permute.xlu0 %4134 }
 0x673   : > { %v10806_v10 = vpop.f32.mrb[77].mxu0  ;;  %v2641_v9 = vpack.c.bf16 %v2609_v47, %v2609_v47  ;;  %v4140_v31 = vsel %vm2650_vm3, %v4135_v12, 0 }
 0x674   : > { %v2979_v46 = vpop.f32.mrb[78].mxu0 }
 0x675   : > { %v11889_v24 = vpop.eup %11888  ;;  %v10807_v23 = vpop.f32.mrb[79].mxu0 }
 0x676   : > { %v2610_v17 = vmul.f32 %v11889_v24, %v13243_v2  ;;  %v11891_v42 = vpop.eup %11890 }
 0x677   : > { %v13388_v54 = vpop.f32.mrb[80].mxu1  ;;  %v2611_v2 = vmul.f32 %v11891_v42, %v13238_v39  ;;  %v4311_v39 = vpop.permute.xlu1 %4310 }
 0x678   : > { %v10800_v13 = vpop.f32.mrb[81].mxu1  ;;  %10937 = vmatmul.mubr.msk.bf16.vlgmr.msra.gmra.mrb[120].mxu0 %vm694_vm2, %v2641_v9  ;;  %v2642_v0 = vpack.c.bf16 %v2610_v17, %v2610_v17 }
 0x679   : > { %v11893_v59 = vpop.eup %11892  ;;  %v2931_v35 = vpop.f32.mrb[82].mxu1  ;;  %10947 = vmatpush3.bf16.msra.mxu0 %v4092_v56  ;;  %10948 = vmatprep.mubr.msk.bf16.mxu0 %vm12162_vm1, %v15223_v16  ;;  %v2643_v48 = vpack.c.bf16 %v2611_v2, %v2611_v2 }
 0x67a   : > { %v10801_v21 = vpop.f32.mrb[83].mxu1  ;;  %10943 = vmatmul.mubr.msk.bf16.vlgmr.msra.gmra.mrb[128].mxu1 %vm694_vm2, %v2642_v0  ;;  %v2612_v15 = vmul.f32 %v11893_v59, %v13252_v3  ;;  %10958 = vmatprep.subr.bf16.mxu0 %v4309_v37 }
 0x67b   : > { %10953 = vmatpush3.bf16.msra.mxu1 %v4140_v31  ;;  %10954 = vmatprep.mubr.msk.bf16.mxu1 %vm12162_vm1, %v15223_v16 }
 0x67c   : > { %v2644_v32 = vpack.c.bf16 %v2612_v15, %v2612_v15 }
 0x67f   : > { %v13400_v8 = vpop.f32.mrb[84].mxu1 }
 0x680   : > { %v10812_v33 = vpop.f32.mrb[85].mxu1  ;;  %10949 = vmatmul.mubr.msk.bf16.vlgmr.msra.gmra.mrb[124].mxu0 %vm694_vm2, %v2643_v48 }
 0x681   : > { %v3027_v58 = vpop.f32.mrb[86].mxu1  ;;  %10959 = vmatpush3.bf16.msra.mxu0 %v4309_v37 }
 0x682   : > { %v10813_v22 = vpop.f32.mrb[87].mxu1  ;;  %10955 = vmatmul.mubr.msk.bf16.vlgmr.msra.gmra.mrb[132].mxu1 %vm694_vm2, %v2644_v32  ;;  %10960 = vmatprep.subr.bf16.mxu0 %v4311_v39 }
 0x685   : > { %10961 = vmatpush3.bf16.msra.mxu0 %v4311_v39 }
 0x697   : > { %v3072_v26 = vpop.f32.mrb[80].mxu0 }
 0x698   : > { %v10818_v4 = vpop.f32.mrb[81].mxu0 }
 0x699   : > { %v3075_v3 = vpop.f32.mrb[82].mxu0 }
 0x69a   : > { %v3120_v57 = vpop.f32.mrb[88].mxu1  ;;  %v10819_v7 = vpop.f32.mrb[83].mxu0 }
 0x69b   : > { %v11600_v30 = vpack.i.bf16 %v3120_v57, %v3072_v26  ;;  %v10824_v19 = vpop.f32.mrb[89].mxu1 }
 0x69c   : > { %v3123_v62 = vpop.f32.mrb[90].mxu1 }
 0x69d   : > { %11601 = vrot.lane.b32.xlu0 %v11600_v30, %s12168_s26  ;;  %v10825_v34 = vpop.f32.mrb[91].mxu1 }
 0x69f   : > { %v3168_v44 = vpop.f32.mrb[84].mxu0 }
 0x6a0   : > { %v10830_v38 = vpop.f32.mrb[85].mxu0 }
 0x6a1   : > { %v3171_v52 = vpop.f32.mrb[86].mxu0 }
 0x6a2   : > { %v3216_v6 = vpop.f32.mrb[92].mxu1  ;;  %v10831_v60 = vpop.f32.mrb[87].mxu0 }
 0x6a3   : > { %v11605_v53 = vpack.i.bf16 %v3216_v6, %v3168_v44  ;;  %v10836_v28 = vpop.f32.mrb[93].mxu1 }
 0x6a4   : > { %v3219_v55 = vpop.f32.mrb[94].mxu1 }
 0x6a5   : > { %v10837_v43 = vpop.f32.mrb[95].mxu1  ;;  %11606 = vrot.lane.b32.xlu1 %v11605_v53, %s12168_s26 }
 0x6af   : > { %v3264_v27 = vpop.f32.mrb[88].mxu0 }
 0x6b0   : > { %v10842_v25 = vpop.f32.mrb[89].mxu0 }
 0x6b1   : > { %v3267_v11 = vpop.f32.mrb[90].mxu0 }
 0x6b2   : > { %v10843_v20 = vpop.f32.mrb[91].mxu0 }
 0x6b7   : > { %v3360_v49 = vpop.f32.mrb[92].mxu0 }
 0x6b8   : > { %v10854_v41 = vpop.f32.mrb[93].mxu0 }
 0x6b9   : > { %v3363_v14 = vpop.f32.mrb[94].mxu0 }
 0x6ba   : > { %v10855_v63 = vpop.f32.mrb[95].mxu0 }
 0x6d6   : > { %v3312_v50 = vpop.f32.mrb[96].mxu1 }
 0x6d7   : > { %v11610_v1 = vpack.i.bf16 %v3312_v50, %v3264_v27  ;;  %v10848_v18 = vpop.f32.mrb[97].mxu1 }
 0x6d8   : > { %v3315_v47 = vpop.f32.mrb[98].mxu1 }
 0x6d9   : > { %v10849_v10 = vpop.f32.mrb[99].mxu1  ;;  %11611 = vrot.lane.b32.xlu1 %v11610_v1, %s12168_s26 }
 0x6de   : > { %v3408_v46 = vpop.f32.mrb[100].mxu1 }
 0x6df   : > { %v11615_v24 = vpack.i.bf16 %v3408_v46, %v3360_v49  ;;  %v10860_v45 = vpop.f32.mrb[101].mxu1 }
 0x6e0   : > { %v3411_v23 = vpop.f32.mrb[102].mxu1 }
 0x6e1   : > { %v10861_v9 = vpop.f32.mrb[103].mxu1  ;;  %11616 = vrot.lane.b32.xlu0 %v11615_v24, %s12168_s26 }
 0x6e6   : > { %v3504_v17 = vpop.f32.mrb[104].mxu1 }
 0x6e7   : > { %v10872_v42 = vpop.f32.mrb[105].mxu1 }
 0x6e8   : > { %v3507_v12 = vpop.f32.mrb[106].mxu1 }
 0x6e9   : > { %v10873_v56 = vpop.f32.mrb[107].mxu1 }
 0x6ec   : > { %v3456_v13 = vpop.f32.mrb[96].mxu0 }
 0x6ed   : > { %v11620_v0 = vpack.i.bf16 %v3504_v17, %v3456_v13  ;;  %v10866_v59 = vpop.f32.mrb[97].mxu0 }
 0x6ee   : > { %v3459_v35 = vpop.f32.mrb[98].mxu0  ;;  %v3600_v31 = vpop.f32.mrb[108].mxu1 }
 0x6ef   : > { %v10884_v21 = vpop.f32.mrb[109].mxu1  ;;  %11621 = vrot.lane.b32.xlu0 %v11620_v0, %s12169_s30  ;;  %v10867_v2 = vpop.f32.mrb[99].mxu0 }
 0x6f0   : > { %v3603_v15 = vpop.f32.mrb[110].mxu1 }
 0x6f1   : > { %v10885_v48 = vpop.f32.mrb[111].mxu1 }
 0x6f4   : > { %v3552_v33 = vpop.f32.mrb[100].mxu0 }
 0x6f5   : > { %v11625_v32 = vpack.i.bf16 %v3600_v31, %v3552_v33  ;;  %v10878_v58 = vpop.f32.mrb[101].mxu0 }
 0x6f6   : > { %v3555_v22 = vpop.f32.mrb[102].mxu0  ;;  %v3696_v37 = vpop.f32.mrb[112].mxu1 }
 0x6f7   : > { %v10896_v39 = vpop.f32.mrb[113].mxu1  ;;  %11626 = vrot.lane.b32.xlu1 %v11625_v32, %s12169_s30  ;;  %v10879_v26 = vpop.f32.mrb[103].mxu0 }
 0x6f8   : > { %v3699_v4 = vpop.f32.mrb[114].mxu1 }
 0x6f9   : > { %v10897_v3 = vpop.f32.mrb[115].mxu1 }
 0x6fc   : > { %v3648_v57 = vpop.f32.mrb[104].mxu0 }
 0x6fd   : > { %v11630_v7 = vpack.i.bf16 %v3696_v37, %v3648_v57  ;;  %v10890_v30 = vpop.f32.mrb[105].mxu0 }
 0x6fe   : > { %v3651_v19 = vpop.f32.mrb[106].mxu0  ;;  %v3792_v62 = vpop.f32.mrb[116].mxu1 }
 0x6ff   : > { %v10908_v34 = vpop.f32.mrb[117].mxu1  ;;  %11631 = vrot.lane.b32.xlu1 %v11630_v7, %s12169_s30  ;;  %v10891_v44 = vpop.f32.mrb[107].mxu0 }
 0x700   : > { %v3795_v38 = vpop.f32.mrb[118].mxu1 }
 0x701   : > { %v10909_v52 = vpop.f32.mrb[119].mxu1 }
 0x704   : > { %v3744_v6 = vpop.f32.mrb[108].mxu0 }
 0x705   : > { %v11645_v60 = vpack.i.bf16 %v3792_v62, %v3744_v6  ;;  %v10902_v53 = vpop.f32.mrb[109].mxu0 }
 0x706   : > { %v3747_v28 = vpop.f32.mrb[110].mxu0 }
 0x707   : > { %v10903_v55 = vpop.f32.mrb[111].mxu0 }
 0x70e   : > { %v3840_v43 = vpop.f32.mrb[112].mxu0 }
 0x70f   : > { %v10914_v27 = vpop.f32.mrb[113].mxu0  ;;  %v11602_v37 = vpop.permute.xlu0 %11601 }
 0x710   : > { %v3843_v25 = vpop.f32.mrb[114].mxu0  ;;  %v3888_v11 = vpop.f32.mrb[120].mxu1  ;;  %v11604_v4 = vunpack.i.h.bf16 %v11602_v37  ;;  %v11603_v3 = vunpack.i.l.bf16 %v11602_v37 }
 0x711   : > { %v11635_v20 = vpack.i.bf16 %v3888_v11, %v3840_v43  ;;  %v10915_v49 = vpop.f32.mrb[115].mxu0  ;;  %v10920_v41 = vpop.f32.mrb[121].mxu1 }
 0x712   : > { %v3891_v14 = vpop.f32.mrb[122].mxu1  ;;  %v4279_v19 = vsel %vm694_vm2, %v13368_v29, %v11604_v4  ;;  %v4278_v62 = vsel %vm694_vm2, %v13370_v51, %v11603_v3 }
 0x713   : > { %v10921_v63 = vpop.f32.mrb[123].mxu1  ;;  %11636 = vrot.lane.b32.xlu0 %v11635_v20, %s15191_s6 }
 0x717   : > { %v11607_v28 = vpop.permute.xlu1 %11606 }
 0x718   : > { %v3984_v50 = vpop.f32.mrb[124].mxu1  ;;  %v11609_v29 = vunpack.i.h.bf16 %v11607_v28  ;;  %v11608_v27 = vunpack.i.l.bf16 %v11607_v28 }
 0x719   : > { %v10932_v1 = vpop.f32.mrb[125].mxu1 }
 0x71a   : > { %v3987_v18 = vpop.f32.mrb[126].mxu1  ;;  %v4281_v20 = vsel %vm694_vm2, %v13372_v36, %v11609_v29  ;;  %v4280_v49 = vsel %vm694_vm2, %v13374_v5, %v11608_v27 }
 0x71b   : > { %v10933_v47 = vpop.f32.mrb[127].mxu1 }
 0x743   : > { %v3936_v10 = vpop.f32.mrb[116].mxu0 }
 0x744   : > { %v11640_v46 = vpack.i.bf16 %v3984_v50, %v3936_v10  ;;  %v10926_v24 = vpop.f32.mrb[117].mxu0 }
 0x745   : > { %v3939_v45 = vpop.f32.mrb[118].mxu0 }
 0x746   : > { %11641 = vrot.lane.b32.xlu0 %v11640_v46, %s15191_s6  ;;  %v10927_v23 = vpop.f32.mrb[119].mxu0 }
 0x74a   : > { %11646 = vrot.lane.b32.xlu0 %v11645_v60, %s12169_s30 }
 0x74b   : > { %v4032_v9 = vpop.f32.mrb[120].mxu0  ;;  %v11612_v55 = vpop.permute.xlu1 %11611 }
 0x74c   : > { %v10938_v17 = vpop.f32.mrb[121].mxu0  ;;  %v11614_v46 = vunpack.i.h.bf16 %v11612_v55  ;;  %v11613_v24 = vunpack.i.l.bf16 %v11612_v55 }
 0x74d   : > { %v4035_v42 = vpop.f32.mrb[122].mxu0  ;;  %v4080_v12 = vpop.f32.mrb[128].mxu1 }
 0x74e   : > { %v11650_v56 = vpack.i.bf16 %v4080_v12, %v4032_v9  ;;  %v10939_v13 = vpop.f32.mrb[123].mxu0  ;;  %v10944_v0 = vpop.f32.mrb[129].mxu1  ;;  %v4283_v5 = vsel %vm694_vm2, %v13388_v54, %v11614_v46  ;;  %v4282_v9 = vsel %vm694_vm2, %v13376_v61, %v11613_v24 }
 0x74f   : > { %v4083_v59 = vpop.f32.mrb[130].mxu1 }
 0x750   : > { %v10945_v35 = vpop.f32.mrb[131].mxu1  ;;  %11651 = vrot.lane.b32.xlu1 %v11650_v56, %s15191_s6 }
 0x753   : > { %v4128_v31 = vpop.f32.mrb[124].mxu0  ;;  %v11617_v39 = vpop.permute.xlu0 %11616 }
 0x754   : > { %v10950_v21 = vpop.f32.mrb[125].mxu0 }
 0x755   : > { %v4131_v2 = vpop.f32.mrb[126].mxu0  ;;  %v4176_v15 = vpop.f32.mrb[132].mxu1  ;;  %v11618_v21 = vunpack.i.l.bf16 %v11617_v39 }
 0x756   : > { %v11655_v48 = vpack.i.bf16 %v4176_v15, %v4128_v31  ;;  %v10951_v33 = vpop.f32.mrb[127].mxu0  ;;  %v10956_v32 = vpop.f32.mrb[133].mxu1  ;;  %v11619_v31 = vunpack.i.h.bf16 %v11617_v39 }
 0x757   : > { %v4179_v58 = vpop.f32.mrb[134].mxu1 }
 0x758   : > { %v10957_v22 = vpop.f32.mrb[135].mxu1  ;;  %11656 = vrot.lane.b32.xlu0 %v11655_v48, %s15191_s6  ;;  %v4285_v61 = vsel %vm694_vm2, %v13400_v8, %v11619_v31  ;;  %v4284_v48 = vsel %vm694_vm2, %v13383_v40, %v11618_v21  ;;  %v10036_v8 = vld [vmem:[%s15175_s1 + $0xb] ss:$0 sm:$0xff]  ;;  %v15235_v40 = vld [vmem:[#allocation5_spill] sm:$0xff] }
 0x761   : > { %v11622_v26 = vpop.permute.xlu0 %11621 }
 0x762   : > { %v11624_v57 = vunpack.i.h.bf16 %v11622_v26  ;;  %v11623_v7 = vunpack.i.l.bf16 %v11622_v26 }
 0x764   : > { %v4288_v38 = vsel %vm4286_vm4, %v4279_v19, %v11624_v57  ;;  %v4287_v52 = vsel %vm4286_vm4, %v4278_v62, %v11623_v7 }
 0x769   : > { %v11627_v43 = vpop.permute.xlu1 %11626 }
 0x76a   : > { %v11629_v25 = vunpack.i.h.bf16 %v11627_v43  ;;  %v11628_v51 = vunpack.i.l.bf16 %v11627_v43 }
 0x76c   : > { %v4289_v63 = vsel %vm4286_vm4, %v4280_v49, %v11628_v51  ;;  %v4290_v50 = vsel %vm4286_vm4, %v4281_v20, %v11629_v25  ;;  %v15240_v49 = vld [vmem:[#allocation9_spill] sm:$0xff] }
 0x771   : > { %v11632_v10 = vpop.permute.xlu1 %11631 }
 0x772   : > { %v11634_v36 = vunpack.i.h.bf16 %v11632_v10  ;;  %v11633_v45 = vunpack.i.l.bf16 %v11632_v10 }
 0x774   : > { %v4291_v12 = vsel %vm4286_vm4, %v4282_v9, %v11633_v45  ;;  %v4292_v56 = vsel %vm4286_vm4, %v4283_v5, %v11634_v36 }
 0x785   : > { %v11637_v30 = vpop.permute.xlu0 %11636 }
 0x786   : > { %v11639_v34 = vunpack.i.h.bf16 %v11637_v30  ;;  %v11638_v44 = vunpack.i.l.bf16 %v11637_v30  ;;  %v15236_v30 = vld [vmem:[#allocation8_spill] sm:$0xff] }
 0x788   : > { %v4297_v6 = vsel %vm4295_vm5, %v4288_v38, %v11639_v34  ;;  %v4296_v60 = vsel %vm4295_vm5, %v4287_v52, %v11638_v44  ;;  %v15237_v34 = vld [vmem:[#allocation7_spill] sm:$0xff]  ;;  %v15238_v52 = vld [vmem:[#allocation6_spill] sm:$0xff] }
 0x789   : > { %v4304_v53 = vpack.c.bf16 %v4297_v6, %v4296_v60 }
 0x78b   : > { %10962 = vmatprep.mubr.msk.bf16.mxu0 %vm395_vm0, %v4304_v53 }
 0x7b8   : > { %v11642_v11 = vpop.permute.xlu0 %11641 }
 0x7b9   : > { %v11644_v41 = vunpack.i.h.bf16 %v11642_v11  ;;  %v11643_v14 = vunpack.i.l.bf16 %v11642_v11  ;;  %v15239_v11 = vld [vmem:[#allocation10_spill] sm:$0xff] }
 0x7bb   : > { %v4298_v1 = vsel %vm4295_vm5, %v4289_v63, %v11643_v14  ;;  %v4299_v18 = vsel %vm4295_vm5, %v4290_v50, %v11644_v41 }
 0x7bc   : > { %v4305_v47 = vpack.c.bf16 %v4299_v18, %v4298_v1  ;;  %v11647_v13 = vpop.permute.xlu0 %11646  ;;  %v15241_v1 = vld [vmem:[#allocation12_spill] sm:$0xff] }
 0x7bd   : > { %v11649_v2 = vunpack.i.h.bf16 %v11647_v13  ;;  %v11648_v15 = vunpack.i.l.bf16 %v11647_v13 }
 0x7be   : > { %10963 = vmatmul.mubr.msk.bf16.vlgmr.msra.gmra.mrb[128].mxu0 %vm395_vm0, %v4305_v47  ;;  %v15242_v47 = vld [vmem:[#allocation11_spill] sm:$0xff] }
 0x7bf   : > { %v4294_v58 = vsel %vm4286_vm4, %v4285_v61, %v11649_v2  ;;  %v4293_v22 = vsel %vm4286_vm4, %v4284_v48, %v11648_v15 }
 0x7c2   : > { %v11652_v23 = vpop.permute.xlu1 %11651 }
 0x7c3   : > { %v11654_v17 = vunpack.i.h.bf16 %v11652_v23  ;;  %v11653_v42 = vunpack.i.l.bf16 %v11652_v23 }
 0x7c5   : > { %v4300_v0 = vsel %vm4295_vm5, %v4291_v12, %v11653_v42  ;;  %v4301_v59 = vsel %vm4295_vm5, %v4292_v56, %v11654_v17 }
 0x7c6   : > { %v4306_v35 = vpack.c.bf16 %v4301_v59, %v4300_v0 }
 0x7c8   : > { %10966 = vmatprep.mubr.msk.bf16.mxu0 %vm395_vm0, %v4306_v35 }
 0x7ca   : > { %v11657_v54 = vpop.permute.xlu0 %11656 }
 0x7cb   : > { %v11659_v33 = vunpack.i.h.bf16 %v11657_v54  ;;  %v11658_v32 = vunpack.i.l.bf16 %v11657_v54 }
 0x7cd   : > { %v4303_v37 = vsel %vm4295_vm5, %v4294_v58, %v11659_v33  ;;  %v4302_v39 = vsel %vm4295_vm5, %v4293_v22, %v11658_v32 }
 0x7ce   : > { %v4307_v26 = vpack.c.bf16 %v4303_v37, %v4302_v39 }
 0x7d0   : > { %10967 = vmatmul.mubr.msk.bf16.gmra.mrb[132].mxu0 %vm395_vm0, %v4307_v26 }
 0x891   : > { %v10964_v4 = vpop.f32.mrb[128].mxu0 }
 0x892   : > { %v4360_v3 = vpop.f32.mrb[129].mxu0  ;;  %v4393_v44 = vadd.f32 %v10964_v4, %v15237_v34 }
 0x893   : > { %v4391_v57 = vadd.f32 %v4360_v3, %v15235_v40  ;;  %v10965_v7 = vpop.f32.mrb[130].mxu0 }
 0x894   : > { %v4394_v19 = vadd.f32 %v10965_v7, %v15236_v30  ;;  %v4363_v62 = vpop.f32.mrb[131].mxu0  ;;  %v13467_v55 = vadd.f32 %v10036_v8, %v4393_v44 }
 0x895   : > { %v13458_v38 = vadd.f32 %v10036_v8, %v4391_v57  ;;  %v4392_v6 = vadd.f32 %v4363_v62, %v15238_v52 }
 0x896   : > { %v13461_v60 = vadd.f32 %v10036_v8, %v4394_v19  ;;  %v4419_v27 = vsel %vm395_vm0, %v13467_v55, 0.0 }
 0x897   : > { %v13463_v53 = vadd.f32 %v10036_v8, %v4392_v6  ;;  %v4413_v28 = vsel %vm395_vm0, %v13458_v38, 0.0 }
 0x898   : > { %4414 = vadd.xlane.f32.xlu1 %v4413_v28  ;;  %v4422_v29 = vsel %vm395_vm0, %v13461_v60, 0.0 }
 0x899   : > { %v4416_v43 = vsel %vm395_vm0, %v13463_v53, 0.0 }
 0x89a   : > { %4417 = vadd.xlane.f32.xlu0 %v4416_v43 }
 0x89c   : > { %4423 = vadd.xlane.f32.xlu1 %v4422_v29 }
 0x89e   : > { %4420 = vadd.xlane.f32.xlu0 %v4419_v27 }
 0x8a3   : > { %v10968_v25 = vpop.f32.mrb[132].mxu0 }
 0x8a4   : > { %v4376_v51 = vpop.f32.mrb[133].mxu0  ;;  %v4397_v20 = vadd.f32 %v10968_v25, %v15239_v11  ;;  %v11727_v11 = vld [vmem:[%s15176_s2 + $0x14] ss:$8 sps:$4 sm:$0xff]  }
 0x8a5   : > { %v4395_v41 = vadd.f32 %v4376_v51, %v15240_v49  ;;  %v10969_v14 = vpop.f32.mrb[134].mxu0  ;;  %v11726_v51 = vld [vmem:[%s15176_s2 + $0x4] ss:$8 sps:$4 sm:$0xff]  }
 0x8a6   : > { %v4379_v63 = vpop.f32.mrb[135].mxu0  ;;  %v4398_v18 = vadd.f32 %v10969_v14, %v15241_v1  ;;  %v13481_v46 = vadd.f32 %v10036_v8, %v4397_v20  ;;  %10970 = vmatprep.subr.bf16.mxu1 %v11726_v51  ;;  %v11728_v20 = vld [vmem:[%s15177_s3] sm:$0xff]   ;;  %v11729_v49 = vld [vmem:[%s15177_s3 + $0x8] sm:$0xff]   ;;  %v11731_v14 = vld [vmem:[%s15177_s3 + $0x18] sm:$0xff]  }
 0x8a7   : > { %v13477_v50 = vadd.f32 %v10036_v8, %v4395_v41  ;;  %v4396_v10 = vadd.f32 %v4379_v63, %v15242_v47  ;;  %10971 = vmatpush3.bf16.msra.mxu1 %v11726_v51  ;;  %10982 = vmatprep.subr.bf16.mxu0 %v11728_v20  ;;  %v11730_v41 = vld [vmem:[%s15177_s3 + $0x10] sm:$0xff]   ;;  %v11732_v63 = vld [vmem:[%s15177_s3 + $0x20] sm:$0xff]   ;;  %v11733_v1 = vld [vmem:[%s15177_s3 + $0x28] sm:$0xff]  }
 0x8a8   : > { %v13487_v45 = vadd.f32 %v10036_v8, %v4398_v18  ;;  %v4431_v5 = vsel %vm395_vm0, %v13481_v46, 0.0  ;;  %10972 = vmatprep.subr.bf16.mxu1 %v11727_v11  ;;  %10983 = vmatpush3.bf16.msra.mxu0 %v11728_v20 }
 0x8a9   : > { %v13483_v24 = vadd.f32 %v10036_v8, %v4396_v10  ;;  %v4425_v36 = vsel %vm395_vm0, %v13477_v50, 0.0  ;;  %10984 = vmatprep.subr.bf16.mxu0 %v11729_v49 }
 0x8aa   : > { %4426 = vadd.xlane.f32.xlu0 %v4425_v36  ;;  %v4434_v9 = vsel %vm395_vm0, %v13487_v45, 0.0 }
 0x8ab   : > { %v4428_v23 = vsel %vm395_vm0, %v13483_v24, 0.0  ;;  %10973 = vmatpush3.bf16.msra.mxu1 %v11727_v11 }
 0x8ac   : > { %4429 = vadd.xlane.f32.xlu1 %v4428_v23  ;;  %10985 = vmatpush3.bf16.msra.mxu0 %v11729_v49 }
 0x8ad   : > { %10986 = vmatprep.subr.bf16.mxu0 %v11730_v41 }
 0x8ae   : > { %4432 = vadd.xlane.f32.xlu0 %v4431_v5 }
 0x8b0   : > { %4435 = vadd.xlane.f32.xlu1 %v4434_v9  ;;  %10987 = vmatpush3.bf16.msra.mxu0 %v11730_v41 }
 0x8b1   : > { %10988 = vmatprep.subr.bf16.mxu0 %v11731_v14 }
 0x8b4   : > { %10989 = vmatpush3.bf16.msra.mxu0 %v11731_v14 }
 0x8b5   : > { %10990 = vmatprep.subr.bf16.mxu0 %v11732_v63 }
 0x8b8   : > { %10991 = vmatpush3.bf16.msra.mxu0 %v11732_v63 }
 0x8b9   : > { %10992 = vmatprep.subr.bf16.mxu0 %v11733_v1 }
 0x8bc   : > { %10993 = vmatpush3.bf16.msra.mxu0 %v11733_v1 }
 0x925   : > { %v4415_v17 = vpop.xlane.xlu1 %4414 }
 0x926   : > { %v4437_v42 = vmul.f32 0.03125, %v4415_v17 }
 0x927   : > { %v4418_v12 = vpop.xlane.xlu0 %4417 }
 0x928   : > { %v13496_v56 = vsub.f32 %v13458_v38, %v4437_v42  ;;  %v4438_v13 = vmul.f32 0.03125, %v4418_v12 }
 0x929   : > { %v4424_v0 = vpop.xlane.xlu1 %4423 }
 0x92a   : > { %v13499_v59 = vsub.f32 %v13463_v53, %v4438_v13  ;;  %v4440_v35 = vmul.f32 0.03125, %v4424_v0  ;;  %v4453_v31 = vmul.f32 %v13496_v56, %v13496_v56 }
 0x92b   : > { %v4421_v21 = vpop.xlane.xlu0 %4420 }
 0x92c   : > { %v13504_v2 = vsub.f32 %v13461_v60, %v4440_v35  ;;  %v4439_v15 = vmul.f32 0.03125, %v4421_v21  ;;  %v4461_v54 = vsel %vm395_vm0, %v4453_v31, 0.0  ;;  %v4454_v61 = vmul.f32 %v13499_v59, %v13499_v59  ;;  %v10037_v31 = vld [vmem:[%s15175_s1 + $0xc] ss:$0 sm:$0xff] }
 0x92d   : > { %4462 = vadd.xlane.f32.xlu0 %v4461_v54 }
 0x92e   : > { %v13510_v48 = vsub.f32 %v13467_v55, %v4439_v15  ;;  %v4464_v33 = vsel %vm395_vm0, %v4454_v61, 0.0  ;;  %v4456_v32 = vmul.f32 %v13504_v2, %v13504_v2 }
 0x92f   : > { %4465 = vadd.xlane.f32.xlu1 %v4464_v33 }
 0x930   : > { %v4455_v58 = vmul.f32 %v13510_v48, %v13510_v48  ;;  %v4470_v37 = vsel %vm395_vm0, %v4456_v32, 0.0 }
 0x932   : > { %v4467_v22 = vsel %vm395_vm0, %v4455_v58, 0.0  ;;  %v10038_v58 = vld [vmem:[%s15175_s1 + $0xd] ss:$0 sm:$0xff] }
 0x933   : > { %4468 = vadd.xlane.f32.xlu0 %v4467_v22  ;;  %4471 = vadd.xlane.f32.xlu1 %v4470_v37 }
 0x937   : > { %v4427_v39 = vpop.xlane.xlu0 %4426 }
 0x938   : > { %v4441_v26 = vmul.f32 0.03125, %v4427_v39 }
 0x939   : > { %v4430_v4 = vpop.xlane.xlu1 %4429 }
 0x93a   : > { %v13520_v8 = vsub.f32 %v13477_v50, %v4441_v26  ;;  %v4442_v3 = vmul.f32 0.03125, %v4430_v4 }
 0x93b   : > { %v4433_v40 = vpop.xlane.xlu0 %4432 }
 0x93c   : > { %v13523_v57 = vsub.f32 %v13483_v24, %v4442_v3  ;;  %v4443_v7 = vmul.f32 0.03125, %v4433_v40  ;;  %v4457_v30 = vmul.f32 %v13520_v8, %v13520_v8 }
 0x93d   : > { %v4436_v19 = vpop.xlane.xlu1 %4435 }
 0x93e   : > { %v13528_v62 = vsub.f32 %v13481_v46, %v4443_v7  ;;  %v4444_v34 = vmul.f32 0.03125, %v4436_v19  ;;  %v4473_v44 = vsel %vm395_vm0, %v4457_v30, 0.0  ;;  %v4458_v52 = vmul.f32 %v13523_v57, %v13523_v57 }
 0x93f   : > { %4474 = vadd.xlane.f32.xlu0 %v4473_v44 }
 0x940   : > { %v13534_v6 = vsub.f32 %v13487_v45, %v4444_v34  ;;  %v4476_v28 = vsel %vm395_vm0, %v4458_v52, 0.0  ;;  %v4459_v43 = vmul.f32 %v13528_v62, %v13528_v62 }
 0x941   : > { %4477 = vadd.xlane.f32.xlu1 %v4476_v28 }
 0x942   : > { %v4479_v29 = vsel %vm395_vm0, %v4459_v43, 0.0  ;;  %v4460_v27 = vmul.f32 %v13534_v6, %v13534_v6 }
 0x943   : > { %4480 = vadd.xlane.f32.xlu0 %v4479_v29 }
 0x944   : > { %v4482_v25 = vsel %vm395_vm0, %v4460_v27, 0.0 }
 0x945   : > { %4483 = vadd.xlane.f32.xlu1 %v4482_v25 }
 0x9ba   : > { %v4463_v18 = vpop.xlane.xlu0 %4462 }
 0x9bb   : > { %v4485_v47 = vmul.f32 0.03125, %v4463_v18 }
 0x9bc   : > { %v4466_v10 = vpop.xlane.xlu1 %4465 }
 0x9bd   : > { %v4493_v36 = vadd.f32 1e-05, %v4485_v47  ;;  %v4486_v23 = vmul.f32 0.03125, %v4466_v10 }
 0x9bf   : > { %11894 = vrsqrt.f32 %v4493_v36  ;;  %v4494_v5 = vadd.f32 1e-05, %v4486_v23 }
 0x9c0   : > { %v4469_v9 = vpop.xlane.xlu0 %4468  ;;  %v4472_v17 = vpop.xlane.xlu1 %4471 }
 0x9c1   : > { %11896 = vrsqrt.f32 %v4494_v5  ;;  %v4487_v42 = vmul.f32 0.03125, %v4469_v9  ;;  %v4488_v12 = vmul.f32 0.03125, %v4472_v17 }
 0x9c3   : > { %v4495_v13 = vadd.f32 1e-05, %v4487_v42  ;;  %v4496_v0 = vadd.f32 1e-05, %v4488_v12 }
 0x9c5   : > { %11898 = vrsqrt.f32 %v4495_v13 }
 0x9c6   : > { %11900 = vrsqrt.f32 %v4496_v0 }
 0x9c9   : > { %v11895_v35 = vpop.eup %11894 }
 0x9ca   : > { %v4509_v21 = vmul.f32 %v11895_v35, %v13496_v56 }
 0x9cb   : > { %v11897_v15 = vpop.eup %11896 }
 0x9cc   : > { %v4475_v54 = vpop.xlane.xlu0 %4474  ;;  %v4510_v61 = vmul.f32 %v11897_v15, %v13499_v59  ;;  %v4523_v33 = vmul.f32 %v10037_v31, %v4509_v21 }
 0x9cd   : > { %v4489_v32 = vmul.f32 0.03125, %v4475_v54 }
 0x9ce   : > { %v4478_v22 = vpop.xlane.xlu1 %4477  ;;  %v4524_v37 = vmul.f32 %v10037_v31, %v4510_v61  ;;  %v4537_v56 = vadd.f32 %v10038_v58, %v4523_v33 }
 0x9cf   : > { %v11899_v39 = vpop.eup %11898  ;;  %v4497_v26 = vadd.f32 1e-05, %v4489_v32  ;;  %v4490_v4 = vmul.f32 0.03125, %v4478_v22 }
 0x9d0   : > { %v11901_v3 = vpop.eup %11900  ;;  %v4511_v40 = vmul.f32 %v11899_v39, %v13510_v48  ;;  %v4481_v7 = vpop.xlane.xlu0 %4480  ;;  %v4538_v30 = vadd.f32 %v10038_v58, %v4524_v37 }
 0x9d1   : > { %v4512_v19 = vmul.f32 %v11901_v3, %v13504_v2  ;;  %11902 = vrsqrt.f32 %v4497_v26  ;;  %v4498_v59 = vadd.f32 1e-05, %v4490_v4  ;;  %v4491_v34 = vmul.f32 0.03125, %v4481_v7 }
 0x9d2   : > { %v4525_v44 = vmul.f32 %v10037_v31, %v4511_v40  ;;  %v4484_v52 = vpop.xlane.xlu1 %4483  ;;  %v4545_v28 = vpack.c.bf16 %v4538_v30, %v4537_v56 }
 0x9d3   : > { %v4526_v43 = vmul.f32 %v10037_v31, %v4512_v19  ;;  %11904 = vrsqrt.f32 %v4498_v59  ;;  %v4499_v29 = vadd.f32 1e-05, %v4491_v34  ;;  %v4492_v27 = vmul.f32 0.03125, %v4484_v52 }
 0x9d4   : > { %10974 = vmatprep.mubr.msk.bf16.mxu1 %vm395_vm0, %v4545_v28  ;;  %v4539_v25 = vadd.f32 %v10038_v58, %v4525_v44 }
 0x9d5   : > { %11906 = vrsqrt.f32 %v4499_v29  ;;  %v4500_v48 = vadd.f32 1e-05, %v4492_v27  ;;  %v4540_v51 = vadd.f32 %v10038_v58, %v4526_v43  ;;  %v4787_v29 = vlaneseq }
 0x9d7   : > { %11908 = vrsqrt.f32 %v4500_v48  ;;  %v4546_v11 = vpack.c.bf16 %v4540_v51, %v4539_v25  ;;  %v4788_v27 = vshrl.u32 %v4787_v29, 7  ;;  %v13597_v48 = vand.u32 127, %v4787_v29 }
 0x9d9   : > { %10975 = vmatmul.mubr.msk.bf16.vlgmr.msra.gmra.mrb[136].mxu1 %vm395_vm0, %v4546_v11  ;;  %v4791_v25 = vmul.u32 8, %v4788_v27 }
 0x9db   : > { %v11903_v2 = vpop.eup %11902  ;;  %v4792_v51 = vadd.s32 1, %v4791_v25  ;;  %vm4799_vm7 = vcmp.eq.s32.totalorder %v13597_v48, %v4791_v25 }
 0x9dc   : > { %v4513_v20 = vmul.f32 %v11903_v2, %v13520_v8  ;;  %v10055_v11 = vsel %vm4799_vm7, 1.0, %v15223_v16  ;;  %v4793_v2 = vadd.s32 2, %v4791_v25  ;;  %vm9599_vm7 = vcmask 1046534  }
 0x9dd   : > { %v11905_v49 = vpop.eup %11904  ;;  %vm4800_vm8 = vcmp.eq.s32.totalorder %v13597_v48, %v4792_v51 }
 0x9de   : > { %v4514_v41 = vmul.f32 %v11905_v49, %v13523_v57  ;;  %v4527_v14 = vmul.f32 %v10037_v31, %v4513_v20  ;;  %v11734_v57 = vld [vmem:[%s15177_s3 + $0x30] sm:$0xff]   ;;  %v4794_v20 = vadd.s32 3, %v4791_v25  ;;  %vm4801_vm9 = vcmp.eq.s32.totalorder %v13597_v48, %v4793_v2 }
 0x9df   : > { %v11907_v63 = vpop.eup %11906  ;;  %10994 = vmatprep.subr.bf16.mxu0 %v11734_v57  ;;  %v4795_v49 = vadd.s32 4, %v4791_v25 }
 0x9e0   : > { %v4528_v1 = vmul.f32 %v10037_v31, %v4514_v41  ;;  %v4515_v18 = vmul.f32 %v11907_v63, %v13528_v62  ;;  %v4541_v10 = vadd.f32 %v10038_v58, %v4527_v14  ;;  %10995 = vmatpush3.bf16.msra.mxu0 %v11734_v57  ;;  %v11735_v62 = vld [vmem:[%s15177_s3 + $0x38] sm:$0xff]   ;;  %vm4802_vm10 = vcmp.eq.s32.totalorder %v13597_v48, %v4794_v20 }
 0x9e1   : > { %v11909_v47 = vpop.eup %11908  ;;  %10996 = vmatprep.subr.bf16.mxu0 %v11735_v62  ;;  %v4796_v41 = vadd.s32 5, %v4791_v25  ;;  %vm4803_vm11 = vcmp.eq.s32.totalorder %v13597_v48, %v4795_v49  ;;  %v4797_v14 = vadd.s32 6, %v4791_v25  ;;  %v4798_v63 = vadd.s32 7, %v4791_v25 }
 0x9e2   : > { %v4542_v36 = vadd.f32 %v10038_v58, %v4528_v1  ;;  %v4516_v23 = vmul.f32 %v11909_v47, %v13534_v6  ;;  %v4529_v5 = vmul.f32 %v10037_v31, %v4515_v18  ;;  %v10039_v6 = vld [vmem:[%s15175_s1 + $0xe] ss:$0 sm:$0xff] }
 0x9e3   : > { %vm4804_vm12 = vcmp.eq.s32.totalorder %v13597_v48, %v4796_v41  ;;  %vm4805_vm13 = vcmp.eq.s32.totalorder %v13597_v48, %v4797_v14  ;;  %vm4806_vm14 = vcmp.eq.s32.totalorder %v13597_v48, %v4798_v63 }
 0x9e4   : > { %v4547_v9 = vpack.c.bf16 %v4542_v36, %v4541_v10  ;;  %v4530_v17 = vmul.f32 %v10037_v31, %v4516_v23  ;;  %v4543_v42 = vadd.f32 %v10038_v58, %v4529_v5  ;;  %10997 = vmatpush3.bf16.msra.mxu0 %v11735_v62  ;;  %v10054_v10 = vld [vmem:[%s15175_s1 + $0xf] ss:$0 sm:$0xff] }
 0x9e5   : > { %11046 = vmatprep.subr.bf16.mxu0 %v15223_v16 }
 0x9e6   : > { %10978 = vmatprep.mubr.msk.bf16.mxu1 %vm395_vm0, %v4547_v9  ;;  %v4544_v8 = vadd.f32 %v10038_v58, %v4530_v17 }
 0x9e8   : > { %v4548_v12 = vpack.c.bf16 %v4544_v8, %v4543_v42 }
 0x9ea   : > { %10979 = vmatmul.mubr.msk.bf16.gmra.mrb[140].mxu1 %vm395_vm0, %v4548_v12 }
 0x9eb   : > { %11022 = vmatprep.mubr.msk.f32.mxu1 %vm4823_vm6, %v10055_v11 }
 0xaac   : > { %v10976_v13 = vpop.f32.mrb[136].mxu1 }
 0xaad   : > { %v4618_v0 = vadd.f32 %v10976_v13, %v10039_v6  ;;  %v4609_v35 = vpop.f32.mrb[137].mxu1 }
 0xaae   : > { %v4610_v31 = vadd.f32 %v10039_v6, %v4609_v35  ;;  %v10977_v21 = vpop.f32.mrb[138].mxu1 }
 0xaaf   : > { %v4621_v15 = vadd.f32 %v10977_v21, %v10039_v6  ;;  %v4612_v54 = vpop.f32.mrb[139].mxu1  ;;  %v4642_v33 = vmax.f32 %v4618_v0, 0.0 }
 0xab0   : > { %v4613_v61 = vadd.f32 %v10039_v6, %v4612_v54  ;;  %v4640_v58 = vmax.f32 %v4610_v31, 0.0 }
 0xab1   : > { %v4643_v32 = vmax.f32 %v4621_v15, 0.0 }
 0xab2   : > { %v4641_v22 = vmax.f32 %v4613_v61, 0.0 }
 0xab3   : > { %v4649_v37 = vpack.c.bf16 %v4643_v32, %v4642_v33 }
 0xab4   : > { %v4648_v39 = vpack.c.bf16 %v4641_v22, %v4640_v58  ;;  %v10060_v58 = vsel %vm4804_vm12, 1.0, %v15223_v16  ;;  %v10061_v22 = vsel %vm4805_vm13, 1.0, %v15223_v16 }
 0xab6   : > { %10998 = vmatprep.mubr.bf16.mxu0 %v4648_v39 }
 0xab7   : > { %10999 = vmatmul.mubr.bf16.vlgmr.msra.gmra.mrb[136].mxu0 %v4649_v37  ;;  %v10062_v37 = vsel %vm4806_vm14, 1.0, %v15223_v16 }
 0xabd   : > { %v10980_v26 = vpop.f32.mrb[140].mxu1 }
 0xabe   : > { %v4634_v4 = vadd.f32 %v10980_v26, %v10039_v6  ;;  %v4625_v3 = vpop.f32.mrb[141].mxu1 }
 0xabf   : > { %v4626_v40 = vadd.f32 %v10039_v6, %v4625_v3  ;;  %v10981_v7 = vpop.f32.mrb[142].mxu1 }
 0xac0   : > { %v4637_v56 = vadd.f32 %v10981_v7, %v10039_v6  ;;  %v4628_v30 = vpop.f32.mrb[143].mxu1  ;;  %v4646_v59 = vmax.f32 %v4634_v4, 0.0 }
 0xac1   : > { %v4629_v19 = vadd.f32 %v10039_v6, %v4628_v30  ;;  %v4644_v44 = vmax.f32 %v4626_v40, 0.0 }
 0xac2   : > { %v4647_v34 = vmax.f32 %v4637_v56, 0.0 }
 0xac3   : > { %v4645_v52 = vmax.f32 %v4629_v19, 0.0 }
 0xac4   : > { %v4651_v28 = vpack.c.bf16 %v4647_v34, %v4646_v59 }
 0xac5   : > { %v4650_v43 = vpack.c.bf16 %v4645_v52, %v4644_v44 }
 0xac7   : > { %11002 = vmatprep.mubr.bf16.mxu0 %v4650_v43 }
 0xac8   : > { %11003 = vmatmul.mubr.bf16.gmra.mrb[140].mxu0 %v4651_v28 }
 0xac9   : > { %11048 = vmatprep.mubr.msk.bf16.mxu0 %vm12162_vm1, %v15223_v16 }
 0xb8a   : > { %v11000_v1 = vpop.f32.mrb[136].mxu0 }
 0xb8b   : > { %v4767_v18 = vadd.f32 %v11000_v1, %v13467_v55  ;;  %v4734_v47 = vpop.f32.mrb[137].mxu0 }
 0xb8c   : > { %v4765_v36 = vadd.f32 %v4734_v47, %v13458_v38  ;;  %v11001_v23 = vpop.f32.mrb[138].mxu0 }
 0xb8d   : > { %v4768_v5 = vadd.f32 %v11001_v23, %v13461_v60  ;;  %v4737_v9 = vpop.f32.mrb[139].mxu0  ;;  %v4781_v42 = vadd.f32 %v10054_v10, %v4767_v18 }
 0xb8e   : > { %v4766_v17 = vadd.f32 %v4737_v9, %v13463_v53  ;;  %v4779_v12 = vadd.f32 %v10054_v10, %v4765_v36 }
 0xb8f   : > { %v4782_v8 = vadd.f32 %v10054_v10, %v4768_v5 }
 0xb90   : > { %v4780_v57 = vadd.f32 %v10054_v10, %v4766_v17 }
 0xb91   : > { %v11509_v62 = vpack.c.bf16 %v4782_v8, %v4781_v42 }
 0xb92   : > { %v11505_v6 = vpack.c.bf16 %v4780_v57, %v4779_v12 }
 0xb94   : > { %11506 = vmatprep.subr.bf16.mxu1 %v11505_v6 }
 0xb95   : > { %11508 = vmatpush3.bf16.msra.mxu1 %v11505_v6 }
 0xb96   : > { %11510 = vmatprep.subr.bf16.mxu1 %v11509_v62 }
 0xb99   : > { %11512 = vmatpush3.bf16.msra.mxu1 %v11509_v62 }
 0xb9b   : > { %v11004_v55 = vpop.f32.mrb[140].mxu0 }
 0xb9c   : > { %v4771_v13 = vadd.f32 %v11004_v55, %v13481_v46  ;;  %v4750_v38 = vpop.f32.mrb[141].mxu0  ;;  %v10057_v46 = vsel %vm4801_vm9, 1.0, %v15223_v16 }
 0xb9d   : > { %v4769_v0 = vadd.f32 %v4750_v38, %v13477_v50  ;;  %v11005_v60 = vpop.f32.mrb[142].mxu0  ;;  %v10056_v50 = vsel %vm4800_vm8, 1.0, %v15223_v16  ;;  %vm9601_vm8 = vcmask 1047559  }
 0xb9e   : > { %v4772_v35 = vadd.f32 %v11005_v60, %v13487_v45  ;;  %v4753_v53 = vpop.f32.mrb[143].mxu0  ;;  %v4785_v21 = vadd.f32 %v10054_v10, %v4771_v13  ;;  %v10059_v45 = vsel %vm4803_vm11, 1.0, %v15223_v16 }
 0xb9f   : > { %v4770_v31 = vadd.f32 %v4753_v53, %v13483_v24  ;;  %v4783_v54 = vadd.f32 %v10054_v10, %v4769_v0  ;;  %v10058_v24 = vsel %vm4802_vm10, 1.0, %v15223_v16 }
 0xba0   : > { %v4786_v15 = vadd.f32 %v10054_v10, %v4772_v35 }
 0xba1   : > { %v4784_v61 = vadd.f32 %v10054_v10, %v4770_v31 }
 0xba2   : > { %v11517_v33 = vpack.c.bf16 %v4786_v15, %v4785_v21 }
 0xba3   : > { %v11513_v32 = vpack.c.bf16 %v4784_v61, %v4783_v54 }
 0xba5   : > { %11514 = vmatprep.subr.bf16.mxu1 %v11513_v32 }
 0xba6   : > { %11516 = vmatpush3.bf16.msra.mxu1 %v11513_v32 }
 0xba7   : > { %11518 = vmatprep.subr.bf16.mxu1 %v11517_v33 }
 0xbaa   : > { %11520 = vmatpush3.bf16.msra.mxu1 %v11517_v33 }
 0xbad   : > { %11023 = vmatmul.mubr.msk.f32.vlgmr.msra.gmra.mrb[144].mxu1 %vm4823_vm6, %v10056_v50  ;;  %v11736_v50 = vld [vmem:[%s15176_s2 + $0x20] ss:$8 sps:$4 sm:$0xff]  }
 0xbae   : > { %11025 = vmatprep.mubr.msk.f32.mxu1 %vm4823_vm6, %v10057_v46  ;;  %11034 = vmatprep.subr.bf16.mxu1 %v11736_v50  ;;  %v11738_v46 = vld [vmem:[%s15176_s2 + $0x30] ss:$8 sps:$4 sm:$0xff]  }
 0xbaf   : > { %11035 = vmatpush3.bf16.msra.mxu1 %v11736_v50 }
 0xbb0   : > { %11036 = vmatprep.subr.bf16.mxu1 %v11738_v46 }
 0xbb1   : > { %11026 = vmatmul.mubr.msk.f32.gmra.mrb[146].mxu1 %vm4823_vm6, %v10058_v24 }
 0xbb2   : > { %11028 = vmatprep.mubr.msk.f32.mxu1 %vm4823_vm6, %v10059_v45 }
 0xbb3   : > { %11037 = vmatpush3.bf16.msra.mxu1 %v11738_v46 }
 0xbb4   : > { %11052 = vmatprep.subr.bf16.mxu1 %v15223_v16 }
 0xbb5   : > { %11029 = vmatmul.mubr.msk.f32.gmra.mrb[148].mxu1 %vm4823_vm6, %v10060_v58 }
 0xbb6   : > { %11031 = vmatprep.mubr.msk.f32.mxu1 %vm4823_vm6, %v10061_v22 }
 0xbb9   : > { %11032 = vmatmul.mubr.msk.f32.gmra.mrb[150].mxu1 %vm4823_vm6, %v10062_v37  ;;  %vm9597_vm6 = vcmask 1045509  }
 0xc80   : > { %v13648_v39 = vpop.f32.mrb[144].mxu1 }
 0xc81   : > { %15243 = vst [vmem:[#allocation13_spill] sm:$0xff] %v13648_v39  ;;  %v13650_v26 = vpop.f32.mrb[145].mxu1  ;;  %v4994_v4 = vsel %vm395_vm0, %v13648_v39, 0.0 }
 0xc82   : > { %15244 = vst [vmem:[#allocation18_spill] sm:$0xff] %v13650_v26  ;;  %4995 = vadd.xlane.f32.xlu1 %v4994_v4  ;;  %v4991_v3 = vsel %vm395_vm0, %v13650_v26, 0.0 }
 0xc83   : > { %4992 = vadd.xlane.f32.xlu0 %v4991_v3 }
 0xc84   : > { %v13656_v40 = vpop.f32.mrb[146].mxu1 }
 0xc85   : > { %15245 = vst [vmem:[#allocation14_spill] sm:$0xff] %v13656_v40  ;;  %v13658_v7 = vpop.f32.mrb[147].mxu1  ;;  %v5000_v56 = vsel %vm395_vm0, %v13656_v40, 0.0 }
 0xc86   : > { %15246 = vst [vmem:[#allocation16_spill] sm:$0xff] %v13658_v7  ;;  %5001 = vadd.xlane.f32.xlu1 %v5000_v56  ;;  %v4997_v30 = vsel %vm395_vm0, %v13658_v7, 0.0 }
 0xc87   : > { %4998 = vadd.xlane.f32.xlu0 %v4997_v30 }
 0xc88   : > { %v13664_v19 = vpop.f32.mrb[148].mxu1 }
 0xc89   : > { %15247 = vst [vmem:[#allocation20_spill] sm:$0xff] %v13664_v19  ;;  %v13666_v59 = vpop.f32.mrb[149].mxu1  ;;  %v5006_v34 = vsel %vm395_vm0, %v13664_v19, 0.0 }
 0xc8a   : > { %15248 = vst [vmem:[#allocation17_spill] sm:$0xff] %v13666_v59  ;;  %5007 = vadd.xlane.f32.xlu1 %v5006_v34  ;;  %v5003_v44 = vsel %vm395_vm0, %v13666_v59, 0.0 }
 0xc8b   : > { %5004 = vadd.xlane.f32.xlu0 %v5003_v44 }
 0xc8c   : > { %v13672_v52 = vpop.f32.mrb[150].mxu1 }
 0xc8d   : > { %15249 = vst [vmem:[#allocation15_spill] sm:$0xff] %v13672_v52  ;;  %v13674_v28 = vpop.f32.mrb[151].mxu1  ;;  %v5012_v43 = vsel %vm395_vm0, %v13672_v52, 0.0 }
 0xc8e   : > { %15250 = vst [vmem:[#allocation19_spill] sm:$0xff] %v13674_v28  ;;  %5013 = vadd.xlane.f32.xlu1 %v5012_v43  ;;  %v5009_v29 = vsel %vm395_vm0, %v13674_v28, 0.0 }
 0xc8f   : > { %5010 = vadd.xlane.f32.xlu0 %v5009_v29 }
 0xd0f   : > { %v4996_v27 = vpop.xlane.xlu1 %4995 }
 0xd10   : > { %v5016_v25 = vmul.f32 0.03125, %v4996_v27  ;;  %v4993_v48 = vpop.xlane.xlu0 %4992 }
 0xd11   : > { %v5015_v51 = vmul.f32 0.03125, %v4993_v48 }
 0xd12   : > { %v13681_v11 = vsub.f32 %v13648_v39, %v5016_v25 }
 0xd13   : > { %v13684_v2 = vsub.f32 %v13650_v26, %v5015_v51  ;;  %v5002_v20 = vpop.xlane.xlu1 %5001 }
 0xd14   : > { %v5018_v49 = vmul.f32 0.03125, %v5002_v20  ;;  %v4999_v41 = vpop.xlane.xlu0 %4998  ;;  %v5032_v14 = vmul.f32 %v13681_v11, %v13681_v11 }
 0xd15   : > { %v5017_v63 = vmul.f32 0.03125, %v4999_v41  ;;  %v5031_v1 = vmul.f32 %v13684_v2, %v13684_v2 }
 0xd16   : > { %v13691_v18 = vsub.f32 %v13656_v40, %v5018_v49  ;;  %v5042_v47 = vsel %vm395_vm0, %v5032_v14, 0.0 }
 0xd17   : > { %v13695_v10 = vsub.f32 %v13658_v7, %v5017_v63  ;;  %v5008_v36 = vpop.xlane.xlu1 %5007  ;;  %5043 = vadd.xlane.f32.xlu1 %v5042_v47  ;;  %v5039_v23 = vsel %vm395_vm0, %v5031_v1, 0.0  ;;  %v10099_v47 = vld [vmem:[%s15175_s1 + $0x10] ss:$0 sm:$0xff] }
 0xd18   : > { %v5020_v5 = vmul.f32 0.03125, %v5008_v36  ;;  %v5005_v9 = vpop.xlane.xlu0 %5004  ;;  %5040 = vadd.xlane.f32.xlu0 %v5039_v23  ;;  %v5034_v17 = vmul.f32 %v13691_v18, %v13691_v18 }
 0xd19   : > { %v5019_v42 = vmul.f32 0.03125, %v5005_v9  ;;  %v5033_v8 = vmul.f32 %v13695_v10, %v13695_v10 }
 0xd1a   : > { %v13703_v12 = vsub.f32 %v13664_v19, %v5020_v5  ;;  %v5048_v57 = vsel %vm395_vm0, %v5034_v17, 0.0  ;;  %v10100_v17 = vld [vmem:[%s15175_s1 + $0x11] ss:$0 sm:$0xff] }
 0xd1b   : > { %v13707_v62 = vsub.f32 %v13666_v59, %v5019_v42  ;;  %5049 = vadd.xlane.f32.xlu1 %v5048_v57  ;;  %v5014_v6 = vpop.xlane.xlu1 %5013  ;;  %v5045_v55 = vsel %vm395_vm0, %v5033_v8, 0.0 }
 0xd1c   : > { %v5022_v13 = vmul.f32 0.03125, %v5014_v6  ;;  %5046 = vadd.xlane.f32.xlu0 %v5045_v55  ;;  %v5011_v38 = vpop.xlane.xlu0 %5010  ;;  %v5036_v0 = vmul.f32 %v13703_v12, %v13703_v12 }
 0xd1d   : > { %v5021_v60 = vmul.f32 0.03125, %v5011_v38  ;;  %v5035_v35 = vmul.f32 %v13707_v62, %v13707_v62 }
 0xd1e   : > { %v13715_v53 = vsub.f32 %v13672_v52, %v5022_v13  ;;  %v5054_v31 = vsel %vm395_vm0, %v5036_v0, 0.0 }
 0xd1f   : > { %v13719_v21 = vsub.f32 %v13674_v28, %v5021_v60  ;;  %5055 = vadd.xlane.f32.xlu1 %v5054_v31  ;;  %v5051_v15 = vsel %vm395_vm0, %v5035_v35, 0.0 }
 0xd20   : > { %5052 = vadd.xlane.f32.xlu0 %v5051_v15  ;;  %v5038_v54 = vmul.f32 %v13715_v53, %v13715_v53 }
 0xd21   : > { %v5037_v61 = vmul.f32 %v13719_v21, %v13719_v21 }
 0xd22   : > { %v5060_v33 = vsel %vm395_vm0, %v5038_v54, 0.0 }
 0xd23   : > { %5061 = vadd.xlane.f32.xlu1 %v5060_v33  ;;  %v5057_v32 = vsel %vm395_vm0, %v5037_v61, 0.0 }
 0xd24   : > { %5058 = vadd.xlane.f32.xlu0 %v5057_v32 }
 0xda4   : > { %v5044_v24 = vpop.xlane.xlu1 %5043 }
 0xda5   : > { %v5064_v45 = vmul.f32 0.03125, %v5044_v24  ;;  %v5041_v58 = vpop.xlane.xlu0 %5040 }
 0xda6   : > { %v5063_v22 = vmul.f32 0.03125, %v5041_v58 }
 0xda7   : > { %v5072_v37 = vadd.f32 1e-05, %v5064_v45 }
 0xda8   : > { %v5071_v4 = vadd.f32 1e-05, %v5063_v22  ;;  %v5050_v3 = vpop.xlane.xlu1 %5049 }
 0xda9   : > { %11910 = vrsqrt.f32 %v5072_v37  ;;  %v5066_v56 = vmul.f32 0.03125, %v5050_v3  ;;  %v5047_v30 = vpop.xlane.xlu0 %5046 }
 0xdaa   : > { %11912 = vrsqrt.f32 %v5071_v4  ;;  %v5065_v34 = vmul.f32 0.03125, %v5047_v30 }
 0xdab   : > { %v5074_v44 = vadd.f32 1e-05, %v5066_v56 }
 0xdac   : > { %v5073_v43 = vadd.f32 1e-05, %v5065_v34  ;;  %v5056_v29 = vpop.xlane.xlu1 %5055 }
 0xdad   : > { %11914 = vrsqrt.f32 %v5074_v44  ;;  %v5068_v27 = vmul.f32 0.03125, %v5056_v29  ;;  %v5053_v25 = vpop.xlane.xlu0 %5052 }
 0xdae   : > { %11916 = vrsqrt.f32 %v5073_v43  ;;  %v5067_v48 = vmul.f32 0.03125, %v5053_v25 }
 0xdaf   : > { %v5076_v51 = vadd.f32 1e-05, %v5068_v27 }
 0xdb0   : > { %v5075_v20 = vadd.f32 1e-05, %v5067_v48  ;;  %v5062_v49 = vpop.xlane.xlu1 %5061 }
 0xdb1   : > { %11918 = vrsqrt.f32 %v5076_v51  ;;  %v5070_v41 = vmul.f32 0.03125, %v5062_v49  ;;  %v5059_v14 = vpop.xlane.xlu0 %5058 }
 0xdb2   : > { %11920 = vrsqrt.f32 %v5075_v20  ;;  %v5069_v63 = vmul.f32 0.03125, %v5059_v14 }
 0xdb3   : > { %v11911_v1 = vpop.eup %11910  ;;  %v5078_v36 = vadd.f32 1e-05, %v5070_v41 }
 0xdb4   : > { %v11913_v23 = vpop.eup %11912  ;;  %v5077_v5 = vadd.f32 1e-05, %v5069_v63  ;;  %v5088_v9 = vmul.f32 %v11911_v1, %v13681_v11 }
 0xdb5   : > { %11922 = vrsqrt.f32 %v5078_v36  ;;  %v5087_v42 = vmul.f32 %v11913_v23, %v13684_v2 }
 0xdb6   : > { %11924 = vrsqrt.f32 %v5077_v5  ;;  %v5102_v8 = vmul.f32 %v10099_v47, %v5088_v9 }
 0xdb7   : > { %v11915_v57 = vpop.eup %11914  ;;  %v5101_v6 = vmul.f32 %v10099_v47, %v5087_v42 }
 0xdb8   : > { %v11917_v55 = vpop.eup %11916  ;;  %v5090_v13 = vmul.f32 %v11915_v57, %v13691_v18  ;;  %v5116_v38 = vadd.f32 %v10100_v17, %v5102_v8 }
 0xdb9   : > { %v5089_v0 = vmul.f32 %v11917_v55, %v13695_v10  ;;  %v5115_v60 = vadd.f32 %v10100_v17, %v5101_v6 }
 0xdba   : > { %v5104_v35 = vmul.f32 %v10099_v47, %v5090_v13 }
 0xdbb   : > { %v11919_v11 = vpop.eup %11918  ;;  %v5103_v31 = vmul.f32 %v10099_v47, %v5089_v0  ;;  %v5123_v15 = vpack.c.bf16 %v5116_v38, %v5115_v60 }
 0xdbc   : > { %v11921_v54 = vpop.eup %11920  ;;  %v5118_v61 = vadd.f32 %v10100_v17, %v5104_v35  ;;  %v5092_v33 = vmul.f32 %v11919_v11, %v13703_v12 }
 0xdbd   : > { %v5117_v2 = vadd.f32 %v10100_v17, %v5103_v31  ;;  %11038 = vmatprep.mubr.msk.bf16.mxu1 %vm395_vm0, %v5123_v15  ;;  %v5091_v32 = vmul.f32 %v11921_v54, %v13707_v62 }
 0xdbe   : > { %v5106_v50 = vmul.f32 %v10099_v47, %v5092_v33 }
 0xdbf   : > { %v11923_v46 = vpop.eup %11922  ;;  %v5124_v18 = vpack.c.bf16 %v5118_v61, %v5117_v2  ;;  %v5105_v24 = vmul.f32 %v10099_v47, %v5091_v32 }
 0xdc0   : > { %v11925_v45 = vpop.eup %11924  ;;  %v5120_v10 = vadd.f32 %v10100_v17, %v5106_v50  ;;  %v5094_v58 = vmul.f32 %v11923_v46, %v13715_v53  ;;  %v10101_v53 = vld [vmem:[%s15175_s1 + $0x12] ss:$0 sm:$0xff] }
 0xdc1   : > { %11039 = vmatmul.mubr.msk.bf16.vlgmr.msra.gmra.mrb[152].mxu1 %vm395_vm0, %v5124_v18  ;;  %v5119_v22 = vadd.f32 %v10100_v17, %v5105_v24  ;;  %v5093_v37 = vmul.f32 %v11925_v45, %v13719_v21 }
 0xdc2   : > { %v5108_v4 = vmul.f32 %v10099_v47, %v5094_v58 }
 0xdc3   : > { %v5125_v12 = vpack.c.bf16 %v5120_v10, %v5119_v22  ;;  %v5107_v3 = vmul.f32 %v10099_v47, %v5093_v37 }
 0xdc4   : > { %v5122_v56 = vadd.f32 %v10100_v17, %v5108_v4 }
 0xdc5   : > { %11042 = vmatprep.mubr.msk.bf16.mxu1 %vm395_vm0, %v5125_v12  ;;  %v5121_v62 = vadd.f32 %v10100_v17, %v5107_v3 }
 0xdc7   : > { %v5126_v30 = vpack.c.bf16 %v5122_v56, %v5121_v62 }
 0xdc9   : > { %11043 = vmatmul.mubr.msk.bf16.gmra.mrb[156].mxu1 %vm395_vm0, %v5126_v30 }
 0xdca   : > { %11054 = vmatprep.mubr.msk.bf16.mxu1 %vm12162_vm1, %v15223_v16 }
 0xe94   : > { %v11040_v34 = vpop.f32.mrb[152].mxu1 }
 0xe95   : > { %v5191_v44 = vpop.f32.mrb[153].mxu1  ;;  %v5200_v51 = vadd.f32 %v11040_v34, %v10101_v53 }
 0xe96   : > { %v5192_v21 = vadd.f32 %v10101_v53, %v5191_v44  ;;  %v11041_v43 = vpop.f32.mrb[154].mxu1 }
 0xe97   : > { %v5194_v29 = vpop.f32.mrb[155].mxu1  ;;  %v5203_v25 = vadd.f32 %v11041_v43, %v10101_v53  ;;  %v13768_v63 = vpack.c.bf16 %v5200_v51, %v5200_v51 }
 0xe98   : > { %v13758_v27 = vpack.c.bf16 %v5192_v21, %v5192_v21  ;;  %v5195_v48 = vadd.f32 %v10101_v53, %v5194_v29 }
 0xe99   : > { %v13764_v49 = vpack.c.bf16 %v5203_v25, %v5203_v25 }
 0xe9a   : > { %v13760_v20 = vpack.c.bf16 %v5195_v48, %v5195_v48  ;;  %5238 = vrot.lane.b32.xlu0 %v13758_v27, %s12160_s10 }
 0xe9c   : > { %5240 = vrot.lane.b32.xlu1 %v13760_v20, %s12160_s10  ;;  %v11044_v41 = vpop.f32.mrb[156].mxu1 }
 0xe9d   : > { %v5207_v14 = vpop.f32.mrb[157].mxu1  ;;  %v5216_v5 = vadd.f32 %v11044_v41, %v10101_v53 }
 0xe9e   : > { %v5208_v1 = vadd.f32 %v10101_v53, %v5207_v14  ;;  %5244 = vrot.lane.b32.xlu0 %v13764_v49, %s12160_s10  ;;  %v11045_v47 = vpop.f32.mrb[158].mxu1 }
 0xe9f   : > { %v5210_v36 = vpop.f32.mrb[159].mxu1  ;;  %v5219_v17 = vadd.f32 %v11045_v47, %v10101_v53  ;;  %v13782_v8 = vpack.c.bf16 %v5216_v5, %v5216_v5 }
 0xea0   : > { %v5211_v23 = vadd.f32 %v10101_v53, %v5210_v36  ;;  %5242 = vrot.lane.b32.xlu1 %v13768_v63, %s12160_s10  ;;  %v13774_v9 = vpack.c.bf16 %v5208_v1, %v5208_v1 }
 0xea1   : > { %v13784_v57 = vpack.c.bf16 %v5219_v17, %v5219_v17 }
 0xea2   : > { %v13776_v42 = vpack.c.bf16 %v5211_v23, %v5211_v23 }
 0xea4   : > { %5248 = vrot.lane.b32.xlu0 %v13776_v42, %s12160_s10  ;;  %5246 = vrot.lane.b32.xlu1 %v13774_v9, %s12160_s10 }
 0xea8   : > { %5252 = vrot.lane.b32.xlu0 %v13784_v57, %s12160_s10  ;;  %5250 = vrot.lane.b32.xlu1 %v13782_v8, %s12160_s10  ;;  %s217_s10 = scalar_lea.vmem [#allocation2], %s9943_s25 }
 0xeac   : > { %5334 = vrot.lane.b32.xlu0 %v13760_v20, %s12163_s11  ;;  %5286 = vrot.lane.b32.xlu1 %v13758_v27, %s12163_s11 }
 0xeb0   : > { %5256 = vrot.lane.b32.xlu0 %v13760_v20, %s12164_s12  ;;  %5254 = vrot.lane.b32.xlu1 %v13758_v27, %s12164_s12 }
 0xeb4   : > { %5430 = vrot.lane.b32.xlu0 %v13764_v49, %s12163_s11  ;;  %5382 = vrot.lane.b32.xlu1 %v13768_v63, %s12163_s11 }
 0xeb8   : > { %5260 = vrot.lane.b32.xlu0 %v13764_v49, %s12164_s12  ;;  %5258 = vrot.lane.b32.xlu1 %v13768_v63, %s12164_s12 }
 0xebc   : > { %5526 = vrot.lane.b32.xlu0 %v13776_v42, %s12163_s11  ;;  %5478 = vrot.lane.b32.xlu1 %v13774_v9, %s12163_s11 }
 0xec0   : > { %5264 = vrot.lane.b32.xlu0 %v13776_v42, %s12164_s12  ;;  %5262 = vrot.lane.b32.xlu1 %v13774_v9, %s12164_s12 }
 0xec4   : > { %5622 = vrot.lane.b32.xlu0 %v13784_v57, %s12163_s11  ;;  %5574 = vrot.lane.b32.xlu1 %v13782_v8, %s12163_s11 }
 0xec8   : > { %5268 = vrot.lane.b32.xlu0 %v13784_v57, %s12164_s12  ;;  %5266 = vrot.lane.b32.xlu1 %v13782_v8, %s12164_s12 }
 0xf0c   : > { %v13822_v6 = vpop.permute.xlu0 %5238 }
 0xf0d   : > { %5670 = vrot.lane.b32.xlu1 %v13822_v6, %s12163_s11 }
 0xf0e   : > { %v13826_v55 = vpop.permute.xlu1 %5240 }
 0xf0f   : > { %5718 = vrot.lane.b32.xlu0 %v13826_v55, %s12163_s11 }
 0xf10   : > { %v13832_v13 = vpop.permute.xlu0 %5244 }
 0xf11   : > { %5270 = vrot.lane.b32.xlu1 %v13758_v27, %s12165_s13 }
 0xf12   : > { %v13834_v38 = vpop.permute.xlu1 %5242 }
 0xf13   : > { %5272 = vrot.lane.b32.xlu0 %v13760_v20, %s12165_s13 }
 0xf15   : > { %5766 = vrot.lane.b32.xlu1 %v13834_v38, %s12163_s11 }
 0xf16   : > { %v13840_v0 = vpop.permute.xlu1 %5246  ;;  %v13842_v60 = vpop.permute.xlu0 %5248 }
 0xf17   : > { %5814 = vrot.lane.b32.xlu0 %v13832_v13, %s12163_s11 }
 0xf19   : > { %5274 = vrot.lane.b32.xlu1 %v13768_v63, %s12165_s13 }
 0xf1a   : > { %v13848_v35 = vpop.permute.xlu1 %5250  ;;  %v13850_v11 = vpop.permute.xlu0 %5252 }
 0xf1b   : > { %5276 = vrot.lane.b32.xlu0 %v13764_v49, %s12165_s13 }
 0xf1d   : > { %5862 = vrot.lane.b32.xlu1 %v13840_v0, %s12163_s11 }
 0xf1e   : > { %v5287_v31 = vpop.permute.xlu1 %5286  ;;  %v5335_v15 = vpop.permute.xlu0 %5334 }
 0xf1f   : > { %v5292_v54 = vsel %vm694_vm2, %v5287_v31, 0  ;;  %v5340_v61 = vsel %vm694_vm2, %v5335_v15, 0  ;;  %5910 = vrot.lane.b32.xlu0 %v13842_v60, %s12163_s11 }
 0xf20   : > { %11047 = vmatpush3.bf16.xpose.msra.mxu0 %v5292_v54  ;;  %11053 = vmatpush3.bf16.xpose.msra.mxu1 %v5340_v61 }
 0xf21   : > { %5278 = vrot.lane.b32.xlu1 %v13774_v9, %s12165_s13  ;;  %11058 = vmatprep.subr.bf16.mxu0 %v15223_v16 }
 0xf22   : > { %v13863_v33 = vpop.permute.xlu1 %5254  ;;  %v13865_v2 = vpop.permute.xlu0 %5256  ;;  %11064 = vmatprep.subr.bf16.mxu1 %v15223_v16 }
 0xf23   : > { %5280 = vrot.lane.b32.xlu0 %v13776_v42, %s12165_s13 }
 0xf25   : > { %5958 = vrot.lane.b32.xlu1 %v13848_v35, %s12163_s11 }
 0xf26   : > { %v5383_v32 = vpop.permute.xlu1 %5382  ;;  %v5431_v50 = vpop.permute.xlu0 %5430 }
 0xf27   : > { %v5388_v46 = vsel %vm694_vm2, %v5383_v32, 0  ;;  %v5436_v18 = vsel %vm694_vm2, %v5431_v50, 0  ;;  %11049 = vmatmul.mubr.msk.bf16.vlgmr.msra.gmra.mrb[144].mxu0 %vm694_vm2, %v13758_v27  ;;  %6006 = vrot.lane.b32.xlu0 %v13850_v11, %s12163_s11 }
 0xf28   : > { %11055 = vmatmul.mubr.msk.bf16.vlgmr.msra.gmra.mrb[160].mxu1 %vm694_vm2, %v13760_v20  ;;  %11059 = vmatpush3.bf16.xpose.msra.mxu0 %v5388_v46 }
 0xf29   : > { %11065 = vmatpush3.bf16.xpose.msra.mxu1 %v5436_v18  ;;  %5282 = vrot.lane.b32.xlu1 %v13782_v8, %s12165_s13 }
 0xf2a   : > { %v13882_v24 = vpop.permute.xlu1 %5258  ;;  %v13884_v45 = vpop.permute.xlu0 %5260  ;;  %11060 = vmatprep.mubr.msk.bf16.mxu0 %vm12162_vm1, %v15223_v16  ;;  %11066 = vmatprep.mubr.msk.bf16.mxu1 %vm12162_vm1, %v15223_v16 }
 0xf2b   : > { %5284 = vrot.lane.b32.xlu0 %v13784_v57, %s12165_s13  ;;  %11070 = vmatprep.subr.bf16.mxu0 %v15223_v16 }
 0xf2c   : > { %11076 = vmatprep.subr.bf16.mxu1 %v15223_v16 }
 0xf2d   : > { %6054 = vrot.lane.b32.xlu1 %v13863_v33, %s12163_s11 }
 0xf2e   : > { %v5479_v10 = vpop.permute.xlu1 %5478  ;;  %v5527_v58 = vpop.permute.xlu0 %5526 }
 0xf2f   : > { %v5484_v22 = vsel %vm694_vm2, %v5479_v10, 0  ;;  %v5532_v37 = vsel %vm694_vm2, %v5527_v58, 0  ;;  %11061 = vmatmul.mubr.msk.bf16.vlgmr.msra.gmra.mrb[148].mxu0 %vm694_vm2, %v13768_v63  ;;  %6102 = vrot.lane.b32.xlu0 %v13865_v2, %s12163_s11 }
 0xf30   : > { %11067 = vmatmul.mubr.msk.bf16.vlgmr.msra.gmra.mrb[164].mxu1 %vm694_vm2, %v13764_v49  ;;  %11071 = vmatpush3.bf16.xpose.msra.mxu0 %v5484_v22 }
 0xf31   : > { %11077 = vmatpush3.bf16.xpose.msra.mxu1 %v5532_v37  ;;  %6150 = vrot.lane.b32.xlu1 %v13882_v24, %s12163_s11 }
 0xf32   : > { %v13906_v4 = vpop.permute.xlu1 %5262  ;;  %v13908_v12 = vpop.permute.xlu0 %5264  ;;  %11072 = vmatprep.mubr.msk.bf16.mxu0 %vm12162_vm1, %v15223_v16  ;;  %11078 = vmatprep.mubr.msk.bf16.mxu1 %vm12162_vm1, %v15223_v16 }
 0xf33   : > { %6198 = vrot.lane.b32.xlu0 %v13884_v45, %s12163_s11  ;;  %11082 = vmatprep.subr.bf16.mxu0 %v15223_v16 }
 0xf34   : > { %11088 = vmatprep.subr.bf16.mxu1 %v15223_v16 }
 0xf35   : > { %6246 = vrot.lane.b32.xlu1 %v13906_v4, %s12163_s11 }
 0xf36   : > { %v5575_v3 = vpop.permute.xlu1 %5574  ;;  %v5623_v56 = vpop.permute.xlu0 %5622 }
 0xf37   : > { %v5580_v62 = vsel %vm694_vm2, %v5575_v3, 0  ;;  %v5628_v30 = vsel %vm694_vm2, %v5623_v56, 0  ;;  %11073 = vmatmul.mubr.msk.bf16.vlgmr.msra.gmra.mrb[152].mxu0 %vm694_vm2, %v13774_v9  ;;  %6294 = vrot.lane.b32.xlu0 %v13908_v12, %s12163_s11 }
 0xf38   : > { %11079 = vmatmul.mubr.msk.bf16.vlgmr.msra.gmra.mrb[168].mxu1 %vm694_vm2, %v13776_v42  ;;  %11083 = vmatpush3.bf16.xpose.msra.mxu0 %v5580_v62 }
 0xf39   : > { %11089 = vmatpush3.bf16.xpose.msra.mxu1 %v5628_v30  ;;  %11084 = vmatprep.mubr.msk.bf16.mxu0 %vm12162_vm1, %v15223_v16 }
 0xf3a   : > { %v13930_v53 = vpop.permute.xlu1 %5266  ;;  %v13932_v34 = vpop.permute.xlu0 %5268  ;;  %11090 = vmatprep.mubr.msk.bf16.mxu1 %vm12162_vm1, %v15223_v16  ;;  %11094 = vmatprep.subr.bf16.mxu0 %v15223_v16 }
 0xf3b   : > { %6342 = vrot.lane.b32.xlu1 %v13930_v53, %s12163_s11  ;;  %6390 = vrot.lane.b32.xlu0 %v13932_v34, %s12163_s11 }
 0xf3c   : > { %11100 = vmatprep.subr.bf16.mxu1 %v15223_v16 }
 0xf3f   : > { %11085 = vmatmul.mubr.msk.bf16.vlgmr.msra.gmra.mrb[156].mxu0 %vm694_vm2, %v13782_v8 }
 0xf40   : > { %11091 = vmatmul.mubr.msk.bf16.vlgmr.msra.gmra.mrb[172].mxu1 %vm694_vm2, %v13784_v57  ;;  %11096 = vmatprep.mubr.msk.bf16.mxu0 %vm12162_vm1, %v15223_v16 }
 0xf41   : > { %11102 = vmatprep.mubr.msk.bf16.mxu1 %vm12162_vm1, %v15223_v16 }
 0xf7f   : > { %v5671_v44 = vpop.permute.xlu1 %5670 }
 0xf80   : > { %v5676_v21 = vsel %vm694_vm2, %v5671_v44, 0 }
 0xf81   : > { %11095 = vmatpush3.bf16.xpose.msra.mxu0 %v5676_v21  ;;  %v5719_v43 = vpop.permute.xlu0 %5718 }
 0xf82   : > { %v5724_v29 = vsel %vm694_vm2, %v5719_v43, 0  ;;  %11106 = vmatprep.subr.bf16.mxu0 %v15223_v16 }
 0xf83   : > { %v13953_v25 = vpop.permute.xlu1 %5270  ;;  %11101 = vmatpush3.bf16.xpose.msra.mxu1 %v5724_v29 }
 0xf84   : > { %6438 = vrot.lane.b32.xlu1 %v13953_v25, %s12163_s11  ;;  %11112 = vmatprep.subr.bf16.mxu1 %v15223_v16 }
 0xf85   : > { %v13958_v48 = vpop.permute.xlu0 %5272 }
 0xf86   : > { %6486 = vrot.lane.b32.xlu0 %v13958_v48, %s12163_s11 }
 0xf87   : > { %v5767_v51 = vpop.permute.xlu1 %5766 }
 0xf88   : > { %v5772_v41 = vsel %vm694_vm2, %v5767_v51, 0  ;;  %11097 = vmatmul.mubr.msk.bf16.vlgmr.msra.gmra.mrb[160].mxu0 %vm694_vm2, %v13822_v6 }
 0xf89   : > { %11107 = vmatpush3.bf16.xpose.msra.mxu0 %v5772_v41  ;;  %v5815_v14 = vpop.permute.xlu0 %5814  ;;  %11108 = vmatprep.mubr.msk.bf16.mxu0 %vm12162_vm1, %v15223_v16 }
 0xf8a   : > { %v5820_v1 = vsel %vm694_vm2, %v5815_v14, 0  ;;  %11103 = vmatmul.mubr.msk.bf16.vlgmr.msra.gmra.mrb[176].mxu1 %vm694_vm2, %v13826_v55  ;;  %11118 = vmatprep.subr.bf16.mxu0 %v15223_v16 }
 0xf8b   : > { %v13971_v47 = vpop.permute.xlu1 %5274  ;;  %11113 = vmatpush3.bf16.xpose.msra.mxu1 %v5820_v1  ;;  %11114 = vmatprep.mubr.msk.bf16.mxu1 %vm12162_vm1, %v15223_v16 }
 0xf8c   : > { %6534 = vrot.lane.b32.xlu1 %v13971_v47, %s12163_s11  ;;  %11124 = vmatprep.subr.bf16.mxu1 %v15223_v16 }
 0xf8d   : > { %v13978_v36 = vpop.permute.xlu0 %5276 }
 0xf8e   : > { %6582 = vrot.lane.b32.xlu0 %v13978_v36, %s12163_s11 }
 0xf8f   : > { %v5863_v23 = vpop.permute.xlu1 %5862 }
 0xf90   : > { %v5868_v5 = vsel %vm694_vm2, %v5863_v23, 0  ;;  %11109 = vmatmul.mubr.msk.bf16.vlgmr.msra.gmra.mrb[164].mxu0 %vm694_vm2, %v13834_v38 }
 0xf91   : > { %11119 = vmatpush3.bf16.xpose.msra.mxu0 %v5868_v5  ;;  %v5911_v17 = vpop.permute.xlu0 %5910  ;;  %11120 = vmatprep.mubr.msk.bf16.mxu0 %vm12162_vm1, %v15223_v16 }
 0xf92   : > { %v5916_v31 = vsel %vm694_vm2, %v5911_v17, 0  ;;  %11115 = vmatmul.mubr.msk.bf16.vlgmr.msra.gmra.mrb[180].mxu1 %vm694_vm2, %v13832_v13  ;;  %11130 = vmatprep.subr.bf16.mxu0 %v15223_v16 }
 0xf93   : > { %v13991_v15 = vpop.permute.xlu1 %5278  ;;  %11125 = vmatpush3.bf16.xpose.msra.mxu1 %v5916_v31  ;;  %11126 = vmatprep.mubr.msk.bf16.mxu1 %vm12162_vm1, %v15223_v16 }
 0xf94   : > { %6630 = vrot.lane.b32.xlu1 %v13991_v15, %s12163_s11  ;;  %11136 = vmatprep.subr.bf16.mxu1 %v15223_v16 }
 0xf95   : > { %v13998_v54 = vpop.permute.xlu0 %5280 }
 0xf96   : > { %6678 = vrot.lane.b32.xlu0 %v13998_v54, %s12163_s11 }
 0xf97   : > { %v5959_v61 = vpop.permute.xlu1 %5958 }
 0xf98   : > { %v5964_v32 = vsel %vm694_vm2, %v5959_v61, 0  ;;  %11121 = vmatmul.mubr.msk.bf16.vlgmr.msra.gmra.mrb[168].mxu0 %vm694_vm2, %v13840_v0 }
 0xf99   : > { %11131 = vmatpush3.bf16.xpose.msra.mxu0 %v5964_v32  ;;  %v6007_v50 = vpop.permute.xlu0 %6006  ;;  %11132 = vmatprep.mubr.msk.bf16.mxu0 %vm12162_vm1, %v15223_v16 }
 0xf9a   : > { %v6012_v46 = vsel %vm694_vm2, %v6007_v50, 0  ;;  %11127 = vmatmul.mubr.msk.bf16.vlgmr.msra.gmra.mrb[184].mxu1 %vm694_vm2, %v13842_v60  ;;  %11142 = vmatprep.subr.bf16.mxu0 %v15223_v16 }
 0xf9b   : > { %v14011_v18 = vpop.permute.xlu1 %5282  ;;  %11137 = vmatpush3.bf16.xpose.msra.mxu1 %v6012_v46  ;;  %11138 = vmatprep.mubr.msk.bf16.mxu1 %vm12162_vm1, %v15223_v16 }
 0xf9c   : > { %6726 = vrot.lane.b32.xlu1 %v14011_v18, %s12163_s11  ;;  %11148 = vmatprep.subr.bf16.mxu1 %v15223_v16 }
 0xf9d   : > { %v14018_v10 = vpop.permute.xlu0 %5284 }
 0xf9e   : > { %15251 = vst [vmem:[#allocation22_spill] sm:$0xff] %v14018_v10  ;;  %6774 = vrot.lane.b32.xlu0 %v14018_v10, %s12163_s11  ;;  %s9880_s11 = sshll.u32 %s217_s10, 4  ;;  %s15133_s11 = int_to_ptr.vmem [resolvable:$true] %s9880_s11 }
 0xf9f   : > { %v6055_v58 = vpop.permute.xlu1 %6054  ;;  %s12094_s22 = scalar_lea.vmem %s15133_s11, 128 }
 0xfa0   : > { %v6060_v22 = vsel %vm694_vm2, %v6055_v58, 0  ;;  %11133 = vmatmul.mubr.msk.bf16.vlgmr.msra.gmra.mrb[172].mxu0 %vm694_vm2, %v13848_v35  ;;  %7286 = vrot.lane.b32.xlu1 %v13760_v20, %s12166_s14  ;;  %p12095_p11 = scmp.ne.s32.totalorder %s15133_s11, %s12094_s22 }
 0xfa1   : > { %11143 = vmatpush3.bf16.xpose.msra.mxu0 %v6060_v22  ;;  %v6103_v37 = vpop.permute.xlu0 %6102  ;;  %11144 = vmatprep.mubr.msk.bf16.mxu0 %vm12162_vm1, %v15223_v16 }
 0xfa2   : > { %v6108_v3 = vsel %vm694_vm2, %v6103_v37, 0  ;;  %11139 = vmatmul.mubr.msk.bf16.vlgmr.msra.gmra.mrb[188].mxu1 %vm694_vm2, %v13850_v11  ;;  %7238 = vrot.lane.b32.xlu0 %v13758_v27, %s12166_s14  ;;  %p12096_p12 = pnand %p12095_p11, %p12241_p5 }
 0xfa3   : > { %11149 = vmatpush3.bf16.xpose.msra.mxu1 %v6108_v3  ;;  %11154 = vmatprep.subr.bf16.mxu0 %v15223_v16  ;;  %v6151_v20 = vpop.permute.xlu1 %6150 }
 0xfa4   : > { %7382 = vrot.lane.b32.xlu1 %v13764_v49, %s12166_s14  ;;  %11150 = vmatprep.mubr.msk.bf16.mxu1 %vm12162_vm1, %v15223_v16  ;;  %v6156_v62 = vsel %vm694_vm2, %v6151_v20, 0  ;;  %p12097_p13 = pneg %p12096_p12 }
 0xfa5   : > { %11160 = vmatprep.subr.bf16.mxu1 %v15223_v16  ;;  %v6199_v56 = vpop.permute.xlu0 %6198 }
 0xfa6   : > { %7334 = vrot.lane.b32.xlu0 %v13768_v63, %s12166_s14  ;;  %v6204_v27 = vsel %vm694_vm2, %v6199_v56, 0 }
 0xfa7   : > { %v6247_v49 = vpop.permute.xlu1 %6246 }
 0xfa8   : > { %7478 = vrot.lane.b32.xlu1 %v13776_v42, %s12166_s14  ;;  %11145 = vmatmul.mubr.msk.bf16.vlgmr.msra.gmra.mrb[176].mxu0 %vm694_vm2, %v13863_v33 }
 0xfa9   : > { %11155 = vmatpush3.bf16.xpose.msra.mxu0 %v6156_v62  ;;  %11156 = vmatprep.mubr.msk.bf16.mxu0 %vm12162_vm1, %v15223_v16  ;;  %v6295_v63 = vpop.permute.xlu0 %6294 }
 0xfaa   : > { %7430 = vrot.lane.b32.xlu0 %v13774_v9, %s12166_s14  ;;  %11151 = vmatmul.mubr.msk.bf16.vlgmr.msra.gmra.mrb[192].mxu1 %vm694_vm2, %v13865_v2  ;;  %v6252_v9 = vsel %vm694_vm2, %v6247_v49, 0  ;;  %v6300_v42 = vsel %vm694_vm2, %v6295_v63, 0 }
 0xfab   : > { %11161 = vmatpush3.bf16.xpose.msra.mxu1 %v6204_v27  ;;  %11166 = vmatprep.subr.bf16.mxu0 %v15223_v16 }
 0xfac   : > { %7574 = vrot.lane.b32.xlu1 %v13784_v57, %s12166_s14  ;;  %11162 = vmatprep.mubr.msk.bf16.mxu1 %vm12162_vm1, %v15223_v16 }
 0xfad   : > { %11172 = vmatprep.subr.bf16.mxu1 %v15223_v16  ;;  %v6391_v57 = vpop.permute.xlu0 %6390 }
 0xfae   : > { %7526 = vrot.lane.b32.xlu0 %v13782_v8, %s12166_s14  ;;  %v6343_v8 = vpop.permute.xlu1 %6342 }
 0xfb0   : > { %7670 = vrot.lane.b32.xlu1 %v13826_v55, %s12166_s14  ;;  %11157 = vmatmul.mubr.msk.bf16.vlgmr.msra.gmra.mrb[180].mxu0 %vm694_vm2, %v13882_v24  ;;  %v6396_v55 = vsel %vm694_vm2, %v6391_v57, 0 }
 0xfb1   : > { %11167 = vmatpush3.bf16.xpose.msra.mxu0 %v6252_v9  ;;  %11168 = vmatprep.mubr.msk.bf16.mxu0 %vm12162_vm1, %v15223_v16 }
 0xfb2   : > { %7622 = vrot.lane.b32.xlu0 %v13822_v6, %s12166_s14  ;;  %11163 = vmatmul.mubr.msk.bf16.vlgmr.msra.gmra.mrb[196].mxu1 %vm694_vm2, %v13884_v45  ;;  %v6348_v6 = vsel %vm694_vm2, %v6343_v8, 0 }
 0xfb3   : > { %11173 = vmatpush3.bf16.xpose.msra.mxu1 %v6300_v42  ;;  %11178 = vmatprep.subr.bf16.mxu0 %v15223_v16 }
 0xfb4   : > { %7766 = vrot.lane.b32.xlu1 %v13832_v13, %s12166_s14  ;;  %11174 = vmatprep.mubr.msk.bf16.mxu1 %vm12162_vm1, %v15223_v16 }
 0xfb5   : > { %11184 = vmatprep.subr.bf16.mxu1 %v15223_v16 }
 0xfb6   : > { %7718 = vrot.lane.b32.xlu0 %v13834_v38, %s12166_s14 }
 0xfb8   : > { %11169 = vmatmul.mubr.msk.bf16.vlgmr.msra.gmra.mrb[184].mxu0 %vm694_vm2, %v13906_v4  ;;  %7958 = vrot.lane.b32.xlu1 %v13850_v11, %s12166_s14 }
 0xfb9   : > { %11179 = vmatpush3.bf16.xpose.msra.mxu0 %v6348_v6  ;;  %11180 = vmatprep.mubr.msk.bf16.mxu0 %vm12162_vm1, %v15223_v16 }
 0xfba   : > { %7814 = vrot.lane.b32.xlu0 %v13840_v0, %s12166_s14  ;;  %11175 = vmatmul.mubr.msk.bf16.vlgmr.msra.gmra.mrb[200].mxu1 %vm694_vm2, %v13908_v12 }
 0xfbb   : > { %11185 = vmatpush3.bf16.xpose.msra.mxu1 %v6396_v55  ;;  %11186 = vmatprep.mubr.msk.bf16.mxu1 %vm12162_vm1, %v15223_v16 }
 0xfbc   : > { %8054 = vrot.lane.b32.xlu1 %v13865_v2, %s12166_s14  ;;  %11190 = vmatprep.subr.bf16.mxu0 %v15223_v16 }
 0xfbd   : > { %11196 = vmatprep.subr.bf16.mxu1 %v15223_v16 }
 0xfbe   : > { %7910 = vrot.lane.b32.xlu0 %v13848_v35, %s12166_s14 }
 0xfc0   : > { %11181 = vmatmul.mubr.msk.bf16.vlgmr.msra.gmra.mrb[188].mxu0 %vm694_vm2, %v13930_v53  ;;  %8150 = vrot.lane.b32.xlu1 %v13884_v45, %s12166_s14 }
 0xfc1   : > { %11192 = vmatprep.mubr.msk.bf16.mxu0 %vm12162_vm1, %v15223_v16 }
 0xfc2   : > { %8006 = vrot.lane.b32.xlu0 %v13863_v33, %s12166_s14  ;;  %11187 = vmatmul.mubr.msk.bf16.vlgmr.msra.gmra.mrb[204].mxu1 %vm694_vm2, %v13932_v34 }
 0xfc3   : > { %11198 = vmatprep.mubr.msk.bf16.mxu1 %vm12162_vm1, %v15223_v16 }
 0xfc4   : > { %8342 = vrot.lane.b32.xlu1 %v13932_v34, %s12166_s14 }
 0xfc6   : > { %8102 = vrot.lane.b32.xlu0 %v13882_v24, %s12166_s14 }
 0xfc8   : > { %8438 = vrot.lane.b32.xlu1 %v13958_v48, %s12166_s14 }
 0xfca   : > { %8198 = vrot.lane.b32.xlu0 %v13906_v4, %s12166_s14 }
 0xfcc   : > { %7862 = vrot.lane.b32.xlu1 %v13842_v60, %s12166_s14 }
 0xfce   : > { %8294 = vrot.lane.b32.xlu0 %v13930_v53, %s12166_s14 }
 0xfd0   : > { %8246 = vrot.lane.b32.xlu1 %v13908_v12, %s12166_s14 }
 0xfd2   : > { %8390 = vrot.lane.b32.xlu0 %v13953_v25, %s12166_s14 }
 0xff6   : > { %v6439_v13 = vpop.permute.xlu1 %6438 }
 0xff7   : > { %v6444_v38 = vsel %vm694_vm2, %v6439_v13, 0 }
 0xff8   : > { %11191 = vmatpush3.bf16.xpose.msra.mxu0 %v6444_v38  ;;  %v6487_v0 = vpop.permute.xlu0 %6486 }
 0xff9   : > { %v6492_v35 = vsel %vm694_vm2, %v6487_v0, 0  ;;  %11202 = vmatprep.subr.bf16.mxu0 %v15223_v16 }
 0xffa   : > { %v5328_v11 = vpop.f32.mrb[144].mxu0  ;;  %11197 = vmatpush3.bf16.xpose.msra.mxu1 %v6492_v35 }
 0xffb   : > { %v14133_v60 = vmul.f32 0.35355338, %v5328_v11  ;;  %v5376_v33 = vpop.f32.mrb[160].mxu1  ;;  %v11050_v2 = vpop.f32.mrb[145].mxu0  ;;  %11208 = vmatprep.subr.bf16.mxu1 %v15223_v16 }
 0xffc   : > { %v14136_v24 = vmul.f32 0.35355338, %v5376_v33  ;;  %v11056_v45 = vpop.f32.mrb[161].mxu1  ;;  %v5331_v4 = vpop.f32.mrb[146].mxu0 }
 0xffd   : > { %v5379_v12 = vpop.f32.mrb[162].mxu1  ;;  %v11051_v30 = vpop.f32.mrb[147].mxu0  ;;  %v6854_v53 = vsel %vm694_vm2, %v14133_v60, -inf }
 0xffe   : > { %v11057_v34 = vpop.f32.mrb[163].mxu1  ;;  %v6535_v44 = vpop.permute.xlu1 %6534  ;;  %6855 = vmax.xlane.f32.xlu1 %v6854_v53  ;;  %v6857_v21 = vsel %vm694_vm2, %v14136_v24, -inf }
 0xfff   : > { %v6540_v43 = vsel %vm694_vm2, %v6535_v44, 0  ;;  %6858 = vmax.xlane.f32.xlu0 %v6857_v21  ;;  %11193 = vmatmul.mubr.msk.bf16.vlgmr.msra.gmra.mrb[192].mxu0 %vm694_vm2, %v13953_v25 }
0x1000   : > { %11203 = vmatpush3.bf16.xpose.msra.mxu0 %v6540_v43  ;;  %v6583_v29 = vpop.permute.xlu0 %6582  ;;  %11204 = vmatprep.mubr.msk.bf16.mxu0 %vm12162_vm1, %v15223_v16 }
0x1001   : > { %v6588_v51 = vsel %vm694_vm2, %v6583_v29, 0  ;;  %11199 = vmatmul.mubr.msk.bf16.vlgmr.msra.gmra.mrb[208].mxu1 %vm694_vm2, %v13958_v48  ;;  %11214 = vmatprep.subr.bf16.mxu0 %v15223_v16 }
0x1002   : > { %v5424_v41 = vpop.f32.mrb[148].mxu0  ;;  %11209 = vmatpush3.bf16.xpose.msra.mxu1 %v6588_v51  ;;  %11210 = vmatprep.mubr.msk.bf16.mxu1 %vm12162_vm1, %v15223_v16 }
0x1003   : > { %v14153_v14 = vmul.f32 0.35355338, %v5424_v41  ;;  %v5472_v25 = vpop.f32.mrb[164].mxu1  ;;  %v11062_v1 = vpop.f32.mrb[149].mxu0  ;;  %11220 = vmatprep.subr.bf16.mxu1 %v15223_v16 }
0x1004   : > { %v14156_v23 = vmul.f32 0.35355338, %v5472_v25  ;;  %v11068_v5 = vpop.f32.mrb[165].mxu1  ;;  %v5427_v17 = vpop.f32.mrb[150].mxu0 }
0x1005   : > { %v5475_v31 = vpop.f32.mrb[166].mxu1  ;;  %v11063_v61 = vpop.f32.mrb[151].mxu0  ;;  %v6860_v48 = vsel %vm694_vm2, %v14153_v14, -inf }
0x1006   : > { %v11069_v32 = vpop.f32.mrb[167].mxu1  ;;  %v6631_v50 = vpop.permute.xlu1 %6630  ;;  %v6863_v46 = vsel %vm694_vm2, %v14156_v23, -inf  ;;  %6861 = vmax.xlane.f32.xlu0 %v6860_v48 }
0x1007   : > { %v6636_v58 = vsel %vm694_vm2, %v6631_v50, 0  ;;  %6864 = vmax.xlane.f32.xlu1 %v6863_v46  ;;  %11205 = vmatmul.mubr.msk.bf16.vlgmr.msra.gmra.mrb[196].mxu0 %vm694_vm2, %v13971_v47 }
0x1008   : > { %11215 = vmatpush3.bf16.xpose.msra.mxu0 %v6636_v58  ;;  %v6679_v22 = vpop.permute.xlu0 %6678  ;;  %11216 = vmatprep.mubr.msk.bf16.mxu0 %vm12162_vm1, %v15223_v16 }
0x1009   : > { %v6684_v37 = vsel %vm694_vm2, %v6679_v22, 0  ;;  %11211 = vmatmul.mubr.msk.bf16.vlgmr.msra.gmra.mrb[212].mxu1 %vm694_vm2, %v13978_v36  ;;  %11226 = vmatprep.subr.bf16.mxu0 %v15223_v16 }
0x100a   : > { %v5520_v3 = vpop.f32.mrb[152].mxu0  ;;  %11221 = vmatpush3.bf16.xpose.msra.mxu1 %v6684_v37  ;;  %11222 = vmatprep.mubr.msk.bf16.mxu1 %vm12162_vm1, %v15223_v16 }
0x100b   : > { %v14173_v20 = vmul.f32 0.35355338, %v5520_v3  ;;  %v5568_v56 = vpop.f32.mrb[168].mxu1  ;;  %v11074_v62 = vpop.f32.mrb[153].mxu0  ;;  %11232 = vmatprep.subr.bf16.mxu1 %v15223_v16 }
0x100c   : > { %v14176_v27 = vmul.f32 0.35355338, %v5568_v56  ;;  %v11080_v49 = vpop.f32.mrb[169].mxu1  ;;  %v5523_v63 = vpop.f32.mrb[154].mxu0 }
0x100d   : > { %v5571_v9 = vpop.f32.mrb[170].mxu1  ;;  %v11075_v42 = vpop.f32.mrb[155].mxu0  ;;  %v6866_v8 = vsel %vm694_vm2, %v14173_v20, -inf }
0x100e   : > { %v11081_v57 = vpop.f32.mrb[171].mxu1  ;;  %v6727_v6 = vpop.permute.xlu1 %6726  ;;  %v6869_v55 = vsel %vm694_vm2, %v14176_v27, -inf  ;;  %6867 = vmax.xlane.f32.xlu0 %v6866_v8 }
0x100f   : > { %v6732_v13 = vsel %vm694_vm2, %v6727_v6, 0  ;;  %6870 = vmax.xlane.f32.xlu1 %v6869_v55  ;;  %11217 = vmatmul.mubr.msk.bf16.vlgmr.msra.gmra.mrb[200].mxu0 %vm694_vm2, %v13991_v15 }
0x1010   : > { %11227 = vmatpush3.bf16.xpose.msra.mxu0 %v6732_v13  ;;  %v6775_v38 = vpop.permute.xlu0 %6774  ;;  %11228 = vmatprep.mubr.msk.bf16.mxu0 %vm12162_vm1, %v15223_v16 }
0x1011   : > { %v6780_v0 = vsel %vm694_vm2, %v6775_v38, 0  ;;  %11223 = vmatmul.mubr.msk.bf16.vlgmr.msra.gmra.mrb[216].mxu1 %vm694_vm2, %v13998_v54  ;;  %11238 = vmatprep.subr.bf16.mxu0 %v15223_v16 }
0x1012   : > { %v5616_v35 = vpop.f32.mrb[156].mxu0  ;;  %v7287_v11 = vpop.permute.xlu1 %7286  ;;  %11233 = vmatpush3.bf16.xpose.msra.mxu1 %v6780_v0  ;;  %11234 = vmatprep.mubr.msk.bf16.mxu1 %vm12162_vm1, %v15223_v16 }
0x1013   : > { %v14193_v33 = vmul.f32 0.35355338, %v5616_v35  ;;  %v5664_v2 = vpop.f32.mrb[172].mxu1  ;;  %v11086_v45 = vpop.f32.mrb[157].mxu0  ;;  %11244 = vmatprep.subr.bf16.mxu1 %v15223_v16  ;;  %v7292_v41 = vsel %vm2650_vm3, %v7287_v11, 0 }
0x1014   : > { %v14196_v4 = vmul.f32 0.35355338, %v5664_v2  ;;  %v11092_v12 = vpop.f32.mrb[173].mxu1  ;;  %v5619_v30 = vpop.f32.mrb[158].mxu0 }
0x1015   : > { %v5667_v53 = vpop.f32.mrb[174].mxu1  ;;  %v7239_v34 = vpop.permute.xlu0 %7238  ;;  %v6872_v44 = vsel %vm694_vm2, %v14193_v33, -inf }
0x1016   : > { %v11087_v21 = vpop.f32.mrb[159].mxu0  ;;  %v11093_v43 = vpop.f32.mrb[175].mxu1  ;;  %v6875_v29 = vsel %vm694_vm2, %v14196_v4, -inf  ;;  %6873 = vmax.xlane.f32.xlu0 %v6872_v44  ;;  %v7244_v51 = vsel %vm2650_vm3, %v7239_v34, 0 }
0x1017   : > { %6876 = vmax.xlane.f32.xlu1 %v6875_v29  ;;  %11229 = vmatmul.mubr.msk.bf16.vlgmr.msra.gmra.mrb[204].mxu0 %vm694_vm2, %v14011_v18  ;;  %v14214_v25 = vpop.permute.xlu1 %7382 }
0x1018   : > { %11239 = vmatpush3.bf16.msra.mxu0 %v7244_v51  ;;  %11240 = vmatprep.mubr.msk.bf16.mxu0 %vm12162_vm1, %v15223_v16 }
0x1019   : > { %11235 = vmatmul.mubr.msk.bf16.vlgmr.msra.gmra.mrb[220].mxu1 %vm694_vm2, %v14018_v10  ;;  %11250 = vmatprep.subr.bf16.mxu0 %v15223_v16  ;;  %v14216_v1 = vpop.permute.xlu0 %7334 }
0x101a   : > { %11245 = vmatpush3.bf16.msra.mxu1 %v7292_v41  ;;  %11246 = vmatprep.mubr.msk.bf16.mxu1 %vm12162_vm1, %v15223_v16 }
0x101b   : > { %11256 = vmatprep.subr.bf16.mxu1 %v15223_v16  ;;  %v14218_v5 = vpop.permute.xlu1 %7478 }
0x101d   : > { %v14220_v17 = vpop.permute.xlu0 %7430 }
0x101f   : > { %v14222_v31 = vpop.permute.xlu1 %7574 }
0x1021   : > { %v14224_v61 = vpop.permute.xlu0 %7526 }
0x1023   : > { %v14226_v48 = vpop.permute.xlu1 %7670 }
0x1025   : > { %v14228_v32 = vpop.permute.xlu0 %7622 }
0x1027   : > { %v14230_v50 = vpop.permute.xlu1 %7766 }
0x1029   : > { %v14232_v58 = vpop.permute.xlu0 %7718 }
0x102b   : > { %v14242_v6 = vpop.permute.xlu1 %7958 }
0x102c   : > { %15252 = vst [vmem:[#allocation21_spill] sm:$0xff] %v14242_v6 }
0x102d   : > { %v14244_v13 = vpop.permute.xlu0 %7814 }
0x102f   : > { %v14254_v21 = vpop.permute.xlu1 %8054 }
0x1030   : > { %15253 = vst [vmem:[#allocation23_spill] sm:$0xff] %v14254_v21 }
0x1031   : > { %v14256_v29 = vpop.permute.xlu0 %7910 }
0x105b   : > { %v5712_v46 = vpop.f32.mrb[160].mxu0 }
0x105c   : > { %v14234_v22 = vmul.f32 0.35355338, %v5712_v46  ;;  %v11098_v37 = vpop.f32.mrb[161].mxu0 }
0x105d   : > { %v5715_v3 = vpop.f32.mrb[162].mxu0  ;;  %v5760_v56 = vpop.f32.mrb[176].mxu1 }
0x105e   : > { %v14236_v62 = vmul.f32 0.35355338, %v5760_v56  ;;  %v11099_v49 = vpop.f32.mrb[163].mxu0  ;;  %v11104_v63 = vpop.f32.mrb[177].mxu1  ;;  %v6878_v9 = vsel %vm694_vm2, %v14234_v22, -inf }
0x105f   : > { %v5763_v42 = vpop.f32.mrb[178].mxu1  ;;  %6879 = vmax.xlane.f32.xlu0 %v6878_v9 }
0x1060   : > { %v11105_v8 = vpop.f32.mrb[179].mxu1  ;;  %v6881_v57 = vsel %vm694_vm2, %v14236_v62, -inf  ;;  %v14264_v42 = vpop.permute.xlu1 %8150 }
0x1061   : > { %6882 = vmax.xlane.f32.xlu1 %v6881_v57  ;;  %15254 = vst [vmem:[#allocation5_spill] sm:$0xff] %v14264_v42  ;;  %v14266_v57 = vpop.permute.xlu0 %8006 }
0x1063   : > { %v5808_v55 = vpop.f32.mrb[164].mxu0 }
0x1064   : > { %v14246_v38 = vmul.f32 0.35355338, %v5808_v55  ;;  %v11110_v0 = vpop.f32.mrb[165].mxu0 }
0x1065   : > { %v5811_v35 = vpop.f32.mrb[166].mxu0  ;;  %v5856_v11 = vpop.f32.mrb[180].mxu1 }
0x1066   : > { %v14248_v2 = vmul.f32 0.35355338, %v5856_v11  ;;  %v11111_v45 = vpop.f32.mrb[167].mxu0  ;;  %v11116_v12 = vpop.f32.mrb[181].mxu1  ;;  %v6884_v30 = vsel %vm694_vm2, %v14246_v38, -inf }
0x1067   : > { %v5859_v53 = vpop.f32.mrb[182].mxu1  ;;  %6885 = vmax.xlane.f32.xlu0 %v6884_v30 }
0x1068   : > { %v11117_v34 = vpop.f32.mrb[183].mxu1  ;;  %v6887_v44 = vsel %vm694_vm2, %v14248_v2, -inf }
0x1069   : > { %6888 = vmax.xlane.f32.xlu1 %v6887_v44  ;;  %v14274_v44 = vpop.permute.xlu1 %8342 }
0x106a   : > { %15255 = vst [vmem:[#allocation8_spill] sm:$0xff] %v14274_v44 }
0x106b   : > { %v5904_v43 = vpop.f32.mrb[168].mxu0 }
0x106c   : > { %v14258_v51 = vmul.f32 0.35355338, %v5904_v43  ;;  %v11122_v41 = vpop.f32.mrb[169].mxu0 }
0x106d   : > { %v5907_v46 = vpop.f32.mrb[170].mxu0  ;;  %v14260_v37 = vpop.f32.mrb[184].mxu1 }
0x106e   : > { %v11123_v3 = vpop.f32.mrb[171].mxu0  ;;  %v11128_v56 = vpop.f32.mrb[185].mxu1  ;;  %v6890_v49 = vsel %vm694_vm2, %v14258_v51, -inf }
0x106f   : > { %v5955_v63 = vpop.f32.mrb[186].mxu1  ;;  %6891 = vmax.xlane.f32.xlu0 %v6890_v49  ;;  %v14278_v41 = vpop.permute.xlu0 %8102 }
0x1070   : > { %v11129_v9 = vpop.f32.mrb[187].mxu1  ;;  %15256 = vst [vmem:[#allocation7_spill] sm:$0xff] %v14278_v41 }
0x1073   : > { %v6000_v8 = vpop.f32.mrb[172].mxu0 }
0x1074   : > { %v14268_v55 = vmul.f32 0.35355338, %v6000_v8  ;;  %v11134_v0 = vpop.f32.mrb[173].mxu0 }
0x1075   : > { %v6003_v35 = vpop.f32.mrb[174].mxu0  ;;  %v6048_v11 = vpop.f32.mrb[188].mxu1 }
0x1076   : > { %v11135_v45 = vpop.f32.mrb[175].mxu0  ;;  %v11140_v12 = vpop.f32.mrb[189].mxu1  ;;  %v6896_v30 = vsel %vm694_vm2, %v14268_v55, -inf }
0x1077   : > { %v6051_v53 = vpop.f32.mrb[190].mxu1  ;;  %6897 = vmax.xlane.f32.xlu0 %v6896_v30  ;;  %v14280_v0 = vpop.permute.xlu1 %8438 }
0x1078   : > { %v11141_v34 = vpop.f32.mrb[191].mxu1  ;;  %15257 = vst [vmem:[#allocation6_spill] sm:$0xff] %v14280_v0  ;;  %v14282_v45 = vpop.permute.xlu0 %8198 }
0x1079   : > { %15258 = vst [vmem:[#allocation10_spill] sm:$0xff] %v14282_v45 }
0x107a   : > { %8486 = vrot.lane.b32.xlu1 %v13971_v47, %s12166_s14 }
0x107b   : > { %v14276_v43 = vpop.f32.mrb[176].mxu0 }
0x107c   : > { %v11146_v46 = vpop.f32.mrb[177].mxu0  ;;  %v14284_v59 = vpop.permute.xlu0 %8294 }
0x107d   : > { %v6099_v3 = vpop.f32.mrb[178].mxu0  ;;  %v6144_v56 = vpop.f32.mrb[192].mxu1  ;;  %15259 = vst [vmem:[#allocation9_spill] sm:$0xff] %v14284_v59 }
0x107e   : > { %v11147_v49 = vpop.f32.mrb[179].mxu0  ;;  %v11152_v63 = vpop.f32.mrb[193].mxu1 }
0x107f   : > { %v6147_v9 = vpop.f32.mrb[194].mxu1  ;;  %v14288_v3 = vpop.permute.xlu1 %7862 }
0x1080   : > { %v11153_v8 = vpop.f32.mrb[195].mxu1  ;;  %v14292_v28 = vpop.permute.xlu0 %8390 }
0x1081   : > { %15260 = vst [vmem:[#allocation12_spill] sm:$0xff] %v14292_v28 }
0x1083   : > { %v6192_v35 = vpop.f32.mrb[180].mxu0 }
0x1084   : > { %v11158_v12 = vpop.f32.mrb[181].mxu0 }
0x1085   : > { %v6195_v47 = vpop.f32.mrb[182].mxu0  ;;  %v6240_v30 = vpop.f32.mrb[196].mxu1 }
0x1086   : > { %v11159_v53 = vpop.f32.mrb[183].mxu0  ;;  %v11164_v34 = vpop.f32.mrb[197].mxu1 }
0x1087   : > { %v6243_v19 = vpop.f32.mrb[198].mxu1 }
0x1088   : > { %v11165_v52 = vpop.f32.mrb[199].mxu1  ;;  %v14294_v19 = vpop.permute.xlu1 %8246 }
0x1089   : > { %15261 = vst [vmem:[#allocation11_spill] sm:$0xff] %v14294_v19 }
0x108b   : > { %v14286_v46 = vpop.f32.mrb[184].mxu0 }
0x108c   : > { %v11170_v49 = vpop.f32.mrb[185].mxu0  ;;  %v6859_v34 = vpop.xlane.xlu0 %6858 }
0x108d   : > { %v6291_v63 = vpop.f32.mrb[186].mxu0  ;;  %8534 = vrot.lane.b32.xlu0 %v13978_v36, %s12166_s14  ;;  %v6336_v9 = vpop.f32.mrb[200].mxu1  ;;  %v6951_v36 = vsub.f32 %v14136_v24, %v6859_v34  ;;  %v14312_v34 = vmul.f32 0.35355338, %v6240_v30 }
0x108e   : > { %v11171_v8 = vpop.f32.mrb[187].mxu0  ;;  %v11176_v12 = vpop.f32.mrb[201].mxu1 }
0x108f   : > { %v6339_v47 = vpop.f32.mrb[202].mxu1  ;;  %v14300_v8 = vmul.f32 0.35355338, %v14260_v37  ;;  %v6856_v12 = vpop.xlane.xlu1 %6855 }
0x1090   : > { %v11177_v53 = vpop.f32.mrb[203].mxu1  ;;  %v6984_v47 = vmul.f32 1.442695, %v6951_v36  ;;  %v14325_v36 = vmul.f32 0.35355338, %v6192_v35 }
0x1091   : > { %v14302_v53 = vmul.f32 0.35355338, %v6048_v11  ;;  %v6893_v44 = vsel %vm694_vm2, %v14300_v8, -inf }
0x1092   : > { %11926 = vpow2.f32 %v6984_v47 }
0x1093   : > { %v14296_v52 = vpop.f32.mrb[188].mxu0  ;;  %v6899_v24 = vsel %vm694_vm2, %v14302_v53, -inf }
0x1094   : > { %v11182_v39 = vpop.f32.mrb[189].mxu0  ;;  %v6865_v28 = vpop.xlane.xlu1 %6864 }
0x1095   : > { %v6387_v40 = vpop.f32.mrb[190].mxu0  ;;  %v6432_v26 = vpop.f32.mrb[204].mxu1  ;;  %v6950_v39 = vsub.f32 %v14133_v60, %v6856_v12 }
0x1096   : > { %v11183_v49 = vpop.f32.mrb[191].mxu0  ;;  %v11188_v63 = vpop.f32.mrb[205].mxu1  ;;  %v6953_v40 = vsub.f32 %v14156_v23, %v6865_v28  ;;  %v14318_v28 = vmul.f32 0.35355338, %v14276_v43  ;;  %v14329_v43 = vmul.f32 0.35355338, %v6336_v9 }
0x1097   : > { %v6435_v7 = vpop.f32.mrb[206].mxu1  ;;  %v6982_v37 = vmul.f32 1.442695, %v6950_v39 }
0x1098   : > { %v11189_v0 = vpop.f32.mrb[207].mxu1  ;;  %v14308_v7 = vmul.f32 0.35355338, %v6144_v56  ;;  %v6988_v11 = vmul.f32 1.442695, %v6953_v40  ;;  %v6908_v40 = vsel %vm694_vm2, %v14325_v36, -inf }
0x1099   : > { %v6862_v0 = vpop.xlane.xlu0 %6861  ;;  %11928 = vpow2.f32 %v6982_v37 }
0x109a   : > { %v6905_v63 = vsel %vm694_vm2, %v14308_v7, -inf  ;;  %v6952_v60 = vsub.f32 %v14153_v14, %v6862_v0  ;;  %11930 = vpow2.f32 %v6988_v11  ;;  %v6902_v14 = vsel %vm694_vm2, %v14318_v28, -inf }
0x109b   : > { %v14343_v0 = vmul.f32 0.35355338, %v14286_v46  ;;  %v14347_v11 = vmul.f32 0.35355338, %v6432_v26  ;;  %v14360_v26 = vmul.f32 0.35355338, %v14296_v52 }
0x109c   : > { %v6871_v49 = vpop.xlane.xlu1 %6870  ;;  %v14323_v56 = vpop.eup %11926  ;;  %v6986_v30 = vmul.f32 1.442695, %v6952_v60 }
0x109d   : > { %v6955_v23 = vsub.f32 %v14176_v27, %v6871_v49  ;;  %v6868_v12 = vpop.xlane.xlu0 %6867  ;;  %v7049_v27 = vsel %vm694_vm2, %v14323_v56, 0.0  ;;  %v6923_v46 = vsel %vm694_vm2, %v14347_v11, -inf }
0x109e   : > { %6894 = vmax.xlane.f32.xlu1 %v6893_v44  ;;  %v6911_v44 = vsel %vm694_vm2, %v14312_v34, -inf  ;;  %11932 = vpow2.f32 %v6986_v30  ;;  %v6954_v39 = vsub.f32 %v14173_v20, %v6868_v12  ;;  %v6920_v12 = vsel %vm694_vm2, %v14360_v26, -inf }
0x109f   : > { %v6992_v47 = vmul.f32 1.442695, %v6955_v23 }
0x10a0   : > { %v6990_v9 = vmul.f32 1.442695, %v6954_v39 }
0x10a1   : > { %11934 = vpow2.f32 %v6992_v47 }
0x10a2   : > { %6900 = vmax.xlane.f32.xlu1 %v6899_v24  ;;  %v6917_v24 = vsel %vm694_vm2, %v14329_v43, -inf  ;;  %11936 = vpow2.f32 %v6990_v9 }
0x10a3   : > { %v14336_v35 = vpop.eup %11928  ;;  %v6874_v47 = vpop.xlane.xlu0 %6873 }
0x10a4   : > { %v14340_v37 = vpop.eup %11930  ;;  %v7046_v20 = vsel %vm694_vm2, %v14336_v35, 0.0  ;;  %v6956_v39 = vsub.f32 %v14193_v33, %v6874_v47 }
0x10a5   : > { %v7055_v49 = vsel %vm694_vm2, %v14340_v37, 0.0 }
0x10a6   : > { %6906 = vmax.xlane.f32.xlu1 %v6905_v63  ;;  %v6914_v63 = vsel %vm694_vm2, %v14343_v0, -inf }
0x10a8   : > { %v14353_v60 = vpop.eup %11932 }
0x10aa   : > { %6912 = vmax.xlane.f32.xlu1 %v6911_v44  ;;  %v7052_v44 = vsel %vm694_vm2, %v14353_v60, 0.0 }
0x10ab   : > { %v14357_v23 = vpop.eup %11934 }
0x10ac   : > { %6903 = vmax.xlane.f32.xlu0 %v6902_v14  ;;  %v7061_v30 = vsel %vm694_vm2, %v14357_v23, 0.0  ;;  %v14368_v14 = vpop.eup %11936 }
0x10ad   : > { %v7058_v52 = vsel %vm694_vm2, %v14368_v14, 0.0 }
0x10ae   : > { %7050 = vadd.xlane.f32.xlu1 %v7049_v27  ;;  %v6877_v27 = vpop.xlane.xlu1 %6876 }
0x10b0   : > { %6909 = vmax.xlane.f32.xlu0 %v6908_v40  ;;  %v6957_v40 = vsub.f32 %v14196_v4, %v6877_v27 }
0x10b2   : > { %6918 = vmax.xlane.f32.xlu1 %v6917_v24  ;;  %v6994_v24 = vmul.f32 1.442695, %v6956_v39  ;;  %v6996_v9 = vmul.f32 1.442695, %v6957_v40 }
0x10b4   : > { %7047 = vadd.xlane.f32.xlu0 %v7046_v20  ;;  %11938 = vpow2.f32 %v6994_v24 }
0x10b5   : > { %11940 = vpow2.f32 %v6996_v9 }
0x10b6   : > { %7056 = vadd.xlane.f32.xlu1 %v7055_v49 }
0x10b8   : > { %6915 = vmax.xlane.f32.xlu0 %v6914_v63 }
0x10ba   : > { %6924 = vmax.xlane.f32.xlu1 %v6923_v46 }
0x10bc   : > { %7053 = vadd.xlane.f32.xlu0 %v7052_v44 }
0x10be   : > { %7062 = vadd.xlane.f32.xlu1 %v7061_v30  ;;  %v14380_v47 = vpop.eup %11938 }
0x10bf   : > { %v14384_v39 = vpop.eup %11940  ;;  %v7064_v40 = vsel %vm694_vm2, %v14380_v47, 0.0 }
0x10c0   : > { %6921 = vmax.xlane.f32.xlu0 %v6920_v12 }
0x10c4   : > { %7059 = vadd.xlane.f32.xlu0 %v7058_v52 }
0x10d2   : > { %v6480_v20 = vpop.f32.mrb[192].mxu0 }
0x10d3   : > { %v14374_v49 = vmul.f32 0.35355338, %v6480_v20  ;;  %v11194_v63 = vpop.f32.mrb[193].mxu0  ;;  %v7067_v20 = vsel %vm694_vm2, %v14384_v39, 0.0 }
0x10d4   : > { %v6483_v46 = vpop.f32.mrb[194].mxu0  ;;  %v6528_v44 = vpop.f32.mrb[208].mxu1 }
0x10d5   : > { %v14376_v30 = vmul.f32 0.35355338, %v6528_v44  ;;  %v11195_v12 = vpop.f32.mrb[195].mxu0  ;;  %v11200_v59 = vpop.f32.mrb[209].mxu1  ;;  %v6926_v33 = vsel %vm694_vm2, %v14374_v49, -inf }
0x10d6   : > { %v6531_v4 = vpop.f32.mrb[210].mxu1  ;;  %6927 = vmax.xlane.f32.xlu0 %v6926_v33 }
0x10d7   : > { %v11201_v27 = vpop.f32.mrb[211].mxu1  ;;  %v6929_v52 = vsel %vm694_vm2, %v14376_v30, -inf }
0x10d8   : > { %6930 = vmax.xlane.f32.xlu1 %v6929_v52 }
0x10da   : > { %v6576_v24 = vpop.f32.mrb[196].mxu0  ;;  %7065 = vadd.xlane.f32.xlu0 %v7064_v40 }
0x10db   : > { %v14388_v59 = vmul.f32 0.35355338, %v6576_v24  ;;  %v11206_v9 = vpop.f32.mrb[197].mxu0 }
0x10dc   : > { %v6579_v63 = vpop.f32.mrb[198].mxu0  ;;  %v6624_v46 = vpop.f32.mrb[212].mxu1  ;;  %7068 = vadd.xlane.f32.xlu1 %v7067_v20 }
0x10dd   : > { %v14392_v44 = vmul.f32 0.35355338, %v6624_v46  ;;  %v11207_v12 = vpop.f32.mrb[199].mxu0  ;;  %v11212_v33 = vpop.f32.mrb[213].mxu1  ;;  %v6932_v4 = vsel %vm694_vm2, %v14388_v59, -inf }
0x10de   : > { %v6627_v27 = vpop.f32.mrb[214].mxu1  ;;  %6933 = vmax.xlane.f32.xlu0 %v6932_v4 }
0x10df   : > { %v11213_v52 = vpop.f32.mrb[215].mxu1  ;;  %v6935_v40 = vsel %vm694_vm2, %v14392_v44, -inf }
0x10e0   : > { %6936 = vmax.xlane.f32.xlu1 %v6935_v40 }
0x10e2   : > { %v6672_v24 = vpop.f32.mrb[200].mxu0 }
0x10e3   : > { %v14398_v9 = vmul.f32 0.35355338, %v6672_v24  ;;  %v11218_v63 = vpop.f32.mrb[201].mxu0 }
0x10e4   : > { %v6675_v19 = vpop.f32.mrb[202].mxu0  ;;  %v6720_v20 = vpop.f32.mrb[216].mxu1 }
0x10e5   : > { %v14400_v46 = vmul.f32 0.35355338, %v6720_v20  ;;  %v11219_v12 = vpop.f32.mrb[203].mxu0  ;;  %v11224_v33 = vpop.f32.mrb[217].mxu1  ;;  %v6938_v45 = vsel %vm694_vm2, %v14398_v9, -inf }
0x10e6   : > { %v6723_v27 = vpop.f32.mrb[218].mxu1  ;;  %6939 = vmax.xlane.f32.xlu0 %v6938_v45 }
0x10e7   : > { %v11225_v4 = vpop.f32.mrb[219].mxu1  ;;  %v6941_v52 = vsel %vm694_vm2, %v14400_v46, -inf }
0x10e8   : > { %6942 = vmax.xlane.f32.xlu1 %v6941_v52 }
0x10ea   : > { %v6768_v40 = vpop.f32.mrb[204].mxu0 }
0x10eb   : > { %v14406_v24 = vmul.f32 0.35355338, %v6768_v40  ;;  %v11230_v63 = vpop.f32.mrb[205].mxu0 }
0x10ec   : > { %v6771_v19 = vpop.f32.mrb[206].mxu0  ;;  %v6816_v42 = vpop.f32.mrb[220].mxu1 }
0x10ed   : > { %v14408_v20 = vmul.f32 0.35355338, %v6816_v42  ;;  %v6880_v12 = vpop.xlane.xlu0 %6879  ;;  %v11231_v33 = vpop.f32.mrb[207].mxu0  ;;  %v6944_v41 = vsel %vm694_vm2, %v14406_v24, -inf }
0x10ee   : > { %v6958_v45 = vsub.f32 %v14234_v22, %v6880_v12  ;;  %v11236_v27 = vpop.f32.mrb[221].mxu1  ;;  %v6883_v4 = vpop.xlane.xlu1 %6882  ;;  %6945 = vmax.xlane.f32.xlu1 %v6944_v41 }
0x10ef   : > { %v6959_v52 = vsub.f32 %v14236_v62, %v6883_v4  ;;  %v6819_v21 = vpop.f32.mrb[222].mxu1  ;;  %v6947_v40 = vsel %vm694_vm2, %v14408_v20, -inf }
0x10f0   : > { %v6998_v63 = vmul.f32 1.442695, %v6958_v45  ;;  %v11237_v19 = vpop.f32.mrb[223].mxu1  ;;  %6948 = vmax.xlane.f32.xlu0 %v6947_v40 }
0x10f1   : > { %v7000_v42 = vmul.f32 1.442695, %v6959_v52 }
0x10f2   : > { %11942 = vpow2.f32 %v6998_v63 }
0x10f3   : > { %11944 = vpow2.f32 %v7000_v42 }
0x10f4   : > { %v6886_v33 = vpop.xlane.xlu0 %6885 }
0x10f5   : > { %v6960_v6 = vsub.f32 %v14246_v38, %v6886_v33 }
0x10f6   : > { %v6889_v10 = vpop.xlane.xlu1 %6888 }
0x10f7   : > { %v7002_v22 = vmul.f32 1.442695, %v6960_v6  ;;  %v6961_v12 = vsub.f32 %v14248_v2, %v6889_v10 }
0x10f9   : > { %11946 = vpow2.f32 %v7002_v22  ;;  %v7004_v41 = vmul.f32 1.442695, %v6961_v12 }
0x10fb   : > { %11948 = vpow2.f32 %v7004_v41 }
0x10fc   : > { %v14418_v62 = vpop.eup %11942  ;;  %v6892_v21 = vpop.xlane.xlu0 %6891 }
0x10fd   : > { %v14420_v27 = vpop.eup %11944  ;;  %v6962_v45 = vsub.f32 %v14258_v51, %v6892_v21  ;;  %v7070_v4 = vsel %vm694_vm2, %v14418_v62, 0.0 }
0x10fe   : > { %7071 = vadd.xlane.f32.xlu0 %v7070_v4  ;;  %v7073_v38 = vsel %vm694_vm2, %v14420_v27, 0.0 }
0x10ff   : > { %v7006_v6 = vmul.f32 1.442695, %v6962_v45  ;;  %7074 = vadd.xlane.f32.xlu1 %v7073_v38 }
0x1101   : > { %11950 = vpow2.f32 %v7006_v6 }
0x1103   : > { %v14427_v10 = vpop.eup %11946 }
0x1104   : > { %v6898_v2 = vpop.xlane.xlu0 %6897  ;;  %v7076_v52 = vsel %vm694_vm2, %v14427_v10, 0.0 }
0x1105   : > { %v14431_v40 = vpop.eup %11948  ;;  %v6964_v51 = vsub.f32 %v14268_v55, %v6898_v2  ;;  %7077 = vadd.xlane.f32.xlu1 %v7076_v52  ;;  %v14444_v55 = vpop.permute.xlu1 %8486 }
0x1106   : > { %v7079_v63 = vsel %vm694_vm2, %v14431_v40, 0.0  ;;  %15262 = vst [vmem:[#allocation24_spill] sm:$0xff] %v14444_v55 }
0x1107   : > { %v7010_v19 = vmul.f32 1.442695, %v6964_v51  ;;  %7080 = vadd.xlane.f32.xlu0 %v7079_v63 }
0x1108   : > { %v14449_v51 = vpop.permute.xlu0 %8534 }
0x1109   : > { %11952 = vpow2.f32 %v7010_v19 }
0x110b   : > { %v14436_v42 = vpop.eup %11950 }
0x110c   : > { %v7082_v33 = vsel %vm694_vm2, %v14436_v42, 0.0 }
0x110d   : > { %7083 = vadd.xlane.f32.xlu1 %v7082_v33 }
0x1113   : > { %v14440_v22 = vpop.eup %11952 }
0x1114   : > { %v7088_v12 = vsel %vm694_vm2, %v14440_v22, 0.0 }
0x1115   : > { %7089 = vadd.xlane.f32.xlu1 %v7088_v12 }
0x112b   : > { %v6895_v41 = vpop.xlane.xlu1 %6894 }
0x112c   : > { %v6963_v21 = vsub.f32 %v14300_v8, %v6895_v41 }
0x112e   : > { %v7008_v45 = vmul.f32 1.442695, %v6963_v21 }
0x112f   : > { %v6901_v4 = vpop.xlane.xlu1 %6900 }
0x1130   : > { %11954 = vpow2.f32 %v7008_v45  ;;  %v6965_v38 = vsub.f32 %v14302_v53, %v6901_v4 }
0x1132   : > { %v7012_v6 = vmul.f32 1.442695, %v6965_v38 }
0x1133   : > { %v6907_v2 = vpop.xlane.xlu1 %6906 }
0x1134   : > { %11956 = vpow2.f32 %v7012_v6  ;;  %v6967_v52 = vsub.f32 %v14308_v7, %v6907_v2 }
0x1136   : > { %v7016_v63 = vmul.f32 1.442695, %v6967_v52 }
0x1137   : > { %v6913_v19 = vpop.xlane.xlu1 %6912 }
0x1138   : > { %11958 = vpow2.f32 %v7016_v63  ;;  %v6969_v33 = vsub.f32 %v14312_v34, %v6913_v19 }
0x1139   : > { %v6904_v12 = vpop.xlane.xlu0 %6903 }
0x113a   : > { %v14452_v55 = vpop.eup %11954  ;;  %v7020_v8 = vmul.f32 1.442695, %v6969_v33  ;;  %v6966_v41 = vsub.f32 %v14318_v28, %v6904_v12 }
0x113b   : > { %v7051_v21 = vpop.xlane.xlu1 %7050  ;;  %v7085_v53 = vsel %vm694_vm2, %v14452_v55, 0.0 }
0x113c   : > { %11960 = vpow2.f32 %v7020_v8  ;;  %v7014_v45 = vmul.f32 1.442695, %v6966_v41  ;;  %7086 = vadd.xlane.f32.xlu0 %v7085_v53 }
0x113d   : > { %11962 = vrcp.f32 %v7051_v21  ;;  %v6910_v7 = vpop.xlane.xlu0 %6909 }
0x113e   : > { %v14457_v4 = vpop.eup %11956  ;;  %11964 = vpow2.f32 %v7014_v45  ;;  %v6968_v34 = vsub.f32 %v14325_v36, %v6910_v7 }
0x113f   : > { %v6919_v38 = vpop.xlane.xlu1 %6918  ;;  %v7091_v6 = vsel %vm694_vm2, %v14457_v4, 0.0 }
0x1140   : > { %v7018_v2 = vmul.f32 1.442695, %v6968_v34  ;;  %v6971_v28 = vsub.f32 %v14329_v43, %v6919_v38  ;;  %7092 = vadd.xlane.f32.xlu0 %v7091_v6 }
0x1141   : > { %v7048_v52 = vpop.xlane.xlu0 %7047 }
0x1142   : > { %v14463_v63 = vpop.eup %11958  ;;  %11966 = vpow2.f32 %v7018_v2  ;;  %v7024_v19 = vmul.f32 1.442695, %v6971_v28 }
0x1143   : > { %11968 = vrcp.f32 %v7048_v52  ;;  %v7057_v33 = vpop.xlane.xlu1 %7056  ;;  %v7097_v12 = vsel %vm694_vm2, %v14463_v63, 0.0 }
0x1144   : > { %11970 = vpow2.f32 %v7024_v19  ;;  %7098 = vadd.xlane.f32.xlu0 %v7097_v12 }
0x1145   : > { %11972 = vrcp.f32 %v7057_v33  ;;  %v6916_v36 = vpop.xlane.xlu0 %6915  ;;  %v7388_v33 = vsel %vm2650_vm3, %v14214_v25, 0 }
0x1146   : > { %v14467_v8 = vpop.eup %11960  ;;  %v6970_v41 = vsub.f32 %v14343_v0, %v6916_v36 }
0x1147   : > { %v11963_v43 = vpop.eup %11962  ;;  %v6925_v21 = vpop.xlane.xlu1 %6924  ;;  %v7103_v53 = vsel %vm694_vm2, %v14467_v8, 0.0 }
0x1148   : > { %v14472_v45 = vpop.eup %11964  ;;  %v7175_v7 = vmul.f32 %v11963_v43, %v14323_v56  ;;  %v7022_v34 = vmul.f32 1.442695, %v6970_v41  ;;  %v6973_v38 = vsub.f32 %v14347_v11, %v6925_v21  ;;  %7104 = vadd.xlane.f32.xlu0 %v7103_v53 }
0x1149   : > { %v7054_v6 = vpop.xlane.xlu0 %7053  ;;  %v7094_v2 = vsel %vm694_vm2, %v14472_v45, 0.0 }
0x114a   : > { %11974 = vpow2.f32 %v7022_v34  ;;  %v7028_v28 = vmul.f32 1.442695, %v6973_v38  ;;  %7095 = vadd.xlane.f32.xlu1 %v7094_v2  ;;  %v7207_v0 = vpack.c.bf16 %v7175_v7, %v7175_v7 }
0x114b   : > { %11976 = vrcp.f32 %v7054_v6  ;;  %v7063_v52 = vpop.xlane.xlu1 %7062  ;;  %v7340_v6 = vsel %vm2650_vm3, %v14216_v1, 0 }
0x114c   : > { %v14478_v19 = vpop.eup %11966  ;;  %11978 = vpow2.f32 %v7028_v28  ;;  %11247 = vmatmul.mubr.msk.bf16.vlgmr.msra.gmra.mrb[224].mxu1 %vm694_vm2, %v7207_v0 }
0x114d   : > { %v11969_v56 = vpop.eup %11968  ;;  %11257 = vmatpush3.bf16.msra.mxu1 %v7388_v33  ;;  %11980 = vrcp.f32 %v7063_v52  ;;  %v6922_v11 = vpop.xlane.xlu0 %6921  ;;  %v7100_v12 = vsel %vm694_vm2, %v14478_v19, 0.0  ;;  %11258 = vmatprep.mubr.msk.bf16.mxu1 %vm12162_vm1, %v15223_v16 }
0x114e   : > { %v14487_v36 = vpop.eup %11970  ;;  %v7174_v41 = vmul.f32 %v11969_v56, %v14336_v35  ;;  %v6972_v43 = vsub.f32 %v14360_v26, %v6922_v11  ;;  %7101 = vadd.xlane.f32.xlu1 %v7100_v12  ;;  %11268 = vmatprep.subr.bf16.mxu1 %v15223_v16  ;;  %v7436_v11 = vsel %vm2650_vm3, %v14220_v17, 0 }
0x114f   : > { %v11973_v25 = vpop.eup %11972  ;;  %v7109_v21 = vsel %vm694_vm2, %v14487_v36, 0.0 }
0x1150   : > { %v7177_v53 = vmul.f32 %v11973_v25, %v14340_v37  ;;  %v7026_v7 = vmul.f32 1.442695, %v6972_v43  ;;  %7110 = vadd.xlane.f32.xlu0 %v7109_v21  ;;  %v7206_v34 = vpack.c.bf16 %v7174_v41, %v7174_v41  ;;  %v7484_v37 = vsel %vm2650_vm3, %v14218_v5, 0 }
0x1151   : > { %v7060_v38 = vpop.xlane.xlu0 %7059  ;;  %v7580_v41 = vsel %vm2650_vm3, %v14222_v31, 0  ;;  %v7532_v31 = vsel %vm2650_vm3, %v14224_v61, 0 }
0x1152   : > { %11982 = vpow2.f32 %v7026_v7  ;;  %11241 = vmatmul.mubr.msk.bf16.vlgmr.msra.gmra.mrb[208].mxu0 %vm694_vm2, %v7206_v34  ;;  %v7209_v35 = vpack.c.bf16 %v7177_v53, %v7177_v53 }
0x1153   : > { %11251 = vmatpush3.bf16.msra.mxu0 %v7340_v6  ;;  %11984 = vrcp.f32 %v7060_v38  ;;  %11252 = vmatprep.mubr.msk.bf16.mxu0 %vm12162_vm1, %v15223_v16 }
0x1154   : > { %v14500_v26 = vpop.eup %11974  ;;  %11259 = vmatmul.mubr.msk.bf16.vlgmr.msra.gmra.mrb[228].mxu1 %vm694_vm2, %v7209_v35  ;;  %11262 = vmatprep.subr.bf16.mxu0 %v15223_v16 }
0x1155   : > { %v11977_v2 = vpop.eup %11976  ;;  %11269 = vmatpush3.bf16.msra.mxu1 %v7484_v37  ;;  %v7106_v1 = vsel %vm694_vm2, %v14500_v26, 0.0  ;;  %11270 = vmatprep.mubr.msk.bf16.mxu1 %vm12162_vm1, %v15223_v16 }
0x1156   : > { %v14510_v28 = vpop.eup %11978  ;;  %v7176_v0 = vmul.f32 %v11977_v2, %v14353_v60  ;;  %7107 = vadd.xlane.f32.xlu1 %v7106_v1  ;;  %11280 = vmatprep.subr.bf16.mxu1 %v15223_v16 }
0x1157   : > { %v11981_v5 = vpop.eup %11980  ;;  %v7115_v52 = vsel %vm694_vm2, %v14510_v28, 0.0 }
0x1158   : > { %v7179_v33 = vmul.f32 %v11981_v5, %v14357_v23  ;;  %7116 = vadd.xlane.f32.xlu0 %v7115_v52  ;;  %v7208_v56 = vpack.c.bf16 %v7176_v0, %v7176_v0 }
0x115a   : > { %11253 = vmatmul.mubr.msk.bf16.vlgmr.msra.gmra.mrb[212].mxu0 %vm694_vm2, %v7208_v56  ;;  %v7211_v12 = vpack.c.bf16 %v7179_v33, %v7179_v33 }
0x115b   : > { %11263 = vmatpush3.bf16.msra.mxu0 %v7436_v11  ;;  %11264 = vmatprep.mubr.msk.bf16.mxu0 %vm12162_vm1, %v15223_v16  ;;  %v7628_v11 = vsel %vm2650_vm3, %v14228_v32, 0 }
0x115c   : > { %v14522_v60 = vpop.eup %11982  ;;  %11271 = vmatmul.mubr.msk.bf16.vlgmr.msra.gmra.mrb[232].mxu1 %vm694_vm2, %v7211_v12  ;;  %11274 = vmatprep.subr.bf16.mxu0 %v15223_v16 }
0x115d   : > { %v11985_v23 = vpop.eup %11984  ;;  %11281 = vmatpush3.bf16.msra.mxu1 %v7580_v41  ;;  %v7112_v17 = vsel %vm694_vm2, %v14522_v60, 0.0  ;;  %11282 = vmatprep.mubr.msk.bf16.mxu1 %vm12162_vm1, %v15223_v16 }
0x115e   : > { %v7178_v43 = vmul.f32 %v11985_v23, %v14368_v14  ;;  %7113 = vadd.xlane.f32.xlu1 %v7112_v17  ;;  %11292 = vmatprep.subr.bf16.mxu1 %v15223_v16 }
0x1160   : > { %v7210_v25 = vpack.c.bf16 %v7178_v43, %v7178_v43 }
0x1162   : > { %11265 = vmatmul.mubr.msk.bf16.vlgmr.msra.gmra.mrb[216].mxu0 %vm694_vm2, %v7210_v25 }
0x1163   : > { %11275 = vmatpush3.bf16.msra.mxu0 %v7532_v31  ;;  %v6928_v21 = vpop.xlane.xlu0 %6927  ;;  %11276 = vmatprep.mubr.msk.bf16.mxu0 %vm12162_vm1, %v15223_v16 }
0x1164   : > { %v6974_v53 = vsub.f32 %v14374_v49, %v6928_v21  ;;  %11286 = vmatprep.subr.bf16.mxu0 %v15223_v16 }
0x1165   : > { %v6931_v7 = vpop.xlane.xlu1 %6930 }
0x1166   : > { %v7030_v14 = vmul.f32 1.442695, %v6974_v53  ;;  %v6975_v34 = vsub.f32 %v14376_v30, %v6931_v7 }
0x1167   : > { %v7066_v38 = vpop.xlane.xlu0 %7065 }
0x1168   : > { %11986 = vpow2.f32 %v7030_v14  ;;  %v7032_v6 = vmul.f32 1.442695, %v6975_v34 }
0x1169   : > { %11988 = vrcp.f32 %v7066_v38  ;;  %v7069_v61 = vpop.xlane.xlu1 %7068 }
0x116a   : > { %11990 = vpow2.f32 %v7032_v6 }
0x116b   : > { %11992 = vrcp.f32 %v7069_v61  ;;  %v6934_v41 = vpop.xlane.xlu0 %6933 }
0x116c   : > { %v6976_v21 = vsub.f32 %v14388_v59, %v6934_v41 }
0x116d   : > { %v6937_v35 = vpop.xlane.xlu1 %6936 }
0x116e   : > { %v6977_v37 = vsub.f32 %v14392_v44, %v6937_v35  ;;  %v7034_v34 = vmul.f32 1.442695, %v6976_v21  ;;  %v8012_v21 = vsel %vm2650_vm3, %v14266_v57, 0  ;;  %v12092_v57 = vld [vmem:[%s15176_s2 + $0x20] ss:$8 sps:$4 sm:$0xff]  }
0x1170   : > { %v7036_v2 = vmul.f32 1.442695, %v6977_v37 }
0x1172   : > { %v14543_v1 = vpop.eup %11986  ;;  %11994 = vpow2.f32 %v7036_v2 }
0x1173   : > { %v11989_v49 = vpop.eup %11988  ;;  %v7118_v0 = vsel %vm694_vm2, %v14543_v1, 0.0  ;;  %v6940_v23 = vpop.xlane.xlu0 %6939 }
0x1174   : > { %v14547_v5 = vpop.eup %11990  ;;  %v7180_v30 = vmul.f32 %v11989_v49, %v14380_v47  ;;  %7119 = vadd.xlane.f32.xlu1 %v7118_v0  ;;  %v7676_v47 = vsel %vm2650_vm3, %v14226_v48, 0 }
0x1175   : > { %v11993_v52 = vpop.eup %11992  ;;  %v7121_v33 = vsel %vm694_vm2, %v14547_v5, 0.0  ;;  %v6943_v17 = vpop.xlane.xlu1 %6942 }
0x1176   : > { %v7181_v56 = vmul.f32 %v11993_v52, %v14384_v39  ;;  %7122 = vadd.xlane.f32.xlu0 %v7121_v33  ;;  %v7212_v44 = vpack.c.bf16 %v7180_v30, %v7180_v30 }
0x1178   : > { %11277 = vmatmul.mubr.msk.bf16.vlgmr.msra.gmra.mrb[220].mxu0 %vm694_vm2, %v7212_v44  ;;  %v7213_v12 = vpack.c.bf16 %v7181_v56, %v7181_v56 }
0x1179   : > { %11287 = vmatpush3.bf16.msra.mxu0 %v7628_v11  ;;  %11288 = vmatprep.mubr.msk.bf16.mxu0 %vm12162_vm1, %v15223_v16  ;;  %v7868_v11 = vsel %vm2650_vm3, %v14288_v3, 0 }
0x117a   : > { %11283 = vmatmul.mubr.msk.bf16.vlgmr.msra.gmra.mrb[236].mxu1 %vm694_vm2, %v7213_v12  ;;  %11298 = vmatprep.subr.bf16.mxu0 %v15223_v16 }
0x117b   : > { %11293 = vmatpush3.bf16.msra.mxu1 %v7676_v47  ;;  %11294 = vmatprep.mubr.msk.bf16.mxu1 %vm12162_vm1, %v15223_v16  ;;  %v6946_v43 = vpop.xlane.xlu1 %6945 }
0x117c   : > { %v14564_v39 = vpop.eup %11994  ;;  %11304 = vmatprep.subr.bf16.mxu1 %v15223_v16  ;;  %v6980_v59 = vsub.f32 %v14406_v24, %v6946_v43 }
0x117d   : > { %v7127_v32 = vsel %vm694_vm2, %v14564_v39, 0.0  ;;  %v6949_v48 = vpop.xlane.xlu0 %6948 }
0x117e   : > { %7128 = vadd.xlane.f32.xlu0 %v7127_v32  ;;  %v7042_v24 = vmul.f32 1.442695, %v6980_v59  ;;  %v6981_v52 = vsub.f32 %v14408_v20, %v6949_v48  ;;  %v7916_v32 = vsel %vm2650_vm3, %v14256_v29, 0  ;;  %v15264_v59 = vld [vmem:[#allocation21_spill] sm:$0xff] }
0x1180   : > { %v7044_v20 = vmul.f32 1.442695, %v6981_v52  ;;  %v15266_v52 = vld [vmem:[#allocation7_spill] sm:$0xff] }
0x1185   : > { %8582 = vrot.lane.b32.xlu1 %v13991_v15, %s12166_s14  ;;  %v6978_v15 = vsub.f32 %v14398_v9, %v6940_v23  ;;  %v7772_v9 = vsel %vm2650_vm3, %v14230_v50, 0 }
0x1187   : > { %v7038_v49 = vmul.f32 1.442695, %v6978_v15 }
0x118b   : > { %v7072_v25 = vpop.xlane.xlu0 %7071 }
0x118c   : > { %11996 = vrcp.f32 %v7072_v25  ;;  %v7075_v31 = vpop.xlane.xlu1 %7074 }
0x118d   : > { %11998 = vrcp.f32 %v7075_v31 }
0x1192   : > { %v7078_v53 = vpop.xlane.xlu1 %7077 }
0x1193   : > { %12000 = vrcp.f32 %v7078_v53 }
0x1194   : > { %8630 = vrot.lane.b32.xlu0 %v13998_v54, %s12166_s14  ;;  %v7081_v7 = vpop.xlane.xlu0 %7080  ;;  %v7724_v54 = vsel %vm2650_vm3, %v14232_v58, 0 }
0x1195   : > { %12002 = vrcp.f32 %v7081_v7  ;;  %v12093_v7 = vld [vmem:[%s15176_s2 + $0x30] ss:$8 sps:$4 sm:$0xff]  }
0x1196   : > { %v11997_v14 = vpop.eup %11996  ;;  %12004 = vpow2.f32 %v7034_v34 }
0x1197   : > { %v11999_v38 = vpop.eup %11998  ;;  %v7182_v6 = vmul.f32 %v11997_v14, %v14418_v62  ;;  %v15263_v14 = vld [vmem:[#allocation22_spill] sm:$0xff] }
0x1198   : > { %v7183_v61 = vmul.f32 %v11999_v38, %v14420_v27  ;;  %v6979_v27 = vsub.f32 %v14400_v46, %v6943_v17 }
0x1199   : > { %v7214_v35 = vpack.c.bf16 %v7182_v6, %v7182_v6 }
0x119a   : > { %v7084_v37 = vpop.xlane.xlu1 %7083  ;;  %v7215_v2 = vpack.c.bf16 %v7183_v61, %v7183_v61  ;;  %v7040_v46 = vmul.f32 1.442695, %v6979_v27 }
0x119b   : > { %12006 = vrcp.f32 %v7084_v37  ;;  %11289 = vmatmul.mubr.msk.bf16.vlgmr.msra.gmra.mrb[224].mxu0 %vm694_vm2, %v7214_v35  ;;  %v7964_v37 = vsel %vm2650_vm3, %v15264_v59, 0 }
0x119c   : > { %11299 = vmatpush3.bf16.msra.mxu0 %v7724_v54  ;;  %11295 = vmatmul.mubr.msk.bf16.vlgmr.msra.gmra.mrb[240].mxu1 %vm694_vm2, %v7215_v2  ;;  %12008 = vpow2.f32 %v7038_v49 }
0x119d   : > { %v12001_v62 = vpop.eup %12000  ;;  %11305 = vmatpush3.bf16.msra.mxu1 %v7772_v9  ;;  %11300 = vmatprep.mubr.msk.bf16.mxu0 %vm12162_vm1, %v15223_v16  ;;  %12010 = vpow2.f32 %v7042_v24 }
0x119e   : > { %v7184_v58 = vmul.f32 %v12001_v62, %v14427_v10  ;;  %11310 = vmatprep.subr.bf16.mxu0 %v15223_v16  ;;  %11306 = vmatprep.mubr.msk.bf16.mxu1 %vm12162_vm1, %v15223_v16  ;;  %v7820_v10 = vsel %vm2650_vm3, %v14244_v13, 0  ;;  %v15265_v62 = vld [vmem:[#allocation23_spill] sm:$0xff] }
0x119f   : > { %v12003_v0 = vpop.eup %12002  ;;  %11316 = vmatprep.subr.bf16.mxu1 %v15223_v16  ;;  %v8060_v27 = vsel %vm2650_vm3, %v15265_v62, 0 }
0x11a0   : > { %v7185_v50 = vmul.f32 %v12003_v0, %v14431_v40  ;;  %v7216_v30 = vpack.c.bf16 %v7184_v58, %v7184_v58  ;;  %v14597_v44 = vpop.eup %12004 }
0x11a1   : > { %v7124_v3 = vsel %vm694_vm2, %v14597_v44, 0.0 }
0x11a2   : > { %v7090_v33 = vpop.xlane.xlu1 %7089  ;;  %v7217_v56 = vpack.c.bf16 %v7185_v50, %v7185_v50 }
0x11a3   : > { %12012 = vrcp.f32 %v7090_v33  ;;  %11301 = vmatmul.mubr.msk.bf16.vlgmr.msra.gmra.mrb[228].mxu0 %vm694_vm2, %v7216_v30  ;;  %v8108_v33 = vsel %vm2650_vm3, %v15266_v52, 0 }
0x11a4   : > { %11311 = vmatpush3.bf16.msra.mxu0 %v7820_v10  ;;  %11307 = vmatmul.mubr.msk.bf16.vlgmr.msra.gmra.mrb[244].mxu1 %vm694_vm2, %v7217_v56  ;;  %12014 = vpow2.f32 %v7040_v46 }
0x11a5   : > { %v12007_v40 = vpop.eup %12006  ;;  %11317 = vmatpush3.bf16.msra.mxu1 %v7868_v11  ;;  %11312 = vmatprep.mubr.msk.bf16.mxu0 %vm12162_vm1, %v15223_v16  ;;  %12016 = vpow2.f32 %v7044_v20 }
0x11a6   : > { %v7186_v13 = vmul.f32 %v12007_v40, %v14436_v42  ;;  %11322 = vmatprep.subr.bf16.mxu0 %v15223_v16  ;;  %11318 = vmatprep.mubr.msk.bf16.mxu1 %vm12162_vm1, %v15223_v16  ;;  %v14611_v47 = vpop.eup %12008 }
0x11a7   : > { %11328 = vmatprep.subr.bf16.mxu1 %v15223_v16  ;;  %v14616_v42 = vpop.eup %12010  ;;  %v7130_v41 = vsel %vm694_vm2, %v14611_v47, 0.0 }
0x11a8   : > { %v7218_v12 = vpack.c.bf16 %v7186_v13, %v7186_v13  ;;  %v7136_v29 = vsel %vm694_vm2, %v14616_v42, 0.0 }
0x11a9   : > { %7125 = vadd.xlane.f32.xlu1 %v7124_v3 }
0x11ab   : > { %11313 = vmatmul.mubr.msk.bf16.vlgmr.msra.gmra.mrb[232].mxu0 %vm694_vm2, %v7218_v12 }
0x11ac   : > { %11323 = vmatpush3.bf16.msra.mxu0 %v7916_v32  ;;  %11324 = vmatprep.mubr.msk.bf16.mxu0 %vm12162_vm1, %v15223_v16  ;;  %v15268_v32 = vld [vmem:[#allocation10_spill] sm:$0xff] }
0x11ad   : > { %v12013_v23 = vpop.eup %12012  ;;  %7131 = vadd.xlane.f32.xlu1 %v7130_v41  ;;  %11334 = vmatprep.subr.bf16.mxu0 %v15223_v16 }
0x11ae   : > { %v7188_v17 = vmul.f32 %v12013_v23, %v14440_v22  ;;  %v14624_v48 = vpop.eup %12014 }
0x11af   : > { %v7133_v25 = vsel %vm694_vm2, %v14624_v48, 0.0  ;;  %v14630_v31 = vpop.eup %12016 }
0x11b0   : > { %v7220_v43 = vpack.c.bf16 %v7188_v17, %v7188_v17  ;;  %v7139_v22 = vsel %vm694_vm2, %v14630_v31, 0.0 }
0x11b1   : > { %7137 = vadd.xlane.f32.xlu1 %v7136_v29 }
0x11b3   : > { %11325 = vmatmul.mubr.msk.bf16.vlgmr.msra.gmra.mrb[236].mxu0 %vm694_vm2, %v7220_v43  ;;  %7134 = vadd.xlane.f32.xlu0 %v7133_v25 }
0x11b4   : > { %11335 = vmatpush3.bf16.msra.mxu0 %v8012_v21  ;;  %11336 = vmatprep.mubr.msk.bf16.mxu0 %vm12162_vm1, %v15223_v16 }
0x11b5   : > { %11346 = vmatprep.subr.bf16.mxu0 %v15223_v16 }
0x11b7   : > { %7140 = vadd.xlane.f32.xlu0 %v7139_v22  ;;  %v15270_v22 = vld [vmem:[#allocation9_spill] sm:$0xff] }
0x11c2   : > { %8678 = vrot.lane.b32.xlu1 %v14011_v18, %s12166_s14 }
0x11c6   : > { %8898 = vrot.lane.b32.xlu1 %v12092_v57, %s12167_s17  ;;  %v8300_v57 = vsel %vm2650_vm3, %v15270_v22, 0 }
0x11c9   : > { %v7087_v53 = vpop.xlane.xlu0 %7086 }
0x11ca   : > { %12018 = vrcp.f32 %v7087_v53  ;;  %8900 = vrot.lane.b32.xlu1 %v12093_v7, %s12167_s17  ;;  %v15271_v7 = vld [vmem:[#allocation8_spill] sm:$0xff]  ;;  %s9867_s17 = scalar_lea.sflag [#allocation3], %s215_s23 }
0x11cd   : > { %8726 = vrot.lane.b32.xlu0 %v15263_v14, %s12166_s14  ;;  %v7093_v34 = vpop.xlane.xlu0 %7092  ;;  %v8348_v14 = vsel %vm2650_vm3, %v15271_v7, 0  ;;  %s15275_s14 = smov 24  }
0x11ce   : > { %12020 = vrcp.f32 %v7093_v34 }
0x11d1   : > { %v7099_v18 = vpop.xlane.xlu0 %7098 }
0x11d2   : > { %12022 = vrcp.f32 %v7099_v18 }
0x11d4   : > { %v12019_v38 = vpop.eup %12018 }
0x11d5   : > { %v7187_v15 = vmul.f32 %v12019_v38, %v14452_v55  ;;  %v7105_v54 = vpop.xlane.xlu0 %7104  ;;  %v15272_v38 = vld [vmem:[#allocation12_spill] sm:$0xff] }
0x11d7   : > { %v7096_v6 = vpop.xlane.xlu1 %7095  ;;  %v7219_v61 = vpack.c.bf16 %v7187_v15, %v7187_v15  ;;  %v8396_v15 = vsel %vm2650_vm3, %v15272_v38, 0 }
0x11d8   : > { %v12021_v35 = vpop.eup %12020  ;;  %12024 = vrcp.f32 %v7096_v6 }
0x11d9   : > { %11319 = vmatmul.mubr.msk.bf16.vlgmr.msra.gmra.mrb[248].mxu1 %vm694_vm2, %v7219_v61  ;;  %v7189_v2 = vmul.f32 %v12021_v35, %v14457_v4 }
0x11da   : > { %11329 = vmatpush3.bf16.msra.mxu1 %v7964_v37  ;;  %11330 = vmatprep.mubr.msk.bf16.mxu1 %vm12162_vm1, %v15223_v16 }
0x11db   : > { %v7102_v49 = vpop.xlane.xlu1 %7101  ;;  %11340 = vmatprep.subr.bf16.mxu1 %v15223_v16  ;;  %v7221_v55 = vpack.c.bf16 %v7189_v2, %v7189_v2 }
0x11dc   : > { %12026 = vrcp.f32 %v7102_v49  ;;  %v12023_v9 = vpop.eup %12022 }
0x11dd   : > { %12028 = vrcp.f32 %v7105_v54  ;;  %v7191_v4 = vmul.f32 %v12023_v9, %v14463_v63  ;;  %v7111_v0 = vpop.xlane.xlu0 %7110  ;;  %v15267_v63 = vld [vmem:[#allocation5_spill] sm:$0xff]  ;;  %v15274_v9 = vld [vmem:[#allocation24_spill] sm:$0xff] }
0x11de   : > { %v8492_v62 = vsel %vm2650_vm3, %v15274_v9, 0 }
0x11df   : > { %v7223_v56 = vpack.c.bf16 %v7191_v4, %v7191_v4 }
0x11e1   : > { %11331 = vmatmul.mubr.msk.bf16.vlgmr.msra.gmra.mrb[252].mxu1 %vm694_vm2, %v7221_v55 }
0x11e2   : > { %v12025_v24 = vpop.eup %12024  ;;  %11341 = vmatpush3.bf16.msra.mxu1 %v8060_v27  ;;  %11342 = vmatprep.mubr.msk.bf16.mxu1 %vm12162_vm1, %v15223_v16 }
0x11e3   : > { %v7190_v58 = vmul.f32 %v12025_v24, %v14472_v45  ;;  %v7108_v50 = vpop.xlane.xlu1 %7107  ;;  %11352 = vmatprep.subr.bf16.mxu1 %v15223_v16  ;;  %v8156_v45 = vsel %vm2650_vm3, %v15267_v63, 0  ;;  %v8540_v24 = vsel %vm2650_vm3, %v14449_v51, 0 }
0x11e4   : > { %12030 = vrcp.f32 %v7108_v50 }
0x11e5   : > { %v7222_v30 = vpack.c.bf16 %v7190_v58, %v7190_v58  ;;  %12032 = vrcp.f32 %v7111_v0  ;;  %v7117_v20 = vpop.xlane.xlu0 %7116 }
0x11e6   : > { %v12027_v46 = vpop.eup %12026 }
0x11e7   : > { %11337 = vmatmul.mubr.msk.bf16.vlgmr.msra.gmra.mrb[240].mxu0 %vm694_vm2, %v7222_v30  ;;  %v12029_v10 = vpop.eup %12028  ;;  %v7192_v11 = vmul.f32 %v12027_v46, %v14478_v19  ;;  %v8204_v19 = vsel %vm2650_vm3, %v15268_v32, 0 }
0x11e8   : > { %11347 = vmatpush3.bf16.msra.mxu0 %v8108_v33  ;;  %11348 = vmatprep.mubr.msk.bf16.mxu0 %vm12162_vm1, %v15223_v16  ;;  %v7193_v40 = vmul.f32 %v12029_v10, %v14467_v8  ;;  %v15269_v8 = vld [vmem:[#allocation11_spill] sm:$0xff] }
0x11e9   : > { %11343 = vmatmul.mubr.msk.bf16.vlgmr.msra.gmra.mrb[0].mxu1 %vm694_vm2, %v7223_v56  ;;  %11358 = vmatprep.subr.bf16.mxu0 %v15223_v16  ;;  %v7224_v3 = vpack.c.bf16 %v7192_v11, %v7192_v11  ;;  %v8252_v17 = vsel %vm2650_vm3, %v15269_v8, 0 }
0x11ea   : > { %11353 = vmatpush3.bf16.msra.mxu1 %v8156_v45  ;;  %11354 = vmatprep.mubr.msk.bf16.mxu1 %vm12162_vm1, %v15223_v16  ;;  %v7225_v41 = vpack.c.bf16 %v7193_v40, %v7193_v40 }
0x11eb   : > { %v7114_v13 = vpop.xlane.xlu1 %7113  ;;  %11364 = vmatprep.subr.bf16.mxu1 %v15223_v16 }
0x11ec   : > { %12034 = vrcp.f32 %v7114_v13 }
0x11ed   : > { %12036 = vrcp.f32 %v7117_v20 }
0x11ee   : > { %v12031_v12 = vpop.eup %12030 }
0x11ef   : > { %11349 = vmatmul.mubr.msk.bf16.vlgmr.msra.gmra.mrb[244].mxu0 %vm694_vm2, %v7224_v3  ;;  %v12033_v23 = vpop.eup %12032  ;;  %v7194_v29 = vmul.f32 %v12031_v12, %v14500_v26 }
0x11f0   : > { %11359 = vmatpush3.bf16.msra.mxu0 %v8204_v19  ;;  %11360 = vmatprep.mubr.msk.bf16.mxu0 %vm12162_vm1, %v15223_v16  ;;  %v7195_v43 = vmul.f32 %v12033_v23, %v14487_v36 }
0x11f1   : > { %11355 = vmatmul.mubr.msk.bf16.vlgmr.msra.gmra.mrb[4].mxu1 %vm694_vm2, %v7225_v41  ;;  %11370 = vmatprep.subr.bf16.mxu0 %v15223_v16  ;;  %v7226_v25 = vpack.c.bf16 %v7194_v29, %v7194_v29 }
0x11f2   : > { %11365 = vmatpush3.bf16.msra.mxu1 %v8252_v17  ;;  %11366 = vmatprep.mubr.msk.bf16.mxu1 %vm12162_vm1, %v15223_v16  ;;  %v7227_v53 = vpack.c.bf16 %v7195_v43, %v7195_v43 }
0x11f3   : > { %11376 = vmatprep.subr.bf16.mxu1 %v15223_v16 }
0x11f6   : > { %v12035_v21 = vpop.eup %12034 }
0x11f7   : > { %11361 = vmatmul.mubr.msk.bf16.vlgmr.msra.gmra.mrb[248].mxu0 %vm694_vm2, %v7226_v25  ;;  %v12037_v26 = vpop.eup %12036  ;;  %v7196_v36 = vmul.f32 %v12035_v21, %v14522_v60  ;;  %v15273_v60 = vld [vmem:[#allocation6_spill] sm:$0xff] }
0x11f8   : > { %11371 = vmatpush3.bf16.msra.mxu0 %v8300_v57  ;;  %11372 = vmatprep.mubr.msk.bf16.mxu0 %vm12162_vm1, %v15223_v16  ;;  %v7197_v34 = vmul.f32 %v12037_v26, %v14510_v28  ;;  %v8444_v61 = vsel %vm2650_vm3, %v15273_v60, 0 }
0x11f9   : > { %11367 = vmatmul.mubr.msk.bf16.vlgmr.msra.gmra.mrb[8].mxu1 %vm694_vm2, %v7227_v53  ;;  %11382 = vmatprep.subr.bf16.mxu0 %v15223_v16  ;;  %v7228_v18 = vpack.c.bf16 %v7196_v36, %v7196_v36 }
0x11fa   : > { %11377 = vmatpush3.bf16.msra.mxu1 %v8348_v14  ;;  %11378 = vmatprep.mubr.msk.bf16.mxu1 %vm12162_vm1, %v15223_v16  ;;  %v7229_v6 = vpack.c.bf16 %v7197_v34, %v7197_v34 }
0x11fb   : > { %11388 = vmatprep.subr.bf16.mxu1 %v15223_v16 }
0x11ff   : > { %11373 = vmatmul.mubr.msk.bf16.vlgmr.msra.gmra.mrb[252].mxu0 %vm694_vm2, %v7228_v18 }
0x1200   : > { %11383 = vmatpush3.bf16.msra.mxu0 %v8396_v15  ;;  %11384 = vmatprep.mubr.msk.bf16.mxu0 %vm12162_vm1, %v15223_v16 }
0x1201   : > { %v7120_v35 = vpop.xlane.xlu1 %7119  ;;  %11379 = vmatmul.mubr.msk.bf16.vlgmr.msra.gmra.mrb[12].mxu1 %vm694_vm2, %v7229_v6  ;;  %11394 = vmatprep.subr.bf16.mxu0 %v15223_v16 }
0x1202   : > { %12038 = vrcp.f32 %v7120_v35  ;;  %11389 = vmatpush3.bf16.msra.mxu1 %v8444_v61  ;;  %11390 = vmatprep.mubr.msk.bf16.mxu1 %vm12162_vm1, %v15223_v16 }
0x1203   : > { %v7123_v28 = vpop.xlane.xlu0 %7122  ;;  %11400 = vmatprep.subr.bf16.mxu1 %v15223_v16 }
0x1204   : > { %12040 = vrcp.f32 %v7123_v28 }
0x1205   : > { %v8583_v41 = vpop.permute.xlu1 %8582 }
0x1206   : > { %v8588_v34 = vsel %vm2650_vm3, %v8583_v41, 0 }
0x120b   : > { %v7129_v59 = vpop.xlane.xlu0 %7128 }
0x120c   : > { %v12039_v37 = vpop.eup %12038  ;;  %12042 = vrcp.f32 %v7129_v59 }
0x120d   : > { %v7198_v2 = vmul.f32 %v12039_v37, %v14543_v1 }
0x120e   : > { %v12041_v54 = vpop.eup %12040 }
0x120f   : > { %v7230_v49 = vpack.c.bf16 %v7198_v2, %v7198_v2  ;;  %v7199_v55 = vmul.f32 %v12041_v54, %v14547_v5  ;;  %v8631_v4 = vpop.permute.xlu0 %8630 }
0x1210   : > { %v8636_v0 = vsel %vm2650_vm3, %v8631_v4, 0 }
0x1211   : > { %v7231_v27 = vpack.c.bf16 %v7199_v55, %v7199_v55  ;;  %11385 = vmatmul.mubr.msk.bf16.vlgmr.msra.gmra.mrb[0].mxu0 %vm694_vm2, %v7230_v49 }
0x1212   : > { %11395 = vmatpush3.bf16.msra.mxu0 %v8492_v62  ;;  %11396 = vmatprep.mubr.msk.bf16.mxu0 %vm12162_vm1, %v15223_v16 }
0x1213   : > { %11391 = vmatmul.mubr.msk.bf16.vlgmr.msra.gmra.mrb[16].mxu1 %vm694_vm2, %v7231_v27  ;;  %11406 = vmatprep.subr.bf16.mxu0 %v15223_v16 }
0x1214   : > { %11401 = vmatpush3.bf16.msra.mxu1 %v8540_v24  ;;  %11402 = vmatprep.mubr.msk.bf16.mxu1 %vm12162_vm1, %v15223_v16 }
0x1215   : > { %11412 = vmatprep.subr.bf16.mxu1 %v15223_v16 }
0x1216   : > { %v12043_v1 = vpop.eup %12042 }
0x1217   : > { %v7201_v5 = vmul.f32 %v12043_v1, %v14564_v39 }
0x1219   : > { %v7233_v58 = vpack.c.bf16 %v7201_v5, %v7201_v5 }
0x121b   : > { %11403 = vmatmul.mubr.msk.bf16.vlgmr.msra.gmra.mrb[20].mxu1 %vm694_vm2, %v7233_v58 }
0x121c   : > { %11413 = vmatpush3.bf16.msra.mxu1 %v8636_v0  ;;  %11414 = vmatprep.mubr.msk.bf16.mxu1 %vm12162_vm1, %v15223_v16 }
0x121d   : > { %11424 = vmatprep.subr.bf16.mxu1 %v15223_v16 }
0x121f   : > { %v14742_v51 = vpop.f32.mrb[224].mxu1 }
0x1220   : > { %v11248_v50 = vpop.f32.mrb[225].mxu1 }
0x1221   : > { %v7331_v30 = vpop.f32.mrb[226].mxu1 }
0x1222   : > { %v11249_v46 = vpop.f32.mrb[227].mxu1 }
0x1225   : > { %v14744_v52 = vpop.f32.mrb[208].mxu0 }
0x1226   : > { %v11242_v39 = vpop.f32.mrb[209].mxu0 }
0x1227   : > { %v7283_v33 = vpop.f32.mrb[210].mxu0  ;;  %v14746_v56 = vpop.f32.mrb[228].mxu1 }
0x1228   : > { %v11243_v10 = vpop.f32.mrb[211].mxu0  ;;  %v11260_v63 = vpop.f32.mrb[229].mxu1 }
0x1229   : > { %v7427_v45 = vpop.f32.mrb[230].mxu1 }
0x122a   : > { %v11261_v11 = vpop.f32.mrb[231].mxu1 }
0x122d   : > { %v14748_v40 = vpop.f32.mrb[212].mxu0 }
0x122e   : > { %v11254_v20 = vpop.f32.mrb[213].mxu0 }
0x122f   : > { %v7379_v13 = vpop.f32.mrb[214].mxu0  ;;  %v14750_v3 = vpop.f32.mrb[232].mxu1 }
0x1230   : > { %v11255_v12 = vpop.f32.mrb[215].mxu0  ;;  %v11272_v32 = vpop.f32.mrb[233].mxu1 }
0x1231   : > { %v7523_v19 = vpop.f32.mrb[234].mxu1 }
0x1232   : > { %v11273_v23 = vpop.f32.mrb[235].mxu1 }
0x1235   : > { %v14752_v8 = vpop.f32.mrb[216].mxu0 }
0x1236   : > { %v11266_v17 = vpop.f32.mrb[217].mxu0  ;;  %v7126_v29 = vpop.xlane.xlu1 %7125 }
0x1237   : > { %v7475_v43 = vpop.f32.mrb[218].mxu0  ;;  %12044 = vrcp.f32 %v7126_v29 }
0x1238   : > { %v11267_v25 = vpop.f32.mrb[219].mxu0 }
0x123a   : > { %v7132_v21 = vpop.xlane.xlu1 %7131 }
0x123b   : > { %12046 = vrcp.f32 %v7132_v21 }
0x123e   : > { %v7138_v22 = vpop.xlane.xlu1 %7137 }
0x1240   : > { %v7135_v57 = vpop.xlane.xlu0 %7134 }
0x1241   : > { %v12045_v53 = vpop.eup %12044  ;;  %12048 = vrcp.f32 %v7135_v57 }
0x1242   : > { %v7200_v26 = vmul.f32 %v12045_v53, %v14597_v44  ;;  %12050 = vrcp.f32 %v7138_v22  ;;  %v8679_v15 = vpop.permute.xlu1 %8678 }
0x1243   : > { %v8684_v54 = vsel %vm2650_vm3, %v8679_v15, 0 }
0x1244   : > { %v7232_v7 = vpack.c.bf16 %v7200_v26, %v7200_v26  ;;  %v7141_v14 = vpop.xlane.xlu0 %7140 }
0x1245   : > { %v12047_v36 = vpop.eup %12046  ;;  %12052 = vrcp.f32 %v7141_v14 }
0x1246   : > { %11397 = vmatmul.mubr.msk.bf16.vlgmr.msra.gmra.mrb[4].mxu0 %vm694_vm2, %v7232_v7  ;;  %v7202_v18 = vmul.f32 %v12047_v36, %v14611_v47  ;;  %v8899_v4 = vpop.permute.xlu1 %8898 }
0x1247   : > { %11407 = vmatpush3.bf16.msra.mxu0 %v8588_v34  ;;  %11408 = vmatprep.mubr.msk.bf16.mxu0 %vm12162_vm1, %v15223_v16 }
0x1248   : > { %11418 = vmatprep.subr.bf16.mxu0 %v15223_v16  ;;  %v7234_v6 = vpack.c.bf16 %v7202_v18, %v7202_v18  ;;  %v8727_v61 = vpop.permute.xlu0 %8726 }
0x1249   : > { %v8732_v62 = vsel %vm2650_vm3, %v8727_v61, 0  ;;  %vm9591_vm3 = vcmask 1042434  }
0x124b   : > { %v12049_v38 = vpop.eup %12048  ;;  %v14761_v44 = vpop.f32.mrb[220].mxu0 }
0x124c   : > { %v7203_v60 = vmul.f32 %v12049_v38, %v14624_v48  ;;  %v11278_v35 = vpop.f32.mrb[221].mxu0  ;;  %v12051_v28 = vpop.eup %12050 }
0x124d   : > { %v7571_v59 = vpop.f32.mrb[222].mxu0  ;;  %v14764_v37 = vpop.f32.mrb[236].mxu1  ;;  %v7204_v48 = vmul.f32 %v12051_v28, %v14616_v42 }
0x124e   : > { %v7235_v2 = vpack.c.bf16 %v7203_v60, %v7203_v60  ;;  %v11279_v49 = vpop.f32.mrb[223].mxu0  ;;  %v11284_v47 = vpop.f32.mrb[237].mxu1  ;;  %11409 = vmatmul.mubr.msk.bf16.vlgmr.msra.gmra.mrb[8].mxu0 %vm694_vm2, %v7234_v6 }
0x124f   : > { %v12053_v55 = vpop.eup %12052  ;;  %v7619_v9 = vpop.f32.mrb[238].mxu1  ;;  %11419 = vmatpush3.bf16.msra.mxu0 %v8684_v54  ;;  %11420 = vmatprep.mubr.msk.bf16.mxu0 %vm12162_vm1, %v15223_v16  ;;  %v7236_v1 = vpack.c.bf16 %v7204_v48, %v7204_v48 }
0x1250   : > { %v11285_v27 = vpop.f32.mrb[239].mxu1  ;;  %11415 = vmatmul.mubr.msk.bf16.vlgmr.msra.gmra.mrb[24].mxu1 %vm694_vm2, %v7235_v2  ;;  %v7205_v24 = vmul.f32 %v12053_v55, %v14630_v31  ;;  %11430 = vmatprep.subr.bf16.mxu0 %v8899_v4  ;;  %v8901_v42 = vpop.permute.xlu1 %8900 }
0x1251   : > { %11425 = vmatpush3.bf16.msra.mxu1 %v8732_v62  ;;  %11426 = vmatprep.mubr.msk.bf16.mxu1 %vm12162_vm1, %v15223_v16 }
0x1252   : > { %v7237_v5 = vpack.c.bf16 %v7205_v24, %v7205_v24 }
0x1256   : > { %11421 = vmatmul.mubr.msk.bf16.vlgmr.msra.gmra.mrb[12].mxu0 %vm694_vm2, %v7236_v1 }
0x1257   : > { %11431 = vmatpush3.bf16.msra.mxu0 %v8899_v4 }
0x1258   : > { %11427 = vmatmul.mubr.msk.bf16.vlgmr.msra.gmra.mrb[28].mxu1 %vm694_vm2, %v7237_v5  ;;  %11432 = vmatprep.subr.bf16.mxu0 %v8901_v42 }
0x125b   : > { %11433 = vmatpush3.bf16.msra.mxu0 %v8901_v42 }
0x126e   : > { %v7664_v58 = vpop.f32.mrb[224].mxu0 }
0x126f   : > { %v11290_v0 = vpop.f32.mrb[225].mxu0  ;;  %v7712_v50 = vpop.f32.mrb[240].mxu1 }
0x1270   : > { %v7667_v30 = vpop.f32.mrb[226].mxu0  ;;  %v11660_v46 = vpack.i.bf16 %v7712_v50, %v7664_v58  ;;  %v11296_v39 = vpop.f32.mrb[241].mxu1 }
0x1271   : > { %v11291_v33 = vpop.f32.mrb[227].mxu0  ;;  %v7715_v31 = vpop.f32.mrb[242].mxu1 }
0x1272   : > { %v11297_v10 = vpop.f32.mrb[243].mxu1  ;;  %11661 = vrot.lane.b32.xlu0 %v11660_v46, %s12168_s26 }
0x1276   : > { %v7760_v63 = vpop.f32.mrb[228].mxu0 }
0x1277   : > { %v11302_v45 = vpop.f32.mrb[229].mxu0  ;;  %v7808_v11 = vpop.f32.mrb[244].mxu1 }
0x1278   : > { %v7763_v20 = vpop.f32.mrb[230].mxu0  ;;  %v11665_v13 = vpack.i.bf16 %v7808_v11, %v7760_v63  ;;  %v11308_v12 = vpop.f32.mrb[245].mxu1 }
0x1279   : > { %v11303_v32 = vpop.f32.mrb[231].mxu0  ;;  %v7811_v19 = vpop.f32.mrb[246].mxu1 }
0x127a   : > { %11666 = vrot.lane.b32.xlu1 %v11665_v13, %s12168_s26  ;;  %v11309_v41 = vpop.f32.mrb[247].mxu1 }
0x127e   : > { %v7856_v23 = vpop.f32.mrb[232].mxu0 }
0x127f   : > { %v11314_v17 = vpop.f32.mrb[233].mxu0 }
0x1280   : > { %v7859_v29 = vpop.f32.mrb[234].mxu0 }
0x1281   : > { %v11315_v43 = vpop.f32.mrb[235].mxu0 }
0x1286   : > { %v7952_v25 = vpop.f32.mrb[236].mxu0 }
0x1287   : > { %v11326_v21 = vpop.f32.mrb[237].mxu0 }
0x1288   : > { %v7955_v22 = vpop.f32.mrb[238].mxu0 }
0x1289   : > { %v11327_v57 = vpop.f32.mrb[239].mxu0 }
0x12ac   : > { %v7904_v53 = vpop.f32.mrb[248].mxu1 }
0x12ad   : > { %v11670_v26 = vpack.i.bf16 %v7904_v53, %v7856_v23  ;;  %v11320_v7 = vpop.f32.mrb[249].mxu1 }
0x12ae   : > { %v7907_v14 = vpop.f32.mrb[250].mxu1 }
0x12af   : > { %11671 = vrot.lane.b32.xlu1 %v11670_v26, %s12168_s26  ;;  %v11321_v36 = vpop.f32.mrb[251].mxu1 }
0x12b4   : > { %v8000_v34 = vpop.f32.mrb[252].mxu1 }
0x12b5   : > { %v11675_v18 = vpack.i.bf16 %v8000_v34, %v7952_v25  ;;  %v11332_v38 = vpop.f32.mrb[253].mxu1 }
0x12b6   : > { %v8003_v15 = vpop.f32.mrb[254].mxu1 }
0x12b7   : > { %11676 = vrot.lane.b32.xlu0 %v11675_v18, %s12168_s26  ;;  %v11333_v6 = vpop.f32.mrb[255].mxu1  ;;  %s12172_s26 = smov [#allocation2]  }
0x12ba   : > { %v8048_v60 = vpop.f32.mrb[240].mxu0 }
0x12bb   : > { %v11338_v61 = vpop.f32.mrb[241].mxu0 }
0x12bc   : > { %v8051_v35 = vpop.f32.mrb[242].mxu0  ;;  %v8096_v28 = vpop.f32.mrb[0].mxu1 }
0x12bd   : > { %v11680_v59 = vpack.i.bf16 %v8096_v28, %v8048_v60  ;;  %v11339_v2 = vpop.f32.mrb[243].mxu0  ;;  %v11344_v54 = vpop.f32.mrb[1].mxu1 }
0x12be   : > { %v8099_v49 = vpop.f32.mrb[2].mxu1 }
0x12bf   : > { %11681 = vrot.lane.b32.xlu0 %v11680_v59, %s12169_s30  ;;  %v11345_v47 = vpop.f32.mrb[3].mxu1 }
0x12c2   : > { %v8144_v55 = vpop.f32.mrb[244].mxu0 }
0x12c3   : > { %v11350_v9 = vpop.f32.mrb[245].mxu0 }
0x12c4   : > { %v8147_v48 = vpop.f32.mrb[246].mxu0  ;;  %v8192_v62 = vpop.f32.mrb[4].mxu1 }
0x12c5   : > { %v11685_v27 = vpack.i.bf16 %v8192_v62, %v8144_v55  ;;  %v11351_v24 = vpop.f32.mrb[247].mxu0  ;;  %v11356_v1 = vpop.f32.mrb[5].mxu1 }
0x12c6   : > { %v8195_v5 = vpop.f32.mrb[6].mxu1 }
0x12c7   : > { %11686 = vrot.lane.b32.xlu1 %v11685_v27, %s12169_s30  ;;  %v11357_v4 = vpop.f32.mrb[7].mxu1 }
0x12ca   : > { %v8240_v42 = vpop.f32.mrb[248].mxu0 }
0x12cb   : > { %v11362_v58 = vpop.f32.mrb[249].mxu0 }
0x12cc   : > { %v8243_v0 = vpop.f32.mrb[250].mxu0  ;;  %v8288_v50 = vpop.f32.mrb[8].mxu1 }
0x12cd   : > { %v11690_v30 = vpack.i.bf16 %v8288_v50, %v8240_v42  ;;  %v11363_v46 = vpop.f32.mrb[251].mxu0  ;;  %v11368_v39 = vpop.f32.mrb[9].mxu1 }
0x12ce   : > { %v8291_v33 = vpop.f32.mrb[10].mxu1 }
0x12cf   : > { %11691 = vrot.lane.b32.xlu1 %v11690_v30, %s12169_s30  ;;  %v11369_v31 = vpop.f32.mrb[11].mxu1 }
0x12d2   : > { %v8336_v10 = vpop.f32.mrb[252].mxu0 }
0x12d3   : > { %v11374_v63 = vpop.f32.mrb[253].mxu0 }
0x12d4   : > { %v8339_v45 = vpop.f32.mrb[254].mxu0  ;;  %v8384_v11 = vpop.f32.mrb[12].mxu1 }
0x12d5   : > { %v11705_v20 = vpack.i.bf16 %v8384_v11, %v8336_v10  ;;  %v11375_v13 = vpop.f32.mrb[255].mxu0  ;;  %v11380_v12 = vpop.f32.mrb[13].mxu1 }
0x12d6   : > { %v8387_v32 = vpop.f32.mrb[14].mxu1 }
0x12d7   : > { %v11381_v19 = vpop.f32.mrb[15].mxu1 }
0x12e4   : > { %v8432_v41 = vpop.f32.mrb[0].mxu0  ;;  %v11662_v54 = vpop.permute.xlu0 %11661 }
0x12e5   : > { %v11386_v23 = vpop.f32.mrb[1].mxu0  ;;  %v11664_v39 = vunpack.i.h.bf16 %v11662_v54  ;;  %v11663_v33 = vunpack.i.l.bf16 %v11662_v54 }
0x12e6   : > { %v8435_v17 = vpop.f32.mrb[2].mxu0  ;;  %v8480_v29 = vpop.f32.mrb[16].mxu1 }
0x12e7   : > { %v11695_v43 = vpack.i.bf16 %v8480_v29, %v8432_v41  ;;  %v11387_v25 = vpop.f32.mrb[3].mxu0  ;;  %v11392_v21 = vpop.f32.mrb[17].mxu1 }
0x12e8   : > { %v8483_v22 = vpop.f32.mrb[18].mxu1 }
0x12e9   : > { %11696 = vrot.lane.b32.xlu0 %v11695_v43, %s15275_s14  ;;  %v11393_v57 = vpop.f32.mrb[19].mxu1 }
0x12ec   : > { %v11667_v41 = vpop.permute.xlu1 %11666 }
0x12ed   : > { %v11668_v29 = vunpack.i.l.bf16 %v11667_v41 }
0x12ee   : > { %v8576_v53 = vpop.f32.mrb[20].mxu1 }
0x12ef   : > { %v11404_v26 = vpop.f32.mrb[21].mxu1  ;;  %v8872_v22 = vsel %vm694_vm2, %v14748_v40, %v11668_v29 }
0x12f0   : > { %v8579_v7 = vpop.f32.mrb[22].mxu1 }
0x12f1   : > { %v11405_v14 = vpop.f32.mrb[23].mxu1 }
0x1319   : > { %v8528_v36 = vpop.f32.mrb[4].mxu0 }
0x131a   : > { %v11700_v34 = vpack.i.bf16 %v8576_v53, %v8528_v36  ;;  %v11398_v18 = vpop.f32.mrb[5].mxu0 }
0x131b   : > { %v8531_v38 = vpop.f32.mrb[6].mxu0 }
0x131c   : > { %v11399_v15 = vpop.f32.mrb[7].mxu0  ;;  %11701 = vrot.lane.b32.xlu0 %v11700_v34, %s15275_s14 }
0x1320   : > { %11706 = vrot.lane.b32.xlu0 %v11705_v20, %s12169_s30  ;;  %s12098_s30 = sshll.u32 %s12172_s26, 4  ;;  %s12099_s30 = int_to_ptr.vmem [resolvable:$false] %s12098_s30 }
0x1321   : > { %v8624_v6 = vpop.f32.mrb[8].mxu0  ;;  %v11672_v23 = vpop.permute.xlu1 %11671  ;;  %s12100_s6 = scalar_lea.vmem %s12099_s30, 256  ;;  %p12101_p0 = scmp.lt.s32.totalorder %s15133_s11, %s12099_s30 }
0x1322   : > { %v11410_v60 = vpop.f32.mrb[9].mxu0  ;;  %v11674_v38 = vunpack.i.h.bf16 %v11672_v23  ;;  %v11673_v15 = vunpack.i.l.bf16 %v11672_v23  ;;  %p12102_p1 = scmp.lt.s32.totalorder %s12100_s6, %s12094_s22 }
0x1323   : > { %v8627_v61 = vpop.f32.mrb[10].mxu0  ;;  %v8672_v35 = vpop.f32.mrb[24].mxu1 }
0x1324   : > { %v11710_v28 = vpack.i.bf16 %v8672_v35, %v8624_v6  ;;  %v11411_v59 = vpop.f32.mrb[11].mxu0  ;;  %v11416_v2 = vpop.f32.mrb[25].mxu1  ;;  %v8875_v40 = vsel %vm694_vm2, %v14750_v3, %v11674_v38  ;;  %v8874_v61 = vsel %vm694_vm2, %v14752_v8, %v11673_v15  ;;  %p12103_p2 = por %p12102_p1, %p12101_p0 }
0x1325   : > { %v8675_v49 = vpop.f32.mrb[26].mxu1 }
0x1326   : > { %11711 = vrot.lane.b32.xlu1 %v11710_v28, %s15275_s14  ;;  %v11417_v47 = vpop.f32.mrb[27].mxu1  ;;  %p12104_p3 = pnand %p12103_p2, %p12097_p13 }
0x1329   : > { %v8720_v55 = vpop.f32.mrb[12].mxu0  ;;  %v11677_v9 = vpop.permute.xlu0 %11676 }
0x132a   : > { %v11679_v48 = vunpack.i.h.bf16 %v11677_v9  ;;  %v11678_v62 = vunpack.i.l.bf16 %v11677_v9  ;;  %v11422_v27 = vpop.f32.mrb[13].mxu0 }
0x132b   : > { %v8723_v24 = vpop.f32.mrb[14].mxu0  ;;  %v8768_v1 = vpop.f32.mrb[28].mxu1 }
0x132c   : > { %v14791_v5 = vsel %vm694_vm2, %v14764_v37, %v11679_v48  ;;  %v14795_v4 = vsel %vm694_vm2, %v14761_v44, %v11678_v62  ;;  %v11715_v42 = vpack.i.bf16 %v8768_v1, %v8720_v55  ;;  %v11423_v58 = vpop.f32.mrb[15].mxu0  ;;  %v11428_v0 = vpop.f32.mrb[29].mxu1  ;;  %v8871_v37 = vsel %vm694_vm2, %v14742_v51, %v11664_v39 }
0x132d   : > { %v8771_v50 = vpop.f32.mrb[30].mxu1  ;;  %v8870_v44 = vsel %vm694_vm2, %v14744_v52, %v11663_v33  ;;  %v11669_v51 = vunpack.i.h.bf16 %v11667_v41  ;;  %v15277_v33 = vld [vmem:[#allocation18_spill] sm:$0xff] }
0x132e   : > { %11716 = vrot.lane.b32.xlu0 %v11715_v42, %s15275_s14  ;;  %v11429_v30 = vpop.f32.mrb[31].mxu1  ;;  %v10176_v50 = vld [vmem:[%s15175_s1 + $0x13] ss:$0 sm:$0xff]  ;;  %s15131_s14 = scalar_lea.hbm %s15179_s5, %s10214_s7 }
0x132f   : > { %v8873_v21 = vsel %vm694_vm2, %v14746_v56, %v11669_v51  ;;  %v15276_v30 = vld [vmem:[#allocation16_spill] sm:$0xff] }
0x1331   : > { %v11682_v46 = vpop.permute.xlu0 %11681 }
0x1332   : > { %v11684_v31 = vunpack.i.h.bf16 %v11682_v46  ;;  %v11683_v10 = vunpack.i.l.bf16 %v11682_v46 }
0x1334   : > { %v8878_v20 = vsel %vm4286_vm4, %v8870_v44, %v11683_v10  ;;  %v8879_v13 = vsel %vm4286_vm4, %v8871_v37, %v11684_v31  ;;  %v15278_v10 = vld [vmem:[#allocation14_spill] sm:$0xff]  ;;  %v15279_v44 = vld [vmem:[#allocation13_spill] sm:$0xff] }
0x1339   : > { %v11687_v17 = vpop.permute.xlu1 %11686 }
0x133a   : > { %v11689_v43 = vunpack.i.h.bf16 %v11687_v17  ;;  %v11688_v52 = vunpack.i.l.bf16 %v11687_v17  ;;  %v15280_v17 = vld [vmem:[#allocation19_spill] sm:$0xff] }
0x133c   : > { %v8881_v26 = vsel %vm4286_vm4, %v8873_v21, %v11689_v43  ;;  %v8880_v7 = vsel %vm4286_vm4, %v8872_v22, %v11688_v52  ;;  %v15281_v43 = vld [vmem:[#allocation17_spill] sm:$0xff]  ;;  %v15282_v21 = vld [vmem:[#allocation15_spill] sm:$0xff] }
0x1341   : > { %v11692_v18 = vpop.permute.xlu1 %11691 }
0x1342   : > { %v11694_v56 = vunpack.i.h.bf16 %v11692_v18  ;;  %v11693_v6 = vunpack.i.l.bf16 %v11692_v18 }
0x1344   : > { %v8883_v59 = vsel %vm4286_vm4, %v8875_v40, %v11694_v56  ;;  %v8882_v2 = vsel %vm4286_vm4, %v8874_v61, %v11693_v6 }
0x135b   : > { %v11697_v63 = vpop.permute.xlu0 %11696 }
0x135c   : > { %v11699_v45 = vunpack.i.h.bf16 %v11697_v63  ;;  %v11698_v11 = vunpack.i.l.bf16 %v11697_v63 }
0x135e   : > { %v8886_v12 = vsel %vm4295_vm5, %v8878_v20, %v11698_v11  ;;  %v8887_v32 = vsel %vm4295_vm5, %v8879_v13, %v11699_v45 }
0x135f   : > { %v8894_v19 = vpack.c.bf16 %v8887_v32, %v8886_v12 }
0x1361   : > { %11434 = vmatprep.mubr.msk.bf16.mxu0 %vm395_vm0, %v8894_v19 }
0x138e   : > { %v11702_v25 = vpop.permute.xlu0 %11701 }
0x138f   : > { %v11704_v57 = vunpack.i.h.bf16 %v11702_v25  ;;  %v11703_v53 = vunpack.i.l.bf16 %v11702_v25 }
0x1391   : > { %v8889_v14 = vsel %vm4295_vm5, %v8881_v26, %v11704_v57  ;;  %v8888_v36 = vsel %vm4295_vm5, %v8880_v7, %v11703_v53  ;;  %v15283_v26 = vld [vmem:[#allocation20_spill] sm:$0xff] }
0x1392   : > { %v8895_v34 = vpack.c.bf16 %v8889_v14, %v8888_v36  ;;  %v11707_v54 = vpop.permute.xlu0 %11706 }
0x1393   : > { %v11709_v9 = vunpack.i.h.bf16 %v11707_v54  ;;  %v11708_v48 = vunpack.i.l.bf16 %v11707_v54 }
0x1394   : > { %11435 = vmatmul.mubr.msk.bf16.vlgmr.msra.gmra.mrb[16].mxu0 %vm395_vm0, %v8895_v34 }
0x1395   : > { %v8884_v8 = vsel %vm4286_vm4, %v14795_v4, %v11708_v48  ;;  %v8885_v24 = vsel %vm4286_vm4, %v14791_v5, %v11709_v9  ;;  %vm9593_vm4 = vcmask 1043459  }
0x1398   : > { %v11712_v60 = vpop.permute.xlu1 %11711 }
0x1399   : > { %v11714_v35 = vunpack.i.h.bf16 %v11712_v60  ;;  %v11713_v28 = vunpack.i.l.bf16 %v11712_v60 }
0x139b   : > { %v8891_v49 = vsel %vm4295_vm5, %v8883_v59, %v11714_v35  ;;  %v8890_v47 = vsel %vm4295_vm5, %v8882_v2, %v11713_v28 }
0x139c   : > { %v8896_v55 = vpack.c.bf16 %v8891_v49, %v8890_v47 }
0x139e   : > { %11438 = vmatprep.mubr.msk.bf16.mxu0 %vm395_vm0, %v8896_v55 }
0x13a0   : > { %v11717_v3 = vpop.permute.xlu0 %11716 }
0x13a1   : > { %v11719_v62 = vunpack.i.h.bf16 %v11717_v3  ;;  %v11718_v27 = vunpack.i.l.bf16 %v11717_v3 }
0x13a3   : > { %v8892_v1 = vsel %vm4295_vm5, %v8884_v8, %v11718_v27  ;;  %v8893_v42 = vsel %vm4295_vm5, %v8885_v24, %v11719_v62  ;;  %vm9595_vm5 = vcmask 1044484  }
0x13a4   : > { %v8897_v58 = vpack.c.bf16 %v8893_v42, %v8892_v1 }
0x13a6   : > { %11439 = vmatmul.mubr.msk.bf16.gmra.mrb[20].mxu0 %vm395_vm0, %v8897_v58 }
0x1467   : > { %v11436_v0 = vpop.f32.mrb[16].mxu0 }
0x1468   : > { %v8983_v46 = vadd.f32 %v11436_v0, %v15276_v30  ;;  %v8950_v39 = vpop.f32.mrb[17].mxu0 }
0x1469   : > { %v8981_v4 = vadd.f32 %v8950_v39, %v15277_v33  ;;  %v11437_v31 = vpop.f32.mrb[18].mxu0 }
0x146a   : > { %v8984_v5 = vadd.f32 %v11437_v31, %v15278_v10  ;;  %v8953_v63 = vpop.f32.mrb[19].mxu0  ;;  %v14847_v12 = vadd.f32 %v10176_v50, %v8983_v46 }
0x146b   : > { %v14838_v37 = vadd.f32 %v10176_v50, %v8981_v4  ;;  %v8982_v45 = vadd.f32 %v15279_v44, %v8953_v63 }
0x146c   : > { %v14841_v11 = vadd.f32 %v10176_v50, %v8984_v5  ;;  %v9009_v41 = vsel %vm395_vm0, %v14847_v12, 0.0 }
0x146d   : > { %v14843_v20 = vadd.f32 %v10176_v50, %v8982_v45  ;;  %v9003_v13 = vsel %vm395_vm0, %v14838_v37, 0.0 }
0x146e   : > { %9004 = vadd.xlane.f32.xlu1 %v9003_v13  ;;  %v9012_v19 = vsel %vm395_vm0, %v14841_v11, 0.0 }
0x146f   : > { %v9006_v32 = vsel %vm395_vm0, %v14843_v20, 0.0 }
0x1470   : > { %9007 = vadd.xlane.f32.xlu0 %v9006_v32 }
0x1472   : > { %9013 = vadd.xlane.f32.xlu1 %v9012_v19 }
0x1474   : > { %9010 = vadd.xlane.f32.xlu0 %v9009_v41 }
0x1479   : > { %v11440_v23 = vpop.f32.mrb[20].mxu0 }
0x147a   : > { %v8987_v51 = vadd.f32 %v11440_v23, %v15280_v17  ;;  %v8966_v29 = vpop.f32.mrb[21].mxu0  ;;  %v11740_v17 = vld [vmem:[%s15176_s2 + $0x24] ss:$8 sps:$4 sm:$0xff]  }
0x147b   : > { %v8985_v52 = vadd.f32 %v8966_v29, %v15281_v43  ;;  %v11441_v25 = vpop.f32.mrb[22].mxu0  ;;  %11442 = vmatprep.subr.bf16.mxu1 %v11740_v17  ;;  %v11742_v29 = vld [vmem:[%s15177_s3 + $0x40] sm:$0xff]   ;;  %v11743_v43 = vld [vmem:[%s15177_s3 + $0x48] sm:$0xff]  }
0x147c   : > { %v8988_v22 = vadd.f32 %v11441_v25, %v15282_v21  ;;  %v8969_v57 = vpop.f32.mrb[23].mxu0  ;;  %v14861_v14 = vadd.f32 %v10176_v50, %v8987_v51  ;;  %11443 = vmatpush3.bf16.msra.mxu1 %v11740_v17  ;;  %v11741_v51 = vld [vmem:[%s15176_s2 + $0x34] ss:$8 sps:$4 sm:$0xff]   ;;  %11454 = vmatprep.subr.bf16.mxu0 %v11742_v29  ;;  %v11746_v21 = vld [vmem:[%s15177_s3 + $0x60] sm:$0xff]  }
0x147d   : > { %v14858_v53 = vadd.f32 %v10176_v50, %v8985_v52  ;;  %v8986_v7 = vadd.f32 %v15283_v26, %v8969_v57  ;;  %11444 = vmatprep.subr.bf16.mxu1 %v11741_v51  ;;  %11455 = vmatpush3.bf16.msra.mxu0 %v11742_v29  ;;  %v11744_v52 = vld [vmem:[%s15177_s3 + $0x50] sm:$0xff]   ;;  %v11745_v25 = vld [vmem:[%s15177_s3 + $0x58] sm:$0xff]  }
0x147e   : > { %v14867_v18 = vadd.f32 %v10176_v50, %v8988_v22  ;;  %v9021_v15 = vsel %vm395_vm0, %v14861_v14, 0.0  ;;  %11456 = vmatprep.subr.bf16.mxu0 %v11743_v43  ;;  %v11747_v22 = vld [vmem:[%s15177_s3 + $0x68] sm:$0xff]  }
0x147f   : > { %v14863_v36 = vadd.f32 %v10176_v50, %v8986_v7  ;;  %v9015_v34 = vsel %vm395_vm0, %v14858_v53, 0.0 }
0x1480   : > { %9016 = vadd.xlane.f32.xlu0 %v9015_v34  ;;  %v9024_v56 = vsel %vm395_vm0, %v14867_v18, 0.0  ;;  %11445 = vmatpush3.bf16.msra.mxu1 %v11741_v51 }
0x1481   : > { %v9018_v38 = vsel %vm395_vm0, %v14863_v36, 0.0  ;;  %11457 = vmatpush3.bf16.msra.mxu0 %v11743_v43 }
0x1482   : > { %9019 = vadd.xlane.f32.xlu1 %v9018_v38  ;;  %11458 = vmatprep.subr.bf16.mxu0 %v11744_v52 }
0x1484   : > { %9022 = vadd.xlane.f32.xlu0 %v9021_v15 }
0x1485   : > { %11459 = vmatpush3.bf16.msra.mxu0 %v11744_v52 }
0x1486   : > { %9025 = vadd.xlane.f32.xlu1 %v9024_v56  ;;  %11460 = vmatprep.subr.bf16.mxu0 %v11745_v25 }
0x1489   : > { %11461 = vmatpush3.bf16.msra.mxu0 %v11745_v25 }
0x148a   : > { %11462 = vmatprep.subr.bf16.mxu0 %v11746_v21 }
0x148d   : > { %11463 = vmatpush3.bf16.msra.mxu0 %v11746_v21 }
0x148e   : > { %11464 = vmatprep.subr.bf16.mxu0 %v11747_v22 }
0x1491   : > { %11465 = vmatpush3.bf16.msra.mxu0 %v11747_v22 }
0x14fb   : > { %v9005_v6 = vpop.xlane.xlu1 %9004 }
0x14fc   : > { %v9027_v60 = vmul.f32 0.03125, %v9005_v6 }
0x14fd   : > { %v9008_v40 = vpop.xlane.xlu0 %9007 }
0x14fe   : > { %v14876_v61 = vsub.f32 %v14838_v37, %v9027_v60  ;;  %v9028_v35 = vmul.f32 0.03125, %v9008_v40 }
0x14ff   : > { %v9014_v28 = vpop.xlane.xlu1 %9013 }
0x1500   : > { %v14879_v59 = vsub.f32 %v14843_v20, %v9028_v35  ;;  %v9030_v2 = vmul.f32 0.03125, %v9014_v28  ;;  %v9043_v54 = vmul.f32 %v14876_v61, %v14876_v61 }
0x1501   : > { %v9011_v49 = vpop.xlane.xlu0 %9010 }
0x1502   : > { %v14884_v47 = vsub.f32 %v14841_v11, %v9030_v2  ;;  %v9029_v55 = vmul.f32 0.03125, %v9011_v49  ;;  %v9051_v9 = vsel %vm395_vm0, %v9043_v54, 0.0  ;;  %v9044_v48 = vmul.f32 %v14879_v59, %v14879_v59  ;;  %v10177_v54 = vld [vmem:[%s15175_s1 + $0x14] ss:$0 sm:$0xff] }
0x1503   : > { %9052 = vadd.xlane.f32.xlu0 %v9051_v9 }
0x1504   : > { %v14890_v3 = vsub.f32 %v14847_v12, %v9029_v55  ;;  %v9054_v62 = vsel %vm395_vm0, %v9044_v48, 0.0  ;;  %v9046_v27 = vmul.f32 %v14884_v47, %v14884_v47 }
0x1505   : > { %9055 = vadd.xlane.f32.xlu1 %v9054_v62 }
0x1506   : > { %v9045_v8 = vmul.f32 %v14890_v3, %v14890_v3  ;;  %v9060_v1 = vsel %vm395_vm0, %v9046_v27, 0.0  ;;  %v10178_v27 = vld [vmem:[%s15175_s1 + $0x15] ss:$0 sm:$0xff] }
0x1508   : > { %v9057_v24 = vsel %vm395_vm0, %v9045_v8, 0.0 }
0x1509   : > { %9058 = vadd.xlane.f32.xlu0 %v9057_v24  ;;  %9061 = vadd.xlane.f32.xlu1 %v9060_v1 }
0x150d   : > { %v9017_v42 = vpop.xlane.xlu0 %9016 }
0x150e   : > { %v9031_v58 = vmul.f32 0.03125, %v9017_v42 }
0x150f   : > { %v9020_v0 = vpop.xlane.xlu1 %9019 }
0x1510   : > { %v14900_v50 = vsub.f32 %v14858_v53, %v9031_v58  ;;  %v9032_v30 = vmul.f32 0.03125, %v9020_v0 }
0x1511   : > { %v9023_v46 = vpop.xlane.xlu0 %9022 }
0x1512   : > { %v14903_v39 = vsub.f32 %v14863_v36, %v9032_v30  ;;  %v9033_v33 = vmul.f32 0.03125, %v9023_v46  ;;  %v9047_v4 = vmul.f32 %v14900_v50, %v14900_v50 }
0x1513   : > { %v9026_v31 = vpop.xlane.xlu1 %9025 }
0x1514   : > { %v14908_v10 = vsub.f32 %v14861_v14, %v9033_v33  ;;  %v9034_v5 = vmul.f32 0.03125, %v9026_v31  ;;  %v9063_v63 = vsel %vm395_vm0, %v9047_v4, 0.0  ;;  %v9048_v44 = vmul.f32 %v14903_v39, %v14903_v39 }
0x1515   : > { %9064 = vadd.xlane.f32.xlu0 %v9063_v63 }
0x1516   : > { %v14914_v45 = vsub.f32 %v14867_v18, %v9034_v5  ;;  %v9066_v13 = vsel %vm395_vm0, %v9048_v44, 0.0  ;;  %v9049_v32 = vmul.f32 %v14908_v10, %v14908_v10 }
0x1517   : > { %9067 = vadd.xlane.f32.xlu1 %v9066_v13 }
0x1518   : > { %v9069_v19 = vsel %vm395_vm0, %v9049_v32, 0.0  ;;  %v9050_v41 = vmul.f32 %v14914_v45, %v14914_v45 }
0x1519   : > { %9070 = vadd.xlane.f32.xlu0 %v9069_v19 }
0x151a   : > { %v9072_v23 = vsel %vm395_vm0, %v9050_v41, 0.0 }
0x151b   : > { %9073 = vadd.xlane.f32.xlu1 %v9072_v23 }
0x1590   : > { %v9053_v57 = vpop.xlane.xlu0 %9052 }
0x1591   : > { %v9075_v26 = vmul.f32 0.03125, %v9053_v57 }
0x1592   : > { %v9056_v7 = vpop.xlane.xlu1 %9055 }
0x1593   : > { %v9083_v34 = vadd.f32 1e-05, %v9075_v26  ;;  %v9076_v38 = vmul.f32 0.03125, %v9056_v7 }
0x1595   : > { %12054 = vrsqrt.f32 %v9083_v34  ;;  %v9084_v15 = vadd.f32 1e-05, %v9076_v38 }
0x1596   : > { %v9059_v56 = vpop.xlane.xlu0 %9058  ;;  %v9062_v6 = vpop.xlane.xlu1 %9061 }
0x1597   : > { %12056 = vrsqrt.f32 %v9084_v15  ;;  %v9077_v60 = vmul.f32 0.03125, %v9059_v56  ;;  %v9078_v40 = vmul.f32 0.03125, %v9062_v6 }
0x1599   : > { %v9085_v35 = vadd.f32 1e-05, %v9077_v60  ;;  %v9086_v28 = vadd.f32 1e-05, %v9078_v40 }
0x159b   : > { %12058 = vrsqrt.f32 %v9085_v35 }
0x159c   : > { %12060 = vrsqrt.f32 %v9086_v28 }
0x159f   : > { %v12055_v2 = vpop.eup %12054 }
0x15a0   : > { %v9099_v49 = vmul.f32 %v12055_v2, %v14876_v61 }
0x15a1   : > { %v12057_v55 = vpop.eup %12056 }
0x15a2   : > { %v9100_v9 = vmul.f32 %v12057_v55, %v14879_v59  ;;  %v9065_v48 = vpop.xlane.xlu0 %9064  ;;  %v9113_v62 = vmul.f32 %v10177_v54, %v9099_v49 }
0x15a3   : > { %v9079_v8 = vmul.f32 0.03125, %v9065_v48 }
0x15a4   : > { %v9068_v24 = vpop.xlane.xlu1 %9067  ;;  %v9114_v1 = vmul.f32 %v10177_v54, %v9100_v9  ;;  %v9127_v61 = vadd.f32 %v10178_v27, %v9113_v62 }
0x15a5   : > { %v12059_v42 = vpop.eup %12058  ;;  %v9087_v58 = vadd.f32 1e-05, %v9079_v8  ;;  %v9080_v0 = vmul.f32 0.03125, %v9068_v24 }
0x15a6   : > { %v12061_v30 = vpop.eup %12060  ;;  %v9101_v46 = vmul.f32 %v12059_v42, %v14890_v3  ;;  %v9071_v33 = vpop.xlane.xlu0 %9070  ;;  %v9128_v4 = vadd.f32 %v10178_v27, %v9114_v1 }
0x15a7   : > { %v9102_v59 = vmul.f32 %v12061_v30, %v14884_v47  ;;  %12062 = vrsqrt.f32 %v9087_v58  ;;  %v9088_v31 = vadd.f32 1e-05, %v9080_v0  ;;  %v9081_v5 = vmul.f32 0.03125, %v9071_v33 }
0x15a8   : > { %v9115_v63 = vmul.f32 %v10177_v54, %v9101_v46  ;;  %v9074_v44 = vpop.xlane.xlu1 %9073  ;;  %v9135_v13 = vpack.c.bf16 %v9128_v4, %v9127_v61 }
0x15a9   : > { %v9116_v32 = vmul.f32 %v10177_v54, %v9102_v59  ;;  %12064 = vrsqrt.f32 %v9088_v31  ;;  %v9089_v19 = vadd.f32 1e-05, %v9081_v5  ;;  %v9082_v41 = vmul.f32 0.03125, %v9074_v44 }
0x15aa   : > { %v9129_v23 = vadd.f32 %v10178_v27, %v9115_v63  ;;  %11446 = vmatprep.mubr.msk.bf16.mxu1 %vm395_vm0, %v9135_v13 }
0x15ab   : > { %v9130_v17 = vadd.f32 %v10178_v27, %v9116_v32  ;;  %12066 = vrsqrt.f32 %v9089_v19  ;;  %v9090_v3 = vadd.f32 1e-05, %v9082_v41  ;;  %v10194_v19 = vld [vmem:[%s15175_s1 + $0x17] ss:$0 sm:$0xff] }
0x15ad   : > { %v9136_v51 = vpack.c.bf16 %v9130_v17, %v9129_v23  ;;  %12068 = vrsqrt.f32 %v9090_v3 }
0x15af   : > { %11447 = vmatmul.mubr.msk.bf16.vlgmr.msra.gmra.mrb[32].mxu1 %vm395_vm0, %v9136_v51 }
0x15b1   : > { %v12063_v47 = vpop.eup %12062 }
0x15b2   : > { %v9103_v29 = vmul.f32 %v12063_v47, %v14900_v50 }
0x15b3   : > { %v12065_v43 = vpop.eup %12064 }
0x15b4   : > { %v9104_v52 = vmul.f32 %v12065_v43, %v14903_v39  ;;  %v9117_v25 = vmul.f32 %v10177_v54, %v9103_v29  ;;  %v11748_v39 = vld [vmem:[%s15177_s3 + $0x70] sm:$0xff]  }
0x15b5   : > { %v12067_v21 = vpop.eup %12066  ;;  %11466 = vmatprep.subr.bf16.mxu0 %v11748_v39 }
0x15b6   : > { %v9105_v22 = vmul.f32 %v12067_v21, %v14908_v10  ;;  %v9118_v57 = vmul.f32 %v10177_v54, %v9104_v52  ;;  %v9131_v38 = vadd.f32 %v10178_v27, %v9117_v25  ;;  %11467 = vmatpush3.bf16.msra.mxu0 %v11748_v39  ;;  %v11749_v10 = vld [vmem:[%s15177_s3 + $0x78] sm:$0xff]  }
0x15b7   : > { %v12069_v26 = vpop.eup %12068  ;;  %11468 = vmatprep.subr.bf16.mxu0 %v11749_v10 }
0x15b8   : > { %v9119_v7 = vmul.f32 %v10177_v54, %v9105_v22  ;;  %v9106_v34 = vmul.f32 %v12069_v26, %v14914_v45  ;;  %v9132_v15 = vadd.f32 %v10178_v27, %v9118_v57  ;;  %v10179_v45 = vld [vmem:[%s15175_s1 + $0x16] ss:$0 sm:$0xff] }
0x15ba   : > { %v9120_v56 = vmul.f32 %v10177_v54, %v9106_v34  ;;  %v9137_v6 = vpack.c.bf16 %v9132_v15, %v9131_v38  ;;  %v9133_v60 = vadd.f32 %v10178_v27, %v9119_v7  ;;  %11469 = vmatpush3.bf16.msra.mxu0 %v11749_v10 }
0x15bc   : > { %v9134_v40 = vadd.f32 %v10178_v27, %v9120_v56  ;;  %11450 = vmatprep.mubr.msk.bf16.mxu1 %vm395_vm0, %v9137_v6 }
0x15be   : > { %v9138_v50 = vpack.c.bf16 %v9134_v40, %v9133_v60 }
0x15c0   : > { %11451 = vmatmul.mubr.msk.bf16.gmra.mrb[36].mxu1 %vm395_vm0, %v9138_v50 }
0x15c1   : > { %11486 = vmatprep.mubr.msk.f32.mxu1 %vm12162_vm1, %v15223_v16 }
0x1682   : > { %v11448_v35 = vpop.f32.mrb[32].mxu1 }
0x1683   : > { %v9208_v28 = vadd.f32 %v11448_v35, %v10179_v45  ;;  %v9199_v2 = vpop.f32.mrb[33].mxu1 }
0x1684   : > { %v9200_v54 = vadd.f32 %v10179_v45, %v9199_v2  ;;  %v11449_v49 = vpop.f32.mrb[34].mxu1 }
0x1685   : > { %v9211_v55 = vadd.f32 %v11449_v49, %v10179_v45  ;;  %v9202_v9 = vpop.f32.mrb[35].mxu1  ;;  %v9232_v62 = vmax.f32 %v9208_v28, 0.0 }
0x1686   : > { %v9203_v48 = vadd.f32 %v10179_v45, %v9202_v9  ;;  %v9230_v8 = vmax.f32 %v9200_v54, 0.0 }
0x1687   : > { %v9233_v27 = vmax.f32 %v9211_v55, 0.0 }
0x1688   : > { %v9231_v24 = vmax.f32 %v9203_v48, 0.0 }
0x1689   : > { %v9239_v1 = vpack.c.bf16 %v9233_v27, %v9232_v62 }
0x168a   : > { %v9238_v42 = vpack.c.bf16 %v9231_v24, %v9230_v8 }
0x168c   : > { %11470 = vmatprep.mubr.bf16.mxu0 %v9238_v42 }
0x168d   : > { %11471 = vmatmul.mubr.bf16.vlgmr.msra.gmra.mrb[24].mxu0 %v9239_v1 }
0x1693   : > { %v11452_v58 = vpop.f32.mrb[36].mxu1 }
0x1694   : > { %v9224_v0 = vadd.f32 %v11452_v58, %v10179_v45  ;;  %v9215_v30 = vpop.f32.mrb[37].mxu1 }
0x1695   : > { %v9216_v46 = vadd.f32 %v10179_v45, %v9215_v30  ;;  %v11453_v33 = vpop.f32.mrb[38].mxu1 }
0x1696   : > { %v9227_v61 = vadd.f32 %v11453_v33, %v10179_v45  ;;  %v9218_v4 = vpop.f32.mrb[39].mxu1  ;;  %v9236_v31 = vmax.f32 %v9224_v0, 0.0 }
0x1697   : > { %v9219_v59 = vadd.f32 %v10179_v45, %v9218_v4  ;;  %v9234_v63 = vmax.f32 %v9216_v46, 0.0 }
0x1698   : > { %v9237_v5 = vmax.f32 %v9227_v61, 0.0 }
0x1699   : > { %v9235_v44 = vmax.f32 %v9219_v59, 0.0 }
0x169a   : > { %v9241_v13 = vpack.c.bf16 %v9237_v5, %v9236_v31 }
0x169b   : > { %v9240_v32 = vpack.c.bf16 %v9235_v44, %v9234_v63 }
0x169d   : > { %11474 = vmatprep.mubr.bf16.mxu0 %v9240_v32 }
0x169e   : > { %11475 = vmatmul.mubr.bf16.gmra.mrb[28].mxu0 %v9241_v13 }
0x1760   : > { %v11472_v41 = vpop.f32.mrb[24].mxu0 }
0x1761   : > { %v9357_v23 = vadd.f32 %v11472_v41, %v14847_v12  ;;  %v9324_v17 = vpop.f32.mrb[25].mxu0 }
0x1762   : > { %v9355_v3 = vadd.f32 %v9324_v17, %v14838_v37  ;;  %v11473_v51 = vpop.f32.mrb[26].mxu0 }
0x1763   : > { %v9371_v47 = vadd.f32 %v10194_v19, %v9357_v23  ;;  %v9358_v29 = vadd.f32 %v11473_v51, %v14841_v11  ;;  %v9327_v43 = vpop.f32.mrb[27].mxu0 }
0x1764   : > { %v9356_v52 = vadd.f32 %v9327_v43, %v14843_v20  ;;  %v9369_v25 = vadd.f32 %v10194_v19, %v9355_v3 }
0x1765   : > { %v9372_v21 = vadd.f32 %v10194_v19, %v9358_v29  ;;  %v9387_v22 = vsel %vm395_vm0, %v9371_v47, 0.0 }
0x1766   : > { %9388 = vadd.xlane.f32.xlu0 %v9387_v22  ;;  %v9370_v57 = vadd.f32 %v10194_v19, %v9356_v52  ;;  %v9381_v12 = vsel %vm395_vm0, %v9369_v25, 0.0 }
0x1767   : > { %v9390_v26 = vsel %vm395_vm0, %v9372_v21, 0.0 }
0x1768   : > { %9391 = vadd.xlane.f32.xlu1 %v9390_v26  ;;  %v9384_v37 = vsel %vm395_vm0, %v9370_v57, 0.0  ;;  %v9571_v26 = vld [vmem:[%s15178_s4 + $0x10] sm:$0xff] }
0x176a   : > { %9382 = vadd.xlane.f32.xlu0 %v9381_v12  ;;  %v9572_v12 = vld [vmem:[%s15178_s4 + $0x18] sm:$0xff] }
0x176c   : > { %9385 = vadd.xlane.f32.xlu1 %v9384_v37  ;;  %v11525_v37 = vpack.c.bf16 %v9572_v12, %v9571_v26 }
0x1771   : > { %v11476_v7 = vpop.f32.mrb[28].mxu0 }
0x1772   : > { %v9340_v11 = vpop.f32.mrb[29].mxu0  ;;  %v9361_v34 = vadd.f32 %v11476_v7, %v14861_v14 }
0x1773   : > { %v9359_v20 = vadd.f32 %v9340_v11, %v14858_v53  ;;  %v11477_v38 = vpop.f32.mrb[30].mxu0 }
0x1774   : > { %v9343_v15 = vpop.f32.mrb[31].mxu0  ;;  %v9362_v6 = vadd.f32 %v11477_v38, %v14867_v18  ;;  %v9375_v40 = vadd.f32 %v10194_v19, %v9361_v34 }
0x1775   : > { %v9373_v56 = vadd.f32 %v10194_v19, %v9359_v20  ;;  %v9360_v60 = vadd.f32 %v9343_v15, %v14863_v36 }
0x1776   : > { %v9376_v10 = vadd.f32 %v10194_v19, %v9362_v6  ;;  %v9399_v14 = vsel %vm395_vm0, %v9375_v40, 0.0 }
0x1777   : > { %v9374_v50 = vadd.f32 %v10194_v19, %v9360_v60  ;;  %v9393_v39 = vsel %vm395_vm0, %v9373_v56, 0.0 }
0x1778   : > { %9394 = vadd.xlane.f32.xlu0 %v9393_v39  ;;  %v9402_v53 = vsel %vm395_vm0, %v9376_v10, 0.0 }
0x1779   : > { %v9396_v45 = vsel %vm395_vm0, %v9374_v50, 0.0 }
0x177a   : > { %9397 = vadd.xlane.f32.xlu1 %v9396_v45  ;;  %v15053_v45 = vld [vmem:[%s15175_s1 + $0x3] ss:$0 sm:$0xff] }
0x177c   : > { %9400 = vadd.xlane.f32.xlu0 %v9399_v14 }
0x177e   : > { %9403 = vadd.xlane.f32.xlu1 %v9402_v53 }
0x17f3   : > { %v9389_v35 = vpop.xlane.xlu0 %9388 }
0x17f4   : > { %v9407_v28 = vmul.f32 0.03125, %v9389_v35  ;;  %v15059_v35 = vld [vmem:[%s15175_s1 + $0x4] ss:$0 sm:$0xff] }
0x17f5   : > { %v9392_v18 = vpop.xlane.xlu1 %9391 }
0x17f6   : > { %v14995_v2 = vsub.f32 %v9371_v47, %v9407_v28  ;;  %v9408_v36 = vmul.f32 0.03125, %v9392_v18 }
0x17f7   : > { %v9383_v54 = vpop.xlane.xlu0 %9382 }
0x17f8   : > { %v14997_v49 = vsub.f32 %v9372_v21, %v9408_v36  ;;  %v9405_v55 = vmul.f32 0.03125, %v9383_v54  ;;  %v9423_v9 = vmul.f32 %v14995_v2, %v14995_v2  ;;  %v9570_v21 = vld [vmem:[%s15178_s4 + $0x8] sm:$0xff] }
0x17f9   : > { %v9386_v48 = vpop.xlane.xlu1 %9385 }
0x17fa   : > { %v15001_v62 = vsub.f32 %v9369_v25, %v9405_v55  ;;  %v9406_v27 = vmul.f32 0.03125, %v9386_v48  ;;  %v9435_v8 = vsel %vm395_vm0, %v9423_v9, 0.0  ;;  %v9424_v24 = vmul.f32 %v14997_v49, %v14997_v49  ;;  %v9569_v25 = vld [vmem:[%s15178_s4] sm:$0xff] }
0x17fb   : > { %9436 = vadd.xlane.f32.xlu0 %v9435_v8  ;;  %v11522_v22 = vpack.c.bf16 %v9570_v21, %v9569_v25 }
0x17fc   : > { %v15006_v1 = vsub.f32 %v9370_v57, %v9406_v27  ;;  %v9438_v42 = vsel %vm395_vm0, %v9424_v24, 0.0  ;;  %v9421_v58 = vmul.f32 %v15001_v62, %v15001_v62  ;;  %v12171_v57 = vmov 0.0|0.0  }
0x17fd   : > { %9439 = vadd.xlane.f32.xlu1 %v9438_v42  ;;  %11521 = vmatprep.subr.bf16.mxu1 %v12171_v57 }
0x17fe   : > { %v9429_v0 = vsel %vm395_vm0, %v9421_v58, 0.0  ;;  %v9422_v30 = vmul.f32 %v15006_v1, %v15006_v1  ;;  %11523 = vmatpush3.bf16.msra.mxu1 %v11522_v22 }
0x17ff   : > { %9430 = vadd.xlane.f32.xlu0 %v9429_v0  ;;  %11524 = vmatprep.subr.bf16.mxu1 %v12171_v57 }
0x1800   : > { %v9432_v46 = vsel %vm395_vm0, %v9422_v30, 0.0 }
0x1801   : > { %9433 = vadd.xlane.f32.xlu1 %v9432_v46 }
0x1802   : > { %11526 = vmatpush3.bf16.msra.mxu1 %v11525_v37 }
0x1803   : > { %11527 = vmatprep.subr.bf16.mxu1 %v12171_v57 }
0x1805   : > { %v9395_v33 = vpop.xlane.xlu0 %9394 }
0x1806   : > { %v9409_v61 = vmul.f32 0.03125, %v9395_v33 }
0x1807   : > { %v9398_v4 = vpop.xlane.xlu1 %9397 }
0x1808   : > { %v15015_v59 = vsub.f32 %v9373_v56, %v9409_v61  ;;  %v9410_v31 = vmul.f32 0.03125, %v9398_v4 }
0x1809   : > { %v9401_v5 = vpop.xlane.xlu0 %9400 }
0x180a   : > { %v15017_v63 = vsub.f32 %v9374_v50, %v9410_v31  ;;  %v9411_v44 = vmul.f32 0.03125, %v9401_v5  ;;  %v9425_v13 = vmul.f32 %v15015_v59, %v15015_v59 }
0x180b   : > { %v9404_v32 = vpop.xlane.xlu1 %9403 }
0x180c   : > { %v15021_v19 = vsub.f32 %v9375_v40, %v9411_v44  ;;  %v9412_v41 = vmul.f32 0.03125, %v9404_v32  ;;  %v9441_v23 = vsel %vm395_vm0, %v9425_v13, 0.0  ;;  %v9426_v17 = vmul.f32 %v15017_v63, %v15017_v63 }
0x180d   : > { %9442 = vadd.xlane.f32.xlu0 %v9441_v23 }
0x180e   : > { %v15026_v3 = vsub.f32 %v9376_v10, %v9412_v41  ;;  %v9444_v51 = vsel %vm395_vm0, %v9426_v17, 0.0  ;;  %v9427_v47 = vmul.f32 %v15021_v19, %v15021_v19 }
0x180f   : > { %9445 = vadd.xlane.f32.xlu1 %v9444_v51 }
0x1810   : > { %v9447_v29 = vsel %vm395_vm0, %v9427_v47, 0.0  ;;  %v9428_v43 = vmul.f32 %v15026_v3, %v15026_v3 }
0x1811   : > { %9448 = vadd.xlane.f32.xlu0 %v9447_v29 }
0x1812   : > { %v9450_v52 = vsel %vm395_vm0, %v9428_v43, 0.0 }
0x1813   : > { %9451 = vadd.xlane.f32.xlu1 %v9450_v52 }
0x1888   : > { %v9437_v7 = vpop.xlane.xlu0 %9436 }
0x1889   : > { %v9455_v11 = vmul.f32 0.03125, %v9437_v7 }
0x188a   : > { %v9440_v34 = vpop.xlane.xlu1 %9439 }
0x188b   : > { %v9463_v20 = vadd.f32 1e-05, %v9455_v11  ;;  %v9456_v38 = vmul.f32 0.03125, %v9440_v34 }
0x188c   : > { %v9431_v15 = vpop.xlane.xlu0 %9430 }
0x188d   : > { %12070 = vrsqrt.f32 %v9463_v20  ;;  %v9464_v56 = vadd.f32 1e-05, %v9456_v38  ;;  %v9453_v6 = vmul.f32 0.03125, %v9431_v15 }
0x188e   : > { %v9434_v60 = vpop.xlane.xlu1 %9433 }
0x188f   : > { %12072 = vrsqrt.f32 %v9464_v56  ;;  %v9461_v40 = vadd.f32 1e-05, %v9453_v6  ;;  %v9454_v50 = vmul.f32 0.03125, %v9434_v60 }
0x1891   : > { %12074 = vrsqrt.f32 %v9461_v40  ;;  %v9462_v39 = vadd.f32 1e-05, %v9454_v50 }
0x1893   : > { %12076 = vrsqrt.f32 %v9462_v39 }
0x1897   : > { %v12071_v10 = vpop.eup %12070 }
0x1898   : > { %v9479_v14 = vmul.f32 %v12071_v10, %v14995_v2 }
0x1899   : > { %v12073_v53 = vpop.eup %12072 }
0x189a   : > { %v9493_v28 = vmul.f32 %v15053_v45, %v9479_v14  ;;  %v9480_v18 = vmul.f32 %v12073_v53, %v14997_v49  ;;  %v9443_v36 = vpop.xlane.xlu0 %9442 }
0x189b   : > { %v12075_v54 = vpop.eup %12074  ;;  %v9457_v55 = vmul.f32 0.03125, %v9443_v36 }
0x189c   : > { %v9507_v9 = vadd.f32 %v15059_v35, %v9493_v28  ;;  %v9494_v48 = vmul.f32 %v15053_v45, %v9480_v18  ;;  %v9477_v27 = vmul.f32 %v12075_v54, %v15001_v62  ;;  %v9446_v2 = vpop.xlane.xlu1 %9445 }
0x189d   : > { %v12077_v8 = vpop.eup %12076  ;;  %v9465_v24 = vadd.f32 1e-05, %v9457_v55  ;;  %v9458_v42 = vmul.f32 0.03125, %v9446_v2 }
0x189e   : > { %v9527_v58 = vsel %vm395_vm0, %v9507_v9, -inf  ;;  %v9508_v0 = vadd.f32 %v15059_v35, %v9494_v48  ;;  %v9491_v30 = vmul.f32 %v15053_v45, %v9477_v27  ;;  %v9478_v49 = vmul.f32 %v12077_v8, %v15006_v1  ;;  %v9449_v46 = vpop.xlane.xlu0 %9448 }
0x189f   : > { %12078 = vrsqrt.f32 %v9465_v24  ;;  %v9466_v33 = vadd.f32 1e-05, %v9458_v42  ;;  %v9459_v61 = vmul.f32 0.03125, %v9449_v46  ;;  %v9528_v5 = vrot.slane %v9527_v58, 4 }
0x18a0   : > { %v9505_v4 = vadd.f32 %v15059_v35, %v9491_v30  ;;  %v9492_v62 = vmul.f32 %v15053_v45, %v9478_v49  ;;  %v9452_v31 = vpop.xlane.xlu1 %9451  ;;  %v9534_v13 = vsel %vm395_vm0, %v9508_v0, -inf }
0x18a1   : > { %12080 = vrsqrt.f32 %v9466_v33  ;;  %v9467_v44 = vadd.f32 1e-05, %v9459_v61  ;;  %v9460_v23 = vmul.f32 0.03125, %v9452_v31  ;;  %v9529_v47 = vmax.f32 %v9527_v58, %v9528_v5 }
0x18a2   : > { %v9513_v32 = vsel %vm395_vm0, %v9505_v4, -inf  ;;  %v9506_v41 = vadd.f32 %v15059_v35, %v9492_v62  ;;  %v9535_v29 = vrot.slane %v9534_v13, 4 }
0x18a3   : > { %v9514_v1 = vrot.slane %v9513_v32, 4  ;;  %12082 = vrsqrt.f32 %v9467_v44  ;;  %v9468_v51 = vadd.f32 1e-05, %v9460_v23  ;;  %v9530_v26 = vrot.slane %v9529_v47, 2 }
0x18a4   : > { %v9520_v17 = vsel %vm395_vm0, %v9506_v41, -inf  ;;  %v9536_v12 = vmax.f32 %v9534_v13, %v9535_v29 }
0x18a5   : > { %v9515_v43 = vmax.f32 %v9513_v32, %v9514_v1  ;;  %v9521_v52 = vrot.slane %v9520_v17, 4  ;;  %12084 = vrsqrt.f32 %v9468_v51  ;;  %v9531_v6 = vmax.f32 %v9529_v47, %v9530_v26  ;;  %v10202_v26 = vld [vmem:[%s15178_s4 + $0x20] sm:$0xff] }
0x18a6   : > { %v9537_v60 = vrot.slane %v9536_v12, 2 }
0x18a7   : > { %v9522_v25 = vmax.f32 %v9520_v17, %v9521_v52  ;;  %v9516_v21 = vrot.slane %v9515_v43, 2  ;;  %v9532_v36 = vrot.slane %v9531_v6, 1 }
0x18a8   : > { %v9538_v55 = vmax.f32 %v9536_v12, %v9537_v60  ;;  %v10203_v12 = vld [vmem:[%s15178_s4 + $0x28] sm:$0xff] }
0x18a9   : > { %v12079_v22 = vpop.eup %12078  ;;  %v9523_v37 = vrot.slane %v9522_v25, 2  ;;  %v9517_v20 = vmax.f32 %v9515_v43, %v9516_v21 }
0x18aa   : > { %v9481_v7 = vmul.f32 %v12079_v22, %v15015_v59  ;;  %v9539_v46 = vrot.slane %v9538_v55, 1 }
0x18ab   : > { %v12081_v11 = vpop.eup %12080  ;;  %v9524_v34 = vmax.f32 %v9522_v25, %v9523_v37  ;;  %v9518_v53 = vrot.slane %v9517_v20, 1 }
0x18ac   : > { %v9495_v38 = vmul.f32 %v15053_v45, %v9481_v7  ;;  %v9482_v15 = vmul.f32 %v12081_v11, %v15017_v63  ;;  %v9540_v41 = vmax.f32 %v9538_v55, %v9539_v46 }
0x18ad   : > { %v12083_v56 = vpop.eup %12082  ;;  %v9525_v40 = vrot.slane %v9524_v34, 1  ;;  %v9519_v24 = vmax.f32 %v9517_v20, %v9518_v53  ;;  %v10204_v20 = vld [vmem:[%s15178_s4 + $0x30] sm:$0xff] }
0x18ae   : > { %v9509_v50 = vadd.f32 %v15059_v35, %v9495_v38  ;;  %v9496_v39 = vmul.f32 %v15053_v45, %v9482_v15  ;;  %v9483_v10 = vmul.f32 %v12083_v56, %v15021_v19  ;;  %v10205_v38 = vld [vmem:[%s15178_s4 + $0x38] sm:$0xff] }
0x18af   : > { %v12085_v14 = vpop.eup %12084  ;;  %v9526_v9 = vmax.f32 %v9524_v34, %v9525_v40  ;;  %v11528_v34 = vpack.c.bf16 %v10203_v12, %v10202_v26  ;;  %v11531_v56 = vpack.c.bf16 %v10205_v38, %v10204_v20 }
0x18b0   : > { %v9541_v59 = vsel %vm395_vm0, %v9509_v50, -inf  ;;  %v9510_v28 = vadd.f32 %v15059_v35, %v9496_v39  ;;  %v9497_v18 = vmul.f32 %v15053_v45, %v9483_v10  ;;  %v9484_v54 = vmul.f32 %v12085_v14, %v15026_v3 }
0x18b1   : > { %v9542_v63 = vrot.slane %v9541_v59, 4  ;;  %v9533_v3 = vmax.f32 %v9531_v6, %v9532_v36  ;;  %v9590_v33 = vsel %vm9589_vm15, %v9526_v9, %v9519_v24  ;;  %v10200_v6 = vld [vmem:[%s15175_s1 + $0x5] ss:$0 sm:$0xff]  ;;  %v15284_v36 = vmov 1  }
0x18b2   : > { %v9548_v48 = vsel %vm395_vm0, %v9510_v28, -inf  ;;  %v9511_v27 = vadd.f32 %v15059_v35, %v9497_v18  ;;  %v9498_v8 = vmul.f32 %v15053_v45, %v9484_v54  ;;  %v10212_v18 = vld [vmem:[%s15175_s1 + $0x7] ss:$0 sm:$0xff] }
0x18b3   : > { %v9543_v19 = vmax.f32 %v9541_v59, %v9542_v63  ;;  %v9549_v2 = vrot.slane %v9548_v48, 4  ;;  %v9592_v32 = vsel %vm9591_vm3, %v9533_v3, %v9590_v33 }
0x18b4   : > { %v9555_v42 = vsel %vm395_vm0, %v9511_v27, -inf  ;;  %v9512_v49 = vadd.f32 %v15059_v35, %v9498_v8  ;;  %v9594_v47 = vsel %vm9593_vm4, %v9540_v41, %v9592_v32 }
0x18b5   : > { %v9544_v58 = vrot.slane %v9543_v19, 2  ;;  %v9550_v0 = vmax.f32 %v9548_v48, %v9549_v2  ;;  %v9556_v30 = vrot.slane %v9555_v42, 4 }
0x18b6   : > { %v9562_v31 = vsel %vm395_vm0, %v9512_v49, -inf }
0x18b7   : > { %v9545_v61 = vmax.f32 %v9543_v19, %v9544_v58  ;;  %v9551_v4 = vrot.slane %v9550_v0, 2  ;;  %v9557_v62 = vmax.f32 %v9555_v42, %v9556_v30  ;;  %v9563_v5 = vrot.slane %v9562_v31, 4 }
0x18b9   : > { %v9546_v45 = vrot.slane %v9545_v61, 1  ;;  %v9552_v44 = vmax.f32 %v9550_v0, %v9551_v4  ;;  %v9558_v13 = vrot.slane %v9557_v62, 2  ;;  %v9564_v23 = vmax.f32 %v9562_v31, %v9563_v5 }
0x18bb   : > { %v9547_v1 = vmax.f32 %v9545_v61, %v9546_v45  ;;  %v9553_v35 = vrot.slane %v9552_v44, 1  ;;  %v9559_v17 = vmax.f32 %v9557_v62, %v9558_v13  ;;  %v9565_v51 = vrot.slane %v9564_v23, 2 }
0x18bd   : > { %v9554_v29 = vmax.f32 %v9552_v44, %v9553_v35  ;;  %v9560_v43 = vrot.slane %v9559_v17, 1  ;;  %v9596_v52 = vsel %vm9595_vm5, %v9547_v1, %v9594_v47  ;;  %v9566_v25 = vmax.f32 %v9564_v23, %v9565_v51 }
0x18bf   : > { %v9561_v21 = vmax.f32 %v9559_v17, %v9560_v43  ;;  %v9598_v22 = vsel %vm9597_vm6, %v9554_v29, %v9596_v52  ;;  %v9567_v37 = vrot.slane %v9566_v25, 1 }
0x18c1   : > { %v9600_v7 = vsel %vm9599_vm7, %v9561_v21, %v9598_v22  ;;  %v9568_v11 = vmax.f32 %v9566_v25, %v9567_v37 }
0x18c3   : > { %v9602_v15 = vsel %vm9601_vm8, %v9568_v11, %v9600_v7 }
0x18c4   : > { %11487 = vmatmul.mubr.msk.f32.vlgmr.msra.gmra.mrb[40].mxu1 %vm395_vm0, %v9602_v15 }
0x18c5   : > { %11529 = vmatpush3.bf16.msra.mxu1 %v11528_v34  ;;  %11497 = vmatprep.mubr.msk.f32.mxu1 %vm12162_vm1, %v15223_v16 }
0x18c6   : > { %11530 = vmatprep.subr.bf16.mxu1 %v12171_v57  ;;  %v10207_v57 = vld [vmem:[%s15175_s1 + $0x6] ss:$0 sm:$0xff] }
0x18c9   : > { %11532 = vmatpush3.bf16.msra.mxu1 %v11531_v56 }
0x18ca   : > { %11500 = vmatprep.subr.mxu1 %v15223_v16 }
0x18cc   : > { %11498 = vmatmul.mubr.msk.f32.vlgmr.msra.gmra.mrb[42].mxu1 %vm395_vm0, %v9602_v15 }
0x18cd   : > { %11502 = vmatprep.mubr.msk.f32.mxu1 %vm12162_vm1, %v15223_v16 }
0x1997   : > { %v9671_v60 = vpop.f32.mrb[40].mxu1 }
0x1998   : > { %v9672_v40 = vadd.f32 %v10200_v6, %v9671_v60  ;;  %v11488_v50 = vpop.f32.mrb[41].mxu1 }
0x199a   : > { %v9758_v39 = vmul.f32 %v9672_v40, %v9672_v40 }
0x199c   : > { %v9759_v10 = vsel %vm395_vm0, %v9758_v39, 0.0 }
0x199d   : > { %9760 = vadd.xlane.f32.xlu1 %v9759_v10 }
0x199f   : > { %v9754_v14 = vpop.f32.mrb[42].mxu1 }
0x19a0   : > { %v9755_v53 = vadd.f32 %v10207_v57, %v9754_v14  ;;  %v11499_v59 = vpop.f32.mrb[43].mxu1 }
0x19a2   : > { %v9765_v28 = vmul.f32 %v9755_v53, %v9755_v53 }
0x19a4   : > { %v9766_v16 = vsel %vm395_vm0, %v9765_v28, 0.0 }
0x19a5   : > { %9767 = vadd.xlane.f32.xlu0 %v9766_v16 }
0x19ae   : > { %9861 = vperm.xlu1 %11599, %v10212_v18  }
0x19bb   : > { %9856 = vperm.xlu0 %11720, %v10212_v18  }
0x19bf   : > { %11721 = vset.pattern.permute.xlu0 %v15284_v36 }
0x1a2a   : > { %v9761_v63 = vpop.xlane.xlu1 %9760 }
0x1a2b   : > { %v9762_v54 = vadd.f32 1e-08, %v9761_v63 }
0x1a2e   : > { %v9862_v0 = vpop.permute.xlu1 %9861 }
0x1a32   : > { %v9768_v55 = vpop.xlane.xlu0 %9767 }
0x1a33   : > { %v9769_v9 = vadd.f32 1e-08, %v9768_v55 }
0x1a35   : > { %12086 = vrsqrt.f32 %v9769_v9 }
0x1a36   : > { %12088 = vrsqrt.f32 %v9762_v54 }
0x1a3a   : > { %v9857_v8 = vpop.permute.xlu0 %9856 }
0x1a3f   : > { %v12087_v48 = vpop.eup %12086 }
0x1a40   : > { %v12089_v27 = vpop.eup %12088  ;;  %v9771_v19 = vmul.f32 %v12087_v48, %v9755_v53 }
0x1a41   : > { %v9764_v2 = vmul.f32 %v12089_v27, %v9672_v40 }
0x1a42   : > { %11501 = vmatpush3.xpose.msk.msra.mxu1 %vm395_vm0, %v9771_v19 }
0x1a45   : > { %11503 = vmatmul.mubr.msk.f32.vlgmr.msra.gmra.mrb[44].mxu1 %vm395_vm0, %v9764_v2 }
0x1b18   : > { %v9844_v24 = vpop.f32.mrb[44].mxu1 }
0x1b19   : > { %v9859_v42 = vmul.f32 %v9857_v8, %v9844_v24  ;;  %v11504_v58 = vpop.f32.mrb[45].mxu1 }
0x1b1b   : > { %v9864_v30 = vadd.f32 %v9862_v0, %v9859_v42 }
0x1b1d   : > { %9865 = vst.msk [vmem:[%s217_s10] sm:$0xff] %vm694_vm2, %v9864_v30 }
0x1b1e   : > { %12107 = shalt.err (!%p12104_p3)
}
0x1b1f   : > { %s12108_s8 = scalar_lea.hbm %s15131_s14, 128  ;;  %s12112_s16 = scalar_lea.hbm %s15179_s5, 256 }
0x1b20   : > { %p12109_p4 = scmp.ne.s32.totalorder %s15131_s14, %s12108_s8  ;;  %p12113_p9 = scmp.lt.u32.totalorder %s15131_s14, %s15179_s5 }
0x1b21   : > { %p12114_p10 = scmp.lt.u32.totalorder %s12112_s16, %s12108_s8  ;;  %p12116_p12 = scmp.lt.u32.totalorder %s12108_s8, %s15131_s14 }
0x1b22   : > { %p12110_p7 = pnand %p12109_p4, %p12241_p5 }
0x1b23   : > { %p12115_p11 = por %p12114_p10, %p12113_p9 }
0x1b24   : > { %p12111_p8 = pneg %p12110_p7 }
0x1b25   : > { %p12117_p13 = por %p12116_p12, %p12115_p11 }
0x1b27   : > { %p12118_p0 = pnand %p12117_p13, %p12111_p8 }
0x1b29   : > { %12121 = shalt.err (!%p12118_p0)
}
0x1b2a   : > { %11537 = dma.vmem_to_hbm [thread:$0]  (%p12241_p5), %s15133_s11, 128, %s15131_s14, %s9867_s17  }
0x1b2b PF: > { %p11543_p1 = scmp.ge.s32.totalorder %s12156_s21, 2  ;;  %s9892_s7 = sand.u32 1, %s12144_s18  }
0x1b2c   : > { %s9893_s10 = scalar_lea.sflag [#allocation3], %s9892_s7 }
0x1b2d   : > { %p11540_p2 = pnand %p11543_p1, %p12245_p6 }
0x1b2f   : > { %12139 = dma.done.wait (!%p11540_p2), %s9893_s10, 128  }
0x1b30   : > { %12141 = vsyncadd (!%p11540_p2), %s9893_s10, 4294967168  ;;  %p15_p3 = scmp.ge.s32.totalorder %s12228_s24, 4   ;;  %s15285_s18 = smov %s12148_s19 }
0x1b31   : > { %s15286_s19 = smov %s12152_s20  ;;  %s15287_s20 = smov %s12239_s27 }
0x1b32   : > { %s15288_s21 = smov %s12228_s24  ;;  %17 = sbr.rel (!%p15_p3) target bundleno = 3 (0x3), region = 101 }
0x1b39   :  { %9898 = vsyncpa [#allocation3], 1 }
0x1b3a   :  { %9900 = vsyncpa [#allocation3 + $0x1], 1 }

</bundles_post_ra>
